<compile_context>
chip_gen: v5e
topology: v5e:2x2
jax: 0.10.0
libtpu: 0.0.40
codegen_flags: <defaults>
</compile_context>

<pallas_src>
import jax
import jax.numpy as jnp
from jax.experimental import pallas as pl
from jax.experimental.pallas import tpu as pltpu

# ----------------------------- small config ---------------------------------
B = 2                                   # per-input batch
IN_CHANS = 3
IMG = 16
PATCH = 4
GRID = IMG // PATCH                     # 4 patches per side
NUM_PATCHES = GRID * GRID               # 16
SEQ = NUM_PATCHES + 1                   # 17 (cls token)
PATCH_DIM = IN_CHANS * PATCH * PATCH    # 48
EMBED_DIM = 32
NUM_HEADS = 4
HEAD_DIM = EMBED_DIM // NUM_HEADS       # 8
MLP_DIM = 4 * EMBED_DIM                 # 128
DEPTH = 2
NUM_CLASSES = 8
LN_EPS = 1e-6

TOT_B = 2 * B                           # inp1 and inp2 stacked along batch
GRID_STEPS = 2                          # "parallel" -> v7x megacore; 2 steps on v5e/v6e
IMG_PER_STEP = TOT_B // GRID_STEPS      # 2 images per grid step
M_STEP = IMG_PER_STEP * SEQ             # 34 token rows per step
MP_STEP = IMG_PER_STEP * NUM_PATCHES    # 32 patch rows per step
LANES = 128                             # lane width of the packed weight slabs


def _round8(n):
    return ((n + 7) // 8) * 8


# --------------------- packed weight-slab layouts (static) -------------------
def _build_w_layout():
    off = [0]

    def nxt(rows):
        o = off[0]
        off[0] += _round8(rows)
        return o

    lay = {"patch_w": nxt(PATCH_DIM), "cls_pos": nxt(SEQ), "blocks": []}
    for _ in range(DEPTH):
        lay["blocks"].append({
            "qkv_w": nxt(EMBED_DIM), "proj_w": nxt(EMBED_DIM),
            "fc1_w": nxt(EMBED_DIM), "fc2_w": nxt(MLP_DIM)})
    lay["head_w"] = nxt(EMBED_DIM)
    lay["_rows"] = off[0]
    return lay


def _build_v_layout():
    idx = [0]

    def nxt():
        i = idx[0]
        idx[0] += 1
        return i

    lay = {"patch_b": nxt(), "blocks": []}
    for _ in range(DEPTH):
        lay["blocks"].append({n: nxt() for n in
                              ("ln1_g", "ln1_b", "qkv_b", "proj_b",
                               "ln2_g", "ln2_b", "fc1_b", "fc2_b")})
    lay["norm_g"] = nxt()
    lay["norm_b"] = nxt()
    lay["head_b"] = nxt()
    lay["_rows"] = _round8(idx[0])
    return lay


W_OFF = _build_w_layout()
V_OFF = _build_v_layout()
W_ROWS = W_OFF["_rows"]
V_ROWS = V_OFF["_rows"]


# ------------------------- in-kernel math helpers ----------------------------
def _layernorm(x, g, b):
    mu = jnp.mean(x, axis=-1, keepdims=True)
    var = jnp.mean(jnp.square(x - mu), axis=-1, keepdims=True)
    return (x - mu) * jax.lax.rsqrt(var + LN_EPS) * g + b


def _gelu_erf(x):
    # Exact erf-GELU (PyTorch nn.GELU default); erf via Abramowitz & Stegun
    # 7.1.26 (|abs err| < 1.5e-7, f32-rounding level) - guaranteed Mosaic lowering.
    z = x * 0.7071067811865476
    az = jnp.abs(z)
    t = 1.0 / (1.0 + 0.3275911 * az)
    poly = ((((1.061405429 * t - 1.453152027) * t + 1.421413741) * t
             - 0.284496736) * t + 0.254829592) * t
    erf_abs = 1.0 - poly * jnp.exp(-az * az)
    erf = jnp.where(z >= 0.0, erf_abs, -erf_abs)
    return 0.5 * x * (1.0 + erf)


# ------------------------------ fused ViT kernel ------------------------------
# One grid step = IMG_PER_STEP images.  Weights live in two VMEM-resident
# slabs (constant index_map -> fetched once, reused across steps).
def _fused_vit_kernel(patches_ref, w_ref, v_ref, attn_ref, logits_ref):
    f32 = jnp.float32
    scale = HEAD_DIM ** -0.5

    def wmat(off, rows, cols):
        return w_ref[off:off + rows, :cols]

    def vrow(idx, cols):
        return v_ref[idx:idx + 1, :cols]            # (1, cols) - broadcasts over rows

    # ---- patch embed, batched over all images of the step ----
    px = patches_ref[0].astype(f32)                                         # (32, 48)
    tok = jnp.dot(px, wmat(W_OFF["patch_w"], PATCH_DIM, EMBED_DIM),
                  preferred_element_type=f32) + vrow(V_OFF["patch_b"], EMBED_DIM)

    cls_pos = wmat(W_OFF["cls_pos"], SEQ, EMBED_DIM)                        # (17, 32)
    cls_row = cls_pos[0:1, :]                                               # cls_token + pos[0]
    pos_rest = cls_pos[1:, :]                                               # pos[1:]

    parts = []
    for bi in range(IMG_PER_STEP):
        parts.append(cls_row)
        parts.append(tok[bi * NUM_PATCHES:(bi + 1) * NUM_PATCHES, :] + pos_rest)
    h = jnp.concatenate(parts, axis=0)                                      # (34, 32)

    attn_imgs = []
    for d in range(DEPTH):
        wb, vb = W_OFF["blocks"][d], V_OFF["blocks"][d]

        hn = _layernorm(h, vrow(vb["ln1_g"], EMBED_DIM), vrow(vb["ln1_b"], EMBED_DIM))
        qkv = jnp.dot(hn, wmat(wb["qkv_w"], EMBED_DIM, 3 * EMBED_DIM),
                      preferred_element_type=f32) + vrow(vb["qkv_b"], 3 * EMBED_DIM)

        o_rows = []
        for bi in range(IMG_PER_STEP):
            qkv_img = qkv[bi * SEQ:(bi + 1) * SEQ, :]                       # (17, 96)
            head_outs, head_ps = [], []
            for hd in range(NUM_HEADS):
                lo = hd * HEAD_DIM
                q = qkv_img[:, lo:lo + HEAD_DIM]
                k = qkv_img[:, EMBED_DIM + lo:EMBED_DIM + lo + HEAD_DIM]
                v = qkv_img[:, 2 * EMBED_DIM + lo:2 * EMBED_DIM + lo + HEAD_DIM]

                s = jax.lax.dot_general(q, k, (((1,), (1,)), ((), ())),
                                        preferred_element_type=f32) * scale  # (17, 17)
                s = s - jnp.max(s, axis=-1, keepdims=True)
                e = jnp.exp(s)
                p = e / jnp.sum(e, axis=-1, keepdims=True)                   # exact softmax
                if d == DEPTH - 1:                                           # hook: last block
                    head_ps.append(p)
                head_outs.append(jnp.dot(p, v, preferred_element_type=f32))  # (17, 8)
            if d == DEPTH - 1:
                attn_imgs.append(jnp.stack(head_ps, axis=0))                 # (H, 17, 17)
            o_rows.append(jnp.concatenate(head_outs, axis=-1))               # (17, 32)

        # head-merge then ONE K=32 output projection for the whole step
        o_all = jnp.concatenate(o_rows, axis=0)                              # (34, 32)
        h = h + jnp.dot(o_all, wmat(wb["proj_w"], EMBED_DIM, EMBED_DIM),
                        preferred_element_type=f32) + vrow(vb["proj_b"], EMBED_DIM)

        hn2 = _layernorm(h, vrow(vb["ln2_g"], EMBED_DIM), vrow(vb["ln2_b"], EMBED_DIM))
        m = jnp.dot(hn2, wmat(wb["fc1_w"], EMBED_DIM, MLP_DIM),
                    preferred_element_type=f32) + vrow(vb["fc1_b"], MLP_DIM)
        m = _gelu_erf(m)
        m = jnp.dot(m, wmat(wb["fc2_w"], MLP_DIM, EMBED_DIM),
                    preferred_element_type=f32) + vrow(vb["fc2_b"], EMBED_DIM)
        h = h + m

    # single lumped store of the last block's attention for this step
    attn_ref[...] = jnp.stack(attn_imgs, axis=0).astype(attn_ref.dtype)     # (2, 4, 17, 17)

    # ---- final LN + head on the cls rows only ----
    cls_rows = jnp.concatenate(
        [h[bi * SEQ:bi * SEQ + 1, :] for bi in range(IMG_PER_STEP)], axis=0)  # (2, 32)
    cls_rows = _layernorm(cls_rows, vrow(V_OFF["norm_g"], EMBED_DIM),
                          vrow(V_OFF["norm_b"], EMBED_DIM))
    logits = jnp.dot(cls_rows, wmat(W_OFF["head_w"], EMBED_DIM, NUM_CLASSES),
                     preferred_element_type=f32) + vrow(V_OFF["head_b"], NUM_CLASSES)
    logits_ref[0] = logits.astype(logits_ref.dtype)                          # (2, 8)


def _cost_estimate():
    mm = (SEQ * PATCH_DIM * EMBED_DIM
          + DEPTH * (SEQ * EMBED_DIM * 3 * EMBED_DIM
                     + 2 * NUM_HEADS * SEQ * SEQ * HEAD_DIM
                     + SEQ * EMBED_DIM * EMBED_DIM
                     + 2 * SEQ * EMBED_DIM * MLP_DIM)
          + EMBED_DIM * NUM_CLASSES)
    flops = 2 * mm * TOT_B
    trans = TOT_B * DEPTH * (NUM_HEADS * SEQ * SEQ + SEQ * MLP_DIM)
    byts = 4 * (TOT_B * NUM_PATCHES * PATCH_DIM + W_ROWS * LANES + V_ROWS * LANES
                + TOT_B * NUM_HEADS * SEQ * SEQ + TOT_B * NUM_CLASSES)
    return pl.CostEstimate(flops=flops, transcendentals=trans, bytes_accessed=byts)


def fused_vit(patches, w_slab, v_slab):
    """patches: (GRID_STEPS, MP_STEP, PATCH_DIM) f32. Returns (attn, logits)."""
    attn, logits = pl.pallas_call(
        _fused_vit_kernel,
        out_shape=(jax.ShapeDtypeStruct((TOT_B, NUM_HEADS, SEQ, SEQ), jnp.float32),
                   jax.ShapeDtypeStruct((GRID_STEPS, IMG_PER_STEP, NUM_CLASSES), jnp.float32)),
        grid=(GRID_STEPS,),
        in_specs=[
            pl.BlockSpec((1, MP_STEP, PATCH_DIM), lambda b: (b, 0, 0)),
            pl.BlockSpec((W_ROWS, LANES), lambda b: (0, 0)),   # resident weight slab
            pl.BlockSpec((V_ROWS, LANES), lambda b: (0, 0)),   # resident bias slab
        ],
        out_specs=(
            pl.BlockSpec((IMG_PER_STEP, NUM_HEADS, SEQ, SEQ), lambda b: (b, 0, 0, 0)),
            pl.BlockSpec((1, IMG_PER_STEP, NUM_CLASSES), lambda b: (b, 0, 0)),
        ),
        compiler_params=pltpu.CompilerParams(dimension_semantics=("parallel",)),
        cost_estimate=_cost_estimate(),
    )(patches, w_slab, v_slab)
    return attn, logits.reshape(TOT_B, NUM_CLASSES)


# ------------------------------- model forward --------------------------------
@jax.jit
def model_forward(w_slab, v_slab, inp1, inp2):
    # Both images in one pass (stacked along batch) through ONE fused kernel.
    x = jnp.concatenate([inp1, inp2], axis=0)                               # (4, C, H, W)
    patches = x.reshape(TOT_B, IN_CHANS, GRID, PATCH, GRID, PATCH)
    patches = patches.transpose(0, 2, 4, 1, 3, 5).reshape(TOT_B, NUM_PATCHES, PATCH_DIM)
    patches = patches.reshape(GRID_STEPS, MP_STEP, PATCH_DIM)               # no cls placeholder row

    attn, logits = fused_vit(patches, w_slab, v_slab)

    # mimic: attn[:, :, 1:, 1:] then 'b h (h1 w1) (h2 w2) -> b h h1 w1 h2 w2'
    attn = attn[:, :, 1:, 1:].reshape(TOT_B, NUM_HEADS, GRID, GRID, GRID, GRID)
    return attn[:B], logits[:B], attn[B:], logits[B:]


# ------------------------------ parameter init / packing ----------------------
def init_params(key):
    ks = iter(jax.random.split(key, 8 + DEPTH * 8))

    def dense(fan_in, fan_out):
        w = jax.random.normal(next(ks), (fan_in, fan_out), jnp.float32) * (fan_in ** -0.5)
        b = jnp.zeros((fan_out,), jnp.float32)
        return w, b

    params = {}
    params["patch_w"], params["patch_b"] = dense(PATCH_DIM, EMBED_DIM)
    params["cls_token"] = 0.02 * jax.random.normal(next(ks), (1, 1, EMBED_DIM), jnp.float32)
    params["pos_embed"] = 0.02 * jax.random.normal(next(ks), (1, SEQ, EMBED_DIM), jnp.float32)

    blocks = []
    for _ in range(DEPTH):
        p = {}
        p["ln1_g"] = jnp.ones((EMBED_DIM,), jnp.float32)
        p["ln1_b"] = jnp.zeros((EMBED_DIM,), jnp.float32)
        p["qkv_w"], p["qkv_b"] = dense(EMBED_DIM, 3 * EMBED_DIM)
        p["proj_w"], p["proj_b"] = dense(EMBED_DIM, EMBED_DIM)
        p["ln2_g"] = jnp.ones((EMBED_DIM,), jnp.float32)
        p["ln2_b"] = jnp.zeros((EMBED_DIM,), jnp.float32)
        p["fc1_w"], p["fc1_b"] = dense(EMBED_DIM, MLP_DIM)
        p["fc2_w"], p["fc2_b"] = dense(MLP_DIM, EMBED_DIM)
        blocks.append(p)
    params["blocks"] = blocks

    params["norm_g"] = jnp.ones((EMBED_DIM,), jnp.float32)
    params["norm_b"] = jnp.zeros((EMBED_DIM,), jnp.float32)
    params["head_w"], params["head_b"] = dense(EMBED_DIM, NUM_CLASSES)
    return params


def pack_params(params):
    """Pack all weights into 2 lane-padded slabs (2 DMAs total at kernel entry)."""
    W = jnp.zeros((W_ROWS, LANES), jnp.float32)

    def put(W, off, mat):
        mat = jnp.asarray(mat, jnp.float32)
        return W.at[off:off + mat.shape[0], :mat.shape[1]].set(mat)

    W = put(W, W_OFF["patch_w"], params["patch_w"])
    pos = params["pos_embed"].reshape(SEQ, EMBED_DIM)
    cls = params["cls_token"].reshape(1, EMBED_DIM)
    cls_pos = jnp.concatenate([cls + pos[0:1], pos[1:]], axis=0)   # row0=cls+pos0, rest=pos[1:]
    W = put(W, W_OFF["cls_pos"], cls_pos)
    for d in range(DEPTH):
        bw, bp = W_OFF["blocks"][d], params["blocks"][d]
        W = put(W, bw["qkv_w"], bp["qkv_w"])
        W = put(W, bw["proj_w"], bp["proj_w"])
        W = put(W, bw["fc1_w"], bp["fc1_w"])
        W = put(W, bw["fc2_w"], bp["fc2_w"])
    W = put(W, W_OFF["head_w"], params["head_w"])

    V = jnp.zeros((V_ROWS, LANES), jnp.float32)

    def putv(V, idx, vec):
        vec = jnp.asarray(vec, jnp.float32).reshape(-1)
        return V.at[idx, :vec.shape[0]].set(vec)

    V = putv(V, V_OFF["patch_b"], params["patch_b"])
    for d in range(DEPTH):
        bv, bp = V_OFF["blocks"][d], params["blocks"][d]
        for name in ("ln1_g", "ln1_b", "qkv_b", "proj_b", "ln2_g", "ln2_b", "fc1_b", "fc2_b"):
            V = putv(V, bv[name], bp[name])
    V = putv(V, V_OFF["norm_g"], params["norm_g"])
    V = putv(V, V_OFF["norm_b"], params["norm_b"])
    V = putv(V, V_OFF["head_b"], params["head_b"])
    return W, V


# --------------------------- pure-JAX reference (sanity) ----------------------
def _reference_vit(params, x):
    tb = x.shape[0]
    p = x.reshape(tb, IN_CHANS, GRID, PATCH, GRID, PATCH)
    p = p.transpose(0, 2, 4, 1, 3, 5).reshape(tb, NUM_PATCHES, PATCH_DIM)
    tok = p @ params["patch_w"] + params["patch_b"]
    cls = jnp.broadcast_to(params["cls_token"].reshape(1, 1, EMBED_DIM), (tb, 1, EMBED_DIM))
    h = jnp.concatenate([cls, tok], axis=1) + params["pos_embed"].reshape(1, SEQ, EMBED_DIM)
    attn_last = None
    for bp in params["blocks"]:
        hn = _layernorm(h, bp["ln1_g"], bp["ln1_b"])
        qkv = hn @ bp["qkv_w"] + bp["qkv_b"]
        qkv = qkv.reshape(tb, SEQ, 3, NUM_HEADS, HEAD_DIM).transpose(2, 0, 3, 1, 4)
        q, k, v = qkv[0], qkv[1], qkv[2]
        s = jnp.einsum("bhqd,bhkd->bhqk", q, k) * (HEAD_DIM ** -0.5)
        s = s - jnp.max(s, axis=-1, keepdims=True)
        e = jnp.exp(s)
        a = e / jnp.sum(e, axis=-1, keepdims=True)
        attn_last = a
        o = jnp.einsum("bhqk,bhkd->bhqd", a, v)
        o = o.transpose(0, 2, 1, 3).reshape(tb, SEQ, EMBED_DIM)
        h = h + o @ bp["proj_w"] + bp["proj_b"]
        hn2 = _layernorm(h, bp["ln2_g"], bp["ln2_b"])
        m = _gelu_erf(hn2 @ bp["fc1_w"] + bp["fc1_b"])
        h = h + m @ bp["fc2_w"] + bp["fc2_b"]
    hf = _layernorm(h, params["norm_g"], params["norm_b"])
    logits = hf[:, 0, :] @ params["head_w"] + params["head_b"]
    return attn_last, logits


# ----------------------------------- main ------------------------------------
if __name__ == "__main__":
    key = jax.random.PRNGKey(0)
    kp, k1, k2 = jax.random.split(key, 3)
    params = init_params(kp)
    w_slab, v_slab = pack_params(params)

    inp1 = jax.random.normal(k1, (B, IN_CHANS, IMG, IMG), jnp.float32)
    inp2 = jax.random.normal(k2, (B, IN_CHANS, IMG, IMG), jnp.float32)

    self_attn_1, output_1, self_attn_2, output_2 = model_forward(w_slab, v_slab, inp1, inp2)
    jax.block_until_ready((self_attn_1, output_1, self_attn_2, output_2))

    assert self_attn_1.shape == (B, NUM_HEADS, GRID, GRID, GRID, GRID), self_attn_1.shape
    assert output_1.shape == (B, NUM_CLASSES), output_1.shape
    assert self_attn_2.shape == (B, NUM_HEADS, GRID, GRID, GRID, GRID), self_attn_2.shape
    assert output_2.shape == (B, NUM_CLASSES), output_2.shape
    assert bool(jnp.all(jnp.isfinite(self_attn_1))) and bool(jnp.all(jnp.isfinite(output_1)))
    assert bool(jnp.all(jnp.isfinite(self_attn_2))) and bool(jnp.all(jnp.isfinite(output_2)))

    # Structural sanity check vs a pure-JAX reference (loose tolerance: only
    # matmul accumulation order / MXU pass precision differ).
    with jax.default_matmul_precision("float32"):
        ra1, rl1 = _reference_vit(params, inp1)
        ra2, rl2 = _reference_vit(params, inp2)

    def _resh(a):
        return a[:, :, 1:, 1:].reshape(B, NUM_HEADS, GRID, GRID, GRID, GRID)

    for got, ref in ((self_attn_1, _resh(ra1)), (output_1, rl1),
                     (self_attn_2, _resh(ra2)), (output_2, rl2)):
        md = float(jnp.max(jnp.abs(got - ref)))
        assert md < 5e-2, f"max abs diff vs reference: {md}"

    print("KERNEL_OK")
</pallas_src>

<mosaic_0001>
module attributes {stable_mosaic.version = 11 : i64} {
  func.func @_fused_vit_kernel(%arg0: i32, %arg1: memref<1x32x48xf32, #tpu.memory_space<vmem>>, %arg2: memref<552x128xf32, #tpu.memory_space<vmem>>, %arg3: memref<24x128xf32, #tpu.memory_space<vmem>>, %arg4: memref<2x4x17x17xf32, #tpu.memory_space<vmem>>, %arg5: memref<1x2x8xf32, #tpu.memory_space<vmem>>) attributes {dimension_semantics = [#tpu.dimension_semantics<parallel>], iteration_bounds = array<i64: 2>, scalar_prefetch = 0 : i64, scratch_operands = 0 : i64, tpu.core_type = #tpu.core_type<tc>, window_params = [{transform_indices = @transform_0, window_bounds = array<i64: 1, 32, 48>}, {pipeline_mode = #tpu.pipeline_mode<synchronous>, transform_indices = @transform_1, window_bounds = array<i64: 552, 128>}, {pipeline_mode = #tpu.pipeline_mode<synchronous>, transform_indices = @transform_2, window_bounds = array<i64: 24, 128>}, {transform_indices = @transform_3, window_bounds = array<i64: 2, 4, 17, 17>}, {transform_indices = @transform_4, window_bounds = array<i64: 1, 2, 8>}]} {
    %c0 = arith.constant 0 : index
    %c0_0 = arith.constant 0 : index
    %c0_1 = arith.constant 0 : index
    %0 = vector.load %arg1[%c0, %c0_0, %c0_1] : memref<1x32x48xf32, #tpu.memory_space<vmem>>, vector<1x32x48xf32>
    %1 = vector.shape_cast %0 : vector<1x32x48xf32> to vector<32x48xf32>
    %c0_2 = arith.constant 0 : index
    %c0_3 = arith.constant 0 : index
    %2 = vector.load %arg2[%c0_2, %c0_3] : memref<552x128xf32, #tpu.memory_space<vmem>>, vector<48x32xf32>
    %cst = arith.constant dense<0.000000e+00> : vector<32x32xf32>
    %3 = tpu.matmul %1, %2, %cst {dimension_numbers = #tpu.dot_dimension_numbers<[1], [0], [0], [1], [0, 0, 1, 1], [], []>} : vector<32x48xf32>, vector<48x32xf32>, vector<32x32xf32> -> vector<32x32xf32>
    %c0_4 = arith.constant 0 : index
    %c0_5 = arith.constant 0 : index
    %4 = vector.load %arg3[%c0_4, %c0_5] : memref<24x128xf32, #tpu.memory_space<vmem>>, vector<1x32xf32>
    %5 = vector.broadcast %4 : vector<1x32xf32> to vector<32x32xf32>
    %6 = arith.addf %3, %5 : vector<32x32xf32>
    %c48 = arith.constant 48 : index
    %c0_6 = arith.constant 0 : index
    %7 = vector.load %arg2[%c48, %c0_6] : memref<552x128xf32, #tpu.memory_space<vmem>>, vector<17x32xf32>
    %8 = vector.extract_strided_slice %7 {offsets = [0, 0], sizes = [1, 32], strides = [1, 1]} : vector<17x32xf32> to vector<1x32xf32>
    %9 = vector.extract_strided_slice %7 {offsets = [1, 0], sizes = [16, 32], strides = [1, 1]} : vector<17x32xf32> to vector<16x32xf32>
    %10 = vector.extract_strided_slice %6 {offsets = [0, 0], sizes = [16, 32], strides = [1, 1]} : vector<32x32xf32> to vector<16x32xf32>
    %11 = arith.addf %10, %9 : vector<16x32xf32>
    %12 = vector.extract_strided_slice %6 {offsets = [16, 0], sizes = [16, 32], strides = [1, 1]} : vector<32x32xf32> to vector<16x32xf32>
    %13 = arith.addf %12, %9 : vector<16x32xf32>
    %14 = tpu.concatenate %8, %11, %8, %13 in 0 : vector<1x32xf32>, vector<16x32xf32>, vector<1x32xf32>, vector<16x32xf32> -> vector<34x32xf32>
    %c1 = arith.constant 1 : index
    %c0_7 = arith.constant 0 : index
    %15 = vector.load %arg3[%c1, %c0_7] : memref<24x128xf32, #tpu.memory_space<vmem>>, vector<1x32xf32>
    %c2 = arith.constant 2 : index
    %c0_8 = arith.constant 0 : index
    %16 = vector.load %arg3[%c2, %c0_8] : memref<24x128xf32, #tpu.memory_space<vmem>>, vector<1x32xf32>
    %cst_9 = arith.constant dense<0.000000e+00> : vector<34xf32>
    %17 = vector.multi_reduction <add>, %14, %cst_9 [1] : vector<34x32xf32> to vector<34xf32>
    %18 = vector.shape_cast %17 : vector<34xf32> to vector<34x1xf32>
    %cst_10 = arith.constant 3.200000e+01 : f32
    %19 = vector.broadcast %cst_10 : f32 to vector<34x1xf32>
    %20 = arith.divf %18, %19 : vector<34x1xf32>
    %21 = vector.broadcast %20 : vector<34x1xf32> to vector<34x32xf32>
    %22 = arith.subf %14, %21 : vector<34x32xf32>
    %23 = arith.mulf %22, %22 : vector<34x32xf32>
    %cst_11 = arith.constant dense<0.000000e+00> : vector<34xf32>
    %24 = vector.multi_reduction <add>, %23, %cst_11 [1] : vector<34x32xf32> to vector<34xf32>
    %25 = vector.shape_cast %24 : vector<34xf32> to vector<34x1xf32>
    %cst_12 = arith.constant 3.200000e+01 : f32
    %26 = vector.broadcast %cst_12 : f32 to vector<34x1xf32>
    %27 = arith.divf %25, %26 : vector<34x1xf32>
    %28 = vector.broadcast %20 : vector<34x1xf32> to vector<34x32xf32>
    %29 = arith.subf %14, %28 : vector<34x32xf32>
    %cst_13 = arith.constant 9.99999997E-7 : f32
    %30 = vector.broadcast %cst_13 : f32 to vector<34x1xf32>
    %31 = arith.addf %27, %30 : vector<34x1xf32>
    %32 = math.rsqrt %31 : vector<34x1xf32>
    %33 = vector.broadcast %32 : vector<34x1xf32> to vector<34x32xf32>
    %34 = arith.mulf %29, %33 : vector<34x32xf32>
    %35 = vector.broadcast %15 : vector<1x32xf32> to vector<34x32xf32>
    %36 = arith.mulf %34, %35 : vector<34x32xf32>
    %37 = vector.broadcast %16 : vector<1x32xf32> to vector<34x32xf32>
    %38 = arith.addf %36, %37 : vector<34x32xf32>
    %c72 = arith.constant 72 : index
    %c0_14 = arith.constant 0 : index
    %39 = vector.load %arg2[%c72, %c0_14] : memref<552x128xf32, #tpu.memory_space<vmem>>, vector<32x96xf32>
    %cst_15 = arith.constant dense<0.000000e+00> : vector<34x96xf32>
    %40 = tpu.matmul %38, %39, %cst_15 {dimension_numbers = #tpu.dot_dimension_numbers<[1], [0], [0], [1], [0, 0, 1, 1], [], []>} : vector<34x32xf32>, vector<32x96xf32>, vector<34x96xf32> -> vector<34x96xf32>
    %c3 = arith.constant 3 : index
    %c0_16 = arith.constant 0 : index
    %41 = vector.load %arg3[%c3, %c0_16] : memref<24x128xf32, #tpu.memory_space<vmem>>, vector<1x96xf32>
    %42 = vector.broadcast %41 : vector<1x96xf32> to vector<34x96xf32>
    %43 = arith.addf %40, %42 : vector<34x96xf32>
    %44 = vector.extract_strided_slice %43 {offsets = [0, 0], sizes = [17, 96], strides = [1, 1]} : vector<34x96xf32> to vector<17x96xf32>
    %45 = vector.extract_strided_slice %44 {offsets = [0, 0], sizes = [17, 8], strides = [1, 1]} : vector<17x96xf32> to vector<17x8xf32>
    %46 = vector.extract_strided_slice %44 {offsets = [0, 32], sizes = [17, 8], strides = [1, 1]} : vector<17x96xf32> to vector<17x8xf32>
    %47 = vector.extract_strided_slice %44 {offsets = [0, 64], sizes = [17, 8], strides = [1, 1]} : vector<17x96xf32> to vector<17x8xf32>
    %cst_17 = arith.constant dense<0.000000e+00> : vector<17x17xf32>
    %48 = tpu.matmul %45, %46, %cst_17 {dimension_numbers = #tpu.dot_dimension_numbers<[1], [1], [0], [0], [0, 0, 1, 0], [], []>} : vector<17x8xf32>, vector<17x8xf32>, vector<17x17xf32> -> vector<17x17xf32>
    %cst_18 = arith.constant 0.353553385 : f32
    %49 = vector.broadcast %cst_18 : f32 to vector<17x17xf32>
    %50 = arith.mulf %48, %49 : vector<17x17xf32>
    %cst_19 = arith.constant dense<0xFF800000> : vector<17xf32>
    %51 = vector.multi_reduction <maximumf>, %50, %cst_19 [1] : vector<17x17xf32> to vector<17xf32>
    %52 = vector.shape_cast %51 : vector<17xf32> to vector<17x1xf32>
    %53 = vector.broadcast %52 : vector<17x1xf32> to vector<17x17xf32>
    %54 = arith.subf %50, %53 : vector<17x17xf32>
    %55 = math.exp %54 : vector<17x17xf32>
    %cst_20 = arith.constant dense<0.000000e+00> : vector<17xf32>
    %56 = vector.multi_reduction <add>, %55, %cst_20 [1] : vector<17x17xf32> to vector<17xf32>
    %57 = vector.shape_cast %56 : vector<17xf32> to vector<17x1xf32>
    %58 = vector.broadcast %57 : vector<17x1xf32> to vector<17x17xf32>
    %59 = arith.divf %55, %58 : vector<17x17xf32>
    %cst_21 = arith.constant dense<0.000000e+00> : vector<17x8xf32>
    %60 = tpu.matmul %59, %47, %cst_21 {dimension_numbers = #tpu.dot_dimension_numbers<[1], [0], [0], [1], [0, 0, 1, 1], [], []>} : vector<17x17xf32>, vector<17x8xf32>, vector<17x8xf32> -> vector<17x8xf32>
    %61 = vector.extract_strided_slice %44 {offsets = [0, 8], sizes = [17, 8], strides = [1, 1]} : vector<17x96xf32> to vector<17x8xf32>
    %62 = vector.extract_strided_slice %44 {offsets = [0, 40], sizes = [17, 8], strides = [1, 1]} : vector<17x96xf32> to vector<17x8xf32>
    %63 = vector.extract_strided_slice %44 {offsets = [0, 72], sizes = [17, 8], strides = [1, 1]} : vector<17x96xf32> to vector<17x8xf32>
    %cst_22 = arith.constant dense<0.000000e+00> : vector<17x17xf32>
    %64 = tpu.matmul %61, %62, %cst_22 {dimension_numbers = #tpu.dot_dimension_numbers<[1], [1], [0], [0], [0, 0, 1, 0], [], []>} : vector<17x8xf32>, vector<17x8xf32>, vector<17x17xf32> -> vector<17x17xf32>
    %cst_23 = arith.constant 0.353553385 : f32
    %65 = vector.broadcast %cst_23 : f32 to vector<17x17xf32>
    %66 = arith.mulf %64, %65 : vector<17x17xf32>
    %cst_24 = arith.constant dense<0xFF800000> : vector<17xf32>
    %67 = vector.multi_reduction <maximumf>, %66, %cst_24 [1] : vector<17x17xf32> to vector<17xf32>
    %68 = vector.shape_cast %67 : vector<17xf32> to vector<17x1xf32>
    %69 = vector.broadcast %68 : vector<17x1xf32> to vector<17x17xf32>
    %70 = arith.subf %66, %69 : vector<17x17xf32>
    %71 = math.exp %70 : vector<17x17xf32>
    %cst_25 = arith.constant dense<0.000000e+00> : vector<17xf32>
    %72 = vector.multi_reduction <add>, %71, %cst_25 [1] : vector<17x17xf32> to vector<17xf32>
    %73 = vector.shape_cast %72 : vector<17xf32> to vector<17x1xf32>
    %74 = vector.broadcast %73 : vector<17x1xf32> to vector<17x17xf32>
    %75 = arith.divf %71, %74 : vector<17x17xf32>
    %cst_26 = arith.constant dense<0.000000e+00> : vector<17x8xf32>
    %76 = tpu.matmul %75, %63, %cst_26 {dimension_numbers = #tpu.dot_dimension_numbers<[1], [0], [0], [1], [0, 0, 1, 1], [], []>} : vector<17x17xf32>, vector<17x8xf32>, vector<17x8xf32> -> vector<17x8xf32>
    %77 = vector.extract_strided_slice %44 {offsets = [0, 16], sizes = [17, 8], strides = [1, 1]} : vector<17x96xf32> to vector<17x8xf32>
    %78 = vector.extract_strided_slice %44 {offsets = [0, 48], sizes = [17, 8], strides = [1, 1]} : vector<17x96xf32> to vector<17x8xf32>
    %79 = vector.extract_strided_slice %44 {offsets = [0, 80], sizes = [17, 8], strides = [1, 1]} : vector<17x96xf32> to vector<17x8xf32>
    %cst_27 = arith.constant dense<0.000000e+00> : vector<17x17xf32>
    %80 = tpu.matmul %77, %78, %cst_27 {dimension_numbers = #tpu.dot_dimension_numbers<[1], [1], [0], [0], [0, 0, 1, 0], [], []>} : vector<17x8xf32>, vector<17x8xf32>, vector<17x17xf32> -> vector<17x17xf32>
    %cst_28 = arith.constant 0.353553385 : f32
    %81 = vector.broadcast %cst_28 : f32 to vector<17x17xf32>
    %82 = arith.mulf %80, %81 : vector<17x17xf32>
    %cst_29 = arith.constant dense<0xFF800000> : vector<17xf32>
    %83 = vector.multi_reduction <maximumf>, %82, %cst_29 [1] : vector<17x17xf32> to vector<17xf32>
    %84 = vector.shape_cast %83 : vector<17xf32> to vector<17x1xf32>
    %85 = vector.broadcast %84 : vector<17x1xf32> to vector<17x17xf32>
    %86 = arith.subf %82, %85 : vector<17x17xf32>
    %87 = math.exp %86 : vector<17x17xf32>
    %cst_30 = arith.constant dense<0.000000e+00> : vector<17xf32>
    %88 = vector.multi_reduction <add>, %87, %cst_30 [1] : vector<17x17xf32> to vector<17xf32>
    %89 = vector.shape_cast %88 : vector<17xf32> to vector<17x1xf32>
    %90 = vector.broadcast %89 : vector<17x1xf32> to vector<17x17xf32>
    %91 = arith.divf %87, %90 : vector<17x17xf32>
    %cst_31 = arith.constant dense<0.000000e+00> : vector<17x8xf32>
    %92 = tpu.matmul %91, %79, %cst_31 {dimension_numbers = #tpu.dot_dimension_numbers<[1], [0], [0], [1], [0, 0, 1, 1], [], []>} : vector<17x17xf32>, vector<17x8xf32>, vector<17x8xf32> -> vector<17x8xf32>
    %93 = vector.extract_strided_slice %44 {offsets = [0, 24], sizes = [17, 8], strides = [1, 1]} : vector<17x96xf32> to vector<17x8xf32>
    %94 = vector.extract_strided_slice %44 {offsets = [0, 56], sizes = [17, 8], strides = [1, 1]} : vector<17x96xf32> to vector<17x8xf32>
    %95 = vector.extract_strided_slice %44 {offsets = [0, 88], sizes = [17, 8], strides = [1, 1]} : vector<17x96xf32> to vector<17x8xf32>
    %cst_32 = arith.constant dense<0.000000e+00> : vector<17x17xf32>
    %96 = tpu.matmul %93, %94, %cst_32 {dimension_numbers = #tpu.dot_dimension_numbers<[1], [1], [0], [0], [0, 0, 1, 0], [], []>} : vector<17x8xf32>, vector<17x8xf32>, vector<17x17xf32> -> vector<17x17xf32>
    %cst_33 = arith.constant 0.353553385 : f32
    %97 = vector.broadcast %cst_33 : f32 to vector<17x17xf32>
    %98 = arith.mulf %96, %97 : vector<17x17xf32>
    %cst_34 = arith.constant dense<0xFF800000> : vector<17xf32>
    %99 = vector.multi_reduction <maximumf>, %98, %cst_34 [1] : vector<17x17xf32> to vector<17xf32>
    %100 = vector.shape_cast %99 : vector<17xf32> to vector<17x1xf32>
    %101 = vector.broadcast %100 : vector<17x1xf32> to vector<17x17xf32>
    %102 = arith.subf %98, %101 : vector<17x17xf32>
    %103 = math.exp %102 : vector<17x17xf32>
    %cst_35 = arith.constant dense<0.000000e+00> : vector<17xf32>
    %104 = vector.multi_reduction <add>, %103, %cst_35 [1] : vector<17x17xf32> to vector<17xf32>
    %105 = vector.shape_cast %104 : vector<17xf32> to vector<17x1xf32>
    %106 = vector.broadcast %105 : vector<17x1xf32> to vector<17x17xf32>
    %107 = arith.divf %103, %106 : vector<17x17xf32>
    %cst_36 = arith.constant dense<0.000000e+00> : vector<17x8xf32>
    %108 = tpu.matmul %107, %95, %cst_36 {dimension_numbers = #tpu.dot_dimension_numbers<[1], [0], [0], [1], [0, 0, 1, 1], [], []>} : vector<17x17xf32>, vector<17x8xf32>, vector<17x8xf32> -> vector<17x8xf32>
    %109 = tpu.concatenate %60, %76, %92, %108 in 1 : vector<17x8xf32>, vector<17x8xf32>, vector<17x8xf32>, vector<17x8xf32> -> vector<17x32xf32>
    %110 = vector.extract_strided_slice %43 {offsets = [17, 0], sizes = [17, 96], strides = [1, 1]} : vector<34x96xf32> to vector<17x96xf32>
    %111 = vector.extract_strided_slice %110 {offsets = [0, 0], sizes = [17, 8], strides = [1, 1]} : vector<17x96xf32> to vector<17x8xf32>
    %112 = vector.extract_strided_slice %110 {offsets = [0, 32], sizes = [17, 8], strides = [1, 1]} : vector<17x96xf32> to vector<17x8xf32>
    %113 = vector.extract_strided_slice %110 {offsets = [0, 64], sizes = [17, 8], strides = [1, 1]} : vector<17x96xf32> to vector<17x8xf32>
    %cst_37 = arith.constant dense<0.000000e+00> : vector<17x17xf32>
    %114 = tpu.matmul %111, %112, %cst_37 {dimension_numbers = #tpu.dot_dimension_numbers<[1], [1], [0], [0], [0, 0, 1, 0], [], []>} : vector<17x8xf32>, vector<17x8xf32>, vector<17x17xf32> -> vector<17x17xf32>
    %cst_38 = arith.constant 0.353553385 : f32
    %115 = vector.broadcast %cst_38 : f32 to vector<17x17xf32>
    %116 = arith.mulf %114, %115 : vector<17x17xf32>
    %cst_39 = arith.constant dense<0xFF800000> : vector<17xf32>
    %117 = vector.multi_reduction <maximumf>, %116, %cst_39 [1] : vector<17x17xf32> to vector<17xf32>
    %118 = vector.shape_cast %117 : vector<17xf32> to vector<17x1xf32>
    %119 = vector.broadcast %118 : vector<17x1xf32> to vector<17x17xf32>
    %120 = arith.subf %116, %119 : vector<17x17xf32>
    %121 = math.exp %120 : vector<17x17xf32>
    %cst_40 = arith.constant dense<0.000000e+00> : vector<17xf32>
    %122 = vector.multi_reduction <add>, %121, %cst_40 [1] : vector<17x17xf32> to vector<17xf32>
    %123 = vector.shape_cast %122 : vector<17xf32> to vector<17x1xf32>
    %124 = vector.broadcast %123 : vector<17x1xf32> to vector<17x17xf32>
    %125 = arith.divf %121, %124 : vector<17x17xf32>
    %cst_41 = arith.constant dense<0.000000e+00> : vector<17x8xf32>
    %126 = tpu.matmul %125, %113, %cst_41 {dimension_numbers = #tpu.dot_dimension_numbers<[1], [0], [0], [1], [0, 0, 1, 1], [], []>} : vector<17x17xf32>, vector<17x8xf32>, vector<17x8xf32> -> vector<17x8xf32>
    %127 = vector.extract_strided_slice %110 {offsets = [0, 8], sizes = [17, 8], strides = [1, 1]} : vector<17x96xf32> to vector<17x8xf32>
    %128 = vector.extract_strided_slice %110 {offsets = [0, 40], sizes = [17, 8], strides = [1, 1]} : vector<17x96xf32> to vector<17x8xf32>
    %129 = vector.extract_strided_slice %110 {offsets = [0, 72], sizes = [17, 8], strides = [1, 1]} : vector<17x96xf32> to vector<17x8xf32>
    %cst_42 = arith.constant dense<0.000000e+00> : vector<17x17xf32>
    %130 = tpu.matmul %127, %128, %cst_42 {dimension_numbers = #tpu.dot_dimension_numbers<[1], [1], [0], [0], [0, 0, 1, 0], [], []>} : vector<17x8xf32>, vector<17x8xf32>, vector<17x17xf32> -> vector<17x17xf32>
    %cst_43 = arith.constant 0.353553385 : f32
    %131 = vector.broadcast %cst_43 : f32 to vector<17x17xf32>
    %132 = arith.mulf %130, %131 : vector<17x17xf32>
    %cst_44 = arith.constant dense<0xFF800000> : vector<17xf32>
    %133 = vector.multi_reduction <maximumf>, %132, %cst_44 [1] : vector<17x17xf32> to vector<17xf32>
    %134 = vector.shape_cast %133 : vector<17xf32> to vector<17x1xf32>
    %135 = vector.broadcast %134 : vector<17x1xf32> to vector<17x17xf32>
    %136 = arith.subf %132, %135 : vector<17x17xf32>
    %137 = math.exp %136 : vector<17x17xf32>
    %cst_45 = arith.constant dense<0.000000e+00> : vector<17xf32>
    %138 = vector.multi_reduction <add>, %137, %cst_45 [1] : vector<17x17xf32> to vector<17xf32>
    %139 = vector.shape_cast %138 : vector<17xf32> to vector<17x1xf32>
    %140 = vector.broadcast %139 : vector<17x1xf32> to vector<17x17xf32>
    %141 = arith.divf %137, %140 : vector<17x17xf32>
    %cst_46 = arith.constant dense<0.000000e+00> : vector<17x8xf32>
    %142 = tpu.matmul %141, %129, %cst_46 {dimension_numbers = #tpu.dot_dimension_numbers<[1], [0], [0], [1], [0, 0, 1, 1], [], []>} : vector<17x17xf32>, vector<17x8xf32>, vector<17x8xf32> -> vector<17x8xf32>
    %143 = vector.extract_strided_slice %110 {offsets = [0, 16], sizes = [17, 8], strides = [1, 1]} : vector<17x96xf32> to vector<17x8xf32>
    %144 = vector.extract_strided_slice %110 {offsets = [0, 48], sizes = [17, 8], strides = [1, 1]} : vector<17x96xf32> to vector<17x8xf32>
    %145 = vector.extract_strided_slice %110 {offsets = [0, 80], sizes = [17, 8], strides = [1, 1]} : vector<17x96xf32> to vector<17x8xf32>
    %cst_47 = arith.constant dense<0.000000e+00> : vector<17x17xf32>
    %146 = tpu.matmul %143, %144, %cst_47 {dimension_numbers = #tpu.dot_dimension_numbers<[1], [1], [0], [0], [0, 0, 1, 0], [], []>} : vector<17x8xf32>, vector<17x8xf32>, vector<17x17xf32> -> vector<17x17xf32>
    %cst_48 = arith.constant 0.353553385 : f32
    %147 = vector.broadcast %cst_48 : f32 to vector<17x17xf32>
    %148 = arith.mulf %146, %147 : vector<17x17xf32>
    %cst_49 = arith.constant dense<0xFF800000> : vector<17xf32>
    %149 = vector.multi_reduction <maximumf>, %148, %cst_49 [1] : vector<17x17xf32> to vector<17xf32>
    %150 = vector.shape_cast %149 : vector<17xf32> to vector<17x1xf32>
    %151 = vector.broadcast %150 : vector<17x1xf32> to vector<17x17xf32>
    %152 = arith.subf %148, %151 : vector<17x17xf32>
    %153 = math.exp %152 : vector<17x17xf32>
    %cst_50 = arith.constant dense<0.000000e+00> : vector<17xf32>
    %154 = vector.multi_reduction <add>, %153, %cst_50 [1] : vector<17x17xf32> to vector<17xf32>
    %155 = vector.shape_cast %154 : vector<17xf32> to vector<17x1xf32>
    %156 = vector.broadcast %155 : vector<17x1xf32> to vector<17x17xf32>
    %157 = arith.divf %153, %156 : vector<17x17xf32>
    %cst_51 = arith.constant dense<0.000000e+00> : vector<17x8xf32>
    %158 = tpu.matmul %157, %145, %cst_51 {dimension_numbers = #tpu.dot_dimension_numbers<[1], [0], [0], [1], [0, 0, 1, 1], [], []>} : vector<17x17xf32>, vector<17x8xf32>, vector<17x8xf32> -> vector<17x8xf32>
    %159 = vector.extract_strided_slice %110 {offsets = [0, 24], sizes = [17, 8], strides = [1, 1]} : vector<17x96xf32> to vector<17x8xf32>
    %160 = vector.extract_strided_slice %110 {offsets = [0, 56], sizes = [17, 8], strides = [1, 1]} : vector<17x96xf32> to vector<17x8xf32>
    %161 = vector.extract_strided_slice %110 {offsets = [0, 88], sizes = [17, 8], strides = [1, 1]} : vector<17x96xf32> to vector<17x8xf32>
    %cst_52 = arith.constant dense<0.000000e+00> : vector<17x17xf32>
    %162 = tpu.matmul %159, %160, %cst_52 {dimension_numbers = #tpu.dot_dimension_numbers<[1], [1], [0], [0], [0, 0, 1, 0], [], []>} : vector<17x8xf32>, vector<17x8xf32>, vector<17x17xf32> -> vector<17x17xf32>
    %cst_53 = arith.constant 0.353553385 : f32
    %163 = vector.broadcast %cst_53 : f32 to vector<17x17xf32>
    %164 = arith.mulf %162, %163 : vector<17x17xf32>
    %cst_54 = arith.constant dense<0xFF800000> : vector<17xf32>
    %165 = vector.multi_reduction <maximumf>, %164, %cst_54 [1] : vector<17x17xf32> to vector<17xf32>
    %166 = vector.shape_cast %165 : vector<17xf32> to vector<17x1xf32>
    %167 = vector.broadcast %166 : vector<17x1xf32> to vector<17x17xf32>
    %168 = arith.subf %164, %167 : vector<17x17xf32>
    %169 = math.exp %168 : vector<17x17xf32>
    %cst_55 = arith.constant dense<0.000000e+00> : vector<17xf32>
    %170 = vector.multi_reduction <add>, %169, %cst_55 [1] : vector<17x17xf32> to vector<17xf32>
    %171 = vector.shape_cast %170 : vector<17xf32> to vector<17x1xf32>
    %172 = vector.broadcast %171 : vector<17x1xf32> to vector<17x17xf32>
    %173 = arith.divf %169, %172 : vector<17x17xf32>
    %cst_56 = arith.constant dense<0.000000e+00> : vector<17x8xf32>
    %174 = tpu.matmul %173, %161, %cst_56 {dimension_numbers = #tpu.dot_dimension_numbers<[1], [0], [0], [1], [0, 0, 1, 1], [], []>} : vector<17x17xf32>, vector<17x8xf32>, vector<17x8xf32> -> vector<17x8xf32>
    %175 = tpu.concatenate %126, %142, %158, %174 in 1 : vector<17x8xf32>, vector<17x8xf32>, vector<17x8xf32>, vector<17x8xf32> -> vector<17x32xf32>
    %176 = tpu.concatenate %109, %175 in 0 : vector<17x32xf32>, vector<17x32xf32> -> vector<34x32xf32>
    %c104 = arith.constant 104 : index
    %c0_57 = arith.constant 0 : index
    %177 = vector.load %arg2[%c104, %c0_57] : memref<552x128xf32, #tpu.memory_space<vmem>>, vector<32x32xf32>
    %cst_58 = arith.constant dense<0.000000e+00> : vector<34x32xf32>
    %178 = tpu.matmul %176, %177, %cst_58 {dimension_numbers = #tpu.dot_dimension_numbers<[1], [0], [0], [1], [0, 0, 1, 1], [], []>} : vector<34x32xf32>, vector<32x32xf32>, vector<34x32xf32> -> vector<34x32xf32>
    %179 = arith.addf %14, %178 : vector<34x32xf32>
    %c4 = arith.constant 4 : index
    %c0_59 = arith.constant 0 : index
    %180 = vector.load %arg3[%c4, %c0_59] : memref<24x128xf32, #tpu.memory_space<vmem>>, vector<1x32xf32>
    %181 = vector.broadcast %180 : vector<1x32xf32> to vector<34x32xf32>
    %182 = arith.addf %179, %181 : vector<34x32xf32>
    %c5 = arith.constant 5 : index
    %c0_60 = arith.constant 0 : index
    %183 = vector.load %arg3[%c5, %c0_60] : memref<24x128xf32, #tpu.memory_space<vmem>>, vector<1x32xf32>
    %c6 = arith.constant 6 : index
    %c0_61 = arith.constant 0 : index
    %184 = vector.load %arg3[%c6, %c0_61] : memref<24x128xf32, #tpu.memory_space<vmem>>, vector<1x32xf32>
    %cst_62 = arith.constant dense<0.000000e+00> : vector<34xf32>
    %185 = vector.multi_reduction <add>, %182, %cst_62 [1] : vector<34x32xf32> to vector<34xf32>
    %186 = vector.shape_cast %185 : vector<34xf32> to vector<34x1xf32>
    %cst_63 = arith.constant 3.200000e+01 : f32
    %187 = vector.broadcast %cst_63 : f32 to vector<34x1xf32>
    %188 = arith.divf %186, %187 : vector<34x1xf32>
    %189 = vector.broadcast %188 : vector<34x1xf32> to vector<34x32xf32>
    %190 = arith.subf %182, %189 : vector<34x32xf32>
    %191 = arith.mulf %190, %190 : vector<34x32xf32>
    %cst_64 = arith.constant dense<0.000000e+00> : vector<34xf32>
    %192 = vector.multi_reduction <add>, %191, %cst_64 [1] : vector<34x32xf32> to vector<34xf32>
    %193 = vector.shape_cast %192 : vector<34xf32> to vector<34x1xf32>
    %cst_65 = arith.constant 3.200000e+01 : f32
    %194 = vector.broadcast %cst_65 : f32 to vector<34x1xf32>
    %195 = arith.divf %193, %194 : vector<34x1xf32>
    %196 = vector.broadcast %188 : vector<34x1xf32> to vector<34x32xf32>
    %197 = arith.subf %182, %196 : vector<34x32xf32>
    %cst_66 = arith.constant 9.99999997E-7 : f32
    %198 = vector.broadcast %cst_66 : f32 to vector<34x1xf32>
    %199 = arith.addf %195, %198 : vector<34x1xf32>
    %200 = math.rsqrt %199 : vector<34x1xf32>
    %201 = vector.broadcast %200 : vector<34x1xf32> to vector<34x32xf32>
    %202 = arith.mulf %197, %201 : vector<34x32xf32>
    %203 = vector.broadcast %183 : vector<1x32xf32> to vector<34x32xf32>
    %204 = arith.mulf %202, %203 : vector<34x32xf32>
    %205 = vector.broadcast %184 : vector<1x32xf32> to vector<34x32xf32>
    %206 = arith.addf %204, %205 : vector<34x32xf32>
    %c136 = arith.constant 136 : index
    %c0_67 = arith.constant 0 : index
    %207 = vector.load %arg2[%c136, %c0_67] : memref<552x128xf32, #tpu.memory_space<vmem>>, vector<32x128xf32>
    %cst_68 = arith.constant dense<0.000000e+00> : vector<34x128xf32>
    %208 = tpu.matmul %206, %207, %cst_68 {dimension_numbers = #tpu.dot_dimension_numbers<[1], [0], [0], [1], [0, 0, 1, 1], [], []>} : vector<34x32xf32>, vector<32x128xf32>, vector<34x128xf32> -> vector<34x128xf32>
    %c7 = arith.constant 7 : index
    %c0_69 = arith.constant 0 : index
    %209 = vector.load %arg3[%c7, %c0_69] : memref<24x128xf32, #tpu.memory_space<vmem>>, vector<1x128xf32>
    %210 = vector.broadcast %209 : vector<1x128xf32> to vector<34x128xf32>
    %211 = arith.addf %208, %210 : vector<34x128xf32>
    %cst_70 = arith.constant 0.707106769 : f32
    %212 = vector.broadcast %cst_70 : f32 to vector<34x128xf32>
    %213 = arith.mulf %211, %212 : vector<34x128xf32>
    %214 = math.absf %213 : vector<34x128xf32>
    %cst_71 = arith.constant 0.327591091 : f32
    %215 = vector.broadcast %cst_71 : f32 to vector<34x128xf32>
    %216 = arith.mulf %215, %214 : vector<34x128xf32>
    %cst_72 = arith.constant 1.000000e+00 : f32
    %217 = vector.broadcast %cst_72 : f32 to vector<34x128xf32>
    %218 = arith.addf %217, %216 : vector<34x128xf32>
    %cst_73 = arith.constant 1.000000e+00 : f32
    %219 = vector.broadcast %cst_73 : f32 to vector<34x128xf32>
    %220 = arith.divf %219, %218 : vector<34x128xf32>
    %cst_74 = arith.constant 1.06140542 : f32
    %221 = vector.broadcast %cst_74 : f32 to vector<34x128xf32>
    %222 = arith.mulf %221, %220 : vector<34x128xf32>
    %cst_75 = arith.constant 1.45315206 : f32
    %223 = vector.broadcast %cst_75 : f32 to vector<34x128xf32>
    %224 = arith.subf %222, %223 : vector<34x128xf32>
    %225 = arith.mulf %224, %220 : vector<34x128xf32>
    %cst_76 = arith.constant 1.42141378 : f32
    %226 = vector.broadcast %cst_76 : f32 to vector<34x128xf32>
    %227 = arith.addf %225, %226 : vector<34x128xf32>
    %228 = arith.mulf %227, %220 : vector<34x128xf32>
    %cst_77 = arith.constant 0.284496725 : f32
    %229 = vector.broadcast %cst_77 : f32 to vector<34x128xf32>
    %230 = arith.subf %228, %229 : vector<34x128xf32>
    %231 = arith.mulf %230, %220 : vector<34x128xf32>
    %cst_78 = arith.constant 0.254829586 : f32
    %232 = vector.broadcast %cst_78 : f32 to vector<34x128xf32>
    %233 = arith.addf %231, %232 : vector<34x128xf32>
    %234 = arith.mulf %233, %220 : vector<34x128xf32>
    %cst_79 = arith.constant 0.000000e+00 : f32
    %235 = vector.broadcast %cst_79 : f32 to vector<34x128xf32>
    %236 = arith.subf %235, %214 : vector<34x128xf32>
    %237 = arith.mulf %236, %214 : vector<34x128xf32>
    %238 = math.exp %237 : vector<34x128xf32>
    %239 = arith.mulf %234, %238 : vector<34x128xf32>
    %cst_80 = arith.constant 1.000000e+00 : f32
    %240 = vector.broadcast %cst_80 : f32 to vector<34x128xf32>
    %241 = arith.subf %240, %239 : vector<34x128xf32>
    %cst_81 = arith.constant 0.000000e+00 : f32
    %242 = vector.broadcast %cst_81 : f32 to vector<34x128xf32>
    %243 = arith.cmpf oge, %213, %242 : vector<34x128xf32>
    %cst_82 = arith.constant 0.000000e+00 : f32
    %244 = vector.broadcast %cst_82 : f32 to vector<34x128xf32>
    %245 = arith.subf %244, %241 : vector<34x128xf32>
    %246 = arith.select %243, %241, %245 : vector<34x128xi1>, vector<34x128xf32>
    %cst_83 = arith.constant 5.000000e-01 : f32
    %247 = vector.broadcast %cst_83 : f32 to vector<34x128xf32>
    %248 = arith.mulf %247, %211 : vector<34x128xf32>
    %cst_84 = arith.constant 1.000000e+00 : f32
    %249 = vector.broadcast %cst_84 : f32 to vector<34x128xf32>
    %250 = arith.addf %249, %246 : vector<34x128xf32>
    %251 = arith.mulf %248, %250 : vector<34x128xf32>
    %c168 = arith.constant 168 : index
    %c0_85 = arith.constant 0 : index
    %252 = vector.load %arg2[%c168, %c0_85] : memref<552x128xf32, #tpu.memory_space<vmem>>, vector<128x32xf32>
    %cst_86 = arith.constant dense<0.000000e+00> : vector<34x32xf32>
    %253 = tpu.matmul %251, %252, %cst_86 {dimension_numbers = #tpu.dot_dimension_numbers<[1], [0], [0], [1], [0, 0, 1, 1], [], []>} : vector<34x128xf32>, vector<128x32xf32>, vector<34x32xf32> -> vector<34x32xf32>
    %c8 = arith.constant 8 : index
    %c0_87 = arith.constant 0 : index
    %254 = vector.load %arg3[%c8, %c0_87] : memref<24x128xf32, #tpu.memory_space<vmem>>, vector<1x32xf32>
    %255 = vector.broadcast %254 : vector<1x32xf32> to vector<34x32xf32>
    %256 = arith.addf %253, %255 : vector<34x32xf32>
    %257 = arith.addf %182, %256 : vector<34x32xf32>
    %c9 = arith.constant 9 : index
    %c0_88 = arith.constant 0 : index
    %258 = vector.load %arg3[%c9, %c0_88] : memref<24x128xf32, #tpu.memory_space<vmem>>, vector<1x32xf32>
    %c10 = arith.constant 10 : index
    %c0_89 = arith.constant 0 : index
    %259 = vector.load %arg3[%c10, %c0_89] : memref<24x128xf32, #tpu.memory_space<vmem>>, vector<1x32xf32>
    %cst_90 = arith.constant dense<0.000000e+00> : vector<34xf32>
    %260 = vector.multi_reduction <add>, %257, %cst_90 [1] : vector<34x32xf32> to vector<34xf32>
    %261 = vector.shape_cast %260 : vector<34xf32> to vector<34x1xf32>
    %cst_91 = arith.constant 3.200000e+01 : f32
    %262 = vector.broadcast %cst_91 : f32 to vector<34x1xf32>
    %263 = arith.divf %261, %262 : vector<34x1xf32>
    %264 = vector.broadcast %263 : vector<34x1xf32> to vector<34x32xf32>
    %265 = arith.subf %257, %264 : vector<34x32xf32>
    %266 = arith.mulf %265, %265 : vector<34x32xf32>
    %cst_92 = arith.constant dense<0.000000e+00> : vector<34xf32>
    %267 = vector.multi_reduction <add>, %266, %cst_92 [1] : vector<34x32xf32> to vector<34xf32>
    %268 = vector.shape_cast %267 : vector<34xf32> to vector<34x1xf32>
    %cst_93 = arith.constant 3.200000e+01 : f32
    %269 = vector.broadcast %cst_93 : f32 to vector<34x1xf32>
    %270 = arith.divf %268, %269 : vector<34x1xf32>
    %271 = vector.broadcast %263 : vector<34x1xf32> to vector<34x32xf32>
    %272 = arith.subf %257, %271 : vector<34x32xf32>
    %cst_94 = arith.constant 9.99999997E-7 : f32
    %273 = vector.broadcast %cst_94 : f32 to vector<34x1xf32>
    %274 = arith.addf %270, %273 : vector<34x1xf32>
    %275 = math.rsqrt %274 : vector<34x1xf32>
    %276 = vector.broadcast %275 : vector<34x1xf32> to vector<34x32xf32>
    %277 = arith.mulf %272, %276 : vector<34x32xf32>
    %278 = vector.broadcast %258 : vector<1x32xf32> to vector<34x32xf32>
    %279 = arith.mulf %277, %278 : vector<34x32xf32>
    %280 = vector.broadcast %259 : vector<1x32xf32> to vector<34x32xf32>
    %281 = arith.addf %279, %280 : vector<34x32xf32>
    %c296 = arith.constant 296 : index
    %c0_95 = arith.constant 0 : index
    %282 = vector.load %arg2[%c296, %c0_95] : memref<552x128xf32, #tpu.memory_space<vmem>>, vector<32x96xf32>
    %cst_96 = arith.constant dense<0.000000e+00> : vector<34x96xf32>
    %283 = tpu.matmul %281, %282, %cst_96 {dimension_numbers = #tpu.dot_dimension_numbers<[1], [0], [0], [1], [0, 0, 1, 1], [], []>} : vector<34x32xf32>, vector<32x96xf32>, vector<34x96xf32> -> vector<34x96xf32>
    %c11 = arith.constant 11 : index
    %c0_97 = arith.constant 0 : index
    %284 = vector.load %arg3[%c11, %c0_97] : memref<24x128xf32, #tpu.memory_space<vmem>>, vector<1x96xf32>
    %285 = vector.broadcast %284 : vector<1x96xf32> to vector<34x96xf32>
    %286 = arith.addf %283, %285 : vector<34x96xf32>
    %287 = vector.extract_strided_slice %286 {offsets = [0, 0], sizes = [17, 96], strides = [1, 1]} : vector<34x96xf32> to vector<17x96xf32>
    %288 = vector.extract_strided_slice %287 {offsets = [0, 0], sizes = [17, 8], strides = [1, 1]} : vector<17x96xf32> to vector<17x8xf32>
    %289 = vector.extract_strided_slice %287 {offsets = [0, 32], sizes = [17, 8], strides = [1, 1]} : vector<17x96xf32> to vector<17x8xf32>
    %290 = vector.extract_strided_slice %287 {offsets = [0, 64], sizes = [17, 8], strides = [1, 1]} : vector<17x96xf32> to vector<17x8xf32>
    %cst_98 = arith.constant dense<0.000000e+00> : vector<17x17xf32>
    %291 = tpu.matmul %288, %289, %cst_98 {dimension_numbers = #tpu.dot_dimension_numbers<[1], [1], [0], [0], [0, 0, 1, 0], [], []>} : vector<17x8xf32>, vector<17x8xf32>, vector<17x17xf32> -> vector<17x17xf32>
    %cst_99 = arith.constant 0.353553385 : f32
    %292 = vector.broadcast %cst_99 : f32 to vector<17x17xf32>
    %293 = arith.mulf %291, %292 : vector<17x17xf32>
    %cst_100 = arith.constant dense<0xFF800000> : vector<17xf32>
    %294 = vector.multi_reduction <maximumf>, %293, %cst_100 [1] : vector<17x17xf32> to vector<17xf32>
    %295 = vector.shape_cast %294 : vector<17xf32> to vector<17x1xf32>
    %296 = vector.broadcast %295 : vector<17x1xf32> to vector<17x17xf32>
    %297 = arith.subf %293, %296 : vector<17x17xf32>
    %298 = math.exp %297 : vector<17x17xf32>
    %cst_101 = arith.constant dense<0.000000e+00> : vector<17xf32>
    %299 = vector.multi_reduction <add>, %298, %cst_101 [1] : vector<17x17xf32> to vector<17xf32>
    %300 = vector.shape_cast %299 : vector<17xf32> to vector<17x1xf32>
    %301 = vector.broadcast %300 : vector<17x1xf32> to vector<17x17xf32>
    %302 = arith.divf %298, %301 : vector<17x17xf32>
    %cst_102 = arith.constant dense<0.000000e+00> : vector<17x8xf32>
    %303 = tpu.matmul %302, %290, %cst_102 {dimension_numbers = #tpu.dot_dimension_numbers<[1], [0], [0], [1], [0, 0, 1, 1], [], []>} : vector<17x17xf32>, vector<17x8xf32>, vector<17x8xf32> -> vector<17x8xf32>
    %304 = vector.extract_strided_slice %287 {offsets = [0, 8], sizes = [17, 8], strides = [1, 1]} : vector<17x96xf32> to vector<17x8xf32>
    %305 = vector.extract_strided_slice %287 {offsets = [0, 40], sizes = [17, 8], strides = [1, 1]} : vector<17x96xf32> to vector<17x8xf32>
    %306 = vector.extract_strided_slice %287 {offsets = [0, 72], sizes = [17, 8], strides = [1, 1]} : vector<17x96xf32> to vector<17x8xf32>
    %cst_103 = arith.constant dense<0.000000e+00> : vector<17x17xf32>
    %307 = tpu.matmul %304, %305, %cst_103 {dimension_numbers = #tpu.dot_dimension_numbers<[1], [1], [0], [0], [0, 0, 1, 0], [], []>} : vector<17x8xf32>, vector<17x8xf32>, vector<17x17xf32> -> vector<17x17xf32>
    %cst_104 = arith.constant 0.353553385 : f32
    %308 = vector.broadcast %cst_104 : f32 to vector<17x17xf32>
    %309 = arith.mulf %307, %308 : vector<17x17xf32>
    %cst_105 = arith.constant dense<0xFF800000> : vector<17xf32>
    %310 = vector.multi_reduction <maximumf>, %309, %cst_105 [1] : vector<17x17xf32> to vector<17xf32>
    %311 = vector.shape_cast %310 : vector<17xf32> to vector<17x1xf32>
    %312 = vector.broadcast %311 : vector<17x1xf32> to vector<17x17xf32>
    %313 = arith.subf %309, %312 : vector<17x17xf32>
    %314 = math.exp %313 : vector<17x17xf32>
    %cst_106 = arith.constant dense<0.000000e+00> : vector<17xf32>
    %315 = vector.multi_reduction <add>, %314, %cst_106 [1] : vector<17x17xf32> to vector<17xf32>
    %316 = vector.shape_cast %315 : vector<17xf32> to vector<17x1xf32>
    %317 = vector.broadcast %316 : vector<17x1xf32> to vector<17x17xf32>
    %318 = arith.divf %314, %317 : vector<17x17xf32>
    %cst_107 = arith.constant dense<0.000000e+00> : vector<17x8xf32>
    %319 = tpu.matmul %318, %306, %cst_107 {dimension_numbers = #tpu.dot_dimension_numbers<[1], [0], [0], [1], [0, 0, 1, 1], [], []>} : vector<17x17xf32>, vector<17x8xf32>, vector<17x8xf32> -> vector<17x8xf32>
    %320 = vector.extract_strided_slice %287 {offsets = [0, 16], sizes = [17, 8], strides = [1, 1]} : vector<17x96xf32> to vector<17x8xf32>
    %321 = vector.extract_strided_slice %287 {offsets = [0, 48], sizes = [17, 8], strides = [1, 1]} : vector<17x96xf32> to vector<17x8xf32>
    %322 = vector.extract_strided_slice %287 {offsets = [0, 80], sizes = [17, 8], strides = [1, 1]} : vector<17x96xf32> to vector<17x8xf32>
    %cst_108 = arith.constant dense<0.000000e+00> : vector<17x17xf32>
    %323 = tpu.matmul %320, %321, %cst_108 {dimension_numbers = #tpu.dot_dimension_numbers<[1], [1], [0], [0], [0, 0, 1, 0], [], []>} : vector<17x8xf32>, vector<17x8xf32>, vector<17x17xf32> -> vector<17x17xf32>
    %cst_109 = arith.constant 0.353553385 : f32
    %324 = vector.broadcast %cst_109 : f32 to vector<17x17xf32>
    %325 = arith.mulf %323, %324 : vector<17x17xf32>
    %cst_110 = arith.constant dense<0xFF800000> : vector<17xf32>
    %326 = vector.multi_reduction <maximumf>, %325, %cst_110 [1] : vector<17x17xf32> to vector<17xf32>
    %327 = vector.shape_cast %326 : vector<17xf32> to vector<17x1xf32>
    %328 = vector.broadcast %327 : vector<17x1xf32> to vector<17x17xf32>
    %329 = arith.subf %325, %328 : vector<17x17xf32>
    %330 = math.exp %329 : vector<17x17xf32>
    %cst_111 = arith.constant dense<0.000000e+00> : vector<17xf32>
    %331 = vector.multi_reduction <add>, %330, %cst_111 [1] : vector<17x17xf32> to vector<17xf32>
    %332 = vector.shape_cast %331 : vector<17xf32> to vector<17x1xf32>
    %333 = vector.broadcast %332 : vector<17x1xf32> to vector<17x17xf32>
    %334 = arith.divf %330, %333 : vector<17x17xf32>
    %cst_112 = arith.constant dense<0.000000e+00> : vector<17x8xf32>
    %335 = tpu.matmul %334, %322, %cst_112 {dimension_numbers = #tpu.dot_dimension_numbers<[1], [0], [0], [1], [0, 0, 1, 1], [], []>} : vector<17x17xf32>, vector<17x8xf32>, vector<17x8xf32> -> vector<17x8xf32>
    %336 = vector.extract_strided_slice %287 {offsets = [0, 24], sizes = [17, 8], strides = [1, 1]} : vector<17x96xf32> to vector<17x8xf32>
    %337 = vector.extract_strided_slice %287 {offsets = [0, 56], sizes = [17, 8], strides = [1, 1]} : vector<17x96xf32> to vector<17x8xf32>
    %338 = vector.extract_strided_slice %287 {offsets = [0, 88], sizes = [17, 8], strides = [1, 1]} : vector<17x96xf32> to vector<17x8xf32>
    %cst_113 = arith.constant dense<0.000000e+00> : vector<17x17xf32>
    %339 = tpu.matmul %336, %337, %cst_113 {dimension_numbers = #tpu.dot_dimension_numbers<[1], [1], [0], [0], [0, 0, 1, 0], [], []>} : vector<17x8xf32>, vector<17x8xf32>, vector<17x17xf32> -> vector<17x17xf32>
    %cst_114 = arith.constant 0.353553385 : f32
    %340 = vector.broadcast %cst_114 : f32 to vector<17x17xf32>
    %341 = arith.mulf %339, %340 : vector<17x17xf32>
    %cst_115 = arith.constant dense<0xFF800000> : vector<17xf32>
    %342 = vector.multi_reduction <maximumf>, %341, %cst_115 [1] : vector<17x17xf32> to vector<17xf32>
    %343 = vector.shape_cast %342 : vector<17xf32> to vector<17x1xf32>
    %344 = vector.broadcast %343 : vector<17x1xf32> to vector<17x17xf32>
    %345 = arith.subf %341, %344 : vector<17x17xf32>
    %346 = math.exp %345 : vector<17x17xf32>
    %cst_116 = arith.constant dense<0.000000e+00> : vector<17xf32>
    %347 = vector.multi_reduction <add>, %346, %cst_116 [1] : vector<17x17xf32> to vector<17xf32>
    %348 = vector.shape_cast %347 : vector<17xf32> to vector<17x1xf32>
    %349 = vector.broadcast %348 : vector<17x1xf32> to vector<17x17xf32>
    %350 = arith.divf %346, %349 : vector<17x17xf32>
    %cst_117 = arith.constant dense<0.000000e+00> : vector<17x8xf32>
    %351 = tpu.matmul %350, %338, %cst_117 {dimension_numbers = #tpu.dot_dimension_numbers<[1], [0], [0], [1], [0, 0, 1, 1], [], []>} : vector<17x17xf32>, vector<17x8xf32>, vector<17x8xf32> -> vector<17x8xf32>
    %352 = vector.shape_cast %302 : vector<17x17xf32> to vector<1x17x17xf32>
    %353 = vector.shape_cast %318 : vector<17x17xf32> to vector<1x17x17xf32>
    %354 = vector.shape_cast %334 : vector<17x17xf32> to vector<1x17x17xf32>
    %355 = vector.shape_cast %350 : vector<17x17xf32> to vector<1x17x17xf32>
    %356 = tpu.concatenate %352, %353, %354, %355 in 0 : vector<1x17x17xf32>, vector<1x17x17xf32>, vector<1x17x17xf32>, vector<1x17x17xf32> -> vector<4x17x17xf32>
    %357 = tpu.concatenate %303, %319, %335, %351 in 1 : vector<17x8xf32>, vector<17x8xf32>, vector<17x8xf32>, vector<17x8xf32> -> vector<17x32xf32>
    %358 = vector.extract_strided_slice %286 {offsets = [17, 0], sizes = [17, 96], strides = [1, 1]} : vector<34x96xf32> to vector<17x96xf32>
    %359 = vector.extract_strided_slice %358 {offsets = [0, 0], sizes = [17, 8], strides = [1, 1]} : vector<17x96xf32> to vector<17x8xf32>
    %360 = vector.extract_strided_slice %358 {offsets = [0, 32], sizes = [17, 8], strides = [1, 1]} : vector<17x96xf32> to vector<17x8xf32>
    %361 = vector.extract_strided_slice %358 {offsets = [0, 64], sizes = [17, 8], strides = [1, 1]} : vector<17x96xf32> to vector<17x8xf32>
    %cst_118 = arith.constant dense<0.000000e+00> : vector<17x17xf32>
    %362 = tpu.matmul %359, %360, %cst_118 {dimension_numbers = #tpu.dot_dimension_numbers<[1], [1], [0], [0], [0, 0, 1, 0], [], []>} : vector<17x8xf32>, vector<17x8xf32>, vector<17x17xf32> -> vector<17x17xf32>
    %cst_119 = arith.constant 0.353553385 : f32
    %363 = vector.broadcast %cst_119 : f32 to vector<17x17xf32>
    %364 = arith.mulf %362, %363 : vector<17x17xf32>
    %cst_120 = arith.constant dense<0xFF800000> : vector<17xf32>
    %365 = vector.multi_reduction <maximumf>, %364, %cst_120 [1] : vector<17x17xf32> to vector<17xf32>
    %366 = vector.shape_cast %365 : vector<17xf32> to vector<17x1xf32>
    %367 = vector.broadcast %366 : vector<17x1xf32> to vector<17x17xf32>
    %368 = arith.subf %364, %367 : vector<17x17xf32>
    %369 = math.exp %368 : vector<17x17xf32>
    %cst_121 = arith.constant dense<0.000000e+00> : vector<17xf32>
    %370 = vector.multi_reduction <add>, %369, %cst_121 [1] : vector<17x17xf32> to vector<17xf32>
    %371 = vector.shape_cast %370 : vector<17xf32> to vector<17x1xf32>
    %372 = vector.broadcast %371 : vector<17x1xf32> to vector<17x17xf32>
    %373 = arith.divf %369, %372 : vector<17x17xf32>
    %cst_122 = arith.constant dense<0.000000e+00> : vector<17x8xf32>
    %374 = tpu.matmul %373, %361, %cst_122 {dimension_numbers = #tpu.dot_dimension_numbers<[1], [0], [0], [1], [0, 0, 1, 1], [], []>} : vector<17x17xf32>, vector<17x8xf32>, vector<17x8xf32> -> vector<17x8xf32>
    %375 = vector.extract_strided_slice %358 {offsets = [0, 8], sizes = [17, 8], strides = [1, 1]} : vector<17x96xf32> to vector<17x8xf32>
    %376 = vector.extract_strided_slice %358 {offsets = [0, 40], sizes = [17, 8], strides = [1, 1]} : vector<17x96xf32> to vector<17x8xf32>
    %377 = vector.extract_strided_slice %358 {offsets = [0, 72], sizes = [17, 8], strides = [1, 1]} : vector<17x96xf32> to vector<17x8xf32>
    %cst_123 = arith.constant dense<0.000000e+00> : vector<17x17xf32>
    %378 = tpu.matmul %375, %376, %cst_123 {dimension_numbers = #tpu.dot_dimension_numbers<[1], [1], [0], [0], [0, 0, 1, 0], [], []>} : vector<17x8xf32>, vector<17x8xf32>, vector<17x17xf32> -> vector<17x17xf32>
    %cst_124 = arith.constant 0.353553385 : f32
    %379 = vector.broadcast %cst_124 : f32 to vector<17x17xf32>
    %380 = arith.mulf %378, %379 : vector<17x17xf32>
    %cst_125 = arith.constant dense<0xFF800000> : vector<17xf32>
    %381 = vector.multi_reduction <maximumf>, %380, %cst_125 [1] : vector<17x17xf32> to vector<17xf32>
    %382 = vector.shape_cast %381 : vector<17xf32> to vector<17x1xf32>
    %383 = vector.broadcast %382 : vector<17x1xf32> to vector<17x17xf32>
    %384 = arith.subf %380, %383 : vector<17x17xf32>
    %385 = math.exp %384 : vector<17x17xf32>
    %cst_126 = arith.constant dense<0.000000e+00> : vector<17xf32>
    %386 = vector.multi_reduction <add>, %385, %cst_126 [1] : vector<17x17xf32> to vector<17xf32>
    %387 = vector.shape_cast %386 : vector<17xf32> to vector<17x1xf32>
    %388 = vector.broadcast %387 : vector<17x1xf32> to vector<17x17xf32>
    %389 = arith.divf %385, %388 : vector<17x17xf32>
    %cst_127 = arith.constant dense<0.000000e+00> : vector<17x8xf32>
    %390 = tpu.matmul %389, %377, %cst_127 {dimension_numbers = #tpu.dot_dimension_numbers<[1], [0], [0], [1], [0, 0, 1, 1], [], []>} : vector<17x17xf32>, vector<17x8xf32>, vector<17x8xf32> -> vector<17x8xf32>
    %391 = vector.extract_strided_slice %358 {offsets = [0, 16], sizes = [17, 8], strides = [1, 1]} : vector<17x96xf32> to vector<17x8xf32>
    %392 = vector.extract_strided_slice %358 {offsets = [0, 48], sizes = [17, 8], strides = [1, 1]} : vector<17x96xf32> to vector<17x8xf32>
    %393 = vector.extract_strided_slice %358 {offsets = [0, 80], sizes = [17, 8], strides = [1, 1]} : vector<17x96xf32> to vector<17x8xf32>
    %cst_128 = arith.constant dense<0.000000e+00> : vector<17x17xf32>
    %394 = tpu.matmul %391, %392, %cst_128 {dimension_numbers = #tpu.dot_dimension_numbers<[1], [1], [0], [0], [0, 0, 1, 0], [], []>} : vector<17x8xf32>, vector<17x8xf32>, vector<17x17xf32> -> vector<17x17xf32>
    %cst_129 = arith.constant 0.353553385 : f32
    %395 = vector.broadcast %cst_129 : f32 to vector<17x17xf32>
    %396 = arith.mulf %394, %395 : vector<17x17xf32>
    %cst_130 = arith.constant dense<0xFF800000> : vector<17xf32>
    %397 = vector.multi_reduction <maximumf>, %396, %cst_130 [1] : vector<17x17xf32> to vector<17xf32>
    %398 = vector.shape_cast %397 : vector<17xf32> to vector<17x1xf32>
    %399 = vector.broadcast %398 : vector<17x1xf32> to vector<17x17xf32>
    %400 = arith.subf %396, %399 : vector<17x17xf32>
    %401 = math.exp %400 : vector<17x17xf32>
    %cst_131 = arith.constant dense<0.000000e+00> : vector<17xf32>
    %402 = vector.multi_reduction <add>, %401, %cst_131 [1] : vector<17x17xf32> to vector<17xf32>
    %403 = vector.shape_cast %402 : vector<17xf32> to vector<17x1xf32>
    %404 = vector.broadcast %403 : vector<17x1xf32> to vector<17x17xf32>
    %405 = arith.divf %401, %404 : vector<17x17xf32>
    %cst_132 = arith.constant dense<0.000000e+00> : vector<17x8xf32>
    %406 = tpu.matmul %405, %393, %cst_132 {dimension_numbers = #tpu.dot_dimension_numbers<[1], [0], [0], [1], [0, 0, 1, 1], [], []>} : vector<17x17xf32>, vector<17x8xf32>, vector<17x8xf32> -> vector<17x8xf32>
    %407 = vector.extract_strided_slice %358 {offsets = [0, 24], sizes = [17, 8], strides = [1, 1]} : vector<17x96xf32> to vector<17x8xf32>
    %408 = vector.extract_strided_slice %358 {offsets = [0, 56], sizes = [17, 8], strides = [1, 1]} : vector<17x96xf32> to vector<17x8xf32>
    %409 = vector.extract_strided_slice %358 {offsets = [0, 88], sizes = [17, 8], strides = [1, 1]} : vector<17x96xf32> to vector<17x8xf32>
    %cst_133 = arith.constant dense<0.000000e+00> : vector<17x17xf32>
    %410 = tpu.matmul %407, %408, %cst_133 {dimension_numbers = #tpu.dot_dimension_numbers<[1], [1], [0], [0], [0, 0, 1, 0], [], []>} : vector<17x8xf32>, vector<17x8xf32>, vector<17x17xf32> -> vector<17x17xf32>
    %cst_134 = arith.constant 0.353553385 : f32
    %411 = vector.broadcast %cst_134 : f32 to vector<17x17xf32>
    %412 = arith.mulf %410, %411 : vector<17x17xf32>
    %cst_135 = arith.constant dense<0xFF800000> : vector<17xf32>
    %413 = vector.multi_reduction <maximumf>, %412, %cst_135 [1] : vector<17x17xf32> to vector<17xf32>
    %414 = vector.shape_cast %413 : vector<17xf32> to vector<17x1xf32>
    %415 = vector.broadcast %414 : vector<17x1xf32> to vector<17x17xf32>
    %416 = arith.subf %412, %415 : vector<17x17xf32>
    %417 = math.exp %416 : vector<17x17xf32>
    %cst_136 = arith.constant dense<0.000000e+00> : vector<17xf32>
    %418 = vector.multi_reduction <add>, %417, %cst_136 [1] : vector<17x17xf32> to vector<17xf32>
    %419 = vector.shape_cast %418 : vector<17xf32> to vector<17x1xf32>
    %420 = vector.broadcast %419 : vector<17x1xf32> to vector<17x17xf32>
    %421 = arith.divf %417, %420 : vector<17x17xf32>
    %cst_137 = arith.constant dense<0.000000e+00> : vector<17x8xf32>
    %422 = tpu.matmul %421, %409, %cst_137 {dimension_numbers = #tpu.dot_dimension_numbers<[1], [0], [0], [1], [0, 0, 1, 1], [], []>} : vector<17x17xf32>, vector<17x8xf32>, vector<17x8xf32> -> vector<17x8xf32>
    %423 = vector.shape_cast %373 : vector<17x17xf32> to vector<1x17x17xf32>
    %424 = vector.shape_cast %389 : vector<17x17xf32> to vector<1x17x17xf32>
    %425 = vector.shape_cast %405 : vector<17x17xf32> to vector<1x17x17xf32>
    %426 = vector.shape_cast %421 : vector<17x17xf32> to vector<1x17x17xf32>
    %427 = tpu.concatenate %423, %424, %425, %426 in 0 : vector<1x17x17xf32>, vector<1x17x17xf32>, vector<1x17x17xf32>, vector<1x17x17xf32> -> vector<4x17x17xf32>
    %428 = tpu.concatenate %374, %390, %406, %422 in 1 : vector<17x8xf32>, vector<17x8xf32>, vector<17x8xf32>, vector<17x8xf32> -> vector<17x32xf32>
    %429 = tpu.concatenate %357, %428 in 0 : vector<17x32xf32>, vector<17x32xf32> -> vector<34x32xf32>
    %c328 = arith.constant 328 : index
    %c0_138 = arith.constant 0 : index
    %430 = vector.load %arg2[%c328, %c0_138] : memref<552x128xf32, #tpu.memory_space<vmem>>, vector<32x32xf32>
    %cst_139 = arith.constant dense<0.000000e+00> : vector<34x32xf32>
    %431 = tpu.matmul %429, %430, %cst_139 {dimension_numbers = #tpu.dot_dimension_numbers<[1], [0], [0], [1], [0, 0, 1, 1], [], []>} : vector<34x32xf32>, vector<32x32xf32>, vector<34x32xf32> -> vector<34x32xf32>
    %432 = arith.addf %257, %431 : vector<34x32xf32>
    %c12 = arith.constant 12 : index
    %c0_140 = arith.constant 0 : index
    %433 = vector.load %arg3[%c12, %c0_140] : memref<24x128xf32, #tpu.memory_space<vmem>>, vector<1x32xf32>
    %434 = vector.broadcast %433 : vector<1x32xf32> to vector<34x32xf32>
    %435 = arith.addf %432, %434 : vector<34x32xf32>
    %c13 = arith.constant 13 : index
    %c0_141 = arith.constant 0 : index
    %436 = vector.load %arg3[%c13, %c0_141] : memref<24x128xf32, #tpu.memory_space<vmem>>, vector<1x32xf32>
    %c14 = arith.constant 14 : index
    %c0_142 = arith.constant 0 : index
    %437 = vector.load %arg3[%c14, %c0_142] : memref<24x128xf32, #tpu.memory_space<vmem>>, vector<1x32xf32>
    %cst_143 = arith.constant dense<0.000000e+00> : vector<34xf32>
    %438 = vector.multi_reduction <add>, %435, %cst_143 [1] : vector<34x32xf32> to vector<34xf32>
    %439 = vector.shape_cast %438 : vector<34xf32> to vector<34x1xf32>
    %cst_144 = arith.constant 3.200000e+01 : f32
    %440 = vector.broadcast %cst_144 : f32 to vector<34x1xf32>
    %441 = arith.divf %439, %440 : vector<34x1xf32>
    %442 = vector.broadcast %441 : vector<34x1xf32> to vector<34x32xf32>
    %443 = arith.subf %435, %442 : vector<34x32xf32>
    %444 = arith.mulf %443, %443 : vector<34x32xf32>
    %cst_145 = arith.constant dense<0.000000e+00> : vector<34xf32>
    %445 = vector.multi_reduction <add>, %444, %cst_145 [1] : vector<34x32xf32> to vector<34xf32>
    %446 = vector.shape_cast %445 : vector<34xf32> to vector<34x1xf32>
    %cst_146 = arith.constant 3.200000e+01 : f32
    %447 = vector.broadcast %cst_146 : f32 to vector<34x1xf32>
    %448 = arith.divf %446, %447 : vector<34x1xf32>
    %449 = vector.broadcast %441 : vector<34x1xf32> to vector<34x32xf32>
    %450 = arith.subf %435, %449 : vector<34x32xf32>
    %cst_147 = arith.constant 9.99999997E-7 : f32
    %451 = vector.broadcast %cst_147 : f32 to vector<34x1xf32>
    %452 = arith.addf %448, %451 : vector<34x1xf32>
    %453 = math.rsqrt %452 : vector<34x1xf32>
    %454 = vector.broadcast %453 : vector<34x1xf32> to vector<34x32xf32>
    %455 = arith.mulf %450, %454 : vector<34x32xf32>
    %456 = vector.broadcast %436 : vector<1x32xf32> to vector<34x32xf32>
    %457 = arith.mulf %455, %456 : vector<34x32xf32>
    %458 = vector.broadcast %437 : vector<1x32xf32> to vector<34x32xf32>
    %459 = arith.addf %457, %458 : vector<34x32xf32>
    %c360 = arith.constant 360 : index
    %c0_148 = arith.constant 0 : index
    %460 = vector.load %arg2[%c360, %c0_148] : memref<552x128xf32, #tpu.memory_space<vmem>>, vector<32x128xf32>
    %cst_149 = arith.constant dense<0.000000e+00> : vector<34x128xf32>
    %461 = tpu.matmul %459, %460, %cst_149 {dimension_numbers = #tpu.dot_dimension_numbers<[1], [0], [0], [1], [0, 0, 1, 1], [], []>} : vector<34x32xf32>, vector<32x128xf32>, vector<34x128xf32> -> vector<34x128xf32>
    %c15 = arith.constant 15 : index
    %c0_150 = arith.constant 0 : index
    %462 = vector.load %arg3[%c15, %c0_150] : memref<24x128xf32, #tpu.memory_space<vmem>>, vector<1x128xf32>
    %463 = vector.broadcast %462 : vector<1x128xf32> to vector<34x128xf32>
    %464 = arith.addf %461, %463 : vector<34x128xf32>
    %cst_151 = arith.constant 0.707106769 : f32
    %465 = vector.broadcast %cst_151 : f32 to vector<34x128xf32>
    %466 = arith.mulf %464, %465 : vector<34x128xf32>
    %467 = math.absf %466 : vector<34x128xf32>
    %cst_152 = arith.constant 0.327591091 : f32
    %468 = vector.broadcast %cst_152 : f32 to vector<34x128xf32>
    %469 = arith.mulf %468, %467 : vector<34x128xf32>
    %cst_153 = arith.constant 1.000000e+00 : f32
    %470 = vector.broadcast %cst_153 : f32 to vector<34x128xf32>
    %471 = arith.addf %470, %469 : vector<34x128xf32>
    %cst_154 = arith.constant 1.000000e+00 : f32
    %472 = vector.broadcast %cst_154 : f32 to vector<34x128xf32>
    %473 = arith.divf %472, %471 : vector<34x128xf32>
    %cst_155 = arith.constant 1.06140542 : f32
    %474 = vector.broadcast %cst_155 : f32 to vector<34x128xf32>
    %475 = arith.mulf %474, %473 : vector<34x128xf32>
    %cst_156 = arith.constant 1.45315206 : f32
    %476 = vector.broadcast %cst_156 : f32 to vector<34x128xf32>
    %477 = arith.subf %475, %476 : vector<34x128xf32>
    %478 = arith.mulf %477, %473 : vector<34x128xf32>
    %cst_157 = arith.constant 1.42141378 : f32
    %479 = vector.broadcast %cst_157 : f32 to vector<34x128xf32>
    %480 = arith.addf %478, %479 : vector<34x128xf32>
    %481 = arith.mulf %480, %473 : vector<34x128xf32>
    %cst_158 = arith.constant 0.284496725 : f32
    %482 = vector.broadcast %cst_158 : f32 to vector<34x128xf32>
    %483 = arith.subf %481, %482 : vector<34x128xf32>
    %484 = arith.mulf %483, %473 : vector<34x128xf32>
    %cst_159 = arith.constant 0.254829586 : f32
    %485 = vector.broadcast %cst_159 : f32 to vector<34x128xf32>
    %486 = arith.addf %484, %485 : vector<34x128xf32>
    %487 = arith.mulf %486, %473 : vector<34x128xf32>
    %cst_160 = arith.constant 0.000000e+00 : f32
    %488 = vector.broadcast %cst_160 : f32 to vector<34x128xf32>
    %489 = arith.subf %488, %467 : vector<34x128xf32>
    %490 = arith.mulf %489, %467 : vector<34x128xf32>
    %491 = math.exp %490 : vector<34x128xf32>
    %492 = arith.mulf %487, %491 : vector<34x128xf32>
    %cst_161 = arith.constant 1.000000e+00 : f32
    %493 = vector.broadcast %cst_161 : f32 to vector<34x128xf32>
    %494 = arith.subf %493, %492 : vector<34x128xf32>
    %cst_162 = arith.constant 0.000000e+00 : f32
    %495 = vector.broadcast %cst_162 : f32 to vector<34x128xf32>
    %496 = arith.cmpf oge, %466, %495 : vector<34x128xf32>
    %cst_163 = arith.constant 0.000000e+00 : f32
    %497 = vector.broadcast %cst_163 : f32 to vector<34x128xf32>
    %498 = arith.subf %497, %494 : vector<34x128xf32>
    %499 = arith.select %496, %494, %498 : vector<34x128xi1>, vector<34x128xf32>
    %cst_164 = arith.constant 5.000000e-01 : f32
    %500 = vector.broadcast %cst_164 : f32 to vector<34x128xf32>
    %501 = arith.mulf %500, %464 : vector<34x128xf32>
    %cst_165 = arith.constant 1.000000e+00 : f32
    %502 = vector.broadcast %cst_165 : f32 to vector<34x128xf32>
    %503 = arith.addf %502, %499 : vector<34x128xf32>
    %504 = arith.mulf %501, %503 : vector<34x128xf32>
    %c392 = arith.constant 392 : index
    %c0_166 = arith.constant 0 : index
    %505 = vector.load %arg2[%c392, %c0_166] : memref<552x128xf32, #tpu.memory_space<vmem>>, vector<128x32xf32>
    %cst_167 = arith.constant dense<0.000000e+00> : vector<34x32xf32>
    %506 = tpu.matmul %504, %505, %cst_167 {dimension_numbers = #tpu.dot_dimension_numbers<[1], [0], [0], [1], [0, 0, 1, 1], [], []>} : vector<34x128xf32>, vector<128x32xf32>, vector<34x32xf32> -> vector<34x32xf32>
    %c16 = arith.constant 16 : index
    %c0_168 = arith.constant 0 : index
    %507 = vector.load %arg3[%c16, %c0_168] : memref<24x128xf32, #tpu.memory_space<vmem>>, vector<1x32xf32>
    %508 = vector.broadcast %507 : vector<1x32xf32> to vector<34x32xf32>
    %509 = arith.addf %506, %508 : vector<34x32xf32>
    %510 = arith.addf %435, %509 : vector<34x32xf32>
    %511 = vector.shape_cast %356 : vector<4x17x17xf32> to vector<1x4x17x17xf32>
    %512 = vector.shape_cast %427 : vector<4x17x17xf32> to vector<1x4x17x17xf32>
    %513 = tpu.concatenate %511, %512 in 0 : vector<1x4x17x17xf32>, vector<1x4x17x17xf32> -> vector<2x4x17x17xf32>
    %c0_169 = arith.constant 0 : index
    %c0_170 = arith.constant 0 : index
    %c0_171 = arith.constant 0 : index
    %c0_172 = arith.constant 0 : index
    %514 = vector.load %arg4[%c0_169, %c0_170, %c0_171, %c0_172] : memref<2x4x17x17xf32, #tpu.memory_space<vmem>>, vector<2x4x17x17xf32>
    tpu.vector_store %arg4[%c0_169, %c0_170, %c0_171, %c0_172], %513 {strides = array<i32>} : memref<2x4x17x17xf32, #tpu.memory_space<vmem>>, vector<2x4x17x17xf32>,
    %515 = vector.extract_strided_slice %510 {offsets = [0, 0], sizes = [1, 32], strides = [1, 1]} : vector<34x32xf32> to vector<1x32xf32>
    %516 = vector.extract_strided_slice %510 {offsets = [17, 0], sizes = [1, 32], strides = [1, 1]} : vector<34x32xf32> to vector<1x32xf32>
    %517 = tpu.concatenate %515, %516 in 0 : vector<1x32xf32>, vector<1x32xf32> -> vector<2x32xf32>
    %c17 = arith.constant 17 : index
    %c0_173 = arith.constant 0 : index
    %518 = vector.load %arg3[%c17, %c0_173] : memref<24x128xf32, #tpu.memory_space<vmem>>, vector<1x32xf32>
    %c18 = arith.constant 18 : index
    %c0_174 = arith.constant 0 : index
    %519 = vector.load %arg3[%c18, %c0_174] : memref<24x128xf32, #tpu.memory_space<vmem>>, vector<1x32xf32>
    %cst_175 = arith.constant dense<0.000000e+00> : vector<2xf32>
    %520 = vector.multi_reduction <add>, %517, %cst_175 [1] : vector<2x32xf32> to vector<2xf32>
    %521 = vector.shape_cast %520 : vector<2xf32> to vector<2x1xf32>
    %cst_176 = arith.constant 3.200000e+01 : f32
    %522 = vector.broadcast %cst_176 : f32 to vector<2x1xf32>
    %523 = arith.divf %521, %522 : vector<2x1xf32>
    %524 = vector.broadcast %523 : vector<2x1xf32> to vector<2x32xf32>
    %525 = arith.subf %517, %524 : vector<2x32xf32>
    %526 = arith.mulf %525, %525 : vector<2x32xf32>
    %cst_177 = arith.constant dense<0.000000e+00> : vector<2xf32>
    %527 = vector.multi_reduction <add>, %526, %cst_177 [1] : vector<2x32xf32> to vector<2xf32>
    %528 = vector.shape_cast %527 : vector<2xf32> to vector<2x1xf32>
    %cst_178 = arith.constant 3.200000e+01 : f32
    %529 = vector.broadcast %cst_178 : f32 to vector<2x1xf32>
    %530 = arith.divf %528, %529 : vector<2x1xf32>
    %531 = vector.broadcast %523 : vector<2x1xf32> to vector<2x32xf32>
    %532 = arith.subf %517, %531 : vector<2x32xf32>
    %cst_179 = arith.constant 9.99999997E-7 : f32
    %533 = vector.broadcast %cst_179 : f32 to vector<2x1xf32>
    %534 = arith.addf %530, %533 : vector<2x1xf32>
    %535 = math.rsqrt %534 : vector<2x1xf32>
    %536 = vector.broadcast %535 : vector<2x1xf32> to vector<2x32xf32>
    %537 = arith.mulf %532, %536 : vector<2x32xf32>
    %538 = vector.broadcast %518 : vector<1x32xf32> to vector<2x32xf32>
    %539 = arith.mulf %537, %538 : vector<2x32xf32>
    %540 = vector.broadcast %519 : vector<1x32xf32> to vector<2x32xf32>
    %541 = arith.addf %539, %540 : vector<2x32xf32>
    %c520 = arith.constant 520 : index
    %c0_180 = arith.constant 0 : index
    %542 = vector.load %arg2[%c520, %c0_180] : memref<552x128xf32, #tpu.memory_space<vmem>>, vector<32x8xf32>
    %cst_181 = arith.constant dense<0.000000e+00> : vector<2x8xf32>
    %543 = tpu.matmul %541, %542, %cst_181 {dimension_numbers = #tpu.dot_dimension_numbers<[1], [0], [0], [1], [0, 0, 1, 1], [], []>} : vector<2x32xf32>, vector<32x8xf32>, vector<2x8xf32> -> vector<2x8xf32>
    %c19 = arith.constant 19 : index
    %c0_182 = arith.constant 0 : index
    %544 = vector.load %arg3[%c19, %c0_182] : memref<24x128xf32, #tpu.memory_space<vmem>>, vector<1x8xf32>
    %545 = vector.broadcast %544 : vector<1x8xf32> to vector<2x8xf32>
    %546 = arith.addf %543, %545 : vector<2x8xf32>
    %c0_183 = arith.constant 0 : index
    %c0_184 = arith.constant 0 : index
    %c0_185 = arith.constant 0 : index
    %547 = vector.load %arg5[%c0_183, %c0_184, %c0_185] : memref<1x2x8xf32, #tpu.memory_space<vmem>>, vector<1x2x8xf32>
    %548 = vector.shape_cast %547 : vector<1x2x8xf32> to vector<2x8xf32>
    %549 = vector.shape_cast %546 : vector<2x8xf32> to vector<1x2x8xf32>
    tpu.vector_store %arg5[%c0_183, %c0_184, %c0_185], %549 {strides = array<i32>} : memref<1x2x8xf32, #tpu.memory_space<vmem>>, vector<1x2x8xf32>,
    return
  }
  func.func @transform_0(%arg0: i32) -> (i32, i32, i32) {
    %c0_i32 = arith.constant 0 : i32
    %c0_i32_0 = arith.constant 0 : i32
    %c0_i32_1 = arith.constant 0 : i32
    return %arg0, %c0_i32, %c0_i32_0 : i32, i32, i32
  }
  func.func @transform_1(%arg0: i32) -> (i32, i32) {
    %c0_i32 = arith.constant 0 : i32
    %c0_i32_0 = arith.constant 0 : i32
    %c0_i32_1 = arith.constant 0 : i32
    return %c0_i32, %c0_i32_0 : i32, i32
  }
  func.func @transform_2(%arg0: i32) -> (i32, i32) {
    %c0_i32 = arith.constant 0 : i32
    %c0_i32_0 = arith.constant 0 : i32
    %c0_i32_1 = arith.constant 0 : i32
    return %c0_i32, %c0_i32_0 : i32, i32
  }
  func.func @transform_3(%arg0: i32) -> (i32, i32, i32, i32) {
    %c0_i32 = arith.constant 0 : i32
    %c0_i32_0 = arith.constant 0 : i32
    %c0_i32_1 = arith.constant 0 : i32
    %c0_i32_2 = arith.constant 0 : i32
    return %arg0, %c0_i32, %c0_i32_0, %c0_i32_1 : i32, i32, i32, i32
  }
  func.func @transform_4(%arg0: i32) -> (i32, i32, i32) {
    %c0_i32 = arith.constant 0 : i32
    %c0_i32_0 = arith.constant 0 : i32
    %c0_i32_1 = arith.constant 0 : i32
    return %arg0, %c0_i32, %c0_i32_0 : i32, i32, i32
  }
}

</mosaic_0001>

<bundles_post_ra>
// kernel: model_forward.1
= control target key start
LH: loop header
LB: loop body
LE: loop exit
PB: predicated region body
PF: predicated region fallthrough
CT: control target
= control target key end

     0   :  { %s5423_s15 = smov 0   ;;  %s7638_s0 = inlined_call_operand.vmem [shape: f32[2,32,48], index: 0, kind: input, shape index: {}]   ;;  %s7639_s1 = inlined_call_operand.vmem [shape: f32[552,128], index: 1, kind: input, shape index: {}]   ;;  %s7640_s2 = inlined_call_operand.vmem [shape: f32[24,128], index: 2, kind: input, shape index: {}]   ;;  %s7641_s3 = inlined_call_operand.vmem [shape: f32[4,4,17,17], index: 3, kind: output, shape index: {0}]   ;;  %s7642_s4 = inlined_call_operand.vmem [shape: f32[2,2,8], index: 4, kind: output, shape index: {1}]  }
   0x1 LB: > { %s5429_s16 = sadd.s32 4294967295, %s5381_s15   ;;  %p4748_p0 = scmp.ge.s32.totalorder %s5381_s15, 1  ;;  %s5381_s15 = sphi %s5423_s15, %s15_s15  }
   0x2   : > { %p165_p1 = scmp.lt.s32.totalorder %s5381_s15, 3 }
   0x4   : > { %p166_p2 = pnand %p4748_p0, %p165_p1 }
   0x6   : > { %169 = sbr.rel (%p166_p2) target bundleno = 5481 (0x1569), region = 32 }
   0xb   : > { %v221_v0 = vld [vmem:[%s7639_s1 + $0x28] sm:$0xff]  ;;  %v220_v1 = vld [vmem:[%s7639_s1 + $0x20] sm:$0xff]  ;;  %p196_p3 = scmp.lt.s32.totalorder %s5429_s16, 1  ;;  %v219_v2 = vld [vmem:[%s7639_s1 + $0x18] sm:$0xff]  ;;  %vm224_vm0 = vcmask 392192   ;;  %vm272_vm1 = vcmask 1046528  }
   0xc   : > { %247 = vmatpush.msra.mxu0 %v221_v0  ;;  %v218_v3 = vld [vmem:[%s7639_s1 + $0x10] sm:$0xff]  ;;  %v217_v4 = vld [vmem:[%s7639_s1 + $0x8] sm:$0xff]  ;;  %v216_v5 = vld [vmem:[%s7639_s1] sm:$0xff]  ;;  %vm286_vm2 = vcmask 1040384   ;;  %vm7644_vm3 = vcmask 261120   ;;  %vm297_vm4 = vcmask 1041408  }
   0xd   : > { %s5444_s23 = scalar_select %p196_p3, %s5429_s16, 1  ;;  %v266_v10 = vld [vmem:[%s7639_s1 + $0x30] sm:$0xff]  ;;  %v267_v11 = vld [vmem:[%s7639_s1 + $0x38] sm:$0xff]  ;;  %v5079_v14 = vld [vmem:[%s7640_s2] ss:$0 sm:$0xff]  ;;  %v5383_v44 = vmov 32.0  }
   0xe   : > { %248 = vmatpush.msra.mxu0 %v220_v1  ;;  %v273_v12 = vrot.slane %v266_v10, 1  ;;  %v274_v13 = vrot.slane %v267_v11, 1  ;;  %v268_v18 = vld [vmem:[%s7639_s1 + $0x40] sm:$0x1]  ;;  %v293_v33 = vrot.slane %v266_v10, 7  ;;  %5099 = vrcp.f32 %v5383_v44  ;;  %s5384_s7 = smov 96  }
   0xf   : > { %s4971_s26 = sshll.u32 %s5444_s23, 5  ;;  %v276_v20 = vrot.slane %v268_v18, 1  ;;  %vm7643_vm15 = vcmask 254976   ;;  %s5385_s8 = smov 120  }
  0x10   : > { %249 = vmatpush.msra.mxu0 %v219_v2  ;;  %s200_s29 = scalar_lea.vmem %s7638_s0, %s4971_s26  ;;  %v275_v16 = vsel %vm272_vm1, %v273_v12, %v274_v13  ;;  %v443_v2 = vld [vmem:[%s7639_s1 + $0x60] sm:$0xff]  ;;  %s5386_s9 = smov 72  }
  0x11   : > { %v212_v6 = vld [vmem:[%s200_s29] sm:$0xff]  ;;  %v213_v7 = vld [vmem:[%s200_s29 + $0x8] sm:$0xff]  ;;  %v214_v8 = vld [vmem:[%s200_s29 + $0x10] sm:$0xff]  ;;  %v277_v24 = vsel %vm272_vm1, %v274_v13, %v276_v20  ;;  %473 = vmatpush.msra.mxu1 %v443_v2  ;;  %s5387_s10 = smov 104   ;;  %s5388_s11 = smov 88  }
  0x12   : > { %250 = vmatpush.msra.mxu0 %v218_v3  ;;  %v215_v9 = vld [vmem:[%s200_s29 + $0x18] sm:$0xff]  ;;  %s5389_s12 = smov 64   ;;  %s5390_s13 = smov 80  }
  0x13   : > { %v442_v3 = vld [vmem:[%s7639_s1 + $0x58] sm:$0xff]  ;;  %s5391_s14 = smov 112   ;;  %s5392_s17 = smov 56  }
  0x14   : > { %251 = vmatpush.msra.mxu0 %v217_v4  ;;  %v5100_v45 = vpop.eup %5099  ;;  %474 = vmatpush.msra.mxu1 %v442_v3  ;;  %v441_v4 = vld [vmem:[%s7639_s1 + $0x50] sm:$0xff]  ;;  %s5393_s18 = smov 48   ;;  %s5394_s19 = smov 40  }
  0x15   : > { %v327_v46 = vmul.f32 32.0, %v5100_v45  ;;  %vm331_vm5 = vweird.f32 %v5100_v45  ;;  %s5395_s20 = smov 16   ;;  %s5396_s21 = smov 8  }
  0x16   : > { %252 = vmatpush.msra.mxu0 %v216_v5  ;;  %475 = vmatpush.msra.mxu1 %v441_v4  ;;  %v440_v5 = vld [vmem:[%s7639_s1 + $0x48] sm:$0xff]  ;;  %s5397_s22 = smov 24  }
  0x17   : > { %4754 = vmatmul.msk.f32.vlgmr.msra.gmra.mxu0 %vm224_vm0, %v212_v6  ;;  %v328_v47 = vsub.f32 1.0, %v327_v46 }
  0x18   : > { %476 = vmatpush.msra.mxu1 %v440_v5 }
  0x19   : > { %v329_v48 = vmul.f32 %v5100_v45, %v328_v47 }
  0x1b   : > { %v330_v49 = vadd.f32 %v5100_v45, %v329_v48 }
  0x1d   : > { %v5493_v50 = vsel %vm331_vm5, %v5100_v45, %v330_v49  ;;  %vm551_vm5 = vcmask 131072  }
  0x1f   : > { %4755 = vmatmul.msk.f32.gmra.mxu0 %vm224_vm0, %v213_v7 }
  0x27   : > { %4756 = vmatmul.msk.f32.gmra.mxu0 %vm224_vm0, %v214_v8 }
  0x2f   : > { %4757 = vmatmul.msk.f32.gmra.mxu0 %vm224_vm0, %v215_v9  ;;  %vm502_vm0 = vcmask 64512  }
  0x94   : > { %v254_v15 = vpop.f32.mrf.mxu0 }
  0x95   : > { %v255_v17 = vadd.f32 %v5079_v14, %v254_v15 }
  0x97   : > { %v280_v19 = vadd.f32 %v275_v16, %v255_v17 }
  0x99   : > { %v287_v21 = vrot.slane %v280_v19, 7 }
  0x9b   : > { %v5473_v22 = vsel %vm286_vm2, %v266_v10, %v287_v21 }
  0x9c   : > { %v257_v23 = vpop.f32.mrf.mxu0  ;;  %v310_v25 = vsel %vm7644_vm3, %v5473_v22, 0.0 }
  0x9d   : > { %v258_v26 = vadd.f32 %v5079_v14, %v257_v23  ;;  %311 = vadd.xlane.f32.xlu0 %v310_v25 }
  0x9f   : > { %v281_v27 = vadd.f32 %v277_v24, %v258_v26 }
  0xa1   : > { %v288_v28 = vrot.slane %v281_v27, 7 }
  0xa3   : > { %v5479_v29 = vsel %vm286_vm2, %v287_v21, %v288_v28  ;;  %v305_v36 = vsel %vm286_vm2, %v288_v28, %v293_v33  ;;  %v5531_v28 = vld [vmem:[%s7640_s2 + $0x2] ss:$0 sm:$0xff] }
  0xa4   : > { %v260_v30 = vpop.f32.mrf.mxu0  ;;  %v313_v31 = vsel %vm7644_vm3, %v5479_v29, 0.0 }
  0xa5   : > { %v261_v32 = vadd.f32 %v5079_v14, %v260_v30  ;;  %314 = vadd.xlane.f32.xlu0 %v313_v31 }
  0xa7   : > { %v282_v34 = vadd.f32 %v275_v16, %v261_v32 }
  0xa9   : > { %v298_v35 = vrot.slane %v282_v34, 6 }
  0xab   : > { %v5484_v37 = vsel %vm297_vm4, %v305_v36, %v298_v35 }
  0xac   : > { %v263_v38 = vpop.f32.mrf.mxu0  ;;  %v316_v39 = vsel %vm7644_vm3, %v5484_v37, 0.0 }
  0xad   : > { %v264_v40 = vadd.f32 %v5079_v14, %v263_v38  ;;  %317 = vadd.xlane.f32.xlu1 %v316_v39 }
  0xaf   : > { %v283_v41 = vadd.f32 %v277_v24, %v264_v40  ;;  %v5526_v24 = vld [vmem:[%s7640_s2 + $0x1] ss:$0 sm:$0xff] }
  0xb1   : > { %v5488_v42 = vrot.slane %v283_v41, 6 }
  0xb3   : > { %v5491_v43 = vsel %vm297_vm4, %v298_v35, %v5488_v42  ;;  %vm544_vm4 = vcmask 138240  }
 0x110   : > { %v312_v51 = vpop.xlane.xlu0 %311 }
 0x111   : > { %v333_v52 = vmul.f32 %v5493_v50, %v312_v51 }
 0x113   : > { %v338_v53 = vsub.f32 %v5473_v22, %v333_v52 }
 0x115   : > { %v343_v54 = vmul.f32 %v338_v53, %v338_v53 }
 0x117   : > { %v348_v55 = vsel %vm7644_vm3, %v343_v54, 0.0 }
 0x118   : > { %349 = vadd.xlane.f32.xlu1 %v348_v55  ;;  %v315_v56 = vpop.xlane.xlu0 %314 }
 0x119   : > { %v334_v57 = vmul.f32 %v5493_v50, %v315_v56 }
 0x11b   : > { %v339_v58 = vsub.f32 %v5479_v29, %v334_v57 }
 0x11d   : > { %v344_v59 = vmul.f32 %v339_v58, %v339_v58 }
 0x11f   : > { %v351_v60 = vsel %vm7644_vm3, %v344_v59, 0.0 }
 0x120   : > { %v318_v61 = vpop.xlane.xlu1 %317  ;;  %352 = vadd.xlane.f32.xlu2 %v351_v60  ;;  %v323_v60 = vsel %vm7643_vm15, %v5488_v42, 0.0 }
 0x121   : > { %v335_v62 = vmul.f32 %v5493_v50, %v318_v61  ;;  %v319_v61 = vsel %vm7644_vm3, %v5491_v43, 0.0 }
 0x123   : > { %v5503_v63 = vsub.f32 %v5484_v37, %v335_v62 }
 0x125   : > { %v345_v0 = vmul.f32 %v5503_v63, %v5503_v63 }
 0x127   : > { %v354_v1 = vsel %vm7644_vm3, %v345_v0, 0.0 }
 0x128   : > { %355 = vadd.xlane.f32.xlu2 %v354_v1 }
 0x18b   : > { %v350_v6 = vpop.xlane.xlu1 %349 }
 0x18c   : > { %v363_v7 = vmul.f32 %v350_v6, %v5493_v50 }
 0x18e   : > { %v368_v8 = vadd.f32 1e-06, %v363_v7 }
 0x190   : > { %5101 = vrsqrt.f32 %v368_v8  ;;  %vm379_vm7 = vweird.f32 %v368_v8 }
 0x193   : > { %v353_v9 = vpop.xlane.xlu2 %352 }
 0x194   : > { %v364_v10 = vmul.f32 %v353_v9, %v5493_v50 }
 0x196   : > { %v5102_v11 = vpop.eup %5101  ;;  %v369_v12 = vadd.f32 1e-06, %v364_v10 }
 0x197   : > { %v374_v13 = vmul.f32 %v5102_v11, %v368_v8  ;;  %vm380_vm6 = vweird.f32 %v5102_v11 }
 0x198   : > { %5103 = vrsqrt.f32 %v369_v12  ;;  %vm381_vm8 = vmor %vm379_vm7, %vm380_vm6  ;;  %vm389_vm10 = vweird.f32 %v369_v12 }
 0x199   : > { %v375_v14 = vmul.f32 %v5102_v11, %v374_v13 }
 0x19b   : > { %v376_v15 = vmul.f32 0.5, %v375_v14  ;;  %v356_v16 = vpop.xlane.xlu2 %355 }
 0x19c   : > { %v365_v17 = vmul.f32 %v356_v16, %v5493_v50 }
 0x19d   : > { %v377_v18 = vsub.f32 1.5, %v376_v15 }
 0x19e   : > { %v5104_v19 = vpop.eup %5103  ;;  %v370_v20 = vadd.f32 1e-06, %v365_v17 }
 0x19f   : > { %v378_v21 = vmul.f32 %v5102_v11, %v377_v18  ;;  %v384_v23 = vmul.f32 %v5104_v19, %v369_v12  ;;  %vm390_vm9 = vweird.f32 %v5104_v19 }
 0x1a0   : > { %5105 = vrsqrt.f32 %v370_v20  ;;  %vm391_vm11 = vmor %vm389_vm10, %vm390_vm9  ;;  %vm399_vm13 = vweird.f32 %v370_v20 }
 0x1a1   : > { %v385_v25 = vmul.f32 %v5104_v19, %v384_v23  ;;  %v382_v26 = vsel %vm381_vm8, %v5102_v11, %v378_v21 }
 0x1a2   : > { %v423_v27 = vmul.f32 %v382_v26, %v338_v53  ;;  %v5546_v53 = vld [vmem:[%s7640_s2 + $0x3] ss:$0 sm:$0xff] }
 0x1a3   : > { %v386_v30 = vmul.f32 0.5, %v385_v25 }
 0x1a4   : > { %v429_v31 = vmul.f32 %v5526_v24, %v423_v27 }
 0x1a5   : > { %v387_v32 = vsub.f32 1.5, %v386_v30 }
 0x1a6   : > { %v5106_v33 = vpop.eup %5105  ;;  %v435_v34 = vadd.f32 %v5531_v28, %v429_v31 }
 0x1a7   : > { %v388_v35 = vmul.f32 %v5104_v19, %v387_v32  ;;  %v394_v36 = vmul.f32 %v5106_v33, %v370_v20  ;;  %vm400_vm12 = vweird.f32 %v5106_v33 }
 0x1a8   : > { %4758 = vmatmul.msk.f32.vlgmr.msra.gmra.mxu1 %vm7644_vm3, %v435_v34  ;;  %vm401_vm14 = vmor %vm399_vm13, %vm400_vm12 }
 0x1a9   : > { %v395_v38 = vmul.f32 %v5106_v33, %v394_v36  ;;  %v392_v39 = vsel %vm391_vm11, %v5104_v19, %v388_v35 }
 0x1aa   : > { %v424_v40 = vmul.f32 %v392_v39, %v339_v58 }
 0x1ab   : > { %v396_v41 = vmul.f32 0.5, %v395_v38 }
 0x1ac   : > { %v430_v44 = vmul.f32 %v5526_v24, %v424_v40 }
 0x1ad   : > { %v397_v45 = vsub.f32 1.5, %v396_v41 }
 0x1ae   : > { %v436_v46 = vadd.f32 %v5531_v28, %v430_v44 }
 0x1af   : > { %v398_v47 = vmul.f32 %v5106_v33, %v397_v45 }
 0x1b0   : > { %4759 = vmatmul.msk.f32.gmra.mxu1 %vm7644_vm3, %v436_v46 }
 0x1b1   : > { %v402_v48 = vsel %vm401_vm14, %v5106_v33, %v398_v47 }
 0x1b2   : > { %v425_v49 = vmul.f32 %v402_v48, %v5503_v63 }
 0x1b4   : > { %v431_v51 = vmul.f32 %v5526_v24, %v425_v49 }
 0x1b6   : > { %v437_v52 = vadd.f32 %v5531_v28, %v431_v51 }
 0x1b8   : > { %4760 = vmatmul.msk.f32.gmra.mxu1 %vm7644_vm3, %v437_v52 }
 0x225   : > { %v478_v54 = vpop.f32.mrf.mxu1 }
 0x226   : > { %v479_v55 = vadd.f32 %v5546_v53, %v478_v54 }
 0x228   : > { %496 = vrot.lane.b32.xlu2 %v479_v55, %s5384_s7 }
 0x22d   : > { %v481_v56 = vpop.f32.mrf.mxu1 }
 0x22e   : > { %v5551_v57 = vadd.f32 %v5546_v53, %v481_v56 }
 0x230   : > { %498 = vrot.lane.b32.xlu1 %v5551_v57, %s5384_s7  ;;  %v5603_v11 = vpack.i.bf16 %v479_v55, %v5551_v57 }
 0x235   : > { %v484_v58 = vpop.f32.mrf.mxu1 }
 0x236   : > { %v5556_v59 = vadd.f32 %v5546_v53, %v484_v58 }
 0x238   : > { %500 = vrot.lane.b32.xlu0 %v5556_v59, %s5384_s7 }
 0x251   : > { %324 = vadd.xlane.f32.xlu2 %v323_v60 }
 0x262   : > { %320 = vadd.xlane.f32.xlu0 %v319_v61 }
 0x269   : > { %665 = vrot.lane.b32.xlu2 %v5551_v57, %s5385_s8 }
 0x271   : > { %1011 = vrot.lane.b32.xlu2 %v5551_v57, %s5386_s9 }
 0x279   : > { %1003 = vrot.lane.b32.xlu2 %v479_v55, %s5387_s10 }
 0x281   : > { %1005 = vrot.lane.b32.xlu2 %v5551_v57, %s5387_s10 }
 0x282   : > { %v497_v0 = vpop.permute.xlu2 %496 }
 0x289   : > { %673 = vrot.lane.b32.xlu2 %v5556_v59, %s5388_s11 }
 0x2a2   : > { %v499_v63 = vpop.permute.xlu1 %498 }
 0x2aa   : > { %v501_v62 = vpop.permute.xlu0 %500 }
 0x2ab   : > { %4763 = vmatpush.xpose.msk.msra.mxu2 %vm502_vm0, %v501_v62  ;;  %4972 = vmatpush.xpose.msk.msra.mxu3 %vm502_vm0, %v501_v62 }
 0x2af   : > { %4764 = vmatpush.xpose.msk.msra.mxu2 %vm502_vm0, %v499_v63  ;;  %4973 = vmatpush.xpose.msk.msra.mxu3 %vm502_vm0, %v499_v63 }
 0x2b3   : > { %4765 = vmatpush.xpose.msk.msra.mxu2 %vm502_vm0, %v497_v0  ;;  %4974 = vmatpush.xpose.msk.msra.mxu3 %vm502_vm0, %v497_v0 }
 0x2b6   : > { %4766 = vmatmul.msk.f32.vlgmr.msra.gmra.mxu2 %vm502_vm0, %v479_v55  ;;  %4767 = vmatmul.msk.f32.vlgmr.msra.gmra.mxu3 %vm502_vm0, %v5551_v57 }
 0x2be   : > { %4768 = vmatmul.msk.f32.gmra.mxu3 %vm502_vm0, %v5556_v59 }
 0x2c4   : > { %v325_v1 = vpop.xlane.xlu2 %324 }
 0x2c5   : > { %v337_v2 = vmul.f32 %v5493_v50, %v325_v1 }
 0x2c7   : > { %v5586_v3 = vsub.f32 %v5488_v42, %v337_v2 }
 0x2c9   : > { %v347_v4 = vmul.f32 %v5586_v3, %v5586_v3 }
 0x2cb   : > { %v360_v5 = vsel %vm7643_vm15, %v347_v4, 0.0 }
 0x2cc   : > { %361 = vadd.xlane.f32.xlu0 %v360_v5  ;;  %v5632_v32 = vpop.permute.xlu2 %665 }
 0x2d4   : > { %v5634_v44 = vpop.permute.xlu2 %1011 }
 0x2d5   : > { %v321_v6 = vpop.xlane.xlu0 %320 }
 0x2d6   : > { %v336_v7 = vmul.f32 %v5493_v50, %v321_v6 }
 0x2d8   : > { %v5593_v8 = vsub.f32 %v5491_v43, %v336_v7 }
 0x2da   : > { %v346_v9 = vmul.f32 %v5593_v8, %v5593_v8 }
 0x2dc   : > { %v357_v10 = vsel %vm7644_vm3, %v346_v9, 0.0  ;;  %v5640_v58 = vpop.permute.xlu2 %1003 }
 0x2dd   : > { %358 = vadd.xlane.f32.xlu1 %v357_v10 }
 0x2e0   : > { %671 = vrot.lane.b32.xlu0 %v5551_v57, %s5388_s11 }
 0x2e4   : > { %v5649_v2 = vpop.permute.xlu2 %1005 }
 0x2e8   : > { %669 = vrot.lane.b32.xlu0 %v479_v55, %s5388_s11 }
 0x2ec   : > { %v674_v7 = vpop.permute.xlu2 %673 }
 0x2f0   : > { %1009 = vrot.lane.b32.xlu0 %v479_v55, %s5386_s9 }
 0x2f6   : > { %5000 = vrot.lane.b32.xlu1 %v5603_v11, %s5389_s12 }
 0x2f8   : > { %841 = vrot.lane.b32.xlu0 %v5551_v57, %s5390_s13 }
 0x2fe   : > { %663 = vrot.lane.b32.xlu1 %v479_v55, %s5385_s8 }
 0x300   : > { %833 = vrot.lane.b32.xlu0 %v479_v55, %s5391_s14 }
 0x306   : > { %839 = vrot.lane.b32.xlu1 %v479_v55, %s5390_s13 }
 0x308   : > { %622 = vrot.lane.b32.xlu0 %v5556_v59, %s5389_s12 }
 0x30e   : > { %667 = vrot.lane.b32.xlu1 %v5556_v59, %s5385_s8 }
 0x310   : > { %1013 = vrot.lane.b32.xlu0 %v5556_v59, %s5386_s9 }
 0x316   : > { %843 = vrot.lane.b32.xlu1 %v5556_v59, %s5390_s13 }
 0x339   : > { %v532_v12 = vpop.f32.mrf.mxu2  ;;  %v5620_v13 = vpop.f32.mrf.mxu3 }
 0x33a   : > { %v5622_v14 = vmul.f32 0.35355338, %v532_v12 }
 0x33c   : > { %v545_v15 = vsel %vm544_vm4, %v5622_v14, -inf }
 0x33d   : > { %546 = vmax.xlane.f32.xlu2 %v545_v15 }
 0x33f   : > { %v362_v16 = vpop.xlane.xlu0 %361 }
 0x340   : > { %v367_v19 = vmul.f32 %v362_v16, %v5493_v50 }
 0x341   : > { %v538_v17 = vpop.f32.mrf.mxu3 }
 0x342   : > { %v5626_v18 = vmul.f32 0.35355338, %v538_v17  ;;  %v372_v21 = vadd.f32 1e-06, %v367_v19 }
 0x344   : > { %v552_v20 = vsel %vm551_vm5, %v5626_v18, -inf  ;;  %5107 = vrsqrt.f32 %v372_v21  ;;  %vm419_vm10 = vweird.f32 %v372_v21 }
 0x345   : > { %553 = vmax.xlane.f32.xlu0 %v552_v20 }
 0x34a   : > { %v5108_v25 = vpop.eup %5107 }
 0x34b   : > { %v414_v31 = vmul.f32 %v5108_v25, %v372_v21  ;;  %vm420_vm7 = vweird.f32 %v5108_v25 }
 0x34c   : > { %vm421_vm11 = vmor %vm419_vm10, %vm420_vm7 }
 0x34d   : > { %v415_v33 = vmul.f32 %v5108_v25, %v414_v31 }
 0x34f   : > { %v416_v36 = vmul.f32 0.5, %v415_v33 }
 0x350   : > { %v359_v23 = vpop.xlane.xlu1 %358 }
 0x351   : > { %v366_v26 = vmul.f32 %v359_v23, %v5493_v50  ;;  %v417_v40 = vsub.f32 1.5, %v416_v36 }
 0x352   : > { %v672_v27 = vpop.permute.xlu0 %671 }
 0x353   : > { %v371_v30 = vadd.f32 1e-06, %v366_v26  ;;  %v418_v47 = vmul.f32 %v5108_v25, %v417_v40 }
 0x355   : > { %5109 = vrsqrt.f32 %v371_v30  ;;  %vm409_vm8 = vweird.f32 %v371_v30  ;;  %v422_v54 = vsel %vm421_vm11, %v5108_v25, %v418_v47 }
 0x356   : > { %v427_v61 = vmul.f32 %v422_v54, %v5586_v3 }
 0x358   : > { %v433_v62 = vmul.f32 %v5526_v24, %v427_v61 }
 0x35a   : > { %v670_v34 = vpop.permute.xlu0 %669  ;;  %v439_v1 = vadd.f32 %v5531_v28, %v433_v62 }
 0x35b   : > { %v5110_v35 = vpop.eup %5109 }
 0x35c   : > { %v404_v38 = vmul.f32 %v5110_v35, %v371_v30  ;;  %vm410_vm6 = vweird.f32 %v5110_v35 }
 0x35d   : > { %vm411_vm9 = vmor %vm409_vm8, %vm410_vm6 }
 0x35e   : > { %v405_v39 = vmul.f32 %v5110_v35, %v404_v38 }
 0x360   : > { %v406_v41 = vmul.f32 0.5, %v405_v39 }
 0x362   : > { %v407_v45 = vsub.f32 1.5, %v406_v41  ;;  %v5636_v46 = vpop.permute.xlu0 %1009 }
 0x364   : > { %v408_v48 = vmul.f32 %v5110_v35, %v407_v45 }
 0x366   : > { %v412_v49 = vsel %vm411_vm9, %v5110_v35, %v408_v48 }
 0x367   : > { %v426_v51 = vmul.f32 %v412_v49, %v5593_v8 }
 0x368   : > { %v5001_v52 = vpop.permute.xlu1 %5000 }
 0x369   : > { %v432_v55 = vmul.f32 %v5526_v24, %v426_v51  ;;  %v5002_v6 = vunpack.i.l.bf16 %v5001_v52  ;;  %v5003_v3 = vunpack.i.h.bf16 %v5001_v52 }
 0x36a   : > { %v842_v56 = vpop.permute.xlu0 %841 }
 0x36b   : > { %v438_v60 = vadd.f32 %v5531_v28, %v432_v55 }
 0x36d   : > { %4761 = vmatmul.msk.f32.gmra.mxu1 %vm7644_vm3, %v438_v60 }
 0x370   : > { %v5646_v63 = vpop.permute.xlu1 %663 }
 0x372   : > { %v834_v0 = vpop.permute.xlu0 %833 }
 0x375   : > { %4762 = vmatmul.msk.f32.gmra.mxu1 %vm7644_vm3, %v439_v1 }
 0x378   : > { %v840_v4 = vpop.permute.xlu1 %839 }
 0x37a   : > { %v623_v5 = vpop.permute.xlu0 %622 }
 0x37b   : > { %4769 = vmatpush.msk.msrb.mxu3 %vm286_vm2, %v623_v5 }
 0x37d   : > { %651 = vmatpush.msrb.mxu3 %v5002_v6 }
 0x37f   : > { %652 = vmatpush.msrb.mxu3 %v5003_v3 }
 0x380   : > { %v5653_v8 = vpop.permute.xlu1 %667 }
 0x381   : > { %4773 = vmatpush.xpose.msk.msra.mxu3 %vm502_vm0, %v674_v7 }
 0x382   : > { %v1014_v16 = vpop.permute.xlu0 %1013 }
 0x385   : > { %4774 = vmatpush.xpose.msk.msra.mxu3 %vm502_vm0, %v672_v27 }
 0x388   : > { %v844_v24 = vpop.permute.xlu1 %843 }
 0x389   : > { %4775 = vmatpush.xpose.msk.msra.mxu3 %vm502_vm0, %v670_v34  ;;  %4783 = vmatpush.xpose.msk.msrb.mxu0 %vm502_vm0, %v844_v24  ;;  %v542_v34 = vmul.f32 0.35355338, %v5620_v13 }
 0x38b   : > { %v548_v35 = vsel %vm544_vm4, %v542_v34, -inf }
 0x38d   : > { %4784 = vmatpush.xpose.msk.msrb.mxu0 %vm502_vm0, %v842_v56 }
 0x391   : > { %4785 = vmatpush.xpose.msk.msrb.mxu0 %vm502_vm0, %v840_v4 }
 0x394   : > { %4786 = vmatmul.msk.f32.vlgmr.msrb.gmra.mxu0 %vm502_vm0, %v834_v0 }
 0x3b0   : > { %v547_v28 = vpop.xlane.xlu2 %546 }
 0x3b1   : > { %v555_v9 = vsub.f32 %v5622_v14, %v547_v28 }
 0x3b3   : > { %v558_v10 = vmul.f32 1.442695, %v555_v9 }
 0x3b5   : > { %5111 = vpow2.f32 %v558_v10 }
 0x3b8   : > { %v554_v17 = vpop.xlane.xlu0 %553 }
 0x3b9   : > { %v557_v20 = vsub.f32 %v5626_v18, %v554_v17 }
 0x3bb   : > { %v5112_v12 = vpop.eup %5111  ;;  %v562_v21 = vmul.f32 1.442695, %v557_v20 }
 0x3bc   : > { %v564_v15 = vsel %vm544_vm4, %v5112_v12, 0.0 }
 0x3bd   : > { %565 = vadd.xlane.f32.xlu2 %v564_v15  ;;  %5113 = vpow2.f32 %v562_v21 }
 0x3c3   : > { %v5679_v18 = vpop.eup %5113 }
 0x3c4   : > { %v570_v31 = vsel %vm551_vm5, %v5679_v18, 0.0 }
 0x3d5   : > { %1007 = vrot.lane.b32.xlu2 %v5556_v59, %s5387_s10 }
 0x3ea   : > { %v487_v19 = vpop.f32.mrf.mxu1 }
 0x3eb   : > { %v488_v23 = vadd.f32 %v5546_v53, %v487_v19 }
 0x3ed   : > { %v1223_v26 = vrot.slane %v488_v23, 1 }
 0x3f2   : > { %v490_v25 = vpop.f32.mrf.mxu1 }
 0x3f3   : > { %v491_v14 = vadd.f32 %v5546_v53, %v490_v25  ;;  %v1222_v53 = vrot.slane %v5556_v59, 1 }
 0x3f5   : > { %v5669_v27 = vrot.slane %v491_v14, 1  ;;  %v5691_v33 = vsel %vm272_vm1, %v1222_v53, %v1223_v26 }
 0x3f7   : > { %1401 = vrot.lane.b32.xlu1 %v5669_v27, %s5388_s11  ;;  %v5675_v30 = vsel %vm272_vm1, %v1223_v26, %v5669_v27 }
 0x3f8   : > { %1399 = vrot.lane.b32.xlu0 %v5675_v30, %s5388_s11 }
 0x3fe   : > { %571 = vadd.xlane.f32.xlu2 %v570_v31 }
 0x400   : > { %1231 = vrot.lane.b32.xlu0 %v5669_v27, %s5384_s7 }
 0x408   : > { %1229 = vrot.lane.b32.xlu0 %v5675_v30, %s5384_s7 }
 0x410   : > { %1741 = vrot.lane.b32.xlu0 %v5669_v27, %s5386_s9 }
 0x416   : > { %1397 = vrot.lane.b32.xlu2 %v5691_v33, %s5388_s11 }
 0x418   : > { %1737 = vrot.lane.b32.xlu0 %v5691_v33, %s5386_s9 }
 0x41e   : > { %837 = vrot.lane.b32.xlu2 %v5556_v59, %s5391_s14 }
 0x420   : > { %1569 = vrot.lane.b32.xlu0 %v5675_v30, %s5390_s13 }
 0x421   : > { %549 = vmax.xlane.f32.xlu1 %v548_v35 }
 0x426   : > { %1393 = vrot.lane.b32.xlu2 %v5675_v30, %s5385_s8 }
 0x428   : > { %1733 = vrot.lane.b32.xlu0 %v5675_v30, %s5387_s10 }
 0x42e   : > { %1739 = vrot.lane.b32.xlu2 %v5675_v30, %s5386_s9 }
 0x430   : > { %1565 = vrot.lane.b32.xlu0 %v5669_v27, %s5391_s14  ;;  %v566_v13 = vpop.xlane.xlu2 %565 }
 0x431   : > { %5115 = vrcp.f32 %v566_v13  ;;  %v584_v40 = vand.u32 2147483648, %v566_v13  ;;  %v582_v45 = vand.u32 2147483647, %v566_v13  ;;  %vm578_vm13 = vweird.f32 %v566_v13 }
 0x433   : > { %v585_v48 = vor.u32 1.1754944e-38, %v584_v40  ;;  %vm583_vm6 = vcmp.eq.f32.partialorder %v582_v45, 8.507059e+37 }
 0x436   : > { %1731 = vrot.lane.b32.xlu2 %v5691_v33, %s5387_s10 }
 0x437   : > { %v5116_v36 = vpop.eup %5115 }
 0x438   : > { %v574_v38 = vmul.f32 %v5116_v36, %v566_v13  ;;  %vm579_vm12 = vweird.f32 %v5116_v36 }
 0x439   : > { %vm580_vm14 = vmor %vm578_vm13, %vm579_vm12 }
 0x43a   : > { %v575_v39 = vsub.f32 1.0, %v574_v38  ;;  %835 = vrot.lane.b32.xlu1 %v5551_v57, %s5391_s14  ;;  %v874_v57 = vpop.f32.mrf.mxu0 }
 0x43b   : > { %v5725_v54 = vmul.f32 0.35355338, %v874_v57 }
 0x43c   : > { %v576_v41 = vmul.f32 %v5116_v36, %v575_v39 }
 0x43d   : > { %v886_v56 = vsel %vm544_vm4, %v5725_v54, -inf }
 0x43e   : > { %1561 = vrot.lane.b32.xlu2 %v5691_v33, %s5391_s14  ;;  %v577_v47 = vadd.f32 %v5116_v36, %v576_v41 }
 0x440   : > { %v581_v49 = vsel %vm580_vm14, %v5116_v36, %v577_v47 }
 0x441   : > { %v586_v51 = vsel %vm583_vm6, %v585_v48, %v581_v49 }
 0x442   : > { %v587_v52 = vmul.f32 %v5112_v12, %v586_v51 }
 0x444   : > { %4770 = vmatmul.msk.f32.vlgmr.msrb.gmra.mxu3 %vm544_vm4, %v587_v52 }
 0x445   : > { %4793 = vmatpush.xpose.msk.msrb.mxu3 %vm502_vm0, %v1014_v16 }
 0x446   : > { %1563 = vrot.lane.b32.xlu2 %v5675_v30, %s5391_s14 }
 0x449   : > { %4794 = vmatpush.xpose.msk.msrb.mxu3 %vm502_vm0, %v5634_v44  ;;  %v5735_v44 = vpop.permute.xlu2 %1007 }
 0x44d   : > { %4795 = vmatpush.xpose.msk.msrb.mxu3 %vm502_vm0, %v5636_v46 }
 0x469   : > { %v5737_v46 = vpop.permute.xlu1 %1401 }
 0x46a   : > { %v5727_v55 = vpop.permute.xlu0 %1399 }
 0x46f   : > { %887 = vmax.xlane.f32.xlu2 %v886_v56 }
 0x471   : > { %v572_v62 = vpop.xlane.xlu2 %571 }
 0x472   : > { %v1232_v60 = vpop.permute.xlu0 %1231  ;;  %v614_v41 = vand.u32 2147483648, %v572_v62  ;;  %vm608_vm12 = vweird.f32 %v572_v62  ;;  %v612_v47 = vand.u32 2147483647, %v572_v62 }
 0x473   : > { %4803 = vmatpush.xpose.msk.msra.mxu0 %vm502_vm0, %v1232_v60 }
 0x474   : > { %v615_v49 = vor.u32 1.1754944e-38, %v614_v41  ;;  %vm613_vm14 = vcmp.eq.f32.partialorder %v612_v47, 8.507059e+37 }
 0x479   : > { %v5741_v5 = vpop.permute.xlu2 %1397 }
 0x47a   : > { %v1230_v61 = vpop.permute.xlu0 %1229 }
 0x47b   : > { %4804 = vmatpush.xpose.msk.msra.mxu0 %vm502_vm0, %v1230_v61 }
 0x481   : > { %v838_v7 = vpop.permute.xlu2 %837 }
 0x487   : > { %792 = vrot.lane.b32.xlu2 %v5556_v59, %s5392_s17 }
 0x489   : > { %v5745_v28 = vpop.permute.xlu2 %1393 }
 0x48f   : > { %1520 = vrot.lane.b32.xlu2 %v5669_v27, %s5392_s17 }
 0x491   : > { %v5750_v9 = vpop.permute.xlu2 %1739 }
 0x494   : > { %v550_v0 = vpop.xlane.xlu1 %549 }
 0x495   : > { %v556_v1 = vsub.f32 %v542_v34, %v550_v0 }
 0x497   : > { %v560_v4 = vmul.f32 1.442695, %v556_v1  ;;  %v1742_v1 = vpop.permute.xlu0 %1741 }
 0x499   : > { %5117 = vpow2.f32 %v560_v4  ;;  %v5754_v10 = vpop.permute.xlu2 %1731 }
 0x49a   : > { %5119 = vrcp.f32 %v572_v62 }
 0x49f   : > { %v5118_v6 = vpop.eup %5117 }
 0x4a0   : > { %v567_v3 = vsel %vm544_vm4, %v5118_v6, 0.0  ;;  %v5120_v20 = vpop.eup %5119 }
 0x4a1   : > { %568 = vadd.xlane.f32.xlu1 %v567_v3  ;;  %v5758_v12 = vpop.permute.xlu2 %1561  ;;  %v604_v21 = vmul.f32 %v5120_v20, %v572_v62  ;;  %vm609_vm11 = vweird.f32 %v5120_v20  ;;  %v1738_v3 = vpop.permute.xlu0 %1737 }
 0x4a2   : > { %vm610_vm13 = vmor %vm608_vm12, %vm609_vm11 }
 0x4a3   : > { %v605_v25 = vsub.f32 1.0, %v604_v21 }
 0x4a5   : > { %v606_v35 = vmul.f32 %v5120_v20, %v605_v25 }
 0x4a7   : > { %v607_v39 = vadd.f32 %v5120_v20, %v606_v35 }
 0x4a9   : > { %v5762_v15 = vpop.permute.xlu2 %1563  ;;  %v611_v48 = vsel %vm610_vm13, %v5120_v20, %v607_v39 }
 0x4aa   : > { %v616_v57 = vsel %vm613_vm14, %v615_v49, %v611_v48 }
 0x4ab   : > { %v617_v61 = vmul.f32 %v5679_v18, %v616_v57 }
 0x4ac   : > { %v836_v24 = vpop.permute.xlu1 %835 }
 0x4ad   : > { %4787 = vmatmul.msk.f32.gmra.mxu0 %vm502_vm0, %v836_v24 }
 0x4b5   : > { %4788 = vmatmul.msk.f32.gmra.mxu0 %vm502_vm0, %v838_v7 }
 0x4ba   : > { %1391 = vrot.lane.b32.xlu1 %v5691_v33, %s5385_s8 }
 0x4c2   : > { %1227 = vrot.lane.b32.xlu1 %v5691_v33, %s5384_s7 }
 0x4ca   : > { %1395 = vrot.lane.b32.xlu1 %v5669_v27, %s5385_s8 }
 0x4d2   : > { %1571 = vrot.lane.b32.xlu1 %v5669_v27, %s5390_s13 }
 0x4da   : > { %1567 = vrot.lane.b32.xlu1 %v5691_v33, %s5390_s13 }
 0x4e2   : > { %1735 = vrot.lane.b32.xlu1 %v5669_v27, %s5387_s10  ;;  %v5768_v16 = vpop.xlane.xlu2 %887 }
 0x4ea   : > { %v793_v17 = vpop.permute.xlu2 %792 }
 0x4eb   : > { %4779 = vmatpush.msk.msrb.mxu2 %vm286_vm2, %v793_v17 }
 0x514   : > { %v569_v19 = vpop.xlane.xlu1 %568 }
 0x515   : > { %5121 = vrcp.f32 %v569_v19  ;;  %v599_v31 = vand.u32 2147483648, %v569_v19  ;;  %v597_v34 = vand.u32 2147483647, %v569_v19  ;;  %vm593_vm8 = vweird.f32 %v569_v19 }
 0x517   : > { %v600_v36 = vor.u32 1.1754944e-38, %v599_v31  ;;  %vm598_vm10 = vcmp.eq.f32.partialorder %v597_v34, 8.507059e+37 }
 0x51b   : > { %v5122_v23 = vpop.eup %5121 }
 0x51c   : > { %v589_v14 = vmul.f32 %v5122_v23, %v569_v19  ;;  %vm594_vm7 = vweird.f32 %v5122_v23 }
 0x51d   : > { %vm595_vm9 = vmor %vm593_vm8, %vm594_vm7 }
 0x51e   : > { %v590_v26 = vsub.f32 1.0, %v589_v14 }
 0x520   : > { %v591_v53 = vmul.f32 %v5122_v23, %v590_v26 }
 0x522   : > { %v592_v13 = vadd.f32 %v5122_v23, %v591_v53 }
 0x524   : > { %v596_v38 = vsel %vm595_vm9, %v5122_v23, %v592_v13 }
 0x525   : > { %v601_v40 = vsel %vm598_vm10, %v600_v36, %v596_v38 }
 0x526   : > { %v602_v45 = vmul.f32 %v5118_v6, %v601_v40 }
 0x528   : > { %4771 = vmatmul.msk.f32.gmra.mxu3 %vm544_vm4, %v602_v45 }
 0x52a   : > { %v877_v51 = vpop.f32.mrf.mxu0 }
 0x52b   : > { %v5772_v52 = vmul.f32 0.35355338, %v877_v51 }
 0x52c   : > { %v1392_v56 = vpop.permute.xlu1 %1391 }
 0x52d   : > { %v889_v60 = vsel %vm544_vm4, %v5772_v52, -inf }
 0x52e   : > { %890 = vmax.xlane.f32.xlu1 %v889_v60 }
 0x530   : > { %4772 = vmatmul.msk.f32.gmra.mxu3 %vm544_vm4, %v617_v61 }
 0x532   : > { %v880_v62 = vpop.f32.mrf.mxu0 }
 0x533   : > { %v885_v0 = vmul.f32 0.35355338, %v880_v62 }
 0x534   : > { %v1228_v4 = vpop.permute.xlu1 %1227 }
 0x535   : > { %4805 = vmatpush.xpose.msk.msra.mxu0 %vm502_vm0, %v1228_v4  ;;  %v892_v6 = vsel %vm551_vm5, %v885_v0, -inf }
 0x536   : > { %893 = vmax.xlane.f32.xlu0 %v892_v6 }
 0x538   : > { %4776 = vmatmul.msk.f32.vlgmr.msra.gmra.mxu3 %vm502_vm0, %v5646_v63  ;;  %4806 = vmatmul.msk.f32.vlgmr.msra.gmra.mxu0 %vm502_vm0, %v5691_v33 }
 0x539   : > { %4813 = vmatpush.xpose.msk.msra.mxu3 %vm502_vm0, %v5737_v46  ;;  %v1570_v46 = vpop.permute.xlu0 %1569 }
 0x53c   : > { %v1396_v18 = vpop.permute.xlu1 %1395 }
 0x53d   : > { %4814 = vmatpush.xpose.msk.msra.mxu3 %vm502_vm0, %v5727_v55 }
 0x540   : > { %4777 = vmatmul.msk.f32.gmra.mxu3 %vm502_vm0, %v5632_v32  ;;  %4807 = vmatmul.msk.f32.gmra.mxu0 %vm502_vm0, %v5675_v30 }
 0x541   : > { %4815 = vmatpush.xpose.msk.msra.mxu3 %vm502_vm0, %v5741_v5  ;;  %v1734_v55 = vpop.permute.xlu0 %1733 }
 0x544   : > { %v1572_v63 = vpop.permute.xlu1 %1571 }
 0x545   : > { %4823 = vmatpush.xpose.msk.msrb.mxu0 %vm502_vm0, %v1572_v63 }
 0x547   : > { %5005 = vrot.lane.b32.xlu1 %v5603_v11, %s5392_s17 }
 0x548   : > { %4778 = vmatmul.msk.f32.gmra.mxu3 %vm502_vm0, %v5653_v8  ;;  %4808 = vmatmul.msk.f32.gmra.mxu0 %vm502_vm0, %v5669_v27 }
 0x549   : > { %4824 = vmatpush.xpose.msk.msrb.mxu0 %vm502_vm0, %v1570_v46  ;;  %v1566_v8 = vpop.permute.xlu0 %1565 }
 0x54c   : > { %v1568_v32 = vpop.permute.xlu1 %1567 }
 0x54d   : > { %4825 = vmatpush.xpose.msk.msrb.mxu0 %vm502_vm0, %v1568_v32 }
 0x550   : > { %4796 = vmatmul.msk.f32.vlgmr.msrb.gmra.mxu3 %vm502_vm0, %v5640_v58  ;;  %4826 = vmatmul.msk.f32.vlgmr.msrb.gmra.mxu0 %vm502_vm0, %v5758_v12  ;;  %v895_v58 = vsub.f32 %v5725_v54, %v5768_v16 }
 0x551   : > { %4833 = vmatpush.xpose.msk.msrb.mxu3 %vm502_vm0, %v1742_v1 }
 0x552   : > { %v898_v5 = vmul.f32 1.442695, %v895_v58 }
 0x554   : > { %5123 = vpow2.f32 %v898_v5  ;;  %v1736_v54 = vpop.permute.xlu1 %1735 }
 0x555   : > { %4834 = vmatpush.xpose.msk.msrb.mxu3 %vm502_vm0, %v5750_v9 }
 0x558   : > { %4797 = vmatmul.msk.f32.gmra.mxu3 %vm502_vm0, %v5649_v2  ;;  %4827 = vmatmul.msk.f32.gmra.mxu0 %vm502_vm0, %v5762_v15 }
 0x559   : > { %4835 = vmatpush.xpose.msk.msrb.mxu3 %vm502_vm0, %v1738_v3 }
 0x55a   : > { %v5821_v7 = vpop.eup %5123 }
 0x55b   : > { %v904_v2 = vsel %vm544_vm4, %v5821_v7, 0.0 }
 0x560   : > { %4798 = vmatmul.msk.f32.gmra.mxu3 %vm502_vm0, %v5735_v44  ;;  %4828 = vmatmul.msk.f32.gmra.mxu0 %vm502_vm0, %v1566_v8  ;;  %v5834_v44 = vpop.f32.mrf.mxu3 }
 0x568   : > { %4816 = vmatmul.msk.f32.vlgmr.msra.gmra.mxu3 %vm502_vm0, %v1392_v56 }
 0x570   : > { %4817 = vmatmul.msk.f32.gmra.mxu3 %vm502_vm0, %v5745_v28 }
 0x571   : > { %905 = vadd.xlane.f32.xlu1 %v904_v2 }
 0x578   : > { %4818 = vmatmul.msk.f32.gmra.mxu3 %vm502_vm0, %v1396_v18 }
 0x580   : > { %4836 = vmatmul.msk.f32.vlgmr.msrb.gmra.mxu3 %vm502_vm0, %v5754_v10 }
 0x588   : > { %4837 = vmatmul.msk.f32.gmra.mxu3 %vm502_vm0, %v1734_v55 }
 0x58a   : > { %962 = vrot.lane.b32.xlu1 %v5556_v59, %s5393_s18 }
 0x590   : > { %4838 = vmatmul.msk.f32.gmra.mxu3 %vm502_vm0, %v1736_v54 }
 0x5a1   : > { %v891_v15 = vpop.xlane.xlu1 %890 }
 0x5a2   : > { %v896_v40 = vsub.f32 %v5772_v52, %v891_v15 }
 0x5a4   : > { %v900_v45 = vmul.f32 1.442695, %v896_v40 }
 0x5a9   : > { %v894_v24 = vpop.xlane.xlu0 %893 }
 0x5aa   : > { %v897_v28 = vsub.f32 %v885_v0, %v894_v24 }
 0x5ab   : > { %v5836_v9 = vpop.f32.mrf.mxu3 }
 0x5ac   : > { %v902_v12 = vmul.f32 1.442695, %v897_v28 }
 0x5ae   : > { %5125 = vpow2.f32 %v902_v12 }
 0x5af   : > { %5127 = vpow2.f32 %v900_v45 }
 0x5b3   : > { %v5838_v16 = vpop.f32.mrf.mxu3 }
 0x5b4   : > { %v5840_v10 = vpop.eup %5125 }
 0x5b5   : > { %v1262_v17 = vpop.f32.mrf.mxu0  ;;  %v910_v19 = vsel %vm551_vm5, %v5840_v10, 0.0  ;;  %v5866_v60 = vpop.eup %5127 }
 0x5b6   : > { %v5844_v20 = vmul.f32 0.35355338, %v1262_v17  ;;  %911 = vadd.xlane.f32.xlu2 %v910_v19  ;;  %v907_v61 = vsel %vm544_vm4, %v5866_v60, 0.0 }
 0x5b8   : > { %v1274_v21 = vsel %vm544_vm4, %v5844_v20, -inf }
 0x5b9   : > { %v5006_v23 = vpop.permute.xlu1 %5005  ;;  %1275 = vmax.xlane.f32.xlu0 %v1274_v21 }
 0x5ba   : > { %v5007_v25 = vunpack.i.l.bf16 %v5006_v23  ;;  %v5008_v31 = vunpack.i.h.bf16 %v5006_v23 }
 0x5bb   : > { %v704_v14 = vpop.f32.mrf.mxu3 }
 0x5bc   : > { %v5848_v26 = vmul.f32 0.35355338, %v704_v14  ;;  %821 = vmatpush.msrb.mxu2 %v5007_v25 }
 0x5bd   : > { %v1265_v53 = vpop.f32.mrf.mxu0 }
 0x5be   : > { %v1272_v34 = vmul.f32 0.35355338, %v1265_v53  ;;  %822 = vmatpush.msrb.mxu2 %v5008_v31  ;;  %v716_v35 = vsel %vm544_vm4, %v5848_v26, -inf }
 0x5bf   : > { %717 = vmax.xlane.f32.xlu1 %v716_v35 }
 0x5c0   : > { %v1277_v13 = vsel %vm544_vm4, %v1272_v34, -inf }
 0x5c1   : > { %1278 = vmax.xlane.f32.xlu0 %v1277_v13 }
 0x5c3   : > { %v5853_v36 = vpop.f32.mrf.mxu3 }
 0x5c5   : > { %v1268_v38 = vpop.f32.mrf.mxu0 }
 0x5c6   : > { %v5855_v39 = vmul.f32 0.35355338, %v1268_v38  ;;  %v5921_v38 = vmul.f32 0.35355338, %v5853_v36 }
 0x5c8   : > { %v1280_v41 = vsel %vm551_vm5, %v5855_v39, -inf }
 0x5c9   : > { %1281 = vmax.xlane.f32.xlu0 %v1280_v41 }
 0x5cb   : > { %v710_v47 = vpop.f32.mrf.mxu3 }
 0x5cc   : > { %v5906_v25 = vmul.f32 0.35355338, %v710_v47 }
 0x5cd   : > { %v1602_v48 = vpop.f32.mrf.mxu0 }
 0x5ce   : > { %v5860_v49 = vmul.f32 0.35355338, %v1602_v48  ;;  %v722_v53 = vsel %vm551_vm5, %v5906_v25, -inf  ;;  %v719_v48 = vsel %vm544_vm4, %v5921_v38, -inf }
 0x5d0   : > { %v1614_v51 = vsel %vm544_vm4, %v5860_v49, -inf }
 0x5d1   : > { %1615 = vmax.xlane.f32.xlu0 %v1614_v51 }
 0x5d3   : > { %v1044_v57 = vpop.f32.mrf.mxu3 }
 0x5d4   : > { %v5864_v56 = vmul.f32 0.35355338, %v1044_v57 }
 0x5d5   : > { %v1605_v58 = vpop.f32.mrf.mxu0 }
 0x5d6   : > { %v1056_v52 = vsel %vm544_vm4, %v5864_v56, -inf  ;;  %v5895_v5 = vmul.f32 0.35355338, %v1605_v58 }
 0x5d7   : > { %1057 = vmax.xlane.f32.xlu1 %v1056_v52 }
 0x5d8   : > { %v1617_v2 = vsel %vm544_vm4, %v5895_v5, -inf }
 0x5d9   : > { %908 = vadd.xlane.f32.xlu0 %v907_v61 }
 0x5db   : > { %v1047_v62 = vpop.f32.mrf.mxu3 }
 0x5dc   : > { %v5923_v40 = vmul.f32 0.35355338, %v1047_v62 }
 0x5dd   : > { %v1608_v36 = vpop.f32.mrf.mxu0 }
 0x5de   : > { %v1059_v51 = vsel %vm544_vm4, %v5923_v40, -inf  ;;  %v5936_v62 = vmul.f32 0.35355338, %v1608_v36 }
 0x5e3   : > { %v1050_v0 = vpop.f32.mrf.mxu3 }
 0x5e4   : > { %v5878_v3 = vpop.xlane.xlu1 %905  ;;  %v5934_v61 = vmul.f32 0.35355338, %v1050_v0 }
 0x5e5   : > { %vm918_vm7 = vweird.f32 %v5878_v3 }
 0x5eb   : > { %v1432_v1 = vpop.f32.mrf.mxu3 }
 0x5ec   : > { %v5872_v4 = vmul.f32 0.35355338, %v1432_v1 }
 0x5ed   : > { %1132 = vrot.lane.b32.xlu0 %v5556_v59, %s5394_s19 }
 0x5ee   : > { %v1444_v6 = vsel %vm544_vm4, %v5872_v4, -inf }
 0x5ef   : > { %1445 = vmax.xlane.f32.xlu1 %v1444_v6  ;;  %v1620_v6 = vsel %vm551_vm5, %v5936_v62, -inf }
 0x5f3   : > { %v1435_v18 = vpop.f32.mrf.mxu3 }
 0x5f4   : > { %v5880_v63 = vmul.f32 0.35355338, %v1435_v18 }
 0x5f5   : > { %5010 = vrot.lane.b32.xlu0 %v5603_v11, %s5394_s19 }
 0x5f6   : > { %v1447_v46 = vsel %vm544_vm4, %v5880_v63, -inf }
 0x5f7   : > { %1448 = vmax.xlane.f32.xlu1 %v1447_v46 }
 0x5fb   : > { %v1438_v32 = vpop.f32.mrf.mxu3 }
 0x5fc   : > { %v5886_v55 = vmul.f32 0.35355338, %v1438_v32  ;;  %v963_v59 = vpop.permute.xlu1 %962  ;;  %v5949_v32 = vpop.permute.xlu2 %1520 }
 0x5fd   : > { %5015 = vrot.lane.b32.xlu0 %v5603_v11, %s5393_s18  ;;  %4789 = vmatpush.msk.msrb.mxu1 %vm286_vm2, %v963_v59 }
 0x5fe   : > { %v1450_v8 = vsel %vm551_vm5, %v5886_v55, -inf }
 0x5ff   : > { %1451 = vmax.xlane.f32.xlu1 %v1450_v8  ;;  %v5953_v8 = vpack.i.bf16 %v5691_v33, %v5675_v30 }
 0x603   : > { %v5900_v11 = vpop.f32.mrf.mxu3 }
 0x60b   : > { %v1775_v21 = vpop.f32.mrf.mxu3 }
 0x60c   : > { %v5908_v14 = vmul.f32 0.35355338, %v1775_v21 }
 0x613   : > { %v1778_v35 = vpop.f32.mrf.mxu3 }
 0x614   : > { %v5925_v45 = vmul.f32 0.35355338, %v1778_v35  ;;  %v922_v35 = vand.u32 2147483647, %v5878_v3 }
 0x616   : > { %v1790_v57 = vsel %vm551_vm5, %v5925_v45, -inf  ;;  %vm923_vm9 = vcmp.eq.f32.partialorder %v922_v35, 8.507059e+37  ;;  %v5975_v35 = vmul.f32 0.35355338, %v5900_v11 }
 0x618   : > { %1350 = vrot.lane.b32.xlu1 %v5669_v27, %s5389_s12 }
 0x627   : > { %1618 = vmax.xlane.f32.xlu0 %v1617_v2 }
 0x62c   : > { %v1276_v54 = vpop.xlane.xlu0 %1275 }
 0x62d   : > { %v1283_v24 = vsub.f32 %v5844_v20, %v1276_v54 }
 0x62f   : > { %v1286_v28 = vmul.f32 1.442695, %v1283_v24  ;;  %v912_v24 = vpop.xlane.xlu2 %911 }
 0x631   : > { %5129 = vpow2.f32 %v1286_v28 }
 0x632   : > { %v718_v41 = vpop.xlane.xlu1 %717 }
 0x633   : > { %v725_v47 = vsub.f32 %v5848_v26, %v718_v41  ;;  %v1062_v26 = vsel %vm551_vm5, %v5934_v61, -inf }
 0x634   : > { %v1279_v12 = vpop.xlane.xlu0 %1278 }
 0x635   : > { %v1284_v15 = vsub.f32 %v1272_v34, %v1279_v12  ;;  %v1787_v34 = vsel %vm544_vm4, %v5908_v14, -inf  ;;  %v728_v52 = vmul.f32 1.442695, %v725_v47 }
 0x637   : > { %v5902_v17 = vpop.eup %5129  ;;  %v1288_v19 = vmul.f32 1.442695, %v1284_v15 }
 0x638   : > { %v1292_v23 = vsel %vm544_vm4, %v5902_v17, 0.0 }
 0x639   : > { %5131 = vpow2.f32 %v1288_v19  ;;  %1293 = vadd.xlane.f32.xlu0 %v1292_v23 }
 0x63a   : > { %5133 = vpow2.f32 %v728_v52 }
 0x63b   : > { %5135 = vrcp.f32 %v5878_v3 }
 0x63c   : > { %v5918_v13 = vpop.xlane.xlu0 %1281 }
 0x63f   : > { %v5910_v20 = vpop.eup %5131 }
 0x640   : > { %v1295_v31 = vsel %vm544_vm4, %v5910_v20, 0.0  ;;  %v5945_v18 = vpop.eup %5133 }
 0x641   : > { %1296 = vadd.xlane.f32.xlu2 %v1295_v31  ;;  %723 = vmax.xlane.f32.xlu0 %v722_v53  ;;  %v734_v0 = vsel %vm544_vm4, %v5945_v18, 0.0  ;;  %v5136_v59 = vpop.eup %5135  ;;  %v924_v53 = vand.u32 2147483648, %v5878_v3 }
 0x642   : > { %1788 = vmax.xlane.f32.xlu1 %v1787_v34  ;;  %v914_v58 = vmul.f32 %v5136_v59, %v5878_v3  ;;  %vm919_vm6 = vweird.f32 %v5136_v59 }
 0x643   : > { %vm920_vm8 = vmor %vm918_vm7, %vm919_vm6  ;;  %vm948_vm6 = vweird.f32 %v912_v24 }
 0x644   : > { %v5938_v1 = vpop.xlane.xlu0 %1615  ;;  %v915_v54 = vsub.f32 1.0, %v914_v58 }
 0x646   : > { %v916_v12 = vmul.f32 %v5136_v59, %v915_v54 }
 0x648   : > { %v917_v23 = vadd.f32 %v5136_v59, %v916_v12 }
 0x649   : > { %720 = vmax.xlane.f32.xlu2 %v719_v48  ;;  %1060 = vmax.xlane.f32.xlu0 %v1059_v51  ;;  %v925_v51 = vor.u32 1.1754944e-38, %v924_v53 }
 0x64a   : > { %1791 = vmax.xlane.f32.xlu1 %v1790_v57  ;;  %v5959_v19 = vpop.xlane.xlu1 %1057  ;;  %v921_v47 = vsel %vm920_vm8, %v5136_v59, %v917_v23  ;;  %v954_v23 = vand.u32 2147483648, %v912_v24 }
 0x64c   : > { %v909_v46 = vpop.xlane.xlu0 %908 }
 0x64d   : > { %5137 = vrcp.f32 %v909_v46  ;;  %vm933_vm11 = vweird.f32 %v909_v46  ;;  %v937_v54 = vand.u32 2147483647, %v909_v46 }
 0x64e   : > { %5139 = vrcp.f32 %v912_v24 }
 0x64f   : > { %vm938_vm13 = vcmp.eq.f32.partialorder %v937_v54, 8.507059e+37 }
 0x651   : > { %1063 = vmax.xlane.f32.xlu2 %v1062_v26  ;;  %v926_v26 = vsel %vm923_vm9, %v925_v51, %v921_v47 }
 0x652   : > { %1621 = vmax.xlane.f32.xlu1 %v1620_v6  ;;  %v927_v3 = vmul.f32 %v5821_v7, %v926_v26  ;;  %v952_v7 = vand.u32 2147483647, %v912_v24 }
 0x653   : > { %v5138_v28 = vpop.eup %5137 }
 0x654   : > { %v929_v15 = vmul.f32 %v5138_v28, %v909_v46  ;;  %v5140_v31 = vpop.eup %5139  ;;  %vm934_vm10 = vweird.f32 %v5138_v28  ;;  %vm953_vm8 = vcmp.eq.f32.partialorder %v952_v7, 8.507059e+37 }
 0x655   : > { %v944_v41 = vmul.f32 %v5140_v31, %v912_v24  ;;  %vm935_vm12 = vmor %vm933_vm11, %vm934_vm10  ;;  %vm949_vm14 = vweird.f32 %v5140_v31 }
 0x656   : > { %v930_v33 = vsub.f32 1.0, %v929_v15  ;;  %vm950_vm7 = vmor %vm948_vm6, %vm949_vm14 }
 0x657   : > { %v945_v6 = vsub.f32 1.0, %v944_v41 }
 0x658   : > { %v931_v48 = vmul.f32 %v5138_v28, %v930_v33 }
 0x659   : > { %735 = vadd.xlane.f32.xlu2 %v734_v0  ;;  %v946_v12 = vmul.f32 %v5140_v31, %v945_v6 }
 0x65a   : > { %v932_v0 = vadd.f32 %v5138_v28, %v931_v48 }
 0x65b   : > { %v947_v33 = vadd.f32 %v5140_v31, %v946_v12 }
 0x65c   : > { %v936_v59 = vsel %vm935_vm12, %v5138_v28, %v932_v0  ;;  %v1285_v0 = vsub.f32 %v5855_v39, %v5918_v13 }
 0x65d   : > { %5020 = vrot.lane.b32.xlu0 %v5953_v8, %s5392_s17 }
 0x65f   : > { %v1133_v2 = vpop.permute.xlu0 %1132 }
 0x660   : > { %4799 = vmatpush.msk.msra.mxu2 %vm286_vm2, %v1133_v2  ;;  %v939_v2 = vand.u32 2147483648, %v909_v46  ;;  %v951_v46 = vsel %vm950_vm7, %v5140_v31, %v947_v33 }
 0x662   : > { %v5966_v57 = vpop.xlane.xlu1 %1445  ;;  %v940_v15 = vor.u32 1.1754944e-38, %v939_v2 }
 0x667   : > { %v5011_v21 = vpop.permute.xlu0 %5010 }
 0x668   : > { %v5012_v30 = vunpack.i.l.bf16 %v5011_v21  ;;  %v5013_v34 = vunpack.i.h.bf16 %v5011_v21 }
 0x66a   : > { %1161 = vmatpush.msra.mxu2 %v5012_v30  ;;  %v5970_v21 = vpop.xlane.xlu1 %1448  ;;  %v941_v30 = vsel %vm938_vm13, %v940_v15, %v936_v59 }
 0x66b   : > { %5030 = vrot.lane.b32.xlu1 %v5953_v8, %s5394_s19  ;;  %v942_v53 = vmul.f32 %v5866_v60, %v941_v30  ;;  %v1784_v60 = vsel %vm544_vm4, %v5975_v35, -inf  ;;  %v1065_v30 = vsub.f32 %v5864_v56, %v5959_v19 }
 0x66c   : > { %1162 = vmatpush.msra.mxu2 %v5013_v34  ;;  %v955_v34 = vor.u32 1.1754944e-38, %v954_v23 }
 0x66d   : > { %v1068_v13 = vmul.f32 1.442695, %v1065_v30 }
 0x66e   : > { %v956_v28 = vsel %vm953_vm8, %v955_v34, %v951_v46 }
 0x66f   : > { %v5016_v36 = vpop.permute.xlu0 %5015  ;;  %v957_v47 = vmul.f32 %v5840_v10, %v956_v28 }
 0x670   : > { %v5017_v52 = vunpack.i.l.bf16 %v5016_v36  ;;  %v5018_v58 = vunpack.i.h.bf16 %v5016_v36 }
 0x672   : > { %991 = vmatpush.msrb.mxu1 %v5017_v52  ;;  %v5977_v41 = vpop.xlane.xlu1 %1451 }
 0x674   : > { %992 = vmatpush.msrb.mxu1 %v5018_v58 }
 0x675   : > { %4790 = vmatmul.msk.f32.vlgmr.msrb.gmra.mxu1 %vm544_vm4, %v927_v3 }
 0x67d   : > { %4791 = vmatmul.msk.f32.gmra.mxu1 %vm544_vm4, %v942_v53 }
 0x685   : > { %4792 = vmatmul.msk.f32.gmra.mxu1 %vm544_vm4, %v957_v47 }
 0x687   : > { %1785 = vmax.xlane.f32.xlu0 %v1784_v60 }
 0x68a   : > { %v1351_v24 = vpop.permute.xlu1 %1350 }
 0x68b   : > { %4809 = vmatpush.msk.msra.mxu1 %vm286_vm2, %v1351_v24 }
 0x69a   : > { %v1619_v31 = vpop.xlane.xlu0 %1618 }
 0x69b   : > { %v1624_v48 = vsub.f32 %v5895_v5, %v1619_v31  ;;  %v1290_v5 = vmul.f32 1.442695, %v1285_v0 }
 0x69d   : > { %v1628_v51 = vmul.f32 1.442695, %v1624_v48 }
 0x69f   : > { %5141 = vpow2.f32 %v1628_v51 }
 0x6a5   : > { %v5985_v11 = vpop.eup %5141 }
 0x6a6   : > { %v1635_v36 = vsel %vm544_vm4, %v5985_v11, 0.0 }
 0x6a7   : > { %1636 = vadd.xlane.f32.xlu1 %v1635_v36 }
 0x6ac   : > { %v5989_v10 = vpop.xlane.xlu0 %1293 }
 0x6ad   : > { %vm1306_vm14 = vweird.f32 %v5989_v10 }
 0x6b4   : > { %v724_v52 = vpop.xlane.xlu0 %723  ;;  %v5991_v26 = vpop.xlane.xlu2 %1296 }
 0x6b5   : > { %v727_v6 = vsub.f32 %v5906_v25, %v724_v52 }
 0x6b7   : > { %v732_v58 = vmul.f32 1.442695, %v727_v6 }
 0x6b9   : > { %5143 = vpow2.f32 %v732_v58 }
 0x6ba   : > { %5145 = vpow2.f32 %v1290_v5 }
 0x6bc   : > { %v1061_v2 = vpop.xlane.xlu0 %1060  ;;  %v721_v3 = vpop.xlane.xlu2 %720 }
 0x6bd   : > { %v726_v54 = vsub.f32 %v5921_v38, %v721_v3  ;;  %v1066_v12 = vsub.f32 %v5923_v40, %v1061_v2  ;;  %v1623_v38 = vsub.f32 %v5860_v49, %v5938_v1 }
 0x6bf   : > { %v5997_v59 = vpop.eup %5143  ;;  %v730_v15 = vmul.f32 1.442695, %v726_v54  ;;  %v1070_v39 = vmul.f32 1.442695, %v1066_v12  ;;  %v1626_v19 = vmul.f32 1.442695, %v1623_v38 }
 0x6c0   : > { %v740_v25 = vsel %vm551_vm5, %v5997_v59, 0.0  ;;  %v6004_v23 = vpop.eup %5145 }
 0x6c1   : > { %741 = vadd.xlane.f32.xlu0 %v740_v25  ;;  %5147 = vpow2.f32 %v730_v15  ;;  %v1298_v56 = vsel %vm551_vm5, %v6004_v23, 0.0  ;;  %v1789_v15 = vpop.xlane.xlu1 %1788 }
 0x6c2   : > { %5149 = vpow2.f32 %v1070_v39  ;;  %v1454_v39 = vsub.f32 %v5880_v63, %v5970_v21 }
 0x6c3   : > { %5151 = vpow2.f32 %v1068_v13 }
 0x6c4   : > { %v1064_v33 = vpop.xlane.xlu2 %1063 }
 0x6c7   : > { %v6008_v53 = vpop.eup %5147 }
 0x6c8   : > { %v737_v40 = vsel %vm544_vm4, %v6008_v53, 0.0  ;;  %v6014_v46 = vpop.eup %5149 }
 0x6c9   : > { %1299 = vadd.xlane.f32.xlu0 %v1298_v56  ;;  %738 = vadd.xlane.f32.xlu2 %v737_v40  ;;  %v6016_v34 = vpop.eup %5151  ;;  %v1077_v49 = vsel %vm544_vm4, %v6014_v46, 0.0  ;;  %v1792_v13 = vpop.xlane.xlu1 %1791 }
 0x6ca   : > { %v1074_v1 = vsel %vm544_vm4, %v6016_v34, 0.0 }
 0x6cc   : > { %v736_v7 = vpop.xlane.xlu2 %735 }
 0x6cd   : > { %5153 = vrcp.f32 %v736_v7  ;;  %v754_v31 = vand.u32 2147483648, %v736_v7  ;;  %v752_v36 = vand.u32 2147483647, %v736_v7  ;;  %vm748_vm10 = vweird.f32 %v736_v7 }
 0x6ce   : > { %5155 = vpow2.f32 %v1626_v19 }
 0x6cf   : > { %v755_v6 = vor.u32 1.1754944e-38, %v754_v31  ;;  %vm753_vm12 = vcmp.eq.f32.partialorder %v752_v36, 8.507059e+37  ;;  %v5021_v5 = vpop.permute.xlu0 %5020 }
 0x6d0   : > { %v5022_v3 = vunpack.i.l.bf16 %v5021_v5  ;;  %v5023_v54 = vunpack.i.h.bf16 %v5021_v5 }
 0x6d1   : > { %1078 = vadd.xlane.f32.xlu0 %v1077_v49  ;;  %1075 = vadd.xlane.f32.xlu2 %v1074_v1  ;;  %v1794_v49 = vsub.f32 %v5908_v14, %v1789_v15 }
 0x6d3   : > { %v5154_v28 = vpop.eup %5153 }
 0x6d4   : > { %v744_v47 = vmul.f32 %v5154_v28, %v736_v7  ;;  %v6022_v60 = vpop.eup %5155  ;;  %vm749_vm9 = vweird.f32 %v5154_v28 }
 0x6d5   : > { %v1632_v51 = vsel %vm544_vm4, %v6022_v60, 0.0  ;;  %vm750_vm11 = vmor %vm748_vm10, %vm749_vm9 }
 0x6d6   : > { %v745_v24 = vsub.f32 1.0, %v744_v47 }
 0x6d8   : > { %v746_v48 = vmul.f32 %v5154_v28, %v745_v24 }
 0x6d9   : > { %1633 = vadd.xlane.f32.xlu0 %v1632_v51 }
 0x6da   : > { %v747_v52 = vadd.f32 %v5154_v28, %v746_v48 }
 0x6dc   : > { %v751_v0 = vsel %vm750_vm11, %v5154_v28, %v747_v52  ;;  %v1622_v28 = vpop.xlane.xlu1 %1621 }
 0x6dd   : > { %v756_v58 = vsel %vm753_vm12, %v755_v6, %v751_v0  ;;  %v1625_v31 = vsub.f32 %v5936_v62, %v1622_v28 }
 0x6de   : > { %v757_v2 = vmul.f32 %v5945_v18, %v756_v58  ;;  %v1067_v18 = vsub.f32 %v5934_v61, %v1064_v33  ;;  %v1795_v61 = vsub.f32 %v5925_v45, %v1792_v13 }
 0x6df   : > { %v1630_v51 = vmul.f32 1.442695, %v1625_v31 }
 0x6e0   : > { %4780 = vmatmul.msk.f32.vlgmr.msrb.gmra.mxu2 %vm544_vm4, %v757_v2  ;;  %v1072_v12 = vmul.f32 1.442695, %v1067_v18 }
 0x6e1   : > { %4819 = vmatpush.msk.msrb.mxu2 %vm286_vm2, %v5949_v32  ;;  %v1453_v32 = vsub.f32 %v5872_v4, %v5966_v57  ;;  %v1455_v4 = vsub.f32 %v5886_v55, %v5977_v41  ;;  %v1800_v57 = vmul.f32 1.442695, %v1795_v61 }
 0x6e2   : > { %5157 = vpow2.f32 %v1072_v12 }
 0x6e3   : > { %1549 = vmatpush.msrb.mxu2 %v5022_v3  ;;  %v1456_v30 = vmul.f32 1.442695, %v1453_v32  ;;  %v1460_v63 = vmul.f32 1.442695, %v1455_v4 }
 0x6e5   : > { %1550 = vmatpush.msrb.mxu2 %v5023_v54  ;;  %5159 = vpow2.f32 %v1456_v30 }
 0x6e8   : > { %v6041_v25 = vpop.eup %5157 }
 0x6e9   : > { %5025 = vrot.lane.b32.xlu2 %v5953_v8, %s5389_s12 }
 0x6eb   : > { %v6048_v33 = vpop.eup %5159 }
 0x6ec   : > { %v1462_v38 = vsel %vm544_vm4, %v6048_v33, 0.0 }
 0x6ed   : > { %1860 = vrot.lane.b32.xlu0 %v5669_v27, %s5394_s19 }
 0x6f2   : > { %v6070_v24 = vpop.f32.mrf.mxu1 }
 0x6f5   : > { %1690 = vrot.lane.b32.xlu0 %v5669_v27, %s5393_s18  ;;  %v1080_v27 = vsel %vm551_vm5, %v6041_v25, 0.0 }
 0x6fa   : > { %v1786_v21 = vpop.xlane.xlu0 %1785  ;;  %v997_v6 = vpop.f32.mrf.mxu1 }
 0x6fb   : > { %v1793_v40 = vsub.f32 %v5975_v35, %v1786_v21  ;;  %v1798_v35 = vmul.f32 1.442695, %v1794_v49 }
 0x6fd   : > { %5035 = vrot.lane.b32.xlu0 %v5953_v8, %s5393_s18  ;;  %v1458_v8 = vmul.f32 1.442695, %v1454_v39  ;;  %v1796_v55 = vmul.f32 1.442695, %v1793_v40 }
 0x6ff   : > { %5161 = vpow2.f32 %v1458_v8 }
 0x700   : > { %5163 = vpow2.f32 %v1800_v57 }
 0x701   : > { %5165 = vpow2.f32 %v1460_v63  ;;  %v1312_v63 = vand.u32 2147483648, %v5989_v10 }
 0x702   : > { %5167 = vpow2.f32 %v1796_v55 }
 0x703   : > { %5169 = vpow2.f32 %v1798_v35 }
 0x704   : > { %5171 = vrcp.f32 %v5989_v10 }
 0x705   : > { %v6054_v56 = vpop.eup %5161  ;;  %5173 = vpow2.f32 %v1630_v51 }
 0x706   : > { %v1465_v45 = vsel %vm544_vm4, %v6054_v56, 0.0  ;;  %v6059_v19 = vpop.eup %5163 }
 0x707   : > { %v1808_v41 = vsel %vm551_vm5, %v6059_v19, 0.0  ;;  %v6063_v7 = vpop.eup %5165 }
 0x708   : > { %v1468_v1 = vsel %vm551_vm5, %v6063_v7, 0.0  ;;  %v6068_v47 = vpop.eup %5167 }
 0x709   : > { %v1802_v48 = vsel %vm544_vm4, %v6068_v47, 0.0  ;;  %v6078_v36 = vpop.eup %5169 }
 0x70a   : > { %v5172_v52 = vpop.eup %5171  ;;  %v1805_v0 = vsel %vm544_vm4, %v6078_v36, 0.0 }
 0x70b   : > { %v1302_v62 = vmul.f32 %v5172_v52, %v5989_v10  ;;  %v6088_v2 = vpop.eup %5173  ;;  %vm1307_vm13 = vweird.f32 %v5172_v52 }
 0x70c   : > { %v1638_v12 = vsel %vm551_vm5, %v6088_v2, 0.0  ;;  %vm6111_vm6 = vmor %vm1306_vm14, %vm1307_vm13 }
 0x70d   : > { %v1303_v3 = vsub.f32 1.0, %v1302_v62 }
 0x70f   : > { %v1304_v15 = vmul.f32 %v5172_v52, %v1303_v3 }
 0x711   : > { %v1305_v8 = vadd.f32 %v5172_v52, %v1304_v15 }
 0x712   : > { %1081 = vadd.xlane.f32.xlu2 %v1080_v27 }
 0x71a   : > { %1463 = vadd.xlane.f32.xlu2 %v1462_v38  ;;  %v1310_v38 = vand.u32 2147483647, %v5989_v10  ;;  %v1313_v10 = vor.u32 1.1754944e-38, %v1312_v63 }
 0x71c   : > { %vm1311_vm8 = vcmp.eq.f32.partialorder %v1310_v38, 8.507059e+37  ;;  %v6134_v38 = vpop.permute.xlu1 %5030 }
 0x722   : > { %1466 = vadd.xlane.f32.xlu2 %v1465_v45 }
 0x727   : > { %1809 = vadd.xlane.f32.xlu0 %v1808_v41 }
 0x72a   : > { %1469 = vadd.xlane.f32.xlu2 %v1468_v1  ;;  %v1309_v1 = vsel %vm6111_vm6, %v5172_v52, %v1305_v8  ;;  %v1327_v52 = vand.u32 2147483648, %v5991_v26 }
 0x72b   : > { %v1314_v3 = vsel %vm1311_vm8, %v1313_v10, %v1309_v1 }
 0x72c   : > { %v1315_v55 = vmul.f32 %v5902_v17, %v1314_v3 }
 0x732   : > { %1803 = vadd.xlane.f32.xlu2 %v1802_v48 }
 0x734   : > { %v6076_v14 = vpop.xlane.xlu0 %741 }
 0x735   : > { %5175 = vrcp.f32 %v6076_v14  ;;  %vm778_vm14 = vweird.f32 %v6076_v14 }
 0x736   : > { %5177 = vrcp.f32 %v5991_v26 }
 0x73a   : > { %1806 = vadd.xlane.f32.xlu2 %v1805_v0 }
 0x73b   : > { %1190 = vrot.lane.b32.xlu0 %v997_v6, %s5395_s20  ;;  %v6090_v54 = vpop.eup %5175 }
 0x73c   : > { %v6086_v58 = vpop.xlane.xlu0 %1299  ;;  %v739_v5 = vpop.xlane.xlu2 %738  ;;  %v774_v32 = vmul.f32 %v6090_v54, %v6076_v14  ;;  %vm779_vm13 = vweird.f32 %v6090_v54 }
 0x73d   : > { %5179 = vrcp.f32 %v739_v5  ;;  %v6092_v18 = vpop.eup %5177  ;;  %v767_v41 = vand.u32 2147483647, %v739_v5  ;;  %v769_v49 = vand.u32 2147483648, %v739_v5  ;;  %vm763_vm9 = vweird.f32 %v739_v5  ;;  %vm6144_vm6 = vmor %vm778_vm14, %vm779_vm13 }
 0x73e   : > { %5181 = vrcp.f32 %v6086_v58  ;;  %v1317_v39 = vmul.f32 %v6092_v18, %v5991_v26  ;;  %v775_v61 = vsub.f32 1.0, %v774_v32  ;;  %vm1322_vm10 = vweird.f32 %v6092_v18 }
 0x73f   : > { %vm768_vm12 = vcmp.eq.f32.partialorder %v767_v41, 8.507059e+37  ;;  %v770_v62 = vor.u32 1.1754944e-38, %v769_v49  ;;  %v1325_v49 = vand.u32 2147483647, %v5991_v26  ;;  %v1342_v3 = vand.u32 2147483648, %v6086_v58 }
 0x740   : > { %v1318_v21 = vsub.f32 1.0, %v1317_v39  ;;  %v776_v28 = vmul.f32 %v6090_v54, %v775_v61 }
 0x742   : > { %1639 = vadd.xlane.f32.xlu2 %v1638_v12  ;;  %v1319_v51 = vmul.f32 %v6092_v18, %v1318_v21  ;;  %v777_v39 = vadd.f32 %v6090_v54, %v776_v28  ;;  %v1328_v28 = vor.u32 1.1754944e-38, %v1327_v52 }
 0x743   : > { %v5180_v30 = vpop.eup %5179 }
 0x744   : > { %v759_v13 = vmul.f32 %v5180_v30, %v739_v5  ;;  %v6101_v27 = vpop.xlane.xlu2 %1075  ;;  %v6104_v57 = vpop.xlane.xlu0 %1078  ;;  %vm764_vm7 = vweird.f32 %v5180_v30  ;;  %v784_v5 = vand.u32 2147483648, %v6076_v14  ;;  %v781_v17 = vsel %vm6144_vm6, %v6090_v54, %v777_v39 }
 0x745   : > { %5183 = vrcp.f32 %v6101_v27  ;;  %v6108_v40 = vpop.eup %5181  ;;  %vm765_vm11 = vmor %vm763_vm9, %vm764_vm7  ;;  %vm1321_vm7 = vweird.f32 %v5991_v26  ;;  %vm1088_vm13 = vweird.f32 %v6101_v27  ;;  %vm1336_vm6 = vweird.f32 %v6086_v58 }
 0x746   : > { %v760_v4 = vsub.f32 1.0, %v759_v13  ;;  %5185 = vrcp.f32 %v6104_v57  ;;  %v1332_v48 = vmul.f32 %v6108_v40, %v6086_v58  ;;  %vm1323_vm8 = vmor %vm1321_vm7, %vm1322_vm10  ;;  %v785_v26 = vor.u32 1.1754944e-38, %v784_v5 }
 0x747   : > { %vm1337_vm10 = vweird.f32 %v6108_v40  ;;  %v1340_v39 = vand.u32 2147483647, %v6086_v58 }
 0x748   : > { %v761_v45 = vmul.f32 %v5180_v30, %v760_v4  ;;  %v1333_v8 = vsub.f32 1.0, %v1332_v48  ;;  %v1320_v4 = vadd.f32 %v6092_v18, %v1319_v51  ;;  %vm1338_vm7 = vmor %vm1336_vm6, %vm1337_vm10 }
 0x74a   : > { %v762_v35 = vadd.f32 %v5180_v30, %v761_v45 }
 0x74b   : > { %v6119_v31 = vpop.eup %5183 }
 0x74c   : > { %v1084_v6 = vmul.f32 %v6119_v31, %v6101_v27  ;;  %v5026_v0 = vpop.permute.xlu2 %5025  ;;  %v766_v32 = vsel %vm765_vm11, %v5180_v30, %v762_v35  ;;  %v6130_v13 = vpop.eup %5185  ;;  %v782_v30 = vand.u32 2147483647, %v6076_v14  ;;  %v1324_v14 = vsel %vm1323_vm8, %v6092_v18, %v1320_v4 }
 0x74d   : > { %v5027_v15 = vunpack.i.l.bf16 %v5026_v0  ;;  %v771_v61 = vsel %vm768_vm12, %v770_v62, %v766_v32  ;;  %v6136_v63 = vpop.xlane.xlu0 %1633  ;;  %v5028_v21 = vunpack.i.h.bf16 %v5026_v0  ;;  %v1099_v1 = vmul.f32 %v6130_v13, %v6104_v57  ;;  %v6168_v62 = vpop.xlane.xlu1 %1636 }
 0x74e   : > { %v1085_v12 = vsub.f32 1.0, %v1084_v6  ;;  %v772_v45 = vmul.f32 %v6008_v53, %v771_v61  ;;  %5187 = vrcp.f32 %v6136_v63  ;;  %v1334_v35 = vmul.f32 %v6108_v40, %v1333_v8 }
 0x74f   : > { %1379 = vmatpush.msra.mxu1 %v5027_v15  ;;  %vm783_vm9 = vcmp.eq.f32.partialorder %v782_v30, 8.507059e+37  ;;  %vm1326_vm11 = vcmp.eq.f32.partialorder %v1325_v49, 8.507059e+37  ;;  %v1100_v48 = vsub.f32 1.0, %v1099_v1  ;;  %vm1089_vm12 = vweird.f32 %v6119_v31 }
 0x750   : > { %v1086_v53 = vmul.f32 %v6119_v31, %v1085_v12  ;;  %4781 = vmatmul.msk.f32.gmra.mxu2 %vm544_vm4, %v772_v45  ;;  %v786_v10 = vsel %vm783_vm9, %v785_v26, %v781_v17  ;;  %v1329_v54 = vsel %vm1326_vm11, %v1328_v28, %v1324_v14  ;;  %v1094_v6 = vand.u32 2147483648, %v6101_v27  ;;  %vm6176_vm14 = vmor %vm1088_vm13, %vm1089_vm12 }
 0x751   : > { %1380 = vmatpush.msra.mxu1 %v5028_v21  ;;  %v1335_v0 = vadd.f32 %v6108_v40, %v1334_v35  ;;  %v1092_v18 = vand.u32 2147483647, %v6101_v27  ;;  %v787_v52 = vmul.f32 %v5997_v59, %v786_v10  ;;  %v1330_v32 = vmul.f32 %v5910_v20, %v1329_v54 }
 0x752   : > { %4810 = vmatmul.msk.f32.vlgmr.msra.gmra.mxu1 %vm544_vm4, %v1315_v55  ;;  %v1087_v51 = vadd.f32 %v6119_v31, %v1086_v53  ;;  %v1101_v59 = vmul.f32 %v6130_v13, %v1100_v48  ;;  %5189 = vrcp.f32 %v6168_v62  ;;  %v1095_v8 = vor.u32 1.1754944e-38, %v1094_v6 }
 0x753   : > { %v1339_v20 = vsel %vm1338_vm7, %v6108_v40, %v1335_v0  ;;  %vm1093_vm8 = vcmp.eq.f32.partialorder %v1092_v18, 8.507059e+37  ;;  %vm1341_vm9 = vcmp.eq.f32.partialorder %v1340_v39, 8.507059e+37  ;;  %vm1104_vm11 = vweird.f32 %v6130_v13 }
 0x754   : > { %v6174_v12 = vpop.eup %5187  ;;  %v1091_v27 = vsel %vm6176_vm14, %v6119_v31, %v1087_v51  ;;  %v1343_v31 = vor.u32 1.1754944e-38, %v1342_v3  ;;  %v1109_v21 = vand.u32 2147483648, %v6104_v57  ;;  %vm1103_vm12 = vweird.f32 %v6104_v57 }
 0x755   : > { %v1642_v58 = vmul.f32 %v6174_v12, %v6136_v63  ;;  %v1096_v61 = vsel %vm1093_vm8, %v1095_v8, %v1091_v27  ;;  %v1107_v40 = vand.u32 2147483647, %v6104_v57  ;;  %vm6202_vm10 = vmor %vm1103_vm12, %vm1104_vm11  ;;  %v5033_v26 = vunpack.i.h.bf16 %v6134_v38 }
 0x756   : > { %v1344_v4 = vsel %vm1341_vm9, %v1343_v31, %v1339_v20  ;;  %v1097_v30 = vmul.f32 %v6016_v34, %v1096_v61  ;;  %v5032_v34 = vunpack.i.l.bf16 %v6134_v38  ;;  %v1110_v57 = vor.u32 1.1754944e-38, %v1109_v21 }
 0x757   : > { %v1643_v45 = vsub.f32 1.0, %v1642_v58  ;;  %v1345_v41 = vmul.f32 %v6004_v23, %v1344_v4  ;;  %vm1108_vm13 = vcmp.eq.f32.partialorder %v1107_v40, 8.507059e+37  ;;  %vm1647_vm14 = vweird.f32 %v6174_v12 }
 0x758   : > { %4782 = vmatmul.msk.f32.gmra.mxu2 %vm544_vm4, %v787_v52  ;;  %v5190_v55 = vpop.eup %5189  ;;  %v1652_v48 = vand.u32 2147483648, %v6136_v63  ;;  %vm1646_vm6 = vweird.f32 %v6136_v63  ;;  %v1650_v51 = vand.u32 2147483647, %v6136_v63  ;;  %v1667_v15 = vand.u32 2147483648, %v6168_v62 }
 0x759   : > { %v1657_v23 = vmul.f32 %v5190_v55, %v6168_v62  ;;  %v1644_v17 = vmul.f32 %v6174_v12, %v1643_v45  ;;  %vm1648_vm7 = vmor %vm1646_vm6, %vm1647_vm14  ;;  %vm1662_vm9 = vweird.f32 %v5190_v55  ;;  %vm1661_vm11 = vweird.f32 %v6168_v62 }
 0x75a   : > { %1188 = vrot.lane.b32.xlu2 %v6070_v24, %s5395_s20  ;;  %4811 = vmatmul.msk.f32.gmra.mxu1 %vm544_vm4, %v1330_v32  ;;  %v1102_v24 = vadd.f32 %v6130_v13, %v1101_v59  ;;  %v1653_v6 = vor.u32 1.1754944e-38, %v1652_v48  ;;  %vm1651_vm8 = vcmp.eq.f32.partialorder %v1650_v51, 8.507059e+37  ;;  %v1665_v63 = vand.u32 2147483647, %v6168_v62  ;;  %vm1663_vm12 = vmor %vm1661_vm11, %vm1662_vm9 }
 0x75b   : > { %v1658_v35 = vsub.f32 1.0, %v1657_v23  ;;  %v1645_v28 = vadd.f32 %v6174_v12, %v1644_v17  ;;  %v1668_v39 = vor.u32 1.1754944e-38, %v1667_v15 }
 0x75c   : > { %v1106_v53 = vsel %vm6202_vm10, %v6130_v13, %v1102_v24  ;;  %vm1666_vm10 = vcmp.eq.f32.partialorder %v1665_v63, 8.507059e+37 }
 0x75d   : > { %v1111_v14 = vsel %vm1108_vm13, %v1110_v57, %v1106_v53  ;;  %v1649_v38 = vsel %vm1648_vm7, %v6174_v12, %v1645_v28  ;;  %v1659_v54 = vmul.f32 %v5190_v55, %v1658_v35 }
 0x75e   : > { %v1112_v10 = vmul.f32 %v6014_v46, %v1111_v14  ;;  %v1654_v52 = vsel %vm1651_vm8, %v1653_v6, %v1649_v38 }
 0x75f   : > { %v1861_v5 = vpop.permute.xlu0 %1860  ;;  %v1660_v3 = vadd.f32 %v5190_v55, %v1659_v54  ;;  %v1655_v32 = vmul.f32 %v6022_v60, %v1654_v52 }
 0x760   : > { %4800 = vmatmul.msk.f32.vlgmr.msra.gmra.mxu2 %vm544_vm4, %v1097_v30 }
 0x761   : > { %4839 = vmatpush.msk.msra.mxu2 %vm286_vm2, %v1861_v5  ;;  %v1664_v12 = vsel %vm1663_vm12, %v5190_v55, %v1660_v3 }
 0x762   : > { %4812 = vmatmul.msk.f32.gmra.mxu1 %vm544_vm4, %v1345_v41  ;;  %v1669_v27 = vsel %vm1666_vm10, %v1668_v39, %v1664_v12 }
 0x763   : > { %v824_v1 = vpop.f32.mrf.mxu2  ;;  %1889 = vmatpush.msra.mxu2 %v5032_v34  ;;  %v1670_v59 = vmul.f32 %v5985_v11, %v1669_v27 }
 0x764   : > { %1176 = vrot.lane.b32.xlu2 %v824_v1, %s5396_s21 }
 0x765   : > { %1890 = vmatpush.msra.mxu2 %v5033_v26 }
 0x767   : > { %v1691_v13 = vpop.permute.xlu0 %1690 }
 0x768   : > { %4829 = vmatpush.msk.msrb.mxu1 %vm286_vm2, %v1691_v13  ;;  %4801 = vmatmul.msk.f32.gmra.mxu2 %vm544_vm4, %v1112_v10 }
 0x76f   : > { %v5036_v0 = vpop.permute.xlu0 %5035 }
 0x770   : > { %v5037_v18 = vunpack.i.l.bf16 %v5036_v0  ;;  %v5038_v46 = vunpack.i.h.bf16 %v5036_v0 }
 0x772   : > { %1719 = vmatpush.msrb.mxu1 %v5037_v18 }
 0x774   : > { %1720 = vmatpush.msrb.mxu1 %v5038_v46 }
 0x775   : > { %4830 = vmatmul.msk.f32.vlgmr.msrb.gmra.mxu1 %vm544_vm4, %v1655_v32 }
 0x77d   : > { %4831 = vmatmul.msk.f32.gmra.mxu1 %vm544_vm4, %v1670_v59 }
 0x785   : > { %v1082_v8 = vpop.xlane.xlu2 %1081 }
 0x786   : > { %5191 = vrcp.f32 %v1082_v8  ;;  %v1124_v62 = vand.u32 2147483648, %v1082_v8  ;;  %v1122_v5 = vand.u32 2147483647, %v1082_v8  ;;  %vm1118_vm14 = vweird.f32 %v1082_v8 }
 0x788   : > { %v1125_v21 = vor.u32 1.1754944e-38, %v1124_v62  ;;  %vm1123_vm7 = vcmp.eq.f32.partialorder %v1122_v5, 8.507059e+37 }
 0x78c   : > { %v5192_v20 = vpop.eup %5191 }
 0x78d   : > { %v1114_v60 = vmul.f32 %v5192_v20, %v1082_v8  ;;  %v1464_v58 = vpop.xlane.xlu2 %1463  ;;  %vm1119_vm13 = vweird.f32 %v5192_v20 }
 0x78e   : > { %5193 = vrcp.f32 %v1464_v58  ;;  %vm1120_vm6 = vmor %vm1118_vm14, %vm1119_vm13  ;;  %v1482_v49 = vand.u32 2147483648, %v1464_v58  ;;  %v1480_v53 = vand.u32 2147483647, %v1464_v58  ;;  %vm1476_vm9 = vweird.f32 %v1464_v58 }
 0x78f   : > { %v1115_v31 = vsub.f32 1.0, %v1114_v60 }
 0x790   : > { %v1483_v23 = vor.u32 1.1754944e-38, %v1482_v49  ;;  %vm1481_vm12 = vcmp.eq.f32.partialorder %v1480_v53, 8.507059e+37 }
 0x791   : > { %v1116_v61 = vmul.f32 %v5192_v20, %v1115_v31 }
 0x793   : > { %v1117_v4 = vadd.f32 %v5192_v20, %v1116_v61 }
 0x794   : > { %v5194_v24 = vpop.eup %5193 }
 0x795   : > { %v1472_v45 = vmul.f32 %v5194_v24, %v1464_v58  ;;  %v1467_v11 = vpop.xlane.xlu2 %1466  ;;  %v1121_v30 = vsel %vm1120_vm6, %v5192_v20, %v1117_v4  ;;  %vm1477_vm8 = vweird.f32 %v5194_v24 }
 0x796   : > { %5195 = vrcp.f32 %v1467_v11  ;;  %v1126_v40 = vsel %vm1123_vm7, %v1125_v21, %v1121_v30  ;;  %vm1478_vm11 = vmor %vm1476_vm9, %vm1477_vm8  ;;  %v1497_v10 = vand.u32 2147483648, %v1467_v11  ;;  %v1495_v48 = vand.u32 2147483647, %v1467_v11 }
 0x797   : > { %v1473_v55 = vsub.f32 1.0, %v1472_v45  ;;  %v1127_v41 = vmul.f32 %v6041_v25, %v1126_v40  ;;  %vm1491_vm13 = vweird.f32 %v1467_v11 }
 0x798   : > { %v1498_v18 = vor.u32 1.1754944e-38, %v1497_v10  ;;  %vm1496_vm6 = vcmp.eq.f32.partialorder %v1495_v48, 8.507059e+37 }
 0x799   : > { %v1474_v1 = vmul.f32 %v5194_v24, %v1473_v55  ;;  %4802 = vmatmul.msk.f32.gmra.mxu2 %vm544_vm4, %v1127_v41 }
 0x79a   : > { %v6237_v52 = vpop.xlane.xlu0 %1809 }
 0x79b   : > { %v1475_v34 = vadd.f32 %v5194_v24, %v1474_v1  ;;  %v1852_v10 = vand.u32 2147483648, %v6237_v52 }
 0x79c   : > { %v5196_v57 = vpop.eup %5195 }
 0x79d   : > { %v1479_v17 = vsel %vm1478_vm11, %v5194_v24, %v1475_v34  ;;  %v1487_v26 = vmul.f32 %v5196_v57, %v1467_v11  ;;  %v1470_v14 = vpop.xlane.xlu2 %1469  ;;  %vm1492_vm10 = vweird.f32 %v5196_v57 }
 0x79e   : > { %5197 = vrcp.f32 %v1470_v14  ;;  %v1484_v13 = vsel %vm1481_vm12, %v1483_v23, %v1479_v17  ;;  %vm1493_vm14 = vmor %vm1491_vm13, %vm1492_vm10  ;;  %v1512_v15 = vand.u32 2147483648, %v1470_v14  ;;  %v1510_v63 = vand.u32 2147483647, %v1470_v14 }
 0x79f   : > { %v1488_v35 = vsub.f32 1.0, %v1487_v26  ;;  %v1485_v25 = vmul.f32 %v6048_v33, %v1484_v13  ;;  %vm1506_vm8 = vweird.f32 %v1470_v14 }
 0x7a0   : > { %v1513_v27 = vor.u32 1.1754944e-38, %v1512_v15  ;;  %vm1511_vm11 = vcmp.eq.f32.partialorder %v1510_v63, 8.507059e+37 }
 0x7a1   : > { %4820 = vmatmul.msk.f32.vlgmr.msrb.gmra.mxu2 %vm544_vm4, %v1485_v25  ;;  %v1489_v28 = vmul.f32 %v5196_v57, %v1488_v35 }
 0x7a3   : > { %v1490_v51 = vadd.f32 %v5196_v57, %v1489_v28 }
 0x7a4   : > { %v5198_v38 = vpop.eup %5197 }
 0x7a5   : > { %v1502_v54 = vmul.f32 %v5198_v38, %v1470_v14  ;;  %v1804_v6 = vpop.xlane.xlu2 %1803  ;;  %v1494_v0 = vsel %vm1493_vm14, %v5196_v57, %v1490_v51  ;;  %vm1507_vm7 = vweird.f32 %v5198_v38  ;;  %v1850_v51 = vand.u32 2147483647, %v6237_v52 }
 0x7a6   : > { %5199 = vrcp.f32 %v1804_v6  ;;  %v1499_v33 = vsel %vm1496_vm6, %v1498_v18, %v1494_v0  ;;  %vm1508_vm9 = vmor %vm1506_vm8, %vm1507_vm7  ;;  %v1822_v62 = vand.u32 2147483648, %v1804_v6  ;;  %v1820_v5 = vand.u32 2147483647, %v1804_v6 }
 0x7a7   : > { %v1503_v3 = vsub.f32 1.0, %v1502_v54  ;;  %v1500_v46 = vmul.f32 %v6054_v56, %v1499_v33  ;;  %5201 = vrcp.f32 %v6237_v52  ;;  %vm1816_vm10 = vweird.f32 %v1804_v6 }
 0x7a8   : > { %v1823_v45 = vor.u32 1.1754944e-38, %v1822_v62  ;;  %vm1821_vm14 = vcmp.eq.f32.partialorder %v1820_v5, 8.507059e+37  ;;  %v1853_v18 = vor.u32 1.1754944e-38, %v1852_v10  ;;  %v1958_v62 = vld [vmem:[%s7639_s1 + $0x78] sm:$0xff] }
 0x7a9   : > { %v1504_v32 = vmul.f32 %v5198_v38, %v1503_v3  ;;  %4821 = vmatmul.msk.f32.gmra.mxu2 %vm544_vm4, %v1500_v46 }
 0x7ab   : > { %v1505_v12 = vadd.f32 %v5198_v38, %v1504_v32  ;;  %v1000_v32 = vpop.f32.mrf.mxu1 }
 0x7ac   : > { %v5200_v39 = vpop.eup %5199 }
 0x7ad   : > { %v1812_v59 = vmul.f32 %v5200_v39, %v1804_v6  ;;  %v1807_v8 = vpop.xlane.xlu2 %1806  ;;  %v1509_v20 = vsel %vm1508_vm9, %v5198_v38, %v1505_v12  ;;  %v5202_v56 = vpop.eup %5201  ;;  %vm1817_vm12 = vweird.f32 %v5200_v39 }
 0x7ae   : > { %5203 = vrcp.f32 %v1807_v8  ;;  %v1514_v60 = vsel %vm1511_vm11, %v1513_v27, %v1509_v20  ;;  %v1842_v4 = vmul.f32 %v5202_v56, %v6237_v52  ;;  %vm1818_vm13 = vmor %vm1816_vm10, %vm1817_vm12  ;;  %v1837_v1 = vand.u32 2147483648, %v1807_v8 }
 0x7af   : > { %v1813_v58 = vsub.f32 1.0, %v1812_v59  ;;  %v1515_v31 = vmul.f32 %v6063_v7, %v1514_v60  ;;  %v1835_v34 = vand.u32 2147483647, %v1807_v8  ;;  %vm1831_vm7 = vweird.f32 %v1807_v8 }
 0x7b0   : > { %v1843_v55 = vsub.f32 1.0, %v1842_v4  ;;  %v1838_v26 = vor.u32 1.1754944e-38, %v1837_v1  ;;  %vm1847_vm11 = vweird.f32 %v5202_v56  ;;  %vm1846_vm12 = vweird.f32 %v6237_v52  ;;  %v1956_v4 = vld [vmem:[%s7639_s1 + $0x68] sm:$0xff] }
 0x7b1   : > { %v1814_v61 = vmul.f32 %v5200_v39, %v1813_v58  ;;  %4822 = vmatmul.msk.f32.gmra.mxu2 %vm544_vm4, %v1515_v31  ;;  %vm1836_vm9 = vcmp.eq.f32.partialorder %v1835_v34, 8.507059e+37  ;;  %v1959_v58 = vld [vmem:[%s7639_s1 + $0x80] sm:$0xff] }
 0x7b2   : > { %v1844_v57 = vmul.f32 %v5202_v56, %v1843_v55  ;;  %1985 = vmatpush.msra.mxu0 %v1959_v58 }
 0x7b3   : > { %v1815_v24 = vadd.f32 %v5200_v39, %v1814_v61  ;;  %v1957_v61 = vld [vmem:[%s7639_s1 + $0x70] sm:$0xff] }
 0x7b4   : > { %v5204_v21 = vpop.eup %5203  ;;  %v1845_v25 = vadd.f32 %v5202_v56, %v1844_v57  ;;  %1986 = vmatpush.msra.mxu0 %v1958_v62  ;;  %v1191_v57 = vpop.permute.xlu0 %1190 }
 0x7b5   : > { %v1819_v11 = vsel %vm1818_vm13, %v5200_v39, %v1815_v24  ;;  %v1827_v30 = vmul.f32 %v5204_v21, %v1807_v8  ;;  %v1640_v40 = vpop.xlane.xlu2 %1639  ;;  %vm1832_vm6 = vweird.f32 %v5204_v21  ;;  %vm1848_vm13 = vmor %vm1846_vm12, %vm1847_vm11  ;;  %vm1216_vm11 = vcmask 195584  }
 0x7b6   : > { %5205 = vrcp.f32 %v1640_v40  ;;  %v1824_v7 = vsel %vm1821_vm14, %v1823_v45, %v1819_v11  ;;  %vm1833_vm8 = vmor %vm1831_vm7, %vm1832_vm6  ;;  %v1682_v48 = vand.u32 2147483648, %v1640_v40  ;;  %v1680_v54 = vand.u32 2147483647, %v1640_v40  ;;  %1987 = vmatpush.msra.mxu0 %v1957_v61 }
 0x7b7   : > { %v1828_v41 = vsub.f32 1.0, %v1827_v30  ;;  %v1825_v49 = vmul.f32 %v6068_v47, %v1824_v7  ;;  %v1849_v6 = vsel %vm1848_vm13, %v5202_v56, %v1845_v25  ;;  %vm1676_vm14 = vweird.f32 %v1640_v40 }
 0x7b8   : > { %v1683_v3 = vor.u32 1.1754944e-38, %v1682_v48  ;;  %vm1851_vm7 = vcmp.eq.f32.partialorder %v1850_v51, 8.507059e+37  ;;  %1988 = vmatpush.msra.mxu0 %v1956_v4 }
 0x7b9   : > { %v1829_v53 = vmul.f32 %v5204_v21, %v1828_v41  ;;  %4840 = vmatmul.msk.f32.vlgmr.msra.gmra.mxu2 %vm544_vm4, %v1825_v49  ;;  %v1854_v33 = vsel %vm1851_vm7, %v1853_v18, %v1849_v6 }
 0x7ba   : > { %v1855_v52 = vmul.f32 %v6059_v19, %v1854_v33 }
 0x7bb   : > { %v1830_v23 = vadd.f32 %v5204_v21, %v1829_v53 }
 0x7bc   : > { %v5206_v17 = vpop.eup %5205 }
 0x7bd   : > { %v1672_v14 = vmul.f32 %v5206_v17, %v1640_v40  ;;  %v1834_v13 = vsel %vm1833_vm8, %v5204_v21, %v1830_v23  ;;  %vm1677_vm10 = vweird.f32 %v5206_v17  ;;  %vm1681_vm8 = vcmp.eq.f32.partialorder %v1680_v54, 8.507059e+37  ;;  %v1189_v21 = vpop.permute.xlu2 %1188 }
 0x7be   : > { %v1839_v35 = vsel %vm1836_vm9, %v1838_v26, %v1834_v13  ;;  %vm1678_vm6 = vmor %vm1676_vm14, %vm1677_vm10  ;;  %vm1212_vm9 = vcmask 130048  }
 0x7bf   : > { %v1673_v28 = vsub.f32 1.0, %v1672_v14  ;;  %v1840_v47 = vmul.f32 %v6078_v36, %v1839_v35 }
 0x7c1   : > { %v1674_v38 = vmul.f32 %v5206_v17, %v1673_v28  ;;  %4841 = vmatmul.msk.f32.gmra.mxu2 %vm544_vm4, %v1840_v47 }
 0x7c3   : > { %v1675_v0 = vadd.f32 %v5206_v17, %v1674_v38 }
 0x7c5   : > { %v1679_v36 = vsel %vm1678_vm6, %v5206_v17, %v1675_v0  ;;  %v1177_v40 = vpop.permute.xlu2 %1176 }
 0x7c6   : > { %v1684_v46 = vsel %vm1681_vm8, %v1683_v3, %v1679_v36  ;;  %v1209_v55 = vsel %vm502_vm0, %v5834_v44, %v1177_v40 }
 0x7c7   : > { %v1685_v15 = vmul.f32 %v6088_v2, %v1684_v46  ;;  %v1213_v49 = vsel %vm1212_vm9, %v1209_v55, %v1189_v21 }
 0x7c9   : > { %4832 = vmatmul.msk.f32.gmra.mxu1 %vm544_vm4, %v1685_v15  ;;  %4842 = vmatmul.msk.f32.gmra.mxu2 %vm544_vm4, %v1855_v52 }
 0x7cf   : > { %v1382_v63 = vpop.f32.mrf.mxu1 }
 0x7d3   : > { %v827_v12 = vpop.f32.mrf.mxu2 }
 0x7d4   : > { %1178 = vrot.lane.b32.xlu2 %v827_v12, %s5396_s21 }
 0x7d7   : > { %v6257_v27 = vpop.f32.mrf.mxu1 }
 0x7db   : > { %v830_v39 = vpop.f32.mrf.mxu2 }
 0x7df   : > { %v6260_v8 = vpop.f32.mrf.mxu1 }
 0x7e3   : > { %v1164_v59 = vpop.f32.mrf.mxu2 }
 0x7e4   : > { %1200 = vrot.lane.b32.xlu1 %v1164_v59, %s5397_s22 }
 0x7eb   : > { %v1167_v2 = vpop.f32.mrf.mxu2 }
 0x7ec   : > { %1180 = vrot.lane.b32.xlu1 %v830_v39, %s5396_s21  ;;  %1202 = vrot.lane.b32.xlu2 %v1167_v2, %s5397_s22  ;;  %v5083_v2 = vld [vmem:[%s7640_s2 + $0x4] ss:$0 sm:$0xff] }
 0x7f2   : > { %v1722_v19 = vpop.f32.mrf.mxu1 }
 0x7f3   : > { %1916 = vrot.lane.b32.xlu0 %v1722_v19, %s5395_s20 }
 0x7fa   : > { %v1725_v20 = vpop.f32.mrf.mxu1 }
 0x7fb   : > { %1192 = vrot.lane.b32.xlu0 %v1000_v32, %s5395_s20 }
 0x803   : > { %1918 = vrot.lane.b32.xlu0 %v1725_v20, %s5395_s20 }
 0x81c   : > { %v1170_v60 = vpop.f32.mrf.mxu2 }
 0x81d   : > { %1204 = vrot.lane.b32.xlu1 %v1170_v60, %s5397_s22 }
 0x824   : > { %v1552_v56 = vpop.f32.mrf.mxu2 }
 0x825   : > { %1904 = vrot.lane.b32.xlu2 %v1552_v56, %s5396_s21 }
 0x82c   : > { %v1555_v31 = vpop.f32.mrf.mxu2 }
 0x82e   : > { %v1179_v7 = vpop.permute.xlu2 %1178 }
 0x82f   : > { %v1210_v53 = vsel %vm502_vm0, %v5836_v9, %v1179_v7 }
 0x830   : > { %v1214_v23 = vsel %vm1212_vm9, %v1210_v53, %v1191_v57 }
 0x834   : > { %v1558_v5 = vpop.f32.mrf.mxu2 }
 0x83c   : > { %v1892_v24 = vpop.f32.mrf.mxu2 }
 0x83d   : > { %1928 = vrot.lane.b32.xlu2 %v1892_v24, %s5397_s22 }
 0x844   : > { %v1895_v45 = vpop.f32.mrf.mxu2 }
 0x845   : > { %1906 = vrot.lane.b32.xlu2 %v1555_v31, %s5396_s21  ;;  %1930 = vrot.lane.b32.xlu1 %v1895_v45, %s5397_s22 }
 0x846   : > { %v1728_v11 = vpop.f32.mrf.mxu1  ;;  %v1203_v34 = vpop.permute.xlu2 %1202 }
 0x847   : > { %1920 = vrot.lane.b32.xlu0 %v1728_v11, %s5395_s20  ;;  %v1218_v17 = vsel %vm1216_vm11, %v1214_v23, %v1203_v34 }
 0x84c   : > { %v1898_v30 = vpop.f32.mrf.mxu2 }
 0x84d   : > { %1908 = vrot.lane.b32.xlu2 %v1558_v5, %s5396_s21  ;;  %1932 = vrot.lane.b32.xlu1 %v1898_v30, %s5397_s22 }
 0x856   : > { %v1201_v41 = vpop.permute.xlu1 %1200 }
 0x857   : > { %v1217_v1 = vsel %vm1216_vm11, %v1213_v49, %v1201_v41 }
 0x858   : > { %4843 = vmatmul.msk.f32.vlgmr.msra.gmra.mxu0 %vm7644_vm3, %v1217_v1 }
 0x85e   : > { %v1181_v26 = vpop.permute.xlu1 %1180 }
 0x85f   : > { %v1211_v9 = vsel %vm502_vm0, %v5838_v16, %v1181_v26 }
 0x860   : > { %4844 = vmatmul.msk.f32.gmra.mxu0 %vm7644_vm3, %v1218_v17 }
 0x865   : > { %v1917_v44 = vpop.permute.xlu0 %1916 }
 0x86d   : > { %v1193_v35 = vpop.permute.xlu0 %1192 }
 0x86e   : > { %v1215_v48 = vsel %vm1212_vm9, %v1211_v9, %v1193_v35  ;;  %v2144_v9 = vld [vmem:[%s7639_s1 + $0xa0] sm:$0xff] }
 0x86f   : > { %2174 = vmatpush.msra.mxu1 %v2144_v9 }
 0x875   : > { %v1919_v0 = vpop.permute.xlu0 %1918 }
 0x87f   : > { %v1905_v14 = vpop.permute.xlu2 %1904 }
 0x880   : > { %v1937_v13 = vsel %vm502_vm0, %v1382_v63, %v1905_v14 }
 0x881   : > { %v1940_v47 = vsel %vm1212_vm9, %v1937_v13, %v1917_v44 }
 0x88f   : > { %v1205_v25 = vpop.permute.xlu1 %1204 }
 0x890   : > { %v1219_v38 = vsel %vm1216_vm11, %v1215_v48, %v1205_v25  ;;  %v2142_v48 = vld [vmem:[%s7639_s1 + $0x90] sm:$0xff] }
 0x897   : > { %v1929_v28 = vpop.permute.xlu2 %1928 }
 0x898   : > { %v1943_v10 = vsel %vm1216_vm11, %v1940_v47, %v1929_v28 }
 0x899   : > { %v1949_v51 = vrot.slane %v1943_v10, 7  ;;  %v2143_v10 = vld [vmem:[%s7639_s1 + $0x98] sm:$0xff] }
 0x89a   : > { %2175 = vmatpush.msra.mxu1 %v2143_v10 }
 0x89b   : > { %v1955_v54 = vsel %vm286_vm2, %v1219_v38, %v1949_v51 }
 0x89c   : > { %4845 = vmatmul.msk.f32.gmra.mxu0 %vm7644_vm3, %v1955_v54  ;;  %2176 = vmatpush.msra.mxu1 %v2142_v48 }
 0x89f   : > { %v1907_v6 = vpop.permute.xlu2 %1906 }
 0x8a0   : > { %v1938_v18 = vsel %vm502_vm0, %v6257_v27, %v1907_v6 }
 0x8a1   : > { %v1941_v36 = vsel %vm1212_vm9, %v1938_v18, %v1919_v0 }
 0x8a7   : > { %v1909_v46 = vpop.permute.xlu2 %1908 }
 0x8a8   : > { %v1939_v32 = vsel %vm502_vm0, %v6260_v8, %v1909_v46 }
 0x8b7   : > { %v1931_v3 = vpop.permute.xlu1 %1930 }
 0x8b8   : > { %v1944_v16 = vsel %vm1216_vm11, %v1941_v36, %v1931_v3 }
 0x8b9   : > { %v1950_v33 = vrot.slane %v1944_v16, 7  ;;  %v1921_v52 = vpop.permute.xlu0 %1920 }
 0x8ba   : > { %v1942_v63 = vsel %vm1212_vm9, %v1939_v32, %v1921_v52 }
 0x8bb   : > { %v1951_v15 = vsel %vm286_vm2, %v1949_v51, %v1950_v33  ;;  %v2141_v51 = vld [vmem:[%s7639_s1 + $0x88] sm:$0xff] }
 0x8bc   : > { %4846 = vmatmul.msk.f32.gmra.mxu0 %vm7644_vm3, %v1951_v15  ;;  %2177 = vmatpush.msra.mxu1 %v2141_v51 }
 0x8bf   : > { %v1933_v12 = vpop.permute.xlu1 %1932 }
 0x8c0   : > { %v1945_v39 = vsel %vm1216_vm11, %v1942_v63, %v1933_v12 }
 0x8c1   : > { %v1952_v27 = vrot.slane %v1945_v39, 7 }
 0x8c3   : > { %v1953_v59 = vsel %vm286_vm2, %v1950_v33, %v1952_v27 }
 0x8c4   : > { %4847 = vmatmul.msk.f32.gmra.mxu0 %vm7644_vm3, %v1953_v59 }
 0x8d5   : > { %v1990_v19 = vpop.f32.mrf.mxu0 }
 0x8d6   : > { %v2005_v20 = vadd.f32 %v1990_v19, %v5473_v22  ;;  %v6398_v19 = vld [vmem:[%s7640_s2 + $0x5] ss:$0 sm:$0xff] }
 0x8d8   : > { %v6322_v60 = vadd.f32 %v5083_v2, %v2005_v20 }
 0x8da   : > { %v2019_v8 = vsel %vm7644_vm3, %v6322_v60, 0.0 }
 0x8db   : > { %2020 = vadd.xlane.f32.xlu2 %v2019_v8 }
 0x8dd   : > { %v1993_v56 = vpop.f32.mrf.mxu0 }
 0x8de   : > { %v2006_v58 = vadd.f32 %v1993_v56, %v5479_v29 }
 0x8e0   : > { %v6327_v31 = vadd.f32 %v5083_v2, %v2006_v58  ;;  %v6404_v58 = vld [vmem:[%s7640_s2 + $0x6] ss:$0 sm:$0xff] }
 0x8e2   : > { %v2022_v62 = vsel %vm7644_vm3, %v6327_v31, 0.0 }
 0x8e3   : > { %2023 = vadd.xlane.f32.xlu0 %v2022_v62 }
 0x919   : > { %v1996_v61 = vpop.f32.mrf.mxu0 }
 0x91a   : > { %v2007_v5 = vadd.f32 %v1996_v61, %v5484_v37 }
 0x91c   : > { %v6332_v4 = vadd.f32 %v5083_v2, %v2007_v5 }
 0x91e   : > { %v2025_v22 = vsel %vm7644_vm3, %v6332_v4, 0.0 }
 0x91f   : > { %2026 = vadd.xlane.f32.xlu1 %v2025_v22 }
 0x939   : > { %v1999_v24 = vpop.f32.mrf.mxu0 }
 0x93a   : > { %v2008_v21 = vadd.f32 %v1999_v24, %v5491_v43 }
 0x93c   : > { %v6337_v45 = vadd.f32 %v5083_v2, %v2008_v21 }
 0x93e   : > { %v2028_v29 = vsel %vm7644_vm3, %v6337_v45, 0.0 }
 0x93f   : > { %2029 = vadd.xlane.f32.xlu0 %v2028_v29 }
 0x941   : > { %v2002_v40 = vpop.f32.mrf.mxu0 }
 0x942   : > { %v2009_v7 = vadd.f32 %v2002_v40, %v5488_v42 }
 0x944   : > { %v6350_v1 = vadd.f32 %v5083_v2, %v2009_v7 }
 0x946   : > { %v2031_v57 = vsel %vm7643_vm15, %v6350_v1, 0.0 }
 0x94e   : > { %v2021_v11 = vpop.xlane.xlu2 %2020 }
 0x94f   : > { %v2034_v30 = vmul.f32 %v2021_v11, %v5493_v50 }
 0x951   : > { %v6343_v37 = vsub.f32 %v6322_v60, %v2034_v30 }
 0x953   : > { %v2044_v55 = vmul.f32 %v6343_v37, %v6343_v37 }
 0x955   : > { %v2049_v43 = vsel %vm7644_vm3, %v2044_v55, 0.0 }
 0x956   : > { %2050 = vadd.xlane.f32.xlu2 %v2049_v43  ;;  %v2024_v41 = vpop.xlane.xlu0 %2023 }
 0x957   : > { %v2035_v49 = vmul.f32 %v2024_v41, %v5493_v50 }
 0x959   : > { %v6353_v53 = vsub.f32 %v6327_v31, %v2035_v49 }
 0x95b   : > { %v2045_v34 = vmul.f32 %v6353_v53, %v6353_v53 }
 0x95d   : > { %v2052_v23 = vsel %vm7644_vm3, %v2045_v34, 0.0 }
 0x95e   : > { %2032 = vadd.xlane.f32.xlu2 %v2031_v57  ;;  %2053 = vadd.xlane.f32.xlu1 %v2052_v23 }
 0x992   : > { %v2027_v42 = vpop.xlane.xlu1 %2026 }
 0x993   : > { %v2036_v17 = vmul.f32 %v2027_v42, %v5493_v50 }
 0x995   : > { %v6362_v44 = vsub.f32 %v6332_v4, %v2036_v17 }
 0x997   : > { %v2046_v26 = vmul.f32 %v6362_v44, %v6362_v44 }
 0x999   : > { %v2055_v14 = vsel %vm7644_vm3, %v2046_v26, 0.0 }
 0x99a   : > { %2056 = vadd.xlane.f32.xlu0 %v2055_v14 }
 0x9b2   : > { %v2030_v13 = vpop.xlane.xlu0 %2029 }
 0x9b3   : > { %v2037_v35 = vmul.f32 %v2030_v13, %v5493_v50 }
 0x9b5   : > { %v6369_v25 = vsub.f32 %v6337_v45, %v2037_v35 }
 0x9b7   : > { %v2047_v28 = vmul.f32 %v6369_v25, %v6369_v25 }
 0x9b9   : > { %v2058_v47 = vsel %vm7644_vm3, %v2047_v28, 0.0 }
 0x9ba   : > { %2059 = vadd.xlane.f32.xlu1 %v2058_v47 }
 0x9c9   : > { %v2051_v38 = vpop.xlane.xlu2 %2050 }
 0x9ca   : > { %v2064_v54 = vmul.f32 %v2051_v38, %v5493_v50 }
 0x9cc   : > { %v2069_v6 = vadd.f32 1e-06, %v2064_v54 }
 0x9ce   : > { %5207 = vrsqrt.f32 %v2069_v6  ;;  %vm2080_vm10 = vweird.f32 %v2069_v6 }
 0x9d1   : > { %v2033_v0 = vpop.xlane.xlu2 %2032  ;;  %v2054_v18 = vpop.xlane.xlu1 %2053 }
 0x9d2   : > { %v2038_v3 = vmul.f32 %v2033_v0, %v5493_v50  ;;  %v2065_v36 = vmul.f32 %v2054_v18, %v5493_v50 }
 0x9d4   : > { %v5208_v16 = vpop.eup %5207  ;;  %v6390_v33 = vsub.f32 %v6350_v1, %v2038_v3  ;;  %v2070_v46 = vadd.f32 1e-06, %v2065_v36 }
 0x9d5   : > { %v2075_v15 = vmul.f32 %v5208_v16, %v2069_v6  ;;  %vm2081_vm12 = vweird.f32 %v5208_v16 }
 0x9d6   : > { %5209 = vrsqrt.f32 %v2070_v46  ;;  %v2048_v52 = vmul.f32 %v6390_v33, %v6390_v33  ;;  %vm2082_vm13 = vmor %vm2080_vm10, %vm2081_vm12  ;;  %vm2090_vm6 = vweird.f32 %v2070_v46 }
 0x9d7   : > { %v2076_v32 = vmul.f32 %v5208_v16, %v2075_v15  ;;  %v2409_v15 = vld [vmem:[%s7639_s1 + $0x120] sm:$0xff] }
 0x9d8   : > { %v2061_v63 = vsel %vm7643_vm15, %v2048_v52, 0.0  ;;  %2412 = vmatpush.msra.mxu3 %v2409_v15  ;;  %v2408_v52 = vld [vmem:[%s7639_s1 + $0x118] sm:$0xff] }
 0x9d9   : > { %v2077_v12 = vmul.f32 0.5, %v2076_v32  ;;  %2062 = vadd.xlane.f32.xlu2 %v2061_v63  ;;  %v6433_v63 = vld [vmem:[%s7640_s2 + $0x7] ss:$0 sm:$0xff] }
 0x9da   : > { %2413 = vmatpush.msra.mxu3 %v2408_v52 }
 0x9db   : > { %v2078_v39 = vsub.f32 1.5, %v2077_v12  ;;  %v2407_v12 = vld [vmem:[%s7639_s1 + $0x110] sm:$0xff] }
 0x9dc   : > { %v5210_v27 = vpop.eup %5209  ;;  %2414 = vmatpush.msra.mxu3 %v2407_v12 }
 0x9dd   : > { %v2079_v59 = vmul.f32 %v5208_v16, %v2078_v39  ;;  %v2085_v2 = vmul.f32 %v5210_v27, %v2070_v46  ;;  %vm2091_vm14 = vweird.f32 %v5210_v27 }
 0x9de   : > { %vm2092_vm7 = vmor %vm2090_vm6, %vm2091_vm14 }
 0x9df   : > { %v2083_v20 = vsel %vm2082_vm13, %v5208_v16, %v2079_v59  ;;  %v2086_v8 = vmul.f32 %v5210_v27, %v2085_v2  ;;  %v2406_v2 = vld [vmem:[%s7639_s1 + $0x108] sm:$0xff] }
 0x9e0   : > { %v2124_v56 = vmul.f32 %v2083_v20, %v6343_v37  ;;  %2415 = vmatpush.msra.mxu3 %v2406_v2 }
 0x9e1   : > { %v2087_v62 = vmul.f32 0.5, %v2086_v8 }
 0x9e2   : > { %v2130_v61 = vmul.f32 %v6398_v19, %v2124_v56  ;;  %v2405_v56 = vld [vmem:[%s7639_s1 + $0x100] sm:$0xff] }
 0x9e3   : > { %v2088_v5 = vsub.f32 1.5, %v2087_v62  ;;  %2416 = vmatpush.msra.mxu3 %v2405_v56 }
 0x9e4   : > { %v2136_v22 = vadd.f32 %v6404_v58, %v2130_v61  ;;  %v2404_v61 = vld [vmem:[%s7639_s1 + $0xf8] sm:$0xff] }
 0x9e5   : > { %v2089_v24 = vmul.f32 %v5210_v27, %v2088_v5  ;;  %2417 = vmatpush.msra.mxu3 %v2404_v61 }
 0x9e6   : > { %4848 = vmatmul.msk.f32.vlgmr.msra.gmra.mxu1 %vm7644_vm3, %v2136_v22 }
 0x9e7   : > { %v2093_v21 = vsel %vm2092_vm7, %v5210_v27, %v2089_v24 }
 0x9e8   : > { %v2125_v29 = vmul.f32 %v2093_v21, %v6353_v53 }
 0x9ea   : > { %v2131_v11 = vmul.f32 %v6398_v19, %v2125_v29 }
 0x9ec   : > { %v2137_v30 = vadd.f32 %v6404_v58, %v2131_v11  ;;  %v2401_v11 = vld [vmem:[%s7639_s1 + $0xe0] sm:$0xff] }
 0x9ee   : > { %4849 = vmatmul.msk.f32.gmra.mxu1 %vm7644_vm3, %v2137_v30 }
 0xa0d   : > { %v2057_v37 = vpop.xlane.xlu0 %2056 }
 0xa0e   : > { %v2066_v40 = vmul.f32 %v2057_v37, %v5493_v50  ;;  %v2400_v37 = vld [vmem:[%s7639_s1 + $0xd8] sm:$0xff] }
 0xa10   : > { %v2071_v55 = vadd.f32 1e-06, %v2066_v40 }
 0xa12   : > { %5211 = vrsqrt.f32 %v2071_v55  ;;  %vm2100_vm12 = vweird.f32 %v2071_v55 }
 0xa18   : > { %v5212_v7 = vpop.eup %5211 }
 0xa19   : > { %v2095_v43 = vmul.f32 %v5212_v7, %v2071_v55  ;;  %vm2101_vm8 = vweird.f32 %v5212_v7  ;;  %v2399_v55 = vld [vmem:[%s7639_s1 + $0xd0] sm:$0xff] }
 0xa1a   : > { %vm2102_vm10 = vmor %vm2100_vm12, %vm2101_vm8 }
 0xa1b   : > { %v2096_v41 = vmul.f32 %v5212_v7, %v2095_v43  ;;  %v2398_v43 = vld [vmem:[%s7639_s1 + $0xc8] sm:$0xff] }
 0xa1d   : > { %v2097_v49 = vmul.f32 0.5, %v2096_v41 }
 0xa1f   : > { %v2098_v34 = vsub.f32 1.5, %v2097_v49 }
 0xa21   : > { %v2099_v57 = vmul.f32 %v5212_v7, %v2098_v34 }
 0xa23   : > { %v2103_v53 = vsel %vm2102_vm10, %v5212_v7, %v2099_v57  ;;  %v2397_v57 = vld [vmem:[%s7639_s1 + $0xc0] sm:$0xff] }
 0xa24   : > { %v2126_v23 = vmul.f32 %v2103_v53, %v6362_v44 }
 0xa26   : > { %v2132_v42 = vmul.f32 %v6398_v19, %v2126_v23  ;;  %v2396_v23 = vld [vmem:[%s7639_s1 + $0xb8] sm:$0xff] }
 0xa28   : > { %v2138_v17 = vadd.f32 %v6404_v58, %v2132_v42 }
 0xa2a   : > { %4850 = vmatmul.msk.f32.gmra.mxu1 %vm7644_vm3, %v2138_v17 }
 0xa2d   : > { %v2060_v26 = vpop.xlane.xlu1 %2059 }
 0xa2e   : > { %v2067_v14 = vmul.f32 %v2060_v26, %v5493_v50 }
 0xa30   : > { %v2072_v13 = vadd.f32 1e-06, %v2067_v14  ;;  %v2395_v14 = vld [vmem:[%s7639_s1 + $0xb0] sm:$0xff] }
 0xa32   : > { %5213 = vrsqrt.f32 %v2072_v13  ;;  %vm2110_vm14 = vweird.f32 %v2072_v13 }
 0xa38   : > { %v5214_v35 = vpop.eup %5213 }
 0xa39   : > { %v2105_v28 = vmul.f32 %v5214_v35, %v2072_v13  ;;  %vm2111_vm13 = vweird.f32 %v5214_v35  ;;  %v2394_v13 = vld [vmem:[%s7639_s1 + $0xa8] sm:$0xff] }
 0xa3a   : > { %vm2112_vm6 = vmor %vm2110_vm14, %vm2111_vm13 }
 0xa3b   : > { %v2106_v47 = vmul.f32 %v5214_v35, %v2105_v28 }
 0xa3d   : > { %v2107_v9 = vmul.f32 0.5, %v2106_v47 }
 0xa3f   : > { %v2108_v10 = vsub.f32 1.5, %v2107_v9 }
 0xa41   : > { %v2109_v48 = vmul.f32 %v5214_v35, %v2108_v10 }
 0xa43   : > { %v2113_v44 = vsel %vm2112_vm6, %v5214_v35, %v2109_v48 }
 0xa44   : > { %v2127_v51 = vmul.f32 %v2113_v44, %v6369_v25 }
 0xa46   : > { %v2133_v38 = vmul.f32 %v6398_v19, %v2127_v51 }
 0xa48   : > { %v2139_v54 = vadd.f32 %v6404_v58, %v2133_v38 }
 0xa4a   : > { %4851 = vmatmul.msk.f32.gmra.mxu1 %vm7644_vm3, %v2139_v54 }
 0xa4c   : > { %v2063_v6 = vpop.xlane.xlu2 %2062 }
 0xa4d   : > { %v2068_v0 = vmul.f32 %v2063_v6, %v5493_v50 }
 0xa4f   : > { %v2073_v18 = vadd.f32 1e-06, %v2068_v0 }
 0xa51   : > { %5215 = vrsqrt.f32 %v2073_v18  ;;  %vm2120_vm8 = vweird.f32 %v2073_v18 }
 0xa57   : > { %v5216_v3 = vpop.eup %5215 }
 0xa58   : > { %v2115_v36 = vmul.f32 %v5216_v3, %v2073_v18  ;;  %vm2121_vm7 = vweird.f32 %v5216_v3 }
 0xa59   : > { %vm2122_vm12 = vmor %vm2120_vm8, %vm2121_vm7 }
 0xa5a   : > { %v2116_v16 = vmul.f32 %v5216_v3, %v2115_v36 }
 0xa5c   : > { %v2117_v46 = vmul.f32 0.5, %v2116_v16 }
 0xa5e   : > { %v2118_v25 = vsub.f32 1.5, %v2117_v46 }
 0xa60   : > { %v2119_v32 = vmul.f32 %v5216_v3, %v2118_v25 }
 0xa62   : > { %v2123_v39 = vsel %vm2122_vm12, %v5216_v3, %v2119_v32 }
 0xa63   : > { %v2179_v27 = vpop.f32.mrf.mxu1  ;;  %v2128_v59 = vmul.f32 %v2123_v39, %v6390_v33 }
 0xa64   : > { %v6443_v20 = vadd.f32 %v6433_v63, %v2179_v27 }
 0xa65   : > { %v2134_v8 = vmul.f32 %v6398_v19, %v2128_v59  ;;  %v2403_v19 = vld [vmem:[%s7639_s1 + $0xf0] sm:$0xff] }
 0xa66   : > { %v6450_v62 = vmul.f32 0.70710677, %v6443_v20  ;;  %2418 = vmatpush.msra.mxu3 %v2403_v19 }
 0xa67   : > { %v2140_v33 = vadd.f32 %v6404_v58, %v2134_v8  ;;  %v2402_v58 = vld [vmem:[%s7639_s1 + $0xe8] sm:$0xff] }
 0xa68   : > { %v2199_v5 = vand.u32 2147483647, %v6450_v62  ;;  %2419 = vmatpush.msra.mxu3 %v2402_v58 }
 0xa69   : > { %4852 = vmatmul.msk.f32.gmra.mxu1 %vm7644_vm3, %v2140_v33 }
 0xa6a   : > { %v2204_v22 = vmul.f32 0.3275911, %v2199_v5  ;;  %2420 = vmatpush.msra.mxu3 %v2401_v11  ;;  %v2334_v48 = vsub.f32 0.0, %v2199_v5 }
 0xa6b   : > { %v2182_v24 = vpop.f32.mrf.mxu1 }
 0xa6c   : > { %v2209_v21 = vadd.f32 1.0, %v2204_v22  ;;  %v6465_v29 = vadd.f32 %v6433_v63, %v2182_v24  ;;  %2421 = vmatpush.msra.mxu3 %v2400_v37  ;;  %v2339_v0 = vmul.f32 %v2334_v48, %v2199_v5 }
 0xa6e   : > { %5217 = vrcp.f32 %v2209_v21  ;;  %v6471_v30 = vmul.f32 0.70710677, %v6465_v29  ;;  %2422 = vmatpush.msra.mxu3 %v2399_v55  ;;  %v2225_v42 = vand.u32 2147483648, %v2209_v21  ;;  %v2223_v26 = vand.u32 2147483647, %v2209_v21 }
 0xa6f   : > { %vm2219_vm13 = vweird.f32 %v2209_v21  ;;  %v2344_v25 = vmul.f32 1.442695, %v2339_v0 }
 0xa70   : > { %v2200_v40 = vand.u32 2147483647, %v6471_v30  ;;  %2423 = vmatpush.msra.mxu3 %v2398_v43  ;;  %v2226_v28 = vor.u32 1.1754944e-38, %v2225_v42  ;;  %vm2224_vm6 = vcmp.eq.f32.partialorder %v2223_v26, 8.507059e+37 }
 0xa72   : > { %v2205_v7 = vmul.f32 0.3275911, %v2200_v40  ;;  %2424 = vmatpush.msra.mxu3 %v2397_v57  ;;  %v2335_v12 = vsub.f32 0.0, %v2200_v40 }
 0xa74   : > { %v5218_v41 = vpop.eup %5217  ;;  %v2210_v34 = vadd.f32 1.0, %v2205_v7  ;;  %2425 = vmatpush.msra.mxu3 %v2396_v23  ;;  %v2340_v56 = vmul.f32 %v2335_v12, %v2200_v40 }
 0xa75   : > { %v2215_v49 = vmul.f32 %v5218_v41, %v2209_v21  ;;  %vm2220_vm10 = vweird.f32 %v5218_v41 }
 0xa76   : > { %5219 = vrcp.f32 %v2210_v34  ;;  %2426 = vmatpush.msra.mxu3 %v2395_v14  ;;  %vm2221_vm14 = vmor %vm2219_vm13, %vm2220_vm10  ;;  %v2240_v6 = vand.u32 2147483648, %v2210_v34  ;;  %v2238_v3 = vand.u32 2147483647, %v2210_v34  ;;  %vm2234_vm8 = vweird.f32 %v2210_v34 }
 0xa77   : > { %v2216_v53 = vsub.f32 1.0, %v2215_v49  ;;  %5221 = vpow2.f32 %v2344_v25  ;;  %v2346_v22 = vmul.f32 1.442695, %v2340_v56  ;;  %vm2364_vm13 = vcmp.ge.f32.partialorder %v6450_v62, 0.0 }
 0xa78   : > { %2427 = vmatpush.msra.mxu3 %v2394_v13  ;;  %v2241_v15 = vor.u32 1.1754944e-38, %v2240_v6  ;;  %vm2239_vm10 = vcmp.eq.f32.partialorder %v2238_v3, 8.507059e+37  ;;  %v2379_v49 = vmul.f32 0.5, %v6443_v20  ;;  %v2380_v14 = vmul.f32 0.5, %v6465_v29 }
 0xa79   : > { %v2217_v17 = vmul.f32 %v5218_v41, %v2216_v53  ;;  %5223 = vpow2.f32 %v2346_v22 }
 0xa7b   : > { %v2218_v35 = vadd.f32 %v5218_v41, %v2217_v17 }
 0xa7c   : > { %v5220_v47 = vpop.eup %5219 }
 0xa7d   : > { %v2222_v9 = vsel %vm2221_vm14, %v5218_v41, %v2218_v35  ;;  %v2230_v44 = vmul.f32 %v5220_v47, %v2210_v34  ;;  %vm2235_vm7 = vweird.f32 %v5220_v47  ;;  %v5222_v24 = vpop.eup %5221  ;;  %vm2365_vm14 = vcmp.ge.f32.partialorder %v6471_v30, 0.0 }
 0xa7e   : > { %v2227_v10 = vsel %vm2224_vm6, %v2226_v28, %v2222_v9  ;;  %vm2236_vm12 = vmor %vm2234_vm8, %vm2235_vm7 }
 0xa7f   : > { %v2289_v51 = vmul.f32 1.0614054, %v2227_v10  ;;  %v2231_v38 = vsub.f32 1.0, %v2230_v44  ;;  %v5224_v57 = vpop.eup %5223 }
 0xa81   : > { %v4853_v54 = vadd.f32 -1.4531521, %v2289_v51  ;;  %v2232_v18 = vmul.f32 %v5220_v47, %v2231_v38 }
 0xa83   : > { %v2299_v36 = vmul.f32 %v4853_v54, %v2227_v10  ;;  %v2233_v16 = vadd.f32 %v5220_v47, %v2232_v18 }
 0xa85   : > { %v2304_v46 = vadd.f32 1.4214138, %v2299_v36  ;;  %v2237_v52 = vsel %vm2236_vm12, %v5220_v47, %v2233_v16 }
 0xa86   : > { %v2242_v39 = vsel %vm2239_vm10, %v2241_v15, %v2237_v52 }
 0xa87   : > { %v2309_v32 = vmul.f32 %v2304_v46, %v2227_v10  ;;  %v2290_v27 = vmul.f32 1.0614054, %v2242_v39 }
 0xa89   : > { %v4858_v59 = vadd.f32 -0.28449672, %v2309_v32  ;;  %v4854_v2 = vadd.f32 -1.4531521, %v2290_v27 }
 0xa8b   : > { %v2319_v8 = vmul.f32 %v4858_v59, %v2227_v10  ;;  %v2300_v33 = vmul.f32 %v4854_v2, %v2242_v39 }
 0xa8d   : > { %v2324_v61 = vadd.f32 0.2548296, %v2319_v8  ;;  %v2305_v5 = vadd.f32 1.4214138, %v2300_v33 }
 0xa8f   : > { %v2329_v19 = vmul.f32 %v2324_v61, %v2227_v10  ;;  %v2310_v58 = vmul.f32 %v2305_v5, %v2242_v39 }
 0xa91   : > { %v2354_v21 = vmul.f32 %v5222_v24, %v2329_v19  ;;  %v4859_v11 = vadd.f32 -0.28449672, %v2310_v58 }
 0xa93   : > { %v2359_v37 = vsub.f32 1.0, %v2354_v21  ;;  %v2320_v55 = vmul.f32 %v4859_v11, %v2242_v39 }
 0xa95   : > { %v2369_v7 = vsub.f32 0.0, %v2359_v37  ;;  %v2325_v43 = vadd.f32 0.2548296, %v2320_v55 }
 0xa97   : > { %v2374_v41 = vsel %vm2364_vm13, %v2359_v37, %v2369_v7  ;;  %v2330_v34 = vmul.f32 %v2325_v43, %v2242_v39 }
 0xa98   : > { %v2384_v40 = vadd.f32 1.0, %v2374_v41 }
 0xa99   : > { %v2355_v23 = vmul.f32 %v5224_v57, %v2330_v34 }
 0xa9a   : > { %v2389_v53 = vmul.f32 %v2384_v40, %v2379_v49 }
 0xa9b   : > { %v2360_v42 = vsub.f32 1.0, %v2355_v23 }
 0xa9c   : > { %2428 = vmatmul.f32.vlgmr.msra.gmra.mxu3 %v2389_v53 }
 0xa9d   : > { %v2370_v17 = vsub.f32 0.0, %v2360_v42 }
 0xa9f   : > { %v2375_v26 = vsel %vm2365_vm14, %v2360_v42, %v2370_v17 }
 0xaa0   : > { %v2385_v13 = vadd.f32 1.0, %v2375_v26 }
 0xaa2   : > { %v2390_v35 = vmul.f32 %v2385_v13, %v2380_v14 }
 0xaa4   : > { %2431 = vmatmul.f32.gmra.mxu3 %v2390_v35 }
 0xaa7   : > { %v2185_v62 = vpop.f32.mrf.mxu1 }
 0xaa8   : > { %v2186_v28 = vadd.f32 %v6433_v63, %v2185_v62 }
 0xaaa   : > { %v2196_v20 = vmul.f32 0.70710677, %v2186_v28  ;;  %v2381_v7 = vmul.f32 0.5, %v2186_v28 }
 0xaac   : > { %v2201_v47 = vand.u32 2147483647, %v2196_v20  ;;  %vm2366_vm10 = vcmp.ge.f32.partialorder %v2196_v20, 0.0 }
 0xaae   : > { %v2206_v9 = vmul.f32 0.3275911, %v2201_v47  ;;  %v2336_v18 = vsub.f32 0.0, %v2201_v47 }
 0xab0   : > { %v2211_v10 = vadd.f32 1.0, %v2206_v9  ;;  %v2341_v46 = vmul.f32 %v2336_v18, %v2201_v47 }
 0xab2   : > { %5225 = vrcp.f32 %v2211_v10  ;;  %v2255_v38 = vand.u32 2147483648, %v2211_v10  ;;  %v2253_v30 = vand.u32 2147483647, %v2211_v10  ;;  %vm2249_vm7 = vweird.f32 %v2211_v10 }
 0xab3   : > { %v2348_v12 = vmul.f32 1.442695, %v2341_v46 }
 0xab4   : > { %v2256_v6 = vor.u32 1.1754944e-38, %v2255_v38  ;;  %vm2254_vm12 = vcmp.eq.f32.partialorder %v2253_v30, 8.507059e+37 }
 0xab5   : > { %5227 = vpow2.f32 %v2348_v12 }
 0xab8   : > { %v5226_v48 = vpop.eup %5225 }
 0xab9   : > { %v2245_v44 = vmul.f32 %v5226_v48, %v2211_v10  ;;  %vm2250_vm6 = vweird.f32 %v5226_v48 }
 0xaba   : > { %vm2251_vm8 = vmor %vm2249_vm7, %vm2250_vm6 }
 0xabb   : > { %v2246_v51 = vsub.f32 1.0, %v2245_v44  ;;  %v5228_v19 = vpop.eup %5227 }
 0xabd   : > { %v2247_v54 = vmul.f32 %v5226_v48, %v2246_v51 }
 0xabf   : > { %v2248_v29 = vadd.f32 %v5226_v48, %v2247_v54 }
 0xac1   : > { %v2252_v0 = vsel %vm2251_vm8, %v5226_v48, %v2248_v29 }
 0xac2   : > { %v2257_v3 = vsel %vm2254_vm12, %v2256_v6, %v2252_v0 }
 0xac3   : > { %v2291_v36 = vmul.f32 1.0614054, %v2257_v3 }
 0xac5   : > { %v4855_v16 = vadd.f32 -1.4531521, %v2291_v36 }
 0xac7   : > { %v2188_v15 = vpop.f32.mrf.mxu1  ;;  %v2301_v25 = vmul.f32 %v4855_v16, %v2257_v3 }
 0xac8   : > { %v6501_v52 = vadd.f32 %v6433_v63, %v2188_v15 }
 0xac9   : > { %v2306_v32 = vadd.f32 1.4214138, %v2301_v25 }
 0xaca   : > { %v6504_v39 = vmul.f32 0.70710677, %v6501_v52  ;;  %v2382_v15 = vmul.f32 0.5, %v6501_v52 }
 0xacb   : > { %v2311_v27 = vmul.f32 %v2306_v32, %v2257_v3 }
 0xacc   : > { %v2202_v59 = vand.u32 2147483647, %v6504_v39  ;;  %vm2367_vm8 = vcmp.ge.f32.partialorder %v6504_v39, 0.0 }
 0xacd   : > { %v4860_v2 = vadd.f32 -0.28449672, %v2311_v27 }
 0xace   : > { %v2207_v8 = vmul.f32 0.3275911, %v2202_v59  ;;  %v2337_v42 = vsub.f32 0.0, %v2202_v59 }
 0xacf   : > { %v2321_v56 = vmul.f32 %v4860_v2, %v2257_v3 }
 0xad0   : > { %v2212_v33 = vadd.f32 1.0, %v2207_v8  ;;  %v2342_v13 = vmul.f32 %v2337_v42, %v2202_v59 }
 0xad1   : > { %v2326_v61 = vadd.f32 0.2548296, %v2321_v56 }
 0xad2   : > { %5229 = vrcp.f32 %v2212_v33  ;;  %v2270_v41 = vand.u32 2147483648, %v2212_v33  ;;  %v2268_v40 = vand.u32 2147483647, %v2212_v33  ;;  %vm2264_vm14 = vweird.f32 %v2212_v33 }
 0xad3   : > { %v2331_v5 = vmul.f32 %v2326_v61, %v2257_v3  ;;  %v2350_v47 = vmul.f32 1.442695, %v2342_v13 }
 0xad4   : > { %v2271_v53 = vor.u32 1.1754944e-38, %v2270_v41  ;;  %vm2269_vm7 = vcmp.eq.f32.partialorder %v2268_v40, 8.507059e+37 }
 0xad5   : > { %v2356_v22 = vmul.f32 %v5228_v19, %v2331_v5  ;;  %5231 = vpow2.f32 %v2350_v47 }
 0xad7   : > { %v2361_v24 = vsub.f32 1.0, %v2356_v22 }
 0xad8   : > { %v5230_v58 = vpop.eup %5229 }
 0xad9   : > { %v2260_v21 = vmul.f32 %v5230_v58, %v2212_v33  ;;  %v2371_v11 = vsub.f32 0.0, %v2361_v24  ;;  %vm2265_vm13 = vweird.f32 %v5230_v58 }
 0xada   : > { %vm2266_vm6 = vmor %vm2264_vm14, %vm2265_vm13 }
 0xadb   : > { %v2261_v37 = vsub.f32 1.0, %v2260_v21  ;;  %v2376_v55 = vsel %vm2366_vm10, %v2361_v24, %v2371_v11  ;;  %v5232_v6 = vpop.eup %5231 }
 0xadc   : > { %v2386_v43 = vadd.f32 1.0, %v2376_v55 }
 0xadd   : > { %v2262_v49 = vmul.f32 %v5230_v58, %v2261_v37 }
 0xade   : > { %v2391_v34 = vmul.f32 %v2386_v43, %v2381_v7 }
 0xadf   : > { %v2263_v57 = vadd.f32 %v5230_v58, %v2262_v49 }
 0xae0   : > { %2434 = vmatmul.f32.gmra.mxu3 %v2391_v34 }
 0xae1   : > { %v2267_v23 = vsel %vm2266_vm6, %v5230_v58, %v2263_v57 }
 0xae2   : > { %v2272_v17 = vsel %vm2269_vm7, %v2271_v53, %v2267_v23  ;;  %v5087_v53 = vld [vmem:[%s7640_s2 + $0x8] ss:$0 sm:$0xff] }
 0xae3   : > { %v2292_v26 = vmul.f32 1.0614054, %v2272_v17 }
 0xae5   : > { %v4856_v14 = vadd.f32 -1.4531521, %v2292_v26 }
 0xae6   : > { %v2191_v35 = vpop.f32.mrf.mxu1 }
 0xae7   : > { %v2302_v62 = vmul.f32 %v4856_v14, %v2272_v17  ;;  %v2192_v28 = vadd.f32 %v6433_v63, %v2191_v35 }
 0xae9   : > { %v2307_v20 = vadd.f32 1.4214138, %v2302_v62  ;;  %v2198_v9 = vmul.f32 0.70710677, %v2192_v28  ;;  %v2383_v34 = vmul.f32 0.5, %v2192_v28 }
 0xaeb   : > { %v2312_v10 = vmul.f32 %v2307_v20, %v2272_v17  ;;  %v2203_v48 = vand.u32 2147483647, %v2198_v9  ;;  %vm2368_vm6 = vcmp.ge.f32.partialorder %v2198_v9, 0.0 }
 0xaed   : > { %v4861_v44 = vadd.f32 -0.28449672, %v2312_v10  ;;  %v2208_v51 = vmul.f32 0.3275911, %v2203_v48  ;;  %v2338_v33 = vsub.f32 0.0, %v2203_v48 }
 0xaef   : > { %v2322_v38 = vmul.f32 %v4861_v44, %v2272_v17  ;;  %v2213_v54 = vadd.f32 1.0, %v2208_v51  ;;  %v2343_v19 = vmul.f32 %v2338_v33, %v2203_v48  ;;  %v2575_v33 = vld [vmem:[%s7639_s1 + $0x138] sm:$0xff] }
 0xaf1   : > { %v2327_v30 = vadd.f32 0.2548296, %v2322_v38  ;;  %5233 = vrcp.f32 %v2213_v54  ;;  %v2285_v32 = vand.u32 2147483648, %v2213_v54  ;;  %v2283_v27 = vand.u32 2147483647, %v2213_v54 }
 0xaf2   : > { %vm2279_vm10 = vweird.f32 %v2213_v54  ;;  %v2352_v24 = vmul.f32 1.442695, %v2343_v19 }
 0xaf3   : > { %v2332_v29 = vmul.f32 %v2327_v30, %v2272_v17  ;;  %v2286_v8 = vor.u32 1.1754944e-38, %v2285_v32  ;;  %vm2284_vm14 = vcmp.eq.f32.partialorder %v2283_v27, 8.507059e+37 }
 0xaf4   : > { %5235 = vpow2.f32 %v2352_v24 }
 0xaf5   : > { %v2357_v0 = vmul.f32 %v5232_v6, %v2332_v29 }
 0xaf7   : > { %v2362_v18 = vsub.f32 1.0, %v2357_v0  ;;  %v5234_v3 = vpop.eup %5233 }
 0xaf8   : > { %v2275_v36 = vmul.f32 %v5234_v3, %v2213_v54  ;;  %vm2280_vm12 = vweird.f32 %v5234_v3 }
 0xaf9   : > { %v2372_v16 = vsub.f32 0.0, %v2362_v18  ;;  %vm2281_vm13 = vmor %vm2279_vm10, %vm2280_vm12 }
 0xafa   : > { %v2276_v63 = vsub.f32 1.0, %v2275_v36  ;;  %v5236_v7 = vpop.eup %5235 }
 0xafb   : > { %v2377_v46 = vsel %vm2367_vm8, %v2362_v18, %v2372_v16 }
 0xafc   : > { %v2387_v25 = vadd.f32 1.0, %v2377_v46  ;;  %v2277_v12 = vmul.f32 %v5234_v3, %v2276_v63 }
 0xafe   : > { %v2392_v59 = vmul.f32 %v2387_v25, %v2382_v15  ;;  %v2278_v2 = vadd.f32 %v5234_v3, %v2277_v12 }
 0xb00   : > { %2437 = vmatmul.f32.gmra.mxu3 %v2392_v59  ;;  %v2282_v56 = vsel %vm2281_vm13, %v5234_v3, %v2278_v2 }
 0xb01   : > { %v2287_v61 = vsel %vm2284_vm14, %v2286_v8, %v2282_v56  ;;  %v2576_v56 = vld [vmem:[%s7639_s1 + $0x140] sm:$0xff] }
 0xb02   : > { %v2293_v39 = vmul.f32 1.0614054, %v2287_v61  ;;  %2606 = vmatpush.msrb.mxu2 %v2576_v56 }
 0xb04   : > { %v4857_v5 = vadd.f32 -1.4531521, %v2293_v39  ;;  %2607 = vmatpush.msrb.mxu2 %v2575_v33  ;;  %v2573_v39 = vld [vmem:[%s7639_s1 + $0x128] sm:$0xff] }
 0xb06   : > { %v2303_v22 = vmul.f32 %v4857_v5, %v2287_v61 }
 0xb08   : > { %v2308_v52 = vadd.f32 1.4214138, %v2303_v22 }
 0xb0a   : > { %v2313_v58 = vmul.f32 %v2308_v52, %v2287_v61 }
 0xb0c   : > { %v4862_v21 = vadd.f32 -0.28449672, %v2313_v58 }
 0xb0e   : > { %v2323_v11 = vmul.f32 %v4862_v21, %v2287_v61 }
 0xb10   : > { %v2328_v37 = vadd.f32 0.2548296, %v2323_v11 }
 0xb12   : > { %v2333_v55 = vmul.f32 %v2328_v37, %v2287_v61  ;;  %v2574_v61 = vld [vmem:[%s7639_s1 + $0x130] sm:$0xff] }
 0xb13   : > { %2608 = vmatpush.msrb.mxu2 %v2574_v61 }
 0xb14   : > { %v2358_v43 = vmul.f32 %v5236_v7, %v2333_v55 }
 0xb15   : > { %2609 = vmatpush.msrb.mxu2 %v2573_v39 }
 0xb16   : > { %v2363_v41 = vsub.f32 1.0, %v2358_v43 }
 0xb18   : > { %v2373_v49 = vsub.f32 0.0, %v2363_v41 }
 0xb1a   : > { %v2378_v40 = vsel %vm2368_vm6, %v2363_v41, %v2373_v49 }
 0xb1b   : > { %v2388_v57 = vadd.f32 1.0, %v2378_v40 }
 0xb1d   : > { %v2393_v23 = vmul.f32 %v2388_v57, %v2383_v34 }
 0xb1f   : > { %v2429_v42 = vpop.f32.mrf.mxu3  ;;  %2440 = vmatmul.f32.gmra.mxu3 %v2393_v23  ;;  %v6590_v23 = vld [vmem:[%s7640_s2 + $0x9] ss:$0 sm:$0xff] }
 0xb20   : > { %v2430_v17 = vadd.f32 %v5087_v53, %v2429_v42 }
 0xb22   : > { %v6514_v26 = vadd.f32 %v2430_v17, %v6322_v60 }
 0xb24   : > { %v2451_v14 = vsel %vm7644_vm3, %v6514_v26, 0.0 }
 0xb25   : > { %2452 = vadd.xlane.f32.xlu0 %v2451_v14 }
 0xb27   : > { %v2432_v13 = vpop.f32.mrf.mxu3 }
 0xb28   : > { %v2433_v35 = vadd.f32 %v5087_v53, %v2432_v13 }
 0xb2a   : > { %v6519_v62 = vadd.f32 %v2433_v35, %v6327_v31  ;;  %v6596_v35 = vld [vmem:[%s7640_s2 + $0xa] ss:$0 sm:$0xff] }
 0xb2c   : > { %v2454_v28 = vsel %vm7644_vm3, %v6519_v62, 0.0 }
 0xb2d   : > { %2455 = vadd.xlane.f32.xlu1 %v2454_v28 }
 0xb63   : > { %v2435_v20 = vpop.f32.mrf.mxu3 }
 0xb64   : > { %v2436_v47 = vadd.f32 %v5087_v53, %v2435_v20 }
 0xb66   : > { %v6524_v9 = vadd.f32 %v2436_v47, %v6332_v4 }
 0xb68   : > { %v2457_v60 = vsel %vm7644_vm3, %v6524_v9, 0.0 }
 0xb69   : > { %2458 = vadd.xlane.f32.xlu2 %v2457_v60 }
 0xb83   : > { %v2438_v10 = vpop.f32.mrf.mxu3 }
 0xb84   : > { %v2439_v48 = vadd.f32 %v5087_v53, %v2438_v10 }
 0xb86   : > { %v6529_v44 = vadd.f32 %v2439_v48, %v6337_v45 }
 0xb88   : > { %v2460_v31 = vsel %vm7644_vm3, %v6529_v44, 0.0 }
 0xb89   : > { %2461 = vadd.xlane.f32.xlu1 %v2460_v31 }
 0xb98   : > { %v2453_v51 = vpop.xlane.xlu0 %2452 }
 0xb99   : > { %v2466_v38 = vmul.f32 %v2453_v51, %v5493_v50 }
 0xb9b   : > { %v6535_v54 = vsub.f32 %v6514_v26, %v2466_v38 }
 0xb9d   : > { %v2476_v4 = vmul.f32 %v6535_v54, %v6535_v54 }
 0xb9f   : > { %v2481_v30 = vsel %vm7644_vm3, %v2476_v4, 0.0 }
 0xba0   : > { %2482 = vadd.xlane.f32.xlu0 %v2481_v30  ;;  %v2456_v29 = vpop.xlane.xlu1 %2455 }
 0xba1   : > { %v2467_v45 = vmul.f32 %v2456_v29, %v5493_v50 }
 0xba2   : > { %v2441_v6 = vpop.f32.mrf.mxu3 }
 0xba3   : > { %v2442_v0 = vadd.f32 %v5087_v53, %v2441_v6  ;;  %v6542_v18 = vsub.f32 %v6519_v62, %v2467_v45 }
 0xba5   : > { %v6545_v3 = vadd.f32 %v2442_v0, %v6350_v1  ;;  %v2477_v36 = vmul.f32 %v6542_v18, %v6542_v18 }
 0xba7   : > { %7654 = vst [vmem:[#allocation2_spill] sm:$0xff] %v6545_v3  ;;  %v2463_v16 = vsel %vm7643_vm15, %v6545_v3, 0.0  ;;  %v2484_v63 = vsel %vm7644_vm3, %v2477_v36, 0.0 }
 0xba8   : > { %2464 = vadd.xlane.f32.xlu0 %v2463_v16  ;;  %2485 = vadd.xlane.f32.xlu2 %v2484_v63 }
 0xbdc   : > { %v2459_v46 = vpop.xlane.xlu2 %2458 }
 0xbdd   : > { %v2468_v15 = vmul.f32 %v2459_v46, %v5493_v50 }
 0xbdf   : > { %v6554_v25 = vsub.f32 %v6524_v9, %v2468_v15 }
 0xbe1   : > { %v2478_v1 = vmul.f32 %v6554_v25, %v6554_v25 }
 0xbe3   : > { %v2487_v32 = vsel %vm7644_vm3, %v2478_v1, 0.0 }
 0xbe4   : > { %2488 = vadd.xlane.f32.xlu1 %v2487_v32 }
 0xbfc   : > { %v2462_v12 = vpop.xlane.xlu1 %2461 }
 0xbfd   : > { %v2469_v27 = vmul.f32 %v2462_v12, %v5493_v50 }
 0xbff   : > { %v6561_v59 = vsub.f32 %v6529_v44, %v2469_v27 }
 0xc01   : > { %v2479_v2 = vmul.f32 %v6561_v59, %v6561_v59 }
 0xc03   : > { %v2490_v8 = vsel %vm7644_vm3, %v2479_v2, 0.0 }
 0xc04   : > { %2491 = vadd.xlane.f32.xlu2 %v2490_v8 }
 0xc13   : > { %v2483_v5 = vpop.xlane.xlu0 %2482 }
 0xc14   : > { %v2496_v19 = vmul.f32 %v2483_v5, %v5493_v50 }
 0xc16   : > { %v2501_v22 = vadd.f32 1e-06, %v2496_v19 }
 0xc18   : > { %5237 = vrsqrt.f32 %v2501_v22  ;;  %vm2512_vm8 = vweird.f32 %v2501_v22 }
 0xc1b   : > { %v2465_v52 = vpop.xlane.xlu0 %2464  ;;  %v2486_v24 = vpop.xlane.xlu2 %2485 }
 0xc1c   : > { %v2470_v58 = vmul.f32 %v2465_v52, %v5493_v50  ;;  %v2497_v21 = vmul.f32 %v2486_v24, %v5493_v50 }
 0xc1e   : > { %v5238_v11 = vpop.eup %5237  ;;  %v6582_v37 = vsub.f32 %v6545_v3, %v2470_v58  ;;  %v2502_v7 = vadd.f32 1e-06, %v2497_v21 }
 0xc1f   : > { %v2507_v55 = vmul.f32 %v5238_v11, %v2501_v22  ;;  %vm2513_vm7 = vweird.f32 %v5238_v11 }
 0xc20   : > { %v2480_v43 = vmul.f32 %v6582_v37, %v6582_v37  ;;  %5239 = vrsqrt.f32 %v2502_v7  ;;  %vm2514_vm12 = vmor %vm2512_vm8, %vm2513_vm7  ;;  %vm2522_vm13 = vweird.f32 %v2502_v7 }
 0xc21   : > { %v2508_v41 = vmul.f32 %v5238_v11, %v2507_v55 }
 0xc22   : > { %v2493_v49 = vsel %vm7643_vm15, %v2480_v43, 0.0 }
 0xc23   : > { %v2509_v40 = vmul.f32 0.5, %v2508_v41  ;;  %2494 = vadd.xlane.f32.xlu0 %v2493_v49 }
 0xc25   : > { %v2510_v34 = vsub.f32 1.5, %v2509_v40  ;;  %v5090_v40 = vld [vmem:[%s7640_s2 + $0xb] ss:$0 sm:$0xff] }
 0xc26   : > { %v5240_v57 = vpop.eup %5239 }
 0xc27   : > { %v2511_v53 = vmul.f32 %v5238_v11, %v2510_v34  ;;  %v2517_v42 = vmul.f32 %v5240_v57, %v2502_v7  ;;  %vm2523_vm10 = vweird.f32 %v5240_v57 }
 0xc28   : > { %vm2524_vm14 = vmor %vm2522_vm13, %vm2523_vm10 }
 0xc29   : > { %v2515_v17 = vsel %vm2514_vm12, %v5238_v11, %v2511_v53  ;;  %v2518_v13 = vmul.f32 %v5240_v57, %v2517_v42 }
 0xc2a   : > { %v2556_v14 = vmul.f32 %v2515_v17, %v6535_v54 }
 0xc2b   : > { %v2519_v20 = vmul.f32 0.5, %v2518_v13 }
 0xc2c   : > { %v2562_v28 = vmul.f32 %v6590_v23, %v2556_v14 }
 0xc2d   : > { %v2520_v47 = vsub.f32 1.5, %v2519_v20 }
 0xc2e   : > { %v2568_v60 = vadd.f32 %v6596_v35, %v2562_v28 }
 0xc2f   : > { %v2521_v10 = vmul.f32 %v5240_v57, %v2520_v47 }
 0xc30   : > { %4863 = vmatmul.msk.f32.vlgmr.msrb.gmra.mxu2 %vm7644_vm3, %v2568_v60 }
 0xc31   : > { %v2525_v48 = vsel %vm2524_vm14, %v5240_v57, %v2521_v10 }
 0xc32   : > { %v2557_v31 = vmul.f32 %v2525_v48, %v6542_v18 }
 0xc34   : > { %v2563_v51 = vmul.f32 %v6590_v23, %v2557_v31 }
 0xc36   : > { %v2569_v38 = vadd.f32 %v6596_v35, %v2563_v51 }
 0xc38   : > { %4864 = vmatmul.msk.f32.gmra.mxu2 %vm7644_vm3, %v2569_v38 }
 0xc57   : > { %v2489_v54 = vpop.xlane.xlu1 %2488 }
 0xc58   : > { %v2498_v4 = vmul.f32 %v2489_v54, %v5493_v50 }
 0xc5a   : > { %v2503_v30 = vadd.f32 1e-06, %v2498_v4 }
 0xc5c   : > { %5241 = vrsqrt.f32 %v2503_v30  ;;  %vm2532_vm7 = vweird.f32 %v2503_v30 }
 0xc62   : > { %v5242_v29 = vpop.eup %5241 }
 0xc63   : > { %v2527_v45 = vmul.f32 %v5242_v29, %v2503_v30  ;;  %vm2533_vm6 = vweird.f32 %v5242_v29 }
 0xc64   : > { %vm2534_vm8 = vmor %vm2532_vm7, %vm2533_vm6 }
 0xc65   : > { %v2528_v6 = vmul.f32 %v5242_v29, %v2527_v45 }
 0xc67   : > { %v2529_v0 = vmul.f32 0.5, %v2528_v6 }
 0xc69   : > { %v2530_v36 = vsub.f32 1.5, %v2529_v0 }
 0xc6b   : > { %v2531_v16 = vmul.f32 %v5242_v29, %v2530_v36 }
 0xc6d   : > { %v2535_v18 = vsel %vm2534_vm8, %v5242_v29, %v2531_v16 }
 0xc6e   : > { %v2558_v63 = vmul.f32 %v2535_v18, %v6554_v25 }
 0xc70   : > { %v2564_v46 = vmul.f32 %v6590_v23, %v2558_v63 }
 0xc72   : > { %v2570_v15 = vadd.f32 %v6596_v35, %v2564_v46 }
 0xc74   : > { %4865 = vmatmul.msk.f32.gmra.mxu2 %vm7644_vm3, %v2570_v15 }
 0xc77   : > { %v2492_v1 = vpop.xlane.xlu2 %2491 }
 0xc78   : > { %v2499_v32 = vmul.f32 %v2492_v1, %v5493_v50 }
 0xc7a   : > { %v2504_v12 = vadd.f32 1e-06, %v2499_v32 }
 0xc7c   : > { %5243 = vrsqrt.f32 %v2504_v12  ;;  %vm2542_vm10 = vweird.f32 %v2504_v12 }
 0xc82   : > { %v5244_v27 = vpop.eup %5243 }
 0xc83   : > { %v2537_v2 = vmul.f32 %v5244_v27, %v2504_v12  ;;  %vm2543_vm12 = vweird.f32 %v5244_v27 }
 0xc84   : > { %vm2544_vm13 = vmor %vm2542_vm10, %vm2543_vm12 }
 0xc85   : > { %v2538_v8 = vmul.f32 %v5244_v27, %v2537_v2 }
 0xc87   : > { %v2539_v56 = vmul.f32 0.5, %v2538_v8 }
 0xc89   : > { %v2540_v33 = vsub.f32 1.5, %v2539_v56 }
 0xc8b   : > { %v2541_v61 = vmul.f32 %v5244_v27, %v2540_v33 }
 0xc8d   : > { %v2545_v25 = vsel %vm2544_vm13, %v5244_v27, %v2541_v61 }
 0xc8e   : > { %v2559_v39 = vmul.f32 %v2545_v25, %v6561_v59 }
 0xc90   : > { %v2565_v5 = vmul.f32 %v6590_v23, %v2559_v39 }
 0xc92   : > { %v2571_v19 = vadd.f32 %v6596_v35, %v2565_v5 }
 0xc94   : > { %4866 = vmatmul.msk.f32.gmra.mxu2 %vm7644_vm3, %v2571_v19 }
 0xc96   : > { %v2495_v22 = vpop.xlane.xlu0 %2494 }
 0xc97   : > { %v2500_v52 = vmul.f32 %v2495_v22, %v5493_v50 }
 0xc99   : > { %v2505_v24 = vadd.f32 1e-06, %v2500_v52 }
 0xc9b   : > { %5245 = vrsqrt.f32 %v2505_v24  ;;  %vm2552_vm6 = vweird.f32 %v2505_v24 }
 0xca1   : > { %v5246_v58 = vpop.eup %5245 }
 0xca2   : > { %v2547_v21 = vmul.f32 %v5246_v58, %v2505_v24  ;;  %vm2553_vm14 = vweird.f32 %v5246_v58 }
 0xca3   : > { %vm2554_vm7 = vmor %vm2552_vm6, %vm2553_vm14 }
 0xca4   : > { %v2548_v11 = vmul.f32 %v5246_v58, %v2547_v21 }
 0xca6   : > { %v2549_v55 = vmul.f32 0.5, %v2548_v11 }
 0xca8   : > { %v2550_v7 = vsub.f32 1.5, %v2549_v55 }
 0xcaa   : > { %v2551_v43 = vmul.f32 %v5246_v58, %v2550_v7 }
 0xcac   : > { %v2555_v59 = vsel %vm2554_vm7, %v5246_v58, %v2551_v43 }
 0xcad   : > { %v2560_v41 = vmul.f32 %v2555_v59, %v6582_v37 }
 0xcaf   : > { %v2566_v49 = vmul.f32 %v6590_v23, %v2560_v41 }
 0xcb1   : > { %v2572_v34 = vadd.f32 %v6596_v35, %v2566_v49 }
 0xcb3   : > { %v2611_v57 = vpop.f32.mrf.mxu2  ;;  %4867 = vmatmul.msk.f32.gmra.mxu2 %vm7644_vm3, %v2572_v34 }
 0xcb4   : > { %v6623_v53 = vadd.f32 %v5090_v40, %v2611_v57 }
 0xcb6   : > { %2793 = vrot.lane.b32.xlu2 %v6623_v53, %s5385_s8  ;;  %2799 = vrot.lane.b32.xlu0 %v6623_v53, %s5388_s11 }
 0xcbb   : > { %v2614_v37 = vpop.f32.mrf.mxu2 }
 0xcbc   : > { %v6629_v42 = vadd.f32 %v5090_v40, %v2614_v37 }
 0xcbe   : > { %2801 = vrot.lane.b32.xlu2 %v6629_v42, %s5388_s11  ;;  %2631 = vrot.lane.b32.xlu0 %v6629_v42, %s5384_s7  ;;  %v5044_v54 = vpack.i.bf16 %v6623_v53, %v6629_v42 }
 0xcc6   : > { %2795 = vrot.lane.b32.xlu2 %v6629_v42, %s5385_s8  ;;  %3139 = vrot.lane.b32.xlu0 %v6623_v53, %s5386_s9 }
 0xcce   : > { %3141 = vrot.lane.b32.xlu2 %v6629_v42, %s5386_s9  ;;  %2971 = vrot.lane.b32.xlu0 %v6629_v42, %s5390_s13 }
 0xcd6   : > { %3133 = vrot.lane.b32.xlu2 %v6623_v53, %s5387_s10 }
 0xcde   : > { %3135 = vrot.lane.b32.xlu2 %v6629_v42, %s5387_s10 }
 0xcf7   : > { %v2617_v23 = vpop.f32.mrf.mxu2 }
 0xcf8   : > { %v6647_v17 = vadd.f32 %v5090_v40, %v2617_v23 }
 0xcfa   : > { %2803 = vrot.lane.b32.xlu1 %v6647_v17, %s5388_s11  ;;  %3137 = vrot.lane.b32.xlu2 %v6647_v17, %s5387_s10  ;;  %v3350_v35 = vrot.slane %v6647_v17, 1 }
 0xcfb   : > { %3143 = vrot.lane.b32.xlu0 %v6647_v17, %s5386_s9 }
 0xd02   : > { %2629 = vrot.lane.b32.xlu1 %v6623_v53, %s5384_s7 }
 0xd03   : > { %2963 = vrot.lane.b32.xlu0 %v6623_v53, %s5391_s14 }
 0xd0a   : > { %2633 = vrot.lane.b32.xlu1 %v6647_v17, %s5384_s7 }
 0xd10   : > { %v2794_v38 = vpop.permute.xlu2 %2793 }
 0xd12   : > { %2969 = vrot.lane.b32.xlu1 %v6623_v53, %s5390_s13 }
 0xd17   : > { %v2620_v14 = vpop.f32.mrf.mxu2 }
 0xd18   : > { %v2621_v13 = vadd.f32 %v5090_v40, %v2620_v14  ;;  %v2802_v30 = vpop.permute.xlu2 %2801 }
 0xd1a   : > { %v3351_v28 = vrot.slane %v2621_v13, 1  ;;  %2797 = vrot.lane.b32.xlu1 %v6647_v17, %s5385_s8 }
 0xd1c   : > { %v6667_v20 = vsel %vm272_vm1, %v3350_v35, %v3351_v28 }
 0xd1d   : > { %3525 = vrot.lane.b32.xlu2 %v6667_v20, %s5388_s11 }
 0xd20   : > { %v2796_v6 = vpop.permute.xlu2 %2795 }
 0xd22   : > { %2973 = vrot.lane.b32.xlu1 %v6647_v17, %s5390_s13 }
 0xd25   : > { %2967 = vrot.lane.b32.xlu2 %v6647_v17, %s5391_s14 }
 0xd28   : > { %v2800_v31 = vpop.permute.xlu0 %2799  ;;  %v3142_v16 = vpop.permute.xlu2 %3141 }
 0xd30   : > { %v2632_v51 = vpop.permute.xlu0 %2631  ;;  %v3134_v1 = vpop.permute.xlu2 %3133 }
 0xd36   : > { %v2623_v47 = vpop.f32.mrf.mxu2 }
 0xd37   : > { %v2624_v60 = vadd.f32 %v5090_v40, %v2623_v47 }
 0xd38   : > { %v3140_v4 = vpop.permute.xlu0 %3139  ;;  %v3136_v12 = vpop.permute.xlu2 %3135 }
 0xd39   : > { %v6675_v10 = vrot.slane %v2624_v60, 1 }
 0xd3b   : > { %3359 = vrot.lane.b32.xlu0 %v6675_v10, %s5384_s7  ;;  %3529 = vrot.lane.b32.xlu1 %v6675_v10, %s5388_s11  ;;  %v6683_v48 = vsel %vm272_vm1, %v3351_v28, %v6675_v10 }
 0xd3c   : > { %3521 = vrot.lane.b32.xlu2 %v6683_v48, %s5385_s8  ;;  %v6744_v63 = vpack.i.bf16 %v6667_v20, %v6683_v48 }
 0xd40   : > { %v2972_v45 = vpop.permute.xlu0 %2971 }
 0xd43   : > { %3869 = vrot.lane.b32.xlu0 %v6675_v10, %s5386_s9  ;;  %2965 = vrot.lane.b32.xlu1 %v6629_v42, %s5391_s14 }
 0xd44   : > { %3867 = vrot.lane.b32.xlu2 %v6683_v48, %s5386_s9 }
 0xd4b   : > { %3519 = vrot.lane.b32.xlu1 %v6667_v20, %s5385_s8  ;;  %3527 = vrot.lane.b32.xlu0 %v6683_v48, %s5388_s11 }
 0xd4c   : > { %3859 = vrot.lane.b32.xlu2 %v6667_v20, %s5387_s10 }
 0xd53   : > { %3355 = vrot.lane.b32.xlu1 %v6667_v20, %s5384_s7  ;;  %3357 = vrot.lane.b32.xlu0 %v6683_v48, %s5384_s7  ;;  %s4751_s7 = sshll.u32 %s5429_s16, 1 }
 0xd54   : > { %3689 = vrot.lane.b32.xlu2 %v6667_v20, %s5391_s14  ;;  %v3138_v27 = vpop.permute.xlu2 %3137  ;;  %p202_p4 = scmp.lt.s32.totalorder %s4751_s7, 3 }
 0xd56   : > { %s7696_s7 = smov (!%p202_p4, %s4751_s7), 3 }
 0xd57   : > { %s4975_s16 = smul.u32 96, %s7696_s7 }
 0xd59   : > { %s7038_s11 = scalar_lea.vmem %s7641_s3, %s4975_s16 }
 0xd5b   : > { %3523 = vrot.lane.b32.xlu1 %v6675_v10, %s5385_s8  ;;  %3865 = vrot.lane.b32.xlu0 %v6667_v20, %s5386_s9 }
 0xd5c   : > { %5045 = vrot.lane.b32.xlu2 %v5044_v54, %s5389_s12 }
 0xd63   : > { %3699 = vrot.lane.b32.xlu1 %v6675_v10, %s5390_s13  ;;  %2922 = vrot.lane.b32.xlu0 %v6647_v17, %s5392_s17 }
 0xd64   : > { %3092 = vrot.lane.b32.xlu2 %v6647_v17, %s5393_s18 }
 0xd6b   : > { %3695 = vrot.lane.b32.xlu1 %v6667_v20, %s5390_s13  ;;  %3697 = vrot.lane.b32.xlu0 %v6683_v48, %s5390_s13 }
 0xd6c   : > { %v2804_v29 = vpop.permute.xlu1 %2803  ;;  %3648 = vrot.lane.b32.xlu2 %v6675_v10, %s5392_s17 }
 0xd6d   : > { %4878 = vmatpush.xpose.msk.msra.mxu2 %vm502_vm0, %v2804_v29  ;;  %v3144_v36 = vpop.permute.xlu0 %3143 }
 0xd71   : > { %4879 = vmatpush.xpose.msk.msra.mxu2 %vm502_vm0, %v2802_v30 }
 0xd73   : > { %5040 = vrot.lane.b32.xlu1 %v5044_v54, %s5392_s17  ;;  %2752 = vrot.lane.b32.xlu0 %v6647_v17, %s5389_s12 }
 0xd74   : > { %v2630_v0 = vpop.permute.xlu1 %2629  ;;  %3988 = vrot.lane.b32.xlu2 %v6675_v10, %s5394_s19 }
 0xd75   : > { %4880 = vmatpush.xpose.msk.msra.mxu2 %vm502_vm0, %v2800_v31  ;;  %v2964_v2 = vpop.permute.xlu0 %2963 }
 0xd77   : > { %v3526_v8 = vpop.permute.xlu2 %3525 }
 0xd78   : > { %4881 = vmatmul.msk.f32.vlgmr.msra.gmra.mxu2 %vm502_vm0, %v2794_v38 }
 0xd79   : > { %4898 = vmatpush.xpose.msk.msrb.mxu2 %vm502_vm0, %v3144_v36 }
 0xd7b   : > { %3262 = vrot.lane.b32.xlu1 %v6647_v17, %s5394_s19  ;;  %5050 = vrot.lane.b32.xlu0 %v5044_v54, %s5394_s19 }
 0xd7c   : > { %v2634_v18 = vpop.permute.xlu1 %2633 }
 0xd7d   : > { %4899 = vmatpush.xpose.msk.msrb.mxu2 %vm502_vm0, %v3142_v16  ;;  %4868 = vmatpush.xpose.msk.msrb.mxu0 %vm502_vm0, %v2634_v18 }
 0xd7f   : > { %v2968_v61 = vpop.permute.xlu2 %2967 }
 0xd80   : > { %4882 = vmatmul.msk.f32.gmra.mxu2 %vm502_vm0, %v2796_v6 }
 0xd81   : > { %4900 = vmatpush.xpose.msk.msrb.mxu2 %vm502_vm0, %v3140_v4  ;;  %4869 = vmatpush.xpose.msk.msrb.mxu0 %vm502_vm0, %v2632_v51 }
 0xd83   : > { %5060 = vrot.lane.b32.xlu1 %v6744_v63, %s5392_s17  ;;  %5055 = vrot.lane.b32.xlu0 %v5044_v54, %s5393_s18 }
 0xd84   : > { %v2970_v46 = vpop.permute.xlu1 %2969 }
 0xd85   : > { %4870 = vmatpush.xpose.msk.msrb.mxu0 %vm502_vm0, %v2630_v0 }
 0xd88   : > { %4871 = vmatmul.msk.f32.vlgmr.msrb.gmra.mxu0 %vm502_vm0, %v6623_v53 }
 0xd8b   : > { %5065 = vrot.lane.b32.xlu1 %v6744_v63, %s5389_s12  ;;  %3478 = vrot.lane.b32.xlu0 %v6675_v10, %s5389_s12 }
 0xd8c   : > { %v2798_v15 = vpop.permute.xlu1 %2797 }
 0xd8d   : > { %4883 = vmatmul.msk.f32.gmra.mxu2 %vm502_vm0, %v2798_v15 }
 0xd90   : > { %4872 = vmatmul.msk.f32.gmra.mxu0 %vm502_vm0, %v6629_v42 }
 0xd93   : > { %5070 = vrot.lane.b32.xlu0 %v6744_v63, %s5394_s19 }
 0xd94   : > { %v2974_v32 = vpop.permute.xlu1 %2973 }
 0xd95   : > { %4888 = vmatpush.xpose.msk.msra.mxu0 %vm502_vm0, %v2974_v32  ;;  %4901 = vmatmul.msk.f32.vlgmr.msrb.gmra.mxu2 %vm502_vm0, %v3134_v1 }
 0xd96   : > { %v3522_v5 = vpop.permute.xlu2 %3521 }
 0xd98   : > { %4873 = vmatmul.msk.f32.gmra.mxu0 %vm502_vm0, %v6647_v17 }
 0xd99   : > { %4889 = vmatpush.xpose.msk.msra.mxu0 %vm502_vm0, %v2972_v45 }
 0xd9d   : > { %4890 = vmatpush.xpose.msk.msra.mxu0 %vm502_vm0, %v2970_v46  ;;  %4902 = vmatmul.msk.f32.gmra.mxu2 %vm502_vm0, %v3136_v12 }
 0xd9e   : > { %v3868_v52 = vpop.permute.xlu2 %3867 }
 0xda0   : > { %4891 = vmatmul.msk.f32.vlgmr.msra.gmra.mxu0 %vm502_vm0, %v2964_v2 }
 0xda5   : > { %4903 = vmatmul.msk.f32.gmra.mxu2 %vm502_vm0, %v3138_v27 }
 0xda6   : > { %v3860_v21 = vpop.permute.xlu2 %3859 }
 0xdad   : > { %v3530_v56 = vpop.permute.xlu1 %3529  ;;  %v3360_v33 = vpop.permute.xlu0 %3359 }
 0xdae   : > { %4908 = vmatpush.xpose.msk.msrb.mxu0 %vm502_vm0, %v3360_v33  ;;  %4918 = vmatpush.xpose.msk.msra.mxu2 %vm502_vm0, %v3530_v56  ;;  %v3690_v59 = vpop.permute.xlu2 %3689 }
 0xdb5   : > { %v2966_v25 = vpop.permute.xlu1 %2965  ;;  %v3870_v39 = vpop.permute.xlu0 %3869 }
 0xdb6   : > { %4892 = vmatmul.msk.f32.gmra.mxu0 %vm502_vm0, %v2966_v25  ;;  %v5046_v40 = vpop.permute.xlu2 %5045 }
 0xdb7   : > { %v5047_v53 = vunpack.i.l.bf16 %v5046_v40  ;;  %v5048_v42 = vunpack.i.h.bf16 %v5046_v40 }
 0xdbd   : > { %v3520_v19 = vpop.permute.xlu1 %3519  ;;  %v3528_v22 = vpop.permute.xlu0 %3527 }
 0xdbe   : > { %4893 = vmatmul.msk.f32.gmra.mxu0 %vm502_vm0, %v2968_v61  ;;  %4919 = vmatpush.xpose.msk.msra.mxu2 %vm502_vm0, %v3528_v22  ;;  %v3093_v17 = vpop.permute.xlu2 %3092 }
 0xdc2   : > { %4920 = vmatpush.xpose.msk.msra.mxu2 %vm502_vm0, %v3526_v8 }
 0xdc5   : > { %v3356_v24 = vpop.permute.xlu1 %3355  ;;  %4921 = vmatmul.msk.f32.vlgmr.msra.gmra.mxu2 %vm502_vm0, %v3520_v19  ;;  %v3358_v58 = vpop.permute.xlu0 %3357 }
 0xdc6   : > { %4938 = vmatpush.xpose.msk.msrb.mxu2 %vm502_vm0, %v3870_v39  ;;  %4909 = vmatpush.xpose.msk.msrb.mxu0 %vm502_vm0, %v3358_v58 }
 0xdca   : > { %4939 = vmatpush.xpose.msk.msrb.mxu2 %vm502_vm0, %v3868_v52  ;;  %4910 = vmatpush.xpose.msk.msrb.mxu0 %vm502_vm0, %v3356_v24 }
 0xdcd   : > { %v3524_v11 = vpop.permute.xlu1 %3523  ;;  %4911 = vmatmul.msk.f32.vlgmr.msrb.gmra.mxu0 %vm502_vm0, %v6667_v20  ;;  %4922 = vmatmul.msk.f32.gmra.mxu2 %vm502_vm0, %v3522_v5  ;;  %v3866_v55 = vpop.permute.xlu0 %3865 }
 0xdce   : > { %4940 = vmatpush.xpose.msk.msrb.mxu2 %vm502_vm0, %v3866_v55 }
 0xdd5   : > { %v3700_v7 = vpop.permute.xlu1 %3699  ;;  %4912 = vmatmul.msk.f32.gmra.mxu0 %vm502_vm0, %v6683_v48  ;;  %4923 = vmatmul.msk.f32.gmra.mxu2 %vm502_vm0, %v3524_v11  ;;  %v2923_v43 = vpop.permute.xlu0 %2922 }
 0xdd6   : > { %4884 = vmatpush.msk.msrb.mxu3 %vm286_vm2, %v2923_v43  ;;  %4928 = vmatpush.xpose.msk.msra.mxu0 %vm502_vm0, %v3700_v7 }
 0xddd   : > { %v3696_v41 = vpop.permute.xlu1 %3695  ;;  %4913 = vmatmul.msk.f32.gmra.mxu0 %vm502_vm0, %v6675_v10  ;;  %4941 = vmatmul.msk.f32.vlgmr.msrb.gmra.mxu2 %vm502_vm0, %v3860_v21  ;;  %v3698_v49 = vpop.permute.xlu0 %3697 }
 0xdde   : > { %4929 = vmatpush.xpose.msk.msra.mxu0 %vm502_vm0, %v3698_v49 }
 0xde2   : > { %4930 = vmatpush.xpose.msk.msra.mxu0 %vm502_vm0, %v3696_v41 }
 0xde5   : > { %v5041_v34 = vpop.permute.xlu1 %5040  ;;  %4931 = vmatmul.msk.f32.vlgmr.msra.gmra.mxu0 %vm502_vm0, %v3690_v59  ;;  %v2753_v57 = vpop.permute.xlu0 %2752 }
 0xde6   : > { %v5042_v37 = vunpack.i.l.bf16 %v5041_v34  ;;  %4874 = vmatpush.msk.msrb.mxu1 %vm286_vm2, %v2753_v57  ;;  %v5043_v23 = vunpack.i.h.bf16 %v5041_v34 }
 0xde8   : > { %2781 = vmatpush.msrb.mxu1 %v5047_v53  ;;  %2951 = vmatpush.msrb.mxu3 %v5042_v37 }
 0xdea   : > { %2782 = vmatpush.msrb.mxu1 %v5048_v42  ;;  %2952 = vmatpush.msrb.mxu3 %v5043_v23 }
 0xdec   : > { %4894 = vmatpush.msk.msra.mxu1 %vm286_vm2, %v3093_v17 }
 0xded   : > { %v3263_v14 = vpop.permute.xlu1 %3262  ;;  %v5051_v13 = vpop.permute.xlu0 %5050 }
 0xdee   : > { %v5052_v35 = vunpack.i.l.bf16 %v5051_v13  ;;  %4904 = vmatpush.msk.msra.mxu3 %vm286_vm2, %v3263_v14  ;;  %v5053_v28 = vunpack.i.h.bf16 %v5051_v13 }
 0xdf0   : > { %3291 = vmatpush.msra.mxu3 %v5052_v35 }
 0xdf2   : > { %3292 = vmatpush.msra.mxu3 %v5053_v28 }
 0xdf5   : > { %v5056_v20 = vpop.permute.xlu0 %5055 }
 0xdf6   : > { %v5057_v47 = vunpack.i.l.bf16 %v5056_v20  ;;  %v5058_v60 = vunpack.i.h.bf16 %v5056_v20 }
 0xdf8   : > { %3121 = vmatpush.msra.mxu1 %v5057_v47 }
 0xdfa   : > { %3122 = vmatpush.msra.mxu1 %v5058_v60 }
 0xdfb   : > { %v2834_v31 = vpop.f32.mrf.mxu2 }
 0xdfc   : > { %v6799_v51 = vmul.f32 0.35355338, %v2834_v31  ;;  %v6871_v31 = vpop.permute.xlu1 %5060 }
 0xdfe   : > { %v2846_v38 = vsel %vm544_vm4, %v6799_v51, -inf }
 0xdff   : > { %2847 = vmax.xlane.f32.xlu0 %v2846_v38  ;;  %v6873_v38 = vpop.permute.xlu0 %3478 }
 0xe03   : > { %v2837_v54 = vpop.f32.mrf.mxu2 }
 0xe04   : > { %v6803_v4 = vmul.f32 0.35355338, %v2837_v54 }
 0xe05   : > { %v2664_v30 = vpop.f32.mrf.mxu0 }
 0xe06   : > { %v6805_v29 = vmul.f32 0.35355338, %v2664_v30  ;;  %v2849_v45 = vsel %vm544_vm4, %v6803_v4, -inf  ;;  %v6877_v30 = vpop.permute.xlu2 %3648 }
 0xe07   : > { %2850 = vmax.xlane.f32.xlu2 %v2849_v45 }
 0xe08   : > { %v2676_v6 = vsel %vm544_vm4, %v6805_v29, -inf }
 0xe09   : > { %2677 = vmax.xlane.f32.xlu1 %v2676_v6 }
 0xe0d   : > { %v2667_v0 = vpop.f32.mrf.mxu0 }
 0xe0e   : > { %v6811_v36 = vmul.f32 0.35355338, %v2667_v0 }
 0xe10   : > { %v2840_v16 = vpop.f32.mrf.mxu2  ;;  %v2679_v18 = vsel %vm544_vm4, %v6811_v36, -inf }
 0xe11   : > { %v6815_v46 = vmul.f32 0.35355338, %v2840_v16  ;;  %2680 = vmax.xlane.f32.xlu0 %v2679_v18  ;;  %v6883_v16 = vpop.permute.xlu1 %5065  ;;  %v6885_v18 = vpop.permute.xlu0 %5070 }
 0xe13   : > { %v2852_v15 = vsel %vm551_vm5, %v6815_v46, -inf }
 0xe14   : > { %2853 = vmax.xlane.f32.xlu2 %v2852_v15 }
 0xe15   : > { %v2670_v1 = vpop.f32.mrf.mxu0 }
 0xe16   : > { %v6819_v32 = vmul.f32 0.35355338, %v2670_v1  ;;  %v6889_v1 = vpop.permute.xlu2 %3988 }
 0xe18   : > { %v3174_v12 = vpop.f32.mrf.mxu2  ;;  %v2682_v27 = vsel %vm551_vm5, %v6819_v32, -inf }
 0xe19   : > { %v6823_v2 = vmul.f32 0.35355338, %v3174_v12  ;;  %2683 = vmax.xlane.f32.xlu1 %v2682_v27 }
 0xe1b   : > { %v3186_v8 = vsel %vm544_vm4, %v6823_v2, -inf }
 0xe1c   : > { %3187 = vmax.xlane.f32.xlu0 %v3186_v8 }
 0xe1d   : > { %v3004_v56 = vpop.f32.mrf.mxu0 }
 0xe1e   : > { %v6827_v33 = vmul.f32 0.35355338, %v3004_v56 }
 0xe20   : > { %v3177_v61 = vpop.f32.mrf.mxu2  ;;  %v3016_v25 = vsel %vm544_vm4, %v6827_v33, -inf }
 0xe21   : > { %v6831_v39 = vmul.f32 0.35355338, %v3177_v61  ;;  %3017 = vmax.xlane.f32.xlu2 %v3016_v25 }
 0xe23   : > { %v3189_v5 = vsel %vm544_vm4, %v6831_v39, -inf }
 0xe24   : > { %3190 = vmax.xlane.f32.xlu1 %v3189_v5 }
 0xe28   : > { %v3180_v19 = vpop.f32.mrf.mxu2 }
 0xe29   : > { %v6835_v22 = vmul.f32 0.35355338, %v3180_v19 }
 0xe2b   : > { %v3192_v52 = vsel %vm551_vm5, %v6835_v22, -inf }
 0xe2c   : > { %3193 = vmax.xlane.f32.xlu2 %v3192_v52 }
 0xe33   : > { %v3007_v24 = vpop.f32.mrf.mxu0 }
 0xe34   : > { %v6839_v58 = vmul.f32 0.35355338, %v3007_v24 }
 0xe36   : > { %v3019_v21 = vsel %vm544_vm4, %v6839_v58, -inf }
 0xe37   : > { %3020 = vmax.xlane.f32.xlu0 %v3019_v21 }
 0xe3b   : > { %v3010_v11 = vpop.f32.mrf.mxu0 }
 0xe3c   : > { %v6843_v55 = vmul.f32 0.35355338, %v3010_v11 }
 0xe3e   : > { %v3022_v7 = vsel %vm551_vm5, %v6843_v55, -inf }
 0xe3f   : > { %3023 = vmax.xlane.f32.xlu1 %v3022_v7 }
 0xe48   : > { %v3560_v43 = vpop.f32.mrf.mxu2 }
 0xe49   : > { %v6847_v59 = vmul.f32 0.35355338, %v3560_v43 }
 0xe4a   : > { %v3390_v41 = vpop.f32.mrf.mxu0 }
 0xe4b   : > { %v6849_v49 = vmul.f32 0.35355338, %v3390_v41  ;;  %v3572_v40 = vsel %vm544_vm4, %v6847_v59, -inf }
 0xe4c   : > { %3573 = vmax.xlane.f32.xlu0 %v3572_v40 }
 0xe4d   : > { %v3402_v34 = vsel %vm544_vm4, %v6849_v49, -inf }
 0xe4e   : > { %3403 = vmax.xlane.f32.xlu1 %v3402_v34 }
 0xe50   : > { %v3563_v37 = vpop.f32.mrf.mxu2 }
 0xe51   : > { %v6859_v23 = vmul.f32 0.35355338, %v3563_v37 }
 0xe52   : > { %v3393_v57 = vpop.f32.mrf.mxu0 }
 0xe53   : > { %v6855_v53 = vmul.f32 0.35355338, %v3393_v57  ;;  %v3575_v13 = vsel %vm544_vm4, %v6859_v23, -inf }
 0xe55   : > { %v3405_v42 = vsel %vm544_vm4, %v6855_v53, -inf }
 0xe56   : > { %3406 = vmax.xlane.f32.xlu0 %v3405_v42 }
 0xe58   : > { %v3566_v28 = vpop.f32.mrf.mxu2 }
 0xe59   : > { %v6867_v20 = vmul.f32 0.35355338, %v3566_v28 }
 0xe5a   : > { %v3396_v17 = vpop.f32.mrf.mxu0 }
 0xe5b   : > { %v6861_v14 = vmul.f32 0.35355338, %v3396_v17  ;;  %v3578_v47 = vsel %vm551_vm5, %v6867_v20, -inf }
 0xe5d   : > { %v3408_v35 = vsel %vm551_vm5, %v6861_v14, -inf }
 0xe5e   : > { %3576 = vmax.xlane.f32.xlu0 %v3575_v13  ;;  %3409 = vmax.xlane.f32.xlu2 %v3408_v35 }
 0xe60   : > { %v3900_v6 = vpop.f32.mrf.mxu2 }
 0xe61   : > { %v6881_v0 = vmul.f32 0.35355338, %v3900_v6 }
 0xe62   : > { %v3730_v60 = vpop.f32.mrf.mxu0 }
 0xe63   : > { %v6875_v54 = vmul.f32 0.35355338, %v3730_v60  ;;  %v3912_v15 = vsel %vm544_vm4, %v6881_v0, -inf }
 0xe65   : > { %v3742_v45 = vsel %vm544_vm4, %v6875_v54, -inf }
 0xe66   : > { %3579 = vmax.xlane.f32.xlu2 %v3578_v47 }
 0xe6e   : > { %3743 = vmax.xlane.f32.xlu2 %v3742_v45 }
 0xe72   : > { %v2848_v12 = vpop.xlane.xlu0 %2847 }
 0xe73   : > { %v2855_v56 = vsub.f32 %v6799_v51, %v2848_v12 }
 0xe75   : > { %v2858_v5 = vmul.f32 1.442695, %v2855_v56 }
 0xe76   : > { %3913 = vmax.xlane.f32.xlu2 %v3912_v15 }
 0xe7a   : > { %v2851_v61 = vpop.xlane.xlu2 %2850 }
 0xe7b   : > { %v2856_v7 = vsub.f32 %v6803_v4, %v2851_v61 }
 0xe7c   : > { %v2678_v27 = vpop.xlane.xlu1 %2677 }
 0xe7d   : > { %v2685_v8 = vsub.f32 %v6805_v29, %v2678_v27  ;;  %v2860_v41 = vmul.f32 1.442695, %v2856_v7 }
 0xe7f   : > { %v2688_v25 = vmul.f32 1.442695, %v2685_v8 }
 0xe81   : > { %5247 = vpow2.f32 %v2688_v25 }
 0xe82   : > { %5249 = vpow2.f32 %v2858_v5 }
 0xe84   : > { %v2681_v19 = vpop.xlane.xlu0 %2680 }
 0xe85   : > { %v2686_v52 = vsub.f32 %v6811_v36, %v2681_v19 }
 0xe87   : > { %v6894_v24 = vpop.eup %5247  ;;  %v2690_v21 = vmul.f32 1.442695, %v2686_v52  ;;  %v2854_v11 = vpop.xlane.xlu2 %2853 }
 0xe88   : > { %v2857_v43 = vsub.f32 %v6815_v46, %v2854_v11  ;;  %v2694_v29 = vsel %vm544_vm4, %v6894_v24, 0.0  ;;  %v6900_v34 = vpop.eup %5249 }
 0xe89   : > { %5251 = vpow2.f32 %v2690_v21  ;;  %2695 = vadd.xlane.f32.xlu2 %v2694_v29  ;;  %v2864_v46 = vsel %vm544_vm4, %v6900_v34, 0.0 }
 0xe8a   : > { %v2862_v51 = vmul.f32 1.442695, %v2857_v43 }
 0xe8c   : > { %v2684_v40 = vpop.xlane.xlu1 %2683  ;;  %5253 = vpow2.f32 %v2862_v51 }
 0xe8d   : > { %v2687_v36 = vsub.f32 %v6819_v32, %v2684_v40  ;;  %5255 = vpow2.f32 %v2860_v41 }
 0xe8f   : > { %v6903_v57 = vpop.eup %5251  ;;  %v2692_v37 = vmul.f32 1.442695, %v2687_v36  ;;  %v3188_v42 = vpop.xlane.xlu0 %3187 }
 0xe90   : > { %v3195_v4 = vsub.f32 %v6823_v2, %v3188_v42  ;;  %v2697_v17 = vsel %vm544_vm4, %v6903_v57, 0.0 }
 0xe91   : > { %5257 = vpow2.f32 %v2692_v37  ;;  %2865 = vadd.xlane.f32.xlu2 %v2864_v46  ;;  %2698 = vadd.xlane.f32.xlu1 %v2697_v17 }
 0xe92   : > { %v3198_v13 = vmul.f32 1.442695, %v3195_v4  ;;  %v6910_v32 = vpop.eup %5253 }
 0xe93   : > { %v6913_v47 = vpop.eup %5255  ;;  %v2870_v12 = vsel %vm551_vm5, %v6910_v32, 0.0 }
 0xe94   : > { %v3018_v35 = vpop.xlane.xlu2 %3017  ;;  %5259 = vpow2.f32 %v3198_v13 }
 0xe95   : > { %v3025_v28 = vsub.f32 %v6827_v33, %v3018_v35  ;;  %v2867_v33 = vsel %vm544_vm4, %v6913_v47, 0.0 }
 0xe97   : > { %v6915_v60 = vpop.eup %5257  ;;  %v3028_v2 = vmul.f32 1.442695, %v3025_v28  ;;  %v3191_v45 = vpop.xlane.xlu1 %3190 }
 0xe98   : > { %v3196_v6 = vsub.f32 %v6831_v39, %v3191_v45  ;;  %v2700_v15 = vsel %vm551_vm5, %v6915_v60, 0.0 }
 0xe99   : > { %5261 = vpow2.f32 %v3028_v2  ;;  %2701 = vadd.xlane.f32.xlu0 %v2700_v15  ;;  %2871 = vadd.xlane.f32.xlu2 %v2870_v12 }
 0xe9a   : > { %2868 = vadd.xlane.f32.xlu1 %v2867_v33  ;;  %v3200_v27 = vmul.f32 1.442695, %v3196_v6  ;;  %v6924_v8 = vpop.eup %5259 }
 0xe9b   : > { %v3204_v61 = vsel %vm544_vm4, %v6924_v8, 0.0 }
 0xe9c   : > { %5263 = vpow2.f32 %v3200_v27 }
 0xe9f   : > { %v6926_v56 = vpop.eup %5261  ;;  %v3194_v19 = vpop.xlane.xlu2 %3193 }
 0xea0   : > { %v3034_v39 = vsel %vm544_vm4, %v6926_v56, 0.0  ;;  %v3197_v11 = vsub.f32 %v6835_v22, %v3194_v19 }
 0xea1   : > { %3035 = vadd.xlane.f32.xlu0 %v3034_v39 }
 0xea2   : > { %3205 = vadd.xlane.f32.xlu1 %v3204_v61  ;;  %v6932_v25 = vpop.eup %5263  ;;  %v3202_v43 = vmul.f32 1.442695, %v3197_v11 }
 0xea3   : > { %v3207_v5 = vsel %vm544_vm4, %v6932_v25, 0.0 }
 0xeaa   : > { %3208 = vadd.xlane.f32.xlu1 %v3207_v5  ;;  %v3021_v52 = vpop.xlane.xlu0 %3020 }
 0xeab   : > { %v3026_v21 = vsub.f32 %v6839_v58, %v3021_v52 }
 0xead   : > { %v3030_v7 = vmul.f32 1.442695, %v3026_v21 }
 0xeaf   : > { %5265 = vpow2.f32 %v3030_v7 }
 0xeb0   : > { %5267 = vpow2.f32 %v3202_v43 }
 0xeb2   : > { %v3024_v29 = vpop.xlane.xlu1 %3023 }
 0xeb3   : > { %v3027_v51 = vsub.f32 %v6843_v55, %v3024_v29 }
 0xeb5   : > { %v6939_v41 = vpop.eup %5265  ;;  %v3032_v40 = vmul.f32 1.442695, %v3027_v51 }
 0xeb6   : > { %v3037_v36 = vsel %vm544_vm4, %v6939_v41, 0.0  ;;  %v6943_v37 = vpop.eup %5267 }
 0xeb7   : > { %5269 = vpow2.f32 %v3032_v40  ;;  %3038 = vadd.xlane.f32.xlu0 %v3037_v36  ;;  %v3210_v42 = vsel %vm551_vm5, %v6943_v37, 0.0 }
 0xebd   : > { %v6945_v58 = vpop.eup %5269 }
 0xebe   : > { %v3040_v22 = vsel %vm551_vm5, %v6945_v58, 0.0 }
 0xebf   : > { %3041 = vadd.xlane.f32.xlu1 %v3040_v22  ;;  %3211 = vadd.xlane.f32.xlu0 %v3210_v42  ;;  %v3574_v55 = vpop.xlane.xlu0 %3573 }
 0xec0   : > { %v3581_v4 = vsub.f32 %v6847_v59, %v3574_v55 }
 0xec1   : > { %v3404_v46 = vpop.xlane.xlu1 %3403 }
 0xec2   : > { %v3584_v17 = vmul.f32 1.442695, %v3581_v4  ;;  %v3411_v13 = vsub.f32 %v6849_v49, %v3404_v46 }
 0xec4   : > { %5271 = vpow2.f32 %v3584_v17  ;;  %v3414_v35 = vmul.f32 1.442695, %v3411_v13 }
 0xec6   : > { %5273 = vpow2.f32 %v3414_v35 }
 0xec9   : > { %v3407_v28 = vpop.xlane.xlu0 %3406 }
 0xeca   : > { %v6953_v2 = vpop.eup %5271  ;;  %v3412_v45 = vsub.f32 %v6855_v53, %v3407_v28 }
 0xecb   : > { %v3590_v6 = vsel %vm544_vm4, %v6953_v2, 0.0 }
 0xecc   : > { %v6958_v15 = vpop.eup %5273  ;;  %v3416_v12 = vmul.f32 1.442695, %v3412_v45  ;;  %3591 = vadd.xlane.f32.xlu2 %v3590_v6 }
 0xecd   : > { %v3420_v59 = vsel %vm544_vm4, %v6958_v15, 0.0 }
 0xece   : > { %5275 = vpow2.f32 %v3416_v12  ;;  %3421 = vadd.xlane.f32.xlu0 %v3420_v59  ;;  %v5068_v59 = vunpack.i.h.bf16 %v6883_v16 }
 0xed1   : > { %v3577_v49 = vpop.xlane.xlu0 %3576  ;;  %v3410_v61 = vpop.xlane.xlu2 %3409 }
 0xed2   : > { %v3582_v33 = vsub.f32 %v6859_v23, %v3577_v49  ;;  %v3413_v11 = vsub.f32 %v6861_v14, %v3410_v61 }
 0xed4   : > { %v6963_v27 = vpop.eup %5275  ;;  %v3586_v39 = vmul.f32 1.442695, %v3582_v33  ;;  %v3418_v51 = vmul.f32 1.442695, %v3413_v11 }
 0xed5   : > { %v3423_v53 = vsel %vm544_vm4, %v6963_v27, 0.0 }
 0xed6   : > { %3424 = vadd.xlane.f32.xlu1 %v3423_v53  ;;  %5277 = vpow2.f32 %v3586_v39 }
 0xed9   : > { %v3580_v52 = vpop.xlane.xlu2 %3579 }
 0xeda   : > { %v3583_v7 = vsub.f32 %v6867_v20, %v3580_v52 }
 0xedc   : > { %v6967_v5 = vpop.eup %5277  ;;  %v3588_v40 = vmul.f32 1.442695, %v3583_v7 }
 0xedd   : > { %v3593_v19 = vsel %vm544_vm4, %v6967_v5, 0.0 }
 0xede   : > { %3594 = vadd.xlane.f32.xlu1 %v3593_v19 }
 0xee1   : > { %v3744_v23 = vpop.xlane.xlu2 %3743 }
 0xee2   : > { %3861 = vrot.lane.b32.xlu0 %v6683_v48, %s5387_s10  ;;  %v3751_v43 = vsub.f32 %v6875_v54, %v3744_v23 }
 0xee4   : > { %5075 = vrot.lane.b32.xlu2 %v6744_v63, %s5393_s18  ;;  %v3754_v22 = vmul.f32 1.442695, %v3751_v43 }
 0xee9   : > { %v3914_v21 = vpop.xlane.xlu2 %3913 }
 0xeea   : > { %v3921_v36 = vsub.f32 %v6881_v0, %v3914_v21 }
 0xeec   : > { %v3924_v42 = vmul.f32 1.442695, %v3921_v36 }
 0xef7   : > { %3818 = vrot.lane.b32.xlu1 %v6675_v10, %s5393_s18 }
 0xefc   : > { %v2696_v29 = vpop.xlane.xlu2 %2695 }
 0xefd   : > { %5279 = vrcp.f32 %v2696_v29  ;;  %v2714_v46 = vand.u32 2147483648, %v2696_v29  ;;  %v2712_v13 = vand.u32 2147483647, %v2696_v29  ;;  %vm2708_vm8 = vweird.f32 %v2696_v29 }
 0xefe   : > { %5281 = vpow2.f32 %v3418_v51 }
 0xeff   : > { %5283 = vpow2.f32 %v3588_v40  ;;  %v2715_v53 = vor.u32 1.1754944e-38, %v2714_v46  ;;  %vm2713_vm10 = vcmp.eq.f32.partialorder %v2712_v13, 8.507059e+37 }
 0xf00   : > { %5285 = vpow2.f32 %v3754_v22 }
 0xf03   : > { %v5280_v63 = vpop.eup %5279 }
 0xf04   : > { %v2704_v55 = vmul.f32 %v5280_v63, %v2696_v29  ;;  %v6982_v4 = vpop.xlane.xlu2 %2865  ;;  %v6984_v14 = vpop.xlane.xlu1 %2698  ;;  %vm2709_vm1 = vweird.f32 %v5280_v63 }
 0xf05   : > { %5287 = vrcp.f32 %v6982_v4  ;;  %v6988_v54 = vpop.eup %5281  ;;  %vm7001_vm12 = vmor %vm2708_vm8, %vm2709_vm1  ;;  %v2882_v7 = vand.u32 2147483647, %v6982_v4  ;;  %v2884_v36 = vand.u32 2147483648, %v6982_v4  ;;  %vm2878_vm13 = vweird.f32 %v6982_v4 }
 0xf06   : > { %v2705_v20 = vsub.f32 1.0, %v2704_v55  ;;  %5289 = vrcp.f32 %v6984_v14  ;;  %v6992_v17 = vpop.eup %5283  ;;  %v3426_v33 = vsel %vm551_vm5, %v6988_v54, 0.0  ;;  %v5067_v55 = vunpack.i.l.bf16 %v6883_v16 }
 0xf07   : > { %5291 = vpow2.f32 %v3924_v42  ;;  %v6994_v35 = vpop.eup %5285  ;;  %v3596_v23 = vsel %vm551_vm5, %v6992_v17, 0.0  ;;  %v2727_v42 = vand.u32 2147483647, %v6984_v14  ;;  %vm7051_vm6 = vcmp.eq.f32.partialorder %v2882_v7, 8.507059e+37 }
 0xf08   : > { %v2706_v0 = vmul.f32 %v5280_v63, %v2705_v20  ;;  %v7044_v46 = vsel %vm544_vm4, %v6994_v35, 0.0  ;;  %vm2723_vm7 = vweird.f32 %v6984_v14 }
 0xf09   : > { %vm7063_vm1 = vcmp.eq.f32.partialorder %v2727_v42, 8.507059e+37 }
 0xf0a   : > { %v2707_v28 = vadd.f32 %v5280_v63, %v2706_v0 }
 0xf0b   : > { %v6996_v45 = vpop.eup %5287 }
 0xf0c   : > { %v7007_v39 = vpop.eup %5289  ;;  %v2711_v61 = vsel %vm7001_vm12, %v5280_v63, %v2707_v28  ;;  %v2874_v19 = vmul.f32 %v6996_v45, %v6982_v4  ;;  %v7013_v52 = vpop.xlane.xlu2 %2871  ;;  %3597 = vadd.xlane.f32.xlu0 %v3596_v23  ;;  %v2729_v63 = vand.u32 2147483648, %v6984_v14  ;;  %vm2879_vm14 = vweird.f32 %v6996_v45 }
 0xf0d   : > { %v7017_v21 = vpop.xlane.xlu0 %2701  ;;  %v7020_v11 = vpop.eup %5291  ;;  %v2719_v43 = vmul.f32 %v7007_v39, %v6984_v14  ;;  %5293 = vrcp.f32 %v7013_v52  ;;  %v2716_v51 = vsel %vm2713_vm10, %v2715_v53, %v2711_v61  ;;  %3427 = vadd.xlane.f32.xlu2 %v3426_v33  ;;  %v2912_v61 = vand.u32 2147483647, %v7013_v52  ;;  %vm7073_vm8 = vmor %vm2878_vm13, %vm2879_vm14 }
 0xf0e   : > { %v7026_v29 = vpop.xlane.xlu1 %2868  ;;  %v2875_v40 = vsub.f32 1.0, %v2874_v19  ;;  %v3930_v0 = vsel %vm544_vm4, %v7020_v11, 0.0  ;;  %v2717_v28 = vmul.f32 %v6894_v24, %v2716_v51  ;;  %v2885_v19 = vor.u32 1.1754944e-38, %v2884_v36 }
 0xf0f   : > { %5295 = vrcp.f32 %v7026_v29  ;;  %v2720_v22 = vsub.f32 1.0, %v2719_v43  ;;  %v2730_v23 = vor.u32 1.1754944e-38, %v2729_v63  ;;  %v2914_v43 = vand.u32 2147483648, %v7013_v52 }
 0xf10   : > { %5297 = vrcp.f32 %v7017_v21  ;;  %v2876_v20 = vmul.f32 %v6996_v45, %v2875_v40  ;;  %4875 = vmatmul.msk.f32.vlgmr.msrb.gmra.mxu1 %vm544_vm4, %v2717_v28  ;;  %4571 = vst.msk [vmem:[%s7038_s11] sm:$0xff] %vm544_vm4, %v2717_v28  ;;  %vm2908_vm12 = vweird.f32 %v7013_v52  ;;  %vm2724_vm10 = vweird.f32 %v7007_v39 }
 0xf11   : > { %v2721_v13 = vmul.f32 %v7007_v39, %v2720_v22  ;;  %4914 = vmatpush.msk.msrb.mxu1 %vm286_vm2, %v6873_v38  ;;  %vm7097_vm13 = vcmp.eq.f32.partialorder %v2912_v61, 8.507059e+37  ;;  %vm2893_vm14 = vweird.f32 %v7026_v29  ;;  %v2915_v51 = vor.u32 1.1754944e-38, %v2914_v43  ;;  %vm2725_vm15 = vmor %vm2723_vm7, %vm2724_vm10 }
 0xf12   : > { %v2877_v49 = vadd.f32 %v6996_v45, %v2876_v20  ;;  %v2899_v20 = vand.u32 2147483648, %v7026_v29  ;;  %v2897_v14 = vand.u32 2147483647, %v7026_v29 }
 0xf13   : > { %v7057_v53 = vpop.eup %5293  ;;  %v2722_v22 = vadd.f32 %v7007_v39, %v2721_v13  ;;  %3507 = vmatpush.msrb.mxu1 %v5067_v55  ;;  %v7670_v13 = vunpack.i.h.bf16 %v6871_v31 }
 0xf14   : > { %v2904_v40 = vmul.f32 %v7057_v53, %v7013_v52  ;;  %v2881_v4 = vsel %vm7073_vm8, %v6996_v45, %v2877_v49  ;;  %3931 = vadd.xlane.f32.xlu0 %v3930_v0  ;;  %v2744_v49 = vand.u32 2147483648, %v7017_v21  ;;  %vm2738_vm8 = vweird.f32 %v7017_v21 }
 0xf15   : > { %v7067_v7 = vpop.eup %5295  ;;  %v7082_v36 = vpop.xlane.xlu0 %3035  ;;  %v2742_v0 = vand.u32 2147483647, %v7017_v21  ;;  %v2886_v61 = vsel %vm7051_vm6, %v2885_v19, %v2881_v4  ;;  %3508 = vmatpush.msrb.mxu1 %v5068_v59  ;;  %v2726_v55 = vsel %vm2725_vm15, %v7007_v39, %v2722_v22  ;;  %vm2909_vm3 = vweird.f32 %v7057_v53 }
 0xf16   : > { %v7086_v63 = vpop.eup %5297  ;;  %v2889_v42 = vmul.f32 %v7067_v7, %v7026_v29  ;;  %v7094_v28 = vpop.xlane.xlu1 %3205  ;;  %5299 = vrcp.f32 %v7082_v36  ;;  %v2905_v38 = vsub.f32 1.0, %v2904_v40  ;;  %v2745_v19 = vor.u32 1.1754944e-38, %v2744_v49  ;;  %vm7134_vm7 = vmor %vm2908_vm12, %vm2909_vm3 }
 0xf17   : > { %v2734_v45 = vmul.f32 %v7086_v63, %v7017_v21  ;;  %5301 = vrcp.f32 %v7094_v28  ;;  %v2731_v4 = vsel %vm7063_vm1, %v2730_v23, %v2726_v55  ;;  %v2887_v39 = vmul.f32 %v6900_v34, %v2886_v61 }
 0xf18   : > { %v2890_v6 = vsub.f32 1.0, %v2889_v42  ;;  %v2906_v40 = vmul.f32 %v7057_v53, %v2905_v38  ;;  %v2900_v42 = vor.u32 1.1754944e-38, %v2899_v20  ;;  %v2732_v59 = vmul.f32 %v6903_v57, %v2731_v4 }
 0xf19   : > { %v2735_v12 = vsub.f32 1.0, %v2734_v45  ;;  %vm2739_vm15 = vweird.f32 %v7086_v63  ;;  %vm7128_vm6 = vcmp.eq.f32.partialorder %v2742_v0, 8.507059e+37  ;;  %vm2894_vm1 = vweird.f32 %v7067_v7  ;;  %4885 = vmatmul.msk.f32.vlgmr.msrb.gmra.mxu3 %vm544_vm4, %v2887_v39  ;;  %4574 = vst.msk [vmem:[%s7038_s11 + $0x18] sm:$0xff] %vm544_vm4, %v2887_v39 }
 0xf1a   : > { %v2891_v43 = vmul.f32 %v7067_v7, %v2890_v6  ;;  %v2907_v3 = vadd.f32 %v7057_v53, %v2906_v40  ;;  %v3222_v20 = vand.u32 2147483647, %v7094_v28  ;;  %v3224_v38 = vand.u32 2147483648, %v7094_v28  ;;  %4876 = vmatmul.msk.f32.gmra.mxu1 %vm544_vm4, %v2732_v59  ;;  %4572 = vst.msk [vmem:[%s7038_s11 + $0x8] sm:$0xff] %vm544_vm4, %v2732_v59  ;;  %4924 = vmatpush.msk.msrb.mxu3 %vm286_vm2, %v6877_v30  ;;  %vm2740_vm3 = vmor %vm2738_vm8, %vm2739_vm15 }
 0xf1b   : > { %v2736_v33 = vmul.f32 %v7086_v63, %v2735_v12  ;;  %v3052_v0 = vand.u32 2147483647, %v7082_v36  ;;  %v3054_v61 = vand.u32 2147483648, %v7082_v36  ;;  %vm2895_vm10 = vmor %vm2893_vm14, %vm2894_vm1  ;;  %v7669_v55 = vunpack.i.l.bf16 %v6871_v31 }
 0xf1c   : > { %v5300_v16 = vpop.eup %5299  ;;  %v2892_v34 = vadd.f32 %v7067_v7, %v2891_v43  ;;  %v2911_v45 = vsel %vm7134_vm7, %v7057_v53, %v2907_v3  ;;  %vm2898_vm8 = vcmp.eq.f32.partialorder %v2897_v14, 8.507059e+37  ;;  %vm3218_vm14 = vweird.f32 %v7094_v28 }
 0xf1d   : > { %v5302_v22 = vpop.eup %5301  ;;  %v3044_v23 = vmul.f32 %v5300_v16, %v7082_v36  ;;  %v2737_v57 = vadd.f32 %v7086_v63, %v2736_v33  ;;  %vm3049_vm12 = vweird.f32 %v5300_v16  ;;  %v2916_v53 = vsel %vm7097_vm13, %v2915_v51, %v2911_v45  ;;  %3677 = vmatpush.msrb.mxu3 %v7669_v55 }
 0xf1e   : > { %v3214_v24 = vmul.f32 %v5302_v22, %v7094_v28  ;;  %v7149_v52 = vpop.xlane.xlu1 %3208  ;;  %v2896_v43 = vsel %vm2895_vm10, %v7067_v7, %v2892_v34  ;;  %vm3219_vm15 = vweird.f32 %v5302_v22  ;;  %vm3048_vm13 = vweird.f32 %v7082_v36 }
 0xf1f   : > { %v3045_v49 = vsub.f32 1.0, %v3044_v23  ;;  %5303 = vrcp.f32 %v7149_v52  ;;  %v2741_v3 = vsel %vm2740_vm3, %v7086_v63, %v2737_v57  ;;  %v2901_v29 = vsel %vm2898_vm8, %v2900_v42, %v2896_v43  ;;  %3678 = vmatpush.msrb.mxu3 %v7670_v13  ;;  %vm3220_vm7 = vmor %vm3218_vm14, %vm3219_vm15 }
 0xf20   : > { %v3215_v40 = vsub.f32 1.0, %v3214_v24  ;;  %v2746_v21 = vsel %vm7128_vm6, %v2745_v19, %v2741_v3  ;;  %v2902_v51 = vmul.f32 %v6913_v47, %v2901_v29  ;;  %v2917_v19 = vmul.f32 %v6910_v32, %v2916_v53  ;;  %vm3050_vm6 = vmor %vm3048_vm13, %vm3049_vm12 }
 0xf21   : > { %v3046_v30 = vmul.f32 %v5300_v16, %v3045_v49  ;;  %v2747_v33 = vmul.f32 %v6915_v60, %v2746_v21  ;;  %v3055_v7 = vor.u32 1.1754944e-38, %v3054_v61  ;;  %3761 = vadd.xlane.f32.xlu1 %v7044_v46  ;;  %v3225_v31 = vor.u32 1.1754944e-38, %v3224_v38 }
 0xf22   : > { %v3216_v63 = vmul.f32 %v5302_v22, %v3215_v40  ;;  %vm3053_vm1 = vcmp.eq.f32.partialorder %v3052_v0, 8.507059e+37  ;;  %4575 = vst.msk [vmem:[%s7038_s11 + $0x20] sm:$0xff] %vm544_vm4, %v2902_v51  ;;  %vm3223_vm3 = vcmp.eq.f32.partialorder %v3222_v20, 8.507059e+37  ;;  %4886 = vmatmul.msk.f32.gmra.mxu3 %vm544_vm4, %v2902_v51  ;;  %v3239_v39 = vand.u32 2147483648, %v7149_v52 }
 0xf23   : > { %v3047_v4 = vadd.f32 %v5300_v16, %v3046_v30  ;;  %4573 = vst.msk [vmem:[%s7038_s11 + $0x10] sm:$0x1] %vm551_vm5, %v2747_v33  ;;  %4877 = vmatmul.msk.f32.gmra.mxu1 %vm544_vm4, %v2747_v33  ;;  %vm3233_vm10 = vweird.f32 %v7149_v52  ;;  %v5072_v45 = vunpack.i.l.bf16 %v6885_v18  ;;  %v5073_v61 = vunpack.i.h.bf16 %v6885_v18 }
 0xf24   : > { %v3217_v59 = vadd.f32 %v5302_v22, %v3216_v63  ;;  %4576 = vst.msk [vmem:[%s7038_s11 + $0x28] sm:$0x1] %vm551_vm5, %v2917_v19 }
 0xf25   : > { %v5304_v60 = vpop.eup %5303  ;;  %v3051_v36 = vsel %vm3050_vm6, %v5300_v16, %v3047_v4  ;;  %3863 = vrot.lane.b32.xlu2 %v6675_v10, %s5387_s10 }
 0xf26   : > { %v3221_v32 = vsel %vm3220_vm7, %v5302_v22, %v3217_v59  ;;  %v3056_v47 = vsel %vm3053_vm1, %v3055_v7, %v3051_v36  ;;  %v3229_v28 = vmul.f32 %v5304_v60, %v7149_v52  ;;  %vm3234_vm12 = vweird.f32 %v5304_v60 }
 0xf27   : > { %v3226_v46 = vsel %vm3223_vm3, %v3225_v31, %v3221_v32  ;;  %v3057_v42 = vmul.f32 %v6926_v56, %v3056_v47  ;;  %v3237_v22 = vand.u32 2147483647, %v7149_v52  ;;  %vm3235_vm8 = vmor %vm3233_vm10, %vm3234_vm12 }
 0xf28   : > { %v3227_v14 = vmul.f32 %v6924_v8, %v3226_v46  ;;  %v3230_v16 = vsub.f32 1.0, %v3229_v28  ;;  %3691 = vrot.lane.b32.xlu0 %v6683_v48, %s5391_s14  ;;  %v3240_v8 = vor.u32 1.1754944e-38, %v3239_v39 }
 0xf29   : > { %4577 = vst.msk [vmem:[%s7038_s11 + $0x30] sm:$0xff] %vm544_vm4, %v3057_v42  ;;  %vm3238_vm15 = vcmp.eq.f32.partialorder %v3237_v22, 8.507059e+37 }
 0xf2a   : > { %4580 = vst.msk [vmem:[%s7038_s11 + $0x48] sm:$0xff] %vm544_vm4, %v3227_v14  ;;  %v3231_v6 = vmul.f32 %v5304_v60, %v3230_v16  ;;  %v3039_v56 = vpop.xlane.xlu0 %3038  ;;  %4887 = vmatmul.msk.f32.gmra.mxu3 %vm544_vm4, %v2917_v19 }
 0xf2b   : > { %5305 = vrcp.f32 %v3039_v56  ;;  %4895 = vmatmul.msk.f32.vlgmr.msra.gmra.mxu1 %vm544_vm4, %v3057_v42  ;;  %v3069_v49 = vand.u32 2147483648, %v3039_v56  ;;  %vm3063_vm14 = vweird.f32 %v3039_v56 }
 0xf2c   : > { %v3232_v12 = vadd.f32 %v5304_v60, %v3231_v6 }
 0xf2d   : > { %v3070_v53 = vor.u32 1.1754944e-38, %v3069_v49 }
 0xf2e   : > { %v3236_v23 = vsel %vm3235_vm8, %v5304_v60, %v3232_v12 }
 0xf2f   : > { %v3241_v57 = vsel %vm3238_vm15, %v3240_v8, %v3236_v23 }
 0xf30   : > { %v3242_v34 = vmul.f32 %v6932_v25, %v3241_v57  ;;  %v3067_v25 = vand.u32 2147483647, %v3039_v56 }
 0xf31   : > { %v5306_v24 = vpop.eup %5305 }
 0xf32   : > { %4581 = vst.msk [vmem:[%s7038_s11 + $0x50] sm:$0xff] %vm544_vm4, %v3242_v34  ;;  %v3059_v48 = vmul.f32 %v5306_v24, %v3039_v56  ;;  %v3042_v20 = vpop.xlane.xlu1 %3041  ;;  %v3212_v38 = vpop.xlane.xlu0 %3211  ;;  %4905 = vmatmul.msk.f32.vlgmr.msra.gmra.mxu3 %vm544_vm4, %v3227_v14  ;;  %vm3064_vm13 = vweird.f32 %v5306_v24  ;;  %vm3068_vm7 = vcmp.eq.f32.partialorder %v3067_v25, 8.507059e+37 }
 0xf33   : > { %5307 = vrcp.f32 %v3042_v20  ;;  %4944 = vmatpush.msk.msra.mxu3 %vm286_vm2, %v6889_v1  ;;  %vm3065_vm6 = vmor %vm3063_vm14, %vm3064_vm13  ;;  %v3084_v4 = vand.u32 2147483648, %v3042_v20  ;;  %v3254_v13 = vand.u32 2147483648, %v3212_v38  ;;  %v3082_v51 = vand.u32 2147483647, %v3042_v20 }
 0xf34   : > { %v3060_v52 = vsub.f32 1.0, %v3059_v48  ;;  %5309 = vrcp.f32 %v3212_v38  ;;  %v3252_v59 = vand.u32 2147483647, %v3212_v38  ;;  %vm3078_vm12 = vweird.f32 %v3042_v20 }
 0xf35   : > { %4017 = vmatpush.msra.mxu3 %v5072_v45  ;;  %vm3248_vm8 = vweird.f32 %v3212_v38  ;;  %v3085_v31 = vor.u32 1.1754944e-38, %v3084_v4  ;;  %v3255_v36 = vor.u32 1.1754944e-38, %v3254_v13  ;;  %vm3083_vm13 = vcmp.eq.f32.partialorder %v3082_v51, 8.507059e+37 }
 0xf36   : > { %v3061_v0 = vmul.f32 %v5306_v24, %v3060_v52  ;;  %vm3253_vm14 = vcmp.eq.f32.partialorder %v3252_v59, 8.507059e+37 }
 0xf37   : > { %4018 = vmatpush.msra.mxu3 %v5073_v61 }
 0xf38   : > { %v3062_v40 = vadd.f32 %v5306_v24, %v3061_v0 }
 0xf39   : > { %v5308_v3 = vpop.eup %5307 }
 0xf3a   : > { %v5310_v30 = vpop.eup %5309  ;;  %v3074_v55 = vmul.f32 %v5308_v3, %v3042_v20  ;;  %v3066_v21 = vsel %vm3065_vm6, %v5306_v24, %v3062_v40  ;;  %3693 = vrot.lane.b32.xlu1 %v6675_v10, %s5391_s14  ;;  %4906 = vmatmul.msk.f32.gmra.mxu3 %vm544_vm4, %v3242_v34  ;;  %vm3079_vm1 = vweird.f32 %v5308_v3 }
 0xf3b   : > { %v3244_v43 = vmul.f32 %v5310_v30, %v3212_v38  ;;  %v3071_v1 = vsel %vm3068_vm7, %v3070_v53, %v3066_v21  ;;  %vm3249_vm3 = vweird.f32 %v5310_v30  ;;  %vm3080_vm10 = vmor %vm3078_vm12, %vm3079_vm1 }
 0xf3c   : > { %v3075_v63 = vsub.f32 1.0, %v3074_v55  ;;  %v3072_v18 = vmul.f32 %v6939_v41, %v3071_v1  ;;  %vm3250_vm15 = vmor %vm3248_vm8, %vm3249_vm3 }
 0xf3d   : > { %v3245_v33 = vsub.f32 1.0, %v3244_v43 }
 0xf3e   : > { %v3076_v29 = vmul.f32 %v5308_v3, %v3075_v63  ;;  %4896 = vmatmul.msk.f32.gmra.mxu1 %vm544_vm4, %v3072_v18  ;;  %4578 = vst.msk [vmem:[%s7038_s11 + $0x38] sm:$0xff] %vm544_vm4, %v3072_v18 }
 0xf3f   : > { %v3246_v19 = vmul.f32 %v5310_v30, %v3245_v33  ;;  %v3592_v10 = vpop.xlane.xlu2 %3591 }
 0xf40   : > { %v3077_v7 = vadd.f32 %v5308_v3, %v3076_v29  ;;  %5311 = vrcp.f32 %v3592_v10  ;;  %v3610_v8 = vand.u32 2147483648, %v3592_v10  ;;  %vm3604_vm7 = vweird.f32 %v3592_v10 }
 0xf41   : > { %v3247_v60 = vadd.f32 %v5310_v30, %v3246_v19  ;;  %v3422_v41 = vpop.xlane.xlu0 %3421 }
 0xf42   : > { %5313 = vrcp.f32 %v3422_v41  ;;  %v3081_v32 = vsel %vm3080_vm10, %v5308_v3, %v3077_v7  ;;  %v3440_v57 = vand.u32 2147483648, %v3422_v41  ;;  %v3438_v48 = vand.u32 2147483647, %v3422_v41 }
 0xf43   : > { %v3251_v47 = vsel %vm3250_vm15, %v5310_v30, %v3247_v60  ;;  %v3086_v28 = vsel %vm3083_vm13, %v3085_v31, %v3081_v32  ;;  %v3611_v20 = vor.u32 1.1754944e-38, %v3610_v8  ;;  %vm3434_vm10 = vweird.f32 %v3422_v41 }
 0xf44   : > { %v3256_v46 = vsel %vm3253_vm14, %v3255_v36, %v3251_v47  ;;  %v3087_v42 = vmul.f32 %v6945_v58, %v3086_v28  ;;  %v3608_v58 = vand.u32 2147483647, %v3592_v10  ;;  %v3441_v0 = vor.u32 1.1754944e-38, %v3440_v57 }
 0xf45   : > { %v3257_v14 = vmul.f32 %v6943_v37, %v3256_v46  ;;  %vm3439_vm15 = vcmp.eq.f32.partialorder %v3438_v48, 8.507059e+37 }
 0xf46   : > { %v5312_v16 = vpop.eup %5311  ;;  %4897 = vmatmul.msk.f32.gmra.mxu1 %vm544_vm4, %v3087_v42  ;;  %4579 = vst.msk [vmem:[%s7038_s11 + $0x40] sm:$0x1] %vm551_vm5, %v3087_v42  ;;  %vm3609_vm12 = vcmp.eq.f32.partialorder %v3608_v58, 8.507059e+37 }
 0xf47   : > { %v3600_v39 = vmul.f32 %v5312_v16, %v3592_v10  ;;  %4907 = vmatmul.msk.f32.gmra.mxu3 %vm544_vm4, %v3257_v14  ;;  %4582 = vst.msk [vmem:[%s7038_s11 + $0x58] sm:$0x1] %vm551_vm5, %v3257_v14  ;;  %vm3605_vm6 = vweird.f32 %v5312_v16 }
 0xf48   : > { %v5314_v6 = vpop.eup %5313  ;;  %vm3606_vm3 = vmor %vm3604_vm7, %vm3605_vm6 }
 0xf49   : > { %v3601_v22 = vsub.f32 1.0, %v3600_v39  ;;  %v3430_v12 = vmul.f32 %v5314_v6, %v3422_v41  ;;  %v3425_v56 = vpop.xlane.xlu1 %3424  ;;  %vm3435_vm1 = vweird.f32 %v5314_v6 }
 0xf4a   : > { %5315 = vrcp.f32 %v3425_v56  ;;  %vm3436_vm8 = vmor %vm3434_vm10, %vm3435_vm1  ;;  %v3455_v21 = vand.u32 2147483648, %v3425_v56  ;;  %vm3449_vm14 = vweird.f32 %v3425_v56 }
 0xf4b   : > { %v3602_v23 = vmul.f32 %v5312_v16, %v3601_v22  ;;  %v3431_v37 = vsub.f32 1.0, %v3430_v12 }
 0xf4d   : > { %v3603_v34 = vadd.f32 %v5312_v16, %v3602_v23  ;;  %v3432_v24 = vmul.f32 %v5314_v6, %v3431_v37 }
 0xf4f   : > { %v3607_v38 = vsel %vm3606_vm3, %v5312_v16, %v3603_v34  ;;  %v3433_v52 = vadd.f32 %v5314_v6, %v3432_v24 }
 0xf50   : > { %v5316_v45 = vpop.eup %5315  ;;  %v3612_v49 = vsel %vm3609_vm12, %v3611_v20, %v3607_v38 }
 0xf51   : > { %v3613_v25 = vmul.f32 %v6953_v2, %v3612_v49  ;;  %v3437_v61 = vsel %vm3436_vm8, %v5314_v6, %v3433_v52  ;;  %v3445_v40 = vmul.f32 %v5316_v45, %v3425_v56  ;;  %v3595_v53 = vpop.xlane.xlu1 %3594  ;;  %vm3450_vm13 = vweird.f32 %v5316_v45 }
 0xf52   : > { %v3442_v3 = vsel %vm3439_vm15, %v3441_v0, %v3437_v61  ;;  %5317 = vrcp.f32 %v3595_v53  ;;  %v3453_v2 = vand.u32 2147483647, %v3425_v56  ;;  %vm3451_vm6 = vmor %vm3449_vm14, %vm3450_vm13  ;;  %v3625_v19 = vand.u32 2147483648, %v3595_v53 }
 0xf53   : > { %4586 = vst.msk [vmem:[%s7038_s11 + $0x78] sm:$0xff] %vm544_vm4, %v3613_v25  ;;  %v3443_v30 = vmul.f32 %v6958_v15, %v3442_v3  ;;  %v3446_v55 = vsub.f32 1.0, %v3445_v40  ;;  %4925 = vmatmul.msk.f32.vlgmr.msrb.gmra.mxu3 %vm544_vm4, %v3613_v25  ;;  %v3456_v15 = vor.u32 1.1754944e-38, %v3455_v21  ;;  %v3623_v10 = vand.u32 2147483647, %v3595_v53 }
 0xf54   : > { %v3862_v43 = vpop.permute.xlu0 %3861  ;;  %vm3454_vm7 = vcmp.eq.f32.partialorder %v3453_v2, 8.507059e+37  ;;  %vm3619_vm3 = vweird.f32 %v3595_v53  ;;  %v3626_v60 = vor.u32 1.1754944e-38, %v3625_v19 }
 0xf55   : > { %4583 = vst.msk [vmem:[%s7038_s11 + $0x60] sm:$0xff] %vm544_vm4, %v3443_v30  ;;  %v3447_v1 = vmul.f32 %v5316_v45, %v3446_v55  ;;  %4915 = vmatmul.msk.f32.vlgmr.msrb.gmra.mxu1 %vm544_vm4, %v3443_v30  ;;  %4942 = vmatmul.msk.f32.gmra.mxu2 %vm502_vm0, %v3862_v43  ;;  %vm3624_vm10 = vcmp.eq.f32.partialorder %v3623_v10, 8.507059e+37 }
 0xf57   : > { %v3448_v63 = vadd.f32 %v5316_v45, %v3447_v1 }
 0xf58   : > { %v5318_v18 = vpop.eup %5317 }
 0xf59   : > { %v3452_v33 = vsel %vm3451_vm6, %v5316_v45, %v3448_v63  ;;  %v3615_v29 = vmul.f32 %v5318_v18, %v3595_v53  ;;  %vm3620_vm1 = vweird.f32 %v5318_v18 }
 0xf5a   : > { %v3457_v4 = vsel %vm3454_vm7, %v3456_v15, %v3452_v33  ;;  %vm3621_vm12 = vmor %vm3619_vm3, %vm3620_vm1 }
 0xf5b   : > { %v3458_v13 = vmul.f32 %v6963_v27, %v3457_v4  ;;  %v3616_v51 = vsub.f32 1.0, %v3615_v29  ;;  %v5076_v27 = vpop.permute.xlu2 %5075 }
 0xf5c   : > { %v5077_v47 = vunpack.i.l.bf16 %v5076_v27  ;;  %v5078_v28 = vunpack.i.h.bf16 %v5076_v27 }
 0xf5d   : > { %4916 = vmatmul.msk.f32.gmra.mxu1 %vm544_vm4, %v3458_v13  ;;  %4584 = vst.msk [vmem:[%s7038_s11 + $0x68] sm:$0xff] %vm544_vm4, %v3458_v13  ;;  %v3617_v59 = vmul.f32 %v5318_v18, %v3616_v51 }
 0xf5f   : > { %v3618_v7 = vadd.f32 %v5318_v18, %v3617_v59 }
 0xf61   : > { %v3622_v41 = vsel %vm3621_vm12, %v5318_v18, %v3618_v7 }
 0xf62   : > { %v3627_v31 = vsel %vm3624_vm10, %v3626_v60, %v3622_v41 }
 0xf63   : > { %v3628_v36 = vmul.f32 %v6967_v5, %v3627_v31 }
 0xf65   : > { %4926 = vmatmul.msk.f32.gmra.mxu3 %vm544_vm4, %v3628_v36  ;;  %4587 = vst.msk [vmem:[%s7038_s11 + $0x80] sm:$0xff] %vm544_vm4, %v3628_v36 }
 0xf69   : > { %v3819_v32 = vpop.permute.xlu1 %3818 }
 0xf6a   : > { %4934 = vmatpush.msk.msra.mxu1 %vm286_vm2, %v3819_v32 }
 0xf6c   : > { %3847 = vmatpush.msra.mxu1 %v5077_v47 }
 0xf6e   : > { %3848 = vmatpush.msra.mxu1 %v5078_v28 }
 0xf7f   : > { %v3598_v46 = vpop.xlane.xlu0 %3597 }
 0xf80   : > { %5319 = vrcp.f32 %v3598_v46  ;;  %v3428_v42 = vpop.xlane.xlu2 %3427  ;;  %v3640_v56 = vand.u32 2147483648, %v3598_v46  ;;  %v3638_v58 = vand.u32 2147483647, %v3598_v46  ;;  %vm3634_vm13 = vweird.f32 %v3598_v46 }
 0xf81   : > { %5321 = vrcp.f32 %v3428_v42  ;;  %v3470_v37 = vand.u32 2147483648, %v3428_v42  ;;  %v3468_v34 = vand.u32 2147483647, %v3428_v42  ;;  %vm3464_vm6 = vweird.f32 %v3428_v42 }
 0xf82   : > { %v3641_v20 = vor.u32 1.1754944e-38, %v3640_v56  ;;  %vm3639_vm7 = vcmp.eq.f32.partialorder %v3638_v58, 8.507059e+37 }
 0xf83   : > { %v3471_v52 = vor.u32 1.1754944e-38, %v3470_v37  ;;  %vm3469_vm3 = vcmp.eq.f32.partialorder %v3468_v34, 8.507059e+37 }
 0xf86   : > { %v5320_v14 = vpop.eup %5319 }
 0xf87   : > { %v5322_v16 = vpop.eup %5321  ;;  %v3630_v39 = vmul.f32 %v5320_v14, %v3598_v46  ;;  %v3932_v5 = vpop.xlane.xlu0 %3931  ;;  %vm3635_vm8 = vweird.f32 %v5320_v14 }
 0xf88   : > { %v3460_v6 = vmul.f32 %v5322_v16, %v3428_v42  ;;  %5323 = vrcp.f32 %v3932_v5  ;;  %v3864_v22 = vpop.permute.xlu2 %3863  ;;  %vm3465_vm15 = vweird.f32 %v5322_v16  ;;  %vm3636_vm14 = vmor %vm3634_vm13, %vm3635_vm8  ;;  %v3950_v30 = vand.u32 2147483648, %v3932_v5 }
 0xf89   : > { %v3631_v12 = vsub.f32 1.0, %v3630_v39  ;;  %4943 = vmatmul.msk.f32.gmra.mxu2 %vm502_vm0, %v3864_v22  ;;  %vm3466_vm1 = vmor %vm3464_vm6, %vm3465_vm15  ;;  %v3948_v43 = vand.u32 2147483647, %v3932_v5  ;;  %vm3944_vm10 = vweird.f32 %v3932_v5 }
 0xf8a   : > { %v3461_v8 = vsub.f32 1.0, %v3460_v6 }
 0xf8b   : > { %v3632_v23 = vmul.f32 %v5320_v14, %v3631_v12  ;;  %vm3949_vm15 = vcmp.eq.f32.partialorder %v3948_v43, 8.507059e+37 }
 0xf8c   : > { %v3462_v57 = vmul.f32 %v5322_v16, %v3461_v8 }
 0xf8d   : > { %v3633_v24 = vadd.f32 %v5320_v14, %v3632_v23  ;;  %v7253_v49 = vpop.f32.mrf.mxu1 }
 0xf8e   : > { %v5324_v48 = vpop.eup %5323  ;;  %v3463_v38 = vadd.f32 %v5322_v16, %v3462_v57 }
 0xf8f   : > { %v3940_v45 = vmul.f32 %v5324_v48, %v3932_v5  ;;  %v3637_v0 = vsel %vm3636_vm14, %v5320_v14, %v3633_v24  ;;  %vm3945_vm12 = vweird.f32 %v5324_v48 }
 0xf90   : > { %v3642_v25 = vsel %vm3639_vm7, %v3641_v20, %v3637_v0  ;;  %v3467_v61 = vsel %vm3466_vm1, %v5322_v16, %v3463_v38  ;;  %vm3946_vm8 = vmor %vm3944_vm10, %vm3945_vm12  ;;  %v4087_v20 = vld [vmem:[%s7639_s1 + $0x160] sm:$0xff]  ;;  %v4086_v38 = vld [vmem:[%s7639_s1 + $0x158] sm:$0xff]  ;;  %vm7671_vm1 = vcmask 261120  }
 0xf91   : > { %v3941_v40 = vsub.f32 1.0, %v3940_v45  ;;  %v3643_v3 = vmul.f32 %v6992_v17, %v3642_v25  ;;  %v3472_v53 = vsel %vm3469_vm3, %v3471_v52, %v3467_v61  ;;  %v3951_v17 = vor.u32 1.1754944e-38, %v3950_v30  ;;  %4113 = vmatpush.msrb.mxu0 %v4087_v20  ;;  %v4085_v45 = vld [vmem:[%s7639_s1 + $0x150] sm:$0xff]  ;;  %v4084_v0 = vld [vmem:[%s7639_s1 + $0x148] sm:$0xff]  ;;  %vm7672_vm3 = vmmov %vm7671_vm1 }
 0xf92   : > { %v3473_v55 = vmul.f32 %v6988_v54, %v3472_v53  ;;  %vm7673_vm12 = vmmov %vm7671_vm1 }
 0xf93   : > { %v3942_v21 = vmul.f32 %v5324_v48, %v3941_v40  ;;  %4927 = vmatmul.msk.f32.gmra.mxu3 %vm544_vm4, %v3643_v3  ;;  %4588 = vst.msk [vmem:[%s7038_s11 + $0x88] sm:$0x1] %vm551_vm5, %v3643_v3  ;;  %4114 = vmatpush.msrb.mxu0 %v4086_v38 }
 0xf94   : > { %4917 = vmatmul.msk.f32.gmra.mxu1 %vm544_vm4, %v3473_v55  ;;  %4585 = vst.msk [vmem:[%s7038_s11 + $0x70] sm:$0x1] %vm551_vm5, %v3473_v55  ;;  %v3762_v2 = vpop.xlane.xlu1 %3761 }
 0xf95   : > { %v3943_v1 = vadd.f32 %v5324_v48, %v3942_v21  ;;  %5325 = vrcp.f32 %v3762_v2  ;;  %v3780_v19 = vand.u32 2147483648, %v3762_v2  ;;  %v3778_v10 = vand.u32 2147483647, %v3762_v2  ;;  %4115 = vmatpush.msrb.mxu0 %v4085_v45 }
 0xf96   : > { %vm3774_vm14 = vweird.f32 %v3762_v2 }
 0xf97   : > { %v3947_v63 = vsel %vm3946_vm8, %v5324_v48, %v3943_v1  ;;  %v7264_v18 = vpop.f32.mrf.mxu1  ;;  %v3781_v60 = vor.u32 1.1754944e-38, %v3780_v19  ;;  %vm3779_vm7 = vcmp.eq.f32.partialorder %v3778_v10, 8.507059e+37  ;;  %4116 = vmatpush.msrb.mxu0 %v4084_v0  ;;  %v7356_v0 = vld [vmem:[%s7640_s2 + $0xc] ss:$0 sm:$0xff] }
 0xf98   : > { %v3952_v54 = vsel %vm3949_vm15, %v3951_v17, %v3947_v63  ;;  %vm7674_vm15 = vmmov %vm7671_vm1 }
 0xf99   : > { %v3953_v15 = vmul.f32 %v7020_v11, %v3952_v54 }
 0xf9a   : > { %v3692_v33 = vpop.permute.xlu0 %3691 }
 0xf9b   : > { %4592 = vst.msk [vmem:[%s7038_s11 + $0xa8] sm:$0xff] %vm544_vm4, %v3953_v15  ;;  %4932 = vmatmul.msk.f32.gmra.mxu0 %vm502_vm0, %v3692_v33  ;;  %4945 = vmatmul.msk.f32.vlgmr.msra.gmra.mxu3 %vm544_vm4, %v3953_v15  ;;  %v5326_v29 = vpop.eup %5325 }
 0xf9c   : > { %v3770_v4 = vmul.f32 %v5326_v29, %v3762_v2  ;;  %v2954_v51 = vpop.f32.mrf.mxu3  ;;  %vm3775_vm13 = vweird.f32 %v5326_v29 }
 0xf9d   : > { %vm3776_vm6 = vmor %vm3774_vm14, %vm3775_vm13 }
 0xf9e   : > { %v3771_v13 = vsub.f32 1.0, %v3770_v4 }
 0xfa0   : > { %v3772_v59 = vmul.f32 %v5326_v29, %v3771_v13  ;;  %v7270_v7 = vpop.f32.mrf.mxu1 }
 0xfa2   : > { %v3773_v11 = vadd.f32 %v5326_v29, %v3772_v59 }
 0xfa4   : > { %v3777_v41 = vsel %vm3776_vm6, %v5326_v29, %v3773_v11  ;;  %vm7675_vm6 = vmmov %vm7671_vm1 }
 0xfa5   : > { %v3782_v31 = vsel %vm3779_vm7, %v3781_v60, %v3777_v41  ;;  %v2957_v27 = vpop.f32.mrf.mxu3 }
 0xfa6   : > { %v3783_v36 = vmul.f32 %v6994_v35, %v3782_v31 }
 0xfa8   : > { %4589 = vst.msk [vmem:[%s7038_s11 + $0x90] sm:$0xff] %vm544_vm4, %v3783_v36  ;;  %v3124_v32 = vpop.f32.mrf.mxu1  ;;  %4935 = vmatmul.msk.f32.vlgmr.msra.gmra.mxu1 %vm544_vm4, %v3783_v36 }
 0xfa9   : > { %3318 = vrot.lane.b32.xlu0 %v3124_v32, %s5395_s20 }
 0xfac   : > { %v3694_v47 = vpop.permute.xlu1 %3693 }
 0xfad   : > { %4933 = vmatmul.msk.f32.gmra.mxu0 %vm502_vm0, %v3694_v47  ;;  %v2960_v28 = vpop.f32.mrf.mxu3 }
 0xfae   : > { %3310 = vrot.lane.b32.xlu1 %v2960_v28, %s5396_s21 }
 0xfb5   : > { %v3294_v46 = vpop.f32.mrf.mxu3 }
 0xfb6   : > { %3330 = vrot.lane.b32.xlu1 %v3294_v46, %s5397_s22 }
 0xfbb   : > { %v3127_v42 = vpop.f32.mrf.mxu1 }
 0xfbc   : > { %3320 = vrot.lane.b32.xlu0 %v3127_v42, %s5395_s20 }
 0xfbd   : > { %v3297_v35 = vpop.f32.mrf.mxu3 }
 0xfbe   : > { %3332 = vrot.lane.b32.xlu1 %v3297_v35, %s5397_s22 }
 0xfc3   : > { %v3130_v14 = vpop.f32.mrf.mxu1 }
 0xfc4   : > { %3322 = vrot.lane.b32.xlu0 %v3130_v14, %s5395_s20 }
 0xfca   : > { %v3300_v16 = vpop.f32.mrf.mxu3 }
 0xfcb   : > { %3334 = vrot.lane.b32.xlu1 %v3300_v16, %s5397_s22 }
 0xfd2   : > { %v3510_v12 = vpop.f32.mrf.mxu1 }
 0xfd6   : > { %v3680_v22 = vpop.f32.mrf.mxu3 }
 0xfd8   : > { %v3903_v39 = vpop.f32.mrf.mxu2 }
 0xfd9   : > { %v3910_v5 = vmul.f32 0.35355338, %v3903_v39 }
 0xfda   : > { %v7291_v37 = vpop.f32.mrf.mxu1 }
 0xfdb   : > { %v3915_v6 = vsel %vm544_vm4, %v3910_v5, -inf }
 0xfdc   : > { %3916 = vmax.xlane.f32.xlu2 %v3915_v6 }
 0xfe8   : > { %v7288_v23 = vpop.f32.mrf.mxu3 }
 0xff4   : > { %3306 = vrot.lane.b32.xlu2 %v2954_v51, %s5396_s21 }
 0xffc   : > { %3308 = vrot.lane.b32.xlu2 %v2957_v27, %s5396_s21 }
0x1004   : > { %4032 = vrot.lane.b32.xlu2 %v3680_v22, %s5396_s21 }
0x100c   : > { %v3906_v56 = vpop.f32.mrf.mxu2 }
0x100d   : > { %v3911_v8 = vmul.f32 0.35355338, %v3906_v56 }
0x100f   : > { %v3918_v58 = vsel %vm551_vm5, %v3911_v8, -inf }
0x1010   : > { %3919 = vmax.xlane.f32.xlu1 %v3918_v58 }
0x1011   : > { %v7295_v34 = vpop.f32.mrf.mxu1 }
0x1016   : > { %v7293_v57 = vpop.f32.mrf.mxu3 }
0x1018   : > { %v3733_v52 = vpop.f32.mrf.mxu0 }
0x1019   : > { %v3740_v3 = vmul.f32 0.35355338, %v3733_v52 }
0x101b   : > { %v3745_v21 = vsel %vm544_vm4, %v3740_v3, -inf  ;;  %v3319_v17 = vpop.permute.xlu0 %3318 }
0x101e   : > { %v4020_v24 = vpop.f32.mrf.mxu3 }
0x101f   : > { %4056 = vrot.lane.b32.xlu2 %v4020_v24, %s5397_s22 }
0x1020   : > { %v3311_v53 = vpop.permute.xlu1 %3310 }
0x1021   : > { %v3341_v42 = vsel %vm502_vm0, %v7270_v7, %v3311_v53 }
0x1025   : > { %v3850_v48 = vpop.f32.mrf.mxu1 }
0x1026   : > { %4044 = vrot.lane.b32.xlu0 %v3850_v48, %s5395_s20 }
0x1028   : > { %v3331_v1 = vpop.permute.xlu1 %3330 }
0x102a   : > { %v3736_v25 = vpop.f32.mrf.mxu0 }
0x102b   : > { %v3741_v61 = vmul.f32 0.35355338, %v3736_v25 }
0x102d   : > { %v3748_v40 = vsel %vm551_vm5, %v3741_v61, -inf }
0x102e   : > { %v3321_v13 = vpop.permute.xlu0 %3320 }
0x1030   : > { %v3333_v19 = vpop.permute.xlu1 %3332 }
0x1036   : > { %v3323_v27 = vpop.permute.xlu0 %3322 }
0x1037   : > { %v3344_v14 = vsel %vm1212_vm9, %v3341_v42, %v3323_v27 }
0x103d   : > { %v3335_v10 = vpop.permute.xlu1 %3334 }
0x103e   : > { %v3347_v39 = vsel %vm1216_vm11, %v3344_v14, %v3335_v10 }
0x1048   : > { %3749 = vmax.xlane.f32.xlu2 %v3748_v40 }
0x104f   : > { %v3917_v30 = vpop.xlane.xlu2 %3916 }
0x1050   : > { %v3922_v55 = vsub.f32 %v3910_v5, %v3917_v30  ;;  %3746 = vmax.xlane.f32.xlu0 %v3745_v21 }
0x1052   : > { %v3926_v43 = vmul.f32 1.442695, %v3922_v55 }
0x1054   : > { %5327 = vpow2.f32 %v3926_v43 }
0x1057   : > { %v3307_v2 = vpop.permute.xlu2 %3306 }
0x1058   : > { %v3339_v63 = vsel %vm502_vm0, %v7253_v49, %v3307_v2 }
0x1059   : > { %v3342_v54 = vsel %vm1212_vm9, %v3339_v63, %v3319_v17 }
0x105a   : > { %v7316_v15 = vpop.eup %5327  ;;  %v3345_v33 = vsel %vm1216_vm11, %v3342_v54, %v3331_v1 }
0x105b   : > { %4948 = vmatmul.msk.f32.vlgmr.msrb.gmra.mxu0 %vm7671_vm1, %v3345_v33  ;;  %v3933_v29 = vsel %vm544_vm4, %v7316_v15, 0.0 }
0x105c   : > { %3934 = vadd.xlane.f32.xlu0 %v3933_v29 }
0x105f   : > { %v3309_v4 = vpop.permute.xlu2 %3308 }
0x1060   : > { %v3340_v51 = vsel %vm502_vm0, %v7264_v18, %v3309_v4 }
0x1061   : > { %v3343_v49 = vsel %vm1212_vm9, %v3340_v51, %v3321_v13 }
0x1062   : > { %v3346_v59 = vsel %vm1216_vm11, %v3343_v49, %v3333_v19 }
0x1063   : > { %4949 = vmatmul.msk.f32.gmra.mxu0 %vm7672_vm3, %v3346_v59 }
0x1067   : > { %v4033_v18 = vpop.permute.xlu2 %4032 }
0x1068   : > { %v4065_v32 = vsel %vm502_vm0, %v3510_v12, %v4033_v18 }
0x1079   : > { %v4057_v28 = vpop.permute.xlu2 %4056 }
0x1083   : > { %v3920_v11 = vpop.xlane.xlu1 %3919 }
0x1084   : > { %v3923_v60 = vsub.f32 %v3911_v8, %v3920_v11 }
0x1086   : > { %v3928_v41 = vmul.f32 1.442695, %v3923_v60 }
0x1088   : > { %5329 = vpow2.f32 %v3928_v41 }
0x108e   : > { %v7327_v31 = vpop.eup %5329 }
0x108f   : > { %v3936_v36 = vsel %vm551_vm5, %v7327_v31, 0.0 }
0x1090   : > { %3937 = vadd.xlane.f32.xlu1 %v3936_v36 }
0x1098   : > { %v4045_v47 = vpop.permute.xlu0 %4044 }
0x1099   : > { %v4068_v46 = vsel %vm1212_vm9, %v4065_v32, %v4045_v47 }
0x109a   : > { %v7336_v35 = vsel %vm1216_vm11, %v4068_v46, %v4057_v28 }
0x109b   : > { %v4077_v16 = vrot.slane %v7336_v35, 7 }
0x109d   : > { %v4083_v5 = vsel %vm286_vm2, %v3347_v39, %v4077_v16 }
0x109e   : > { %4950 = vmatmul.msk.f32.gmra.mxu0 %vm7673_vm12, %v4083_v5 }
0x10bb   : > { %v3750_v6 = vpop.xlane.xlu2 %3749 }
0x10bc   : > { %v3753_v22 = vsub.f32 %v3741_v61, %v3750_v6 }
0x10be   : > { %v3758_v12 = vmul.f32 1.442695, %v3753_v22 }
0x10c0   : > { %5331 = vpow2.f32 %v3758_v12 }
0x10c3   : > { %v3747_v7 = vpop.xlane.xlu0 %3746 }
0x10c4   : > { %v3752_v56 = vsub.f32 %v3740_v3, %v3747_v7 }
0x10c6   : > { %v7345_v8 = vpop.eup %5331  ;;  %v3756_v58 = vmul.f32 1.442695, %v3752_v56 }
0x10c7   : > { %v3766_v24 = vsel %vm551_vm5, %v7345_v8, 0.0 }
0x10c8   : > { %3767 = vadd.xlane.f32.xlu0 %v3766_v24  ;;  %5333 = vpow2.f32 %v3756_v58 }
0x10ce   : > { %v7349_v48 = vpop.eup %5333 }
0x10cf   : > { %v3935_v20 = vpop.xlane.xlu0 %3934  ;;  %v3763_v38 = vsel %vm544_vm4, %v7349_v48, 0.0 }
0x10d0   : > { %5335 = vrcp.f32 %v3935_v20  ;;  %3764 = vadd.xlane.f32.xlu2 %v3763_v38  ;;  %v3965_v3 = vand.u32 2147483648, %v3935_v20  ;;  %v3963_v30 = vand.u32 2147483647, %v3935_v20  ;;  %vm3959_vm8 = vweird.f32 %v3935_v20 }
0x10d2   : > { %v3966_v1 = vor.u32 1.1754944e-38, %v3965_v3  ;;  %vm3964_vm14 = vcmp.eq.f32.partialorder %v3963_v30, 8.507059e+37 }
0x10d6   : > { %v5336_v52 = vpop.eup %5335 }
0x10d7   : > { %v3955_v45 = vmul.f32 %v5336_v52, %v3935_v20  ;;  %vm3960_vm10 = vweird.f32 %v5336_v52 }
0x10d8   : > { %v4118_v25 = vpop.f32.mrf.mxu0  ;;  %vm3961_vm13 = vmor %vm3959_vm8, %vm3960_vm10 }
0x10d9   : > { %v3956_v61 = vsub.f32 1.0, %v3955_v45  ;;  %v4133_v40 = vadd.f32 %v4118_v25, %v6514_v26  ;;  %vm7676_vm10 = vmmov %vm7675_vm6 }
0x10db   : > { %v3957_v53 = vmul.f32 %v5336_v52, %v3956_v61  ;;  %v7360_v55 = vadd.f32 %v7356_v0, %v4133_v40 }
0x10dd   : > { %v3958_v21 = vadd.f32 %v5336_v52, %v3957_v53  ;;  %v4147_v43 = vsel %vm7674_vm15, %v7360_v55, 0.0 }
0x10de   : > { %4148 = vadd.xlane.f32.xlu2 %v4147_v43 }
0x10df   : > { %v3962_v2 = vsel %vm3961_vm13, %v5336_v52, %v3958_v21 }
0x10e0   : > { %v4121_v17 = vpop.f32.mrf.mxu0  ;;  %v3967_v26 = vsel %vm3964_vm14, %v3966_v1, %v3962_v2 }
0x10e1   : > { %v4134_v63 = vadd.f32 %v4121_v17, %v6519_v62  ;;  %v3968_v54 = vmul.f32 %v7316_v15, %v3967_v26 }
0x10e3   : > { %v7367_v33 = vadd.f32 %v7356_v0, %v4134_v63  ;;  %4946 = vmatmul.msk.f32.gmra.mxu3 %vm544_vm4, %v3968_v54  ;;  %4593 = vst.msk [vmem:[%s7038_s11 + $0xb0] sm:$0xff] %vm544_vm4, %v3968_v54 }
0x10e5   : > { %v4150_v29 = vsel %vm7675_vm6, %v7367_v33, 0.0 }
0x10e6   : > { %4151 = vadd.xlane.f32.xlu1 %v4150_v29  ;;  %v4270_v29 = vld [vmem:[%s7639_s1 + $0x170] sm:$0xff] }
0x1103   : > { %v3938_v4 = vpop.xlane.xlu1 %3937 }
0x1104   : > { %5337 = vrcp.f32 %v3938_v4  ;;  %v3980_v62 = vand.u32 2147483648, %v3938_v4  ;;  %v3978_v15 = vand.u32 2147483647, %v3938_v4  ;;  %vm3974_vm1 = vweird.f32 %v3938_v4 }
0x1106   : > { %v3981_v10 = vor.u32 1.1754944e-38, %v3980_v62  ;;  %vm3979_vm12 = vcmp.eq.f32.partialorder %v3978_v15, 8.507059e+37 }
0x110a   : > { %v5338_v13 = vpop.eup %5337 }
0x110b   : > { %v3970_v51 = vmul.f32 %v5338_v13, %v3938_v4  ;;  %vm3975_vm7 = vweird.f32 %v5338_v13  ;;  %v4269_v4 = vld [vmem:[%s7639_s1 + $0x168] sm:$0xff] }
0x110c   : > { %vm3976_vm3 = vmor %vm3974_vm1, %vm3975_vm7 }
0x110d   : > { %v3971_v19 = vsub.f32 1.0, %v3970_v51 }
0x110f   : > { %v3972_v49 = vmul.f32 %v5338_v13, %v3971_v19 }
0x1111   : > { %v3973_v59 = vadd.f32 %v5338_v13, %v3972_v49 }
0x1113   : > { %v3977_v11 = vsel %vm3976_vm3, %v5338_v13, %v3973_v59 }
0x1114   : > { %v3982_v60 = vsel %vm3979_vm12, %v3981_v10, %v3977_v11 }
0x1115   : > { %v3983_v41 = vmul.f32 %v7327_v31, %v3982_v60 }
0x1117   : > { %4947 = vmatmul.msk.f32.gmra.mxu3 %vm544_vm4, %v3983_v41  ;;  %4594 = vst.msk [vmem:[%s7038_s11 + $0xb8] sm:$0x1] %vm551_vm5, %v3983_v41  ;;  %v7425_v41 = vld [vmem:[%s7640_s2 + $0xd] ss:$0 sm:$0xff] }
0x111b   : > { %v4124_v36 = vpop.f32.mrf.mxu0 }
0x111c   : > { %v4135_v27 = vadd.f32 %v4124_v36, %v6524_v9 }
0x111e   : > { %v7380_v18 = vadd.f32 %v7356_v0, %v4135_v27  ;;  %v7430_v27 = vld [vmem:[%s7640_s2 + $0xe] ss:$0 sm:$0xff] }
0x1120   : > { %v4153_v32 = vsel %vm7676_vm10, %v7380_v18, 0.0 }
0x1121   : > { %4154 = vadd.xlane.f32.xlu0 %v4153_v32 }
0x113b   : > { %v3768_v47 = vpop.xlane.xlu0 %3767 }
0x113c   : > { %5339 = vrcp.f32 %v3768_v47  ;;  %v3810_v14 = vand.u32 2147483648, %v3768_v47  ;;  %v3808_v5 = vand.u32 2147483647, %v3768_v47  ;;  %vm3804_vm15 = vweird.f32 %v3768_v47 }
0x113e   : > { %v3811_v6 = vor.u32 1.1754944e-38, %v3810_v14  ;;  %vm3809_vm14 = vcmp.eq.f32.partialorder %v3808_v5, 8.507059e+37 }
0x1142   : > { %v5340_v28 = vpop.eup %5339 }
0x1143   : > { %v3800_v46 = vmul.f32 %v5340_v28, %v3768_v47  ;;  %v3765_v31 = vpop.xlane.xlu2 %3764  ;;  %vm3805_vm8 = vweird.f32 %v5340_v28 }
0x1144   : > { %5341 = vrcp.f32 %v3765_v31  ;;  %vm3806_vm13 = vmor %vm3804_vm15, %vm3805_vm8  ;;  %v3795_v20 = vand.u32 2147483648, %v3765_v31  ;;  %v3793_v52 = vand.u32 2147483647, %v3765_v31  ;;  %vm3789_vm7 = vweird.f32 %v3765_v31 }
0x1145   : > { %v3801_v42 = vsub.f32 1.0, %v3800_v46 }
0x1146   : > { %v3796_v40 = vor.u32 1.1754944e-38, %v3795_v20  ;;  %vm3794_vm3 = vcmp.eq.f32.partialorder %v3793_v52, 8.507059e+37 }
0x1147   : > { %v3802_v39 = vmul.f32 %v5340_v28, %v3801_v42 }
0x1149   : > { %v3803_v9 = vadd.f32 %v5340_v28, %v3802_v39 }
0x114a   : > { %v5342_v12 = vpop.eup %5341 }
0x114b   : > { %v3807_v22 = vsel %vm3806_vm13, %v5340_v28, %v3803_v9  ;;  %v3785_v56 = vmul.f32 %v5342_v12, %v3765_v31  ;;  %vm3790_vm6 = vweird.f32 %v5342_v12 }
0x114c   : > { %v3812_v7 = vsel %vm3809_vm14, %v3811_v6, %v3807_v22  ;;  %vm3791_vm1 = vmor %vm3789_vm7, %vm3790_vm6 }
0x114d   : > { %v3813_v58 = vmul.f32 %v7345_v8, %v3812_v7  ;;  %v3786_v24 = vsub.f32 1.0, %v3785_v56 }
0x114f   : > { %4591 = vst.msk [vmem:[%s7038_s11 + $0xa0] sm:$0x1] %vm551_vm5, %v3813_v58  ;;  %v3787_v38 = vmul.f32 %v5342_v12, %v3786_v24  ;;  %vm7677_vm5 = vmmov %vm7676_vm10 }
0x1150   : > { %vm7678_vm12 = vmmov %vm7677_vm5 }
0x1151   : > { %v4149_v45 = vpop.xlane.xlu2 %4148  ;;  %v3788_v61 = vadd.f32 %v5342_v12, %v3787_v38  ;;  %vm7679_vm15 = vmmov %vm7677_vm5 }
0x1152   : > { %v4162_v25 = vmul.f32 %v4149_v45, %v5493_v50  ;;  %vm7680_vm13 = vmmov %vm7677_vm5 }
0x1153   : > { %v3792_v53 = vsel %vm3791_vm1, %v5342_v12, %v3788_v61  ;;  %vm7681_vm14 = vmmov %vm7677_vm5 }
0x1154   : > { %v4167_v3 = vsub.f32 %v7360_v55, %v4162_v25  ;;  %v3797_v8 = vsel %vm3794_vm3, %v3796_v40, %v3792_v53  ;;  %v4537_v25 = vld [vmem:[%s7639_s1 + $0x200] sm:$0xff]  ;;  %v4536_v40 = vld [vmem:[%s7639_s1 + $0x1f8] sm:$0xff]  ;;  %v4535_v53 = vld [vmem:[%s7639_s1 + $0x1f0] sm:$0xff] }
0x1155   : > { %v3798_v21 = vmul.f32 %v7349_v48, %v3797_v8  ;;  %4540 = vmatpush.msra.mxu2 %v4537_v25  ;;  %v4534_v8 = vld [vmem:[%s7639_s1 + $0x1e8] sm:$0xff] }
0x1156   : > { %v4172_v30 = vmul.f32 %v4167_v3, %v4167_v3 }
0x1157   : > { %4936 = vmatmul.msk.f32.gmra.mxu1 %vm544_vm4, %v3798_v21  ;;  %4590 = vst.msk [vmem:[%s7038_s11 + $0x98] sm:$0xff] %vm544_vm4, %v3798_v21  ;;  %4541 = vmatpush.msra.mxu2 %v4536_v40  ;;  %v4533_v21 = vld [vmem:[%s7639_s1 + $0x1e0] sm:$0xff] }
0x1158   : > { %v4177_v43 = vsel %vm7677_vm5, %v4172_v30, 0.0 }
0x1159   : > { %4178 = vadd.xlane.f32.xlu2 %v4177_v43  ;;  %v4152_v46 = vpop.xlane.xlu1 %4151  ;;  %4542 = vmatpush.msra.mxu2 %v4535_v53 }
0x115a   : > { %v4163_v42 = vmul.f32 %v4152_v46, %v5493_v50 }
0x115b   : > { %4543 = vmatpush.msra.mxu2 %v4534_v8 }
0x115c   : > { %v7437_v31 = vsub.f32 %v7367_v33, %v4163_v42 }
0x115d   : > { %4544 = vmatpush.msra.mxu2 %v4533_v21 }
0x115e   : > { %v4173_v14 = vmul.f32 %v7437_v31, %v7437_v31 }
0x115f   : > { %4937 = vmatmul.msk.f32.gmra.mxu1 %vm544_vm4, %v3813_v58 }
0x1160   : > { %v4180_v39 = vsel %vm7680_vm13, %v4173_v14, 0.0 }
0x1166   : > { %v4023_v1 = vpop.f32.mrf.mxu3 }
0x1167   : > { %4058 = vrot.lane.b32.xlu0 %v4023_v1, %s5397_s22 }
0x1171   : > { %4034 = vrot.lane.b32.xlu2 %v7288_v23, %s5396_s21  ;;  %v4272_v23 = vld [vmem:[%s7639_s1 + $0x180] sm:$0xff] }
0x1172   : > { %4302 = vmatpush.msrb.mxu1 %v4272_v23  ;;  %v4531_v23 = vld [vmem:[%s7639_s1 + $0x1d0] sm:$0xff] }
0x1179   : > { %4036 = vrot.lane.b32.xlu2 %v7293_v57, %s5396_s21  ;;  %v4271_v57 = vld [vmem:[%s7639_s1 + $0x178] sm:$0xff] }
0x117a   : > { %4303 = vmatpush.msrb.mxu1 %v4271_v57 }
0x117c   : > { %4304 = vmatpush.msrb.mxu1 %v4270_v29  ;;  %v4530_v29 = vld [vmem:[%s7639_s1 + $0x1c8] sm:$0xff] }
0x117e   : > { %4305 = vmatpush.msrb.mxu1 %v4269_v4 }
0x1194   : > { %v4155_v2 = vpop.xlane.xlu0 %4154 }
0x1195   : > { %v4164_v48 = vmul.f32 %v4155_v2, %v5493_v50  ;;  %v4532_v2 = vld [vmem:[%s7639_s1 + $0x1d8] sm:$0xff] }
0x1196   : > { %4545 = vmatpush.msra.mxu2 %v4532_v2 }
0x1197   : > { %v7402_v17 = vsub.f32 %v7380_v18, %v4164_v48 }
0x1198   : > { %4546 = vmatpush.msra.mxu2 %v4531_v23 }
0x1199   : > { %v4174_v26 = vmul.f32 %v7402_v17, %v7402_v17 }
0x119a   : > { %v4026_v54 = vpop.f32.mrf.mxu3  ;;  %4547 = vmatpush.msra.mxu2 %v4530_v29 }
0x119b   : > { %v4183_v63 = vsel %vm7678_vm12, %v4174_v26, 0.0 }
0x119c   : > { %4184 = vadd.xlane.f32.xlu0 %v4183_v63 }
0x11b0   : > { %4060 = vrot.lane.b32.xlu0 %v4026_v54, %s5397_s22 }
0x11cc   : > { %v4179_v13 = vpop.xlane.xlu2 %4178 }
0x11cd   : > { %v4192_v51 = vmul.f32 %v4179_v13, %v5493_v50 }
0x11cf   : > { %v4197_v19 = vadd.f32 1e-06, %v4192_v51 }
0x11d1   : > { %5343 = vrsqrt.f32 %v4197_v19  ;;  %vm4208_vm10 = vweird.f32 %v4197_v19 }
0x11d4   : > { %v3853_v62 = vpop.f32.mrf.mxu1  ;;  %v4035_v9 = vpop.permute.xlu2 %4034 }
0x11d5   : > { %4046 = vrot.lane.b32.xlu1 %v3853_v62, %s5395_s20  ;;  %v4066_v6 = vsel %vm502_vm0, %v7291_v37, %v4035_v9  ;;  %v7459_v37 = vld [vmem:[%s7640_s2 + $0xf] ss:$0 sm:$0xff]  ;;  %v4529_v62 = vld [vmem:[%s7639_s1 + $0x1c0] sm:$0xff] }
0x11d6   : > { %4548 = vmatpush.msra.mxu2 %v4529_v62 }
0x11d7   : > { %v5344_v49 = vpop.eup %5343 }
0x11d8   : > { %v4203_v15 = vmul.f32 %v5344_v49, %v4197_v19  ;;  %vm4209_vm4 = vweird.f32 %v5344_v49 }
0x11d9   : > { %vm4210_vm8 = vmor %vm4208_vm10, %vm4209_vm4  ;;  %v4059_v12 = vpop.permute.xlu0 %4058 }
0x11da   : > { %v4204_v59 = vmul.f32 %v5344_v49, %v4203_v15 }
0x11dc   : > { %v4205_v10 = vmul.f32 0.5, %v4204_v59  ;;  %v3856_v5 = vpop.f32.mrf.mxu1  ;;  %v4527_v59 = vld [vmem:[%s7639_s1 + $0x1b0] sm:$0xff] }
0x11de   : > { %v4206_v11 = vsub.f32 1.5, %v4205_v10 }
0x11e0   : > { %v4207_v60 = vmul.f32 %v5344_v49, %v4206_v11 }
0x11e2   : > { %v4211_v36 = vsel %vm4210_vm8, %v5344_v49, %v4207_v60  ;;  %v4528_v49 = vld [vmem:[%s7639_s1 + $0x1b8] sm:$0xff] }
0x11e3   : > { %v4252_v32 = vmul.f32 %v4211_v36, %v4167_v3  ;;  %4549 = vmatpush.msra.mxu2 %v4528_v49 }
0x11e5   : > { %v4258_v47 = vmul.f32 %v7425_v41, %v4252_v32  ;;  %4550 = vmatpush.msra.mxu2 %v4527_v59 }
0x11e7   : > { %v4264_v28 = vadd.f32 %v7430_v27, %v4258_v47  ;;  %v4526_v47 = vld [vmem:[%s7639_s1 + $0x1a8] sm:$0xff] }
0x11e8   : > { %4551 = vmatpush.msra.mxu2 %v4526_v47  ;;  %v7686_v47 = vld [vmem:[#allocation2_spill] sm:$0xff] }
0x11e9   : > { %4953 = vmatmul.msk.f32.vlgmr.msrb.gmra.mxu1 %vm7679_vm15, %v4264_v28 }
0x11ff   : > { %4181 = vadd.xlane.f32.xlu1 %v4180_v39  ;;  %v4525_v39 = vld [vmem:[%s7639_s1 + $0x1a0] sm:$0xff] }
0x1200   : > { %4552 = vmatpush.msra.mxu2 %v4525_v39 }
0x120f   : > { %v4185_v24 = vpop.xlane.xlu0 %4184 }
0x1210   : > { %v4194_v38 = vmul.f32 %v4185_v24, %v5493_v50  ;;  %v4523_v24 = vld [vmem:[%s7639_s1 + $0x190] sm:$0xff] }
0x1212   : > { %v7468_v35 = vadd.f32 1e-06, %v4194_v38 }
0x1214   : > { %5345 = vrsqrt.f32 %v7468_v35  ;;  %vm4228_vm8 = vweird.f32 %v7468_v35 }
0x1218   : > { %4048 = vrot.lane.b32.xlu1 %v3856_v5, %s5395_s20  ;;  %s4753_s20 = sshll.u32 %s5444_s23, 1 }
0x1219   : > { %s211_s14 = scalar_lea.vmem %s7642_s4, %s4753_s20 }
0x121a   : > { %v7487_v43 = vpop.eup %5345 }
0x121b   : > { %v4223_v63 = vmul.f32 %v7487_v43, %v7468_v35  ;;  %vm4229_vm12 = vweird.f32 %v7487_v43 }
0x121c   : > { %vm4230_vm15 = vmor %vm4228_vm8, %vm4229_vm12 }
0x121d   : > { %v4224_v13 = vmul.f32 %v7487_v43, %v4223_v63 }
0x121f   : > { %v4225_v60 = vmul.f32 0.5, %v4224_v13 }
0x1221   : > { %v4226_v5 = vsub.f32 1.5, %v4225_v60 }
0x1247   : > { %v4047_v22 = vpop.permute.xlu1 %4046 }
0x1248   : > { %v4069_v7 = vsel %vm1212_vm9, %v4066_v6, %v4047_v22  ;;  %v4524_v22 = vld [vmem:[%s7639_s1 + $0x198] sm:$0xff] }
0x1249   : > { %v7447_v33 = vsel %vm1216_vm11, %v4069_v7, %v4059_v12  ;;  %4553 = vmatpush.msra.mxu2 %v4524_v22 }
0x124a   : > { %v4078_v56 = vrot.slane %v7447_v33, 7 }
0x124b   : > { %4554 = vmatpush.msra.mxu2 %v4523_v24 }
0x124c   : > { %v4079_v58 = vsel %vm286_vm2, %v4077_v16, %v4078_v56 }
0x124d   : > { %4951 = vmatmul.msk.f32.gmra.mxu0 %vm7681_vm14, %v4079_v58 }
0x1266   : > { %v4307_v20 = vpop.f32.mrf.mxu1 }
0x1267   : > { %v7463_v52 = vadd.f32 %v7459_v37, %v4307_v20  ;;  %v4227_v20 = vmul.f32 %v7487_v43, %v4226_v5 }
0x1269   : > { %v7466_v45 = vmul.f32 0.70710677, %v7463_v52  ;;  %v4231_v21 = vsel %vm4230_vm15, %v7487_v43, %v4227_v20  ;;  %v4507_v33 = vmul.f32 0.5, %v7463_v52 }
0x126a   : > { %v4254_v23 = vmul.f32 %v4231_v21, %v7402_v17 }
0x126b   : > { %v4327_v16 = vand.u32 2147483647, %v7466_v45 }
0x126c   : > { %v4260_v13 = vmul.f32 %v7425_v41, %v4254_v23 }
0x126d   : > { %v4332_v61 = vmul.f32 0.3275911, %v4327_v16  ;;  %v4462_v46 = vsub.f32 0.0, %v4327_v16 }
0x126e   : > { %v4266_v17 = vadd.f32 %v7430_v27, %v4260_v13 }
0x126f   : > { %v4337_v3 = vadd.f32 1.0, %v4332_v61  ;;  %v4467_v12 = vmul.f32 %v4462_v46, %v4327_v16  ;;  %v4522_v16 = vld [vmem:[%s7639_s1 + $0x188] sm:$0xff]  ;;  %v4037_v61 = vpop.permute.xlu2 %4036 }
0x1270   : > { %4555 = vmatpush.msra.mxu2 %v4522_v16 }
0x1271   : > { %5347 = vrcp.f32 %v4337_v3  ;;  %v4353_v4 = vand.u32 2147483648, %v4337_v3  ;;  %v4351_v19 = vand.u32 2147483647, %v4337_v3  ;;  %vm4347_vm7 = vweird.f32 %v4337_v3 }
0x1272   : > { %v4182_v30 = vpop.xlane.xlu1 %4181  ;;  %v4472_v40 = vmul.f32 1.442695, %v4467_v12 }
0x1273   : > { %v4193_v1 = vmul.f32 %v4182_v30, %v5493_v50  ;;  %v4354_v11 = vor.u32 1.1754944e-38, %v4353_v4  ;;  %vm4352_vm3 = vcmp.eq.f32.partialorder %v4351_v19, 8.507059e+37  ;;  %v4067_v30 = vsel %vm502_vm0, %v7295_v34, %v4037_v61  ;;  %vm7682_vm0 = vmmov %vm7680_vm13 }
0x1274   : > { %vm7683_vm13 = vmmov %vm7682_vm0 }
0x1275   : > { %v4198_v26 = vadd.f32 1e-06, %v4193_v1  ;;  %vm7685_vm14 = vmmov %vm7682_vm0 }
0x1277   : > { %v5348_v48 = vpop.eup %5347  ;;  %5349 = vrsqrt.f32 %v4198_v26  ;;  %vm4218_vm4 = vweird.f32 %v4198_v26 }
0x1278   : > { %v4343_v54 = vmul.f32 %v5348_v48, %v4337_v3  ;;  %vm4348_vm6 = vweird.f32 %v5348_v48  ;;  %5351 = vpow2.f32 %v4472_v40 }
0x1279   : > { %vm4349_vm1 = vmor %vm4347_vm7, %vm4348_vm6  ;;  %vm7687_vm6 = vcmask 254976  }
0x127a   : > { %v4344_v57 = vsub.f32 1.0, %v4343_v54 }
0x127c   : > { %v4345_v51 = vmul.f32 %v5348_v48, %v4344_v57 }
0x127d   : > { %v5350_v10 = vpop.eup %5349 }
0x127e   : > { %v4346_v15 = vadd.f32 %v5348_v48, %v4345_v51  ;;  %v4213_v32 = vmul.f32 %v5350_v10, %v4198_v26  ;;  %vm4219_vm5 = vweird.f32 %v5350_v10  ;;  %v5352_v4 = vpop.eup %5351 }
0x127f   : > { %vm4220_vm10 = vmor %vm4218_vm4, %vm4219_vm5 }
0x1280   : > { %v4350_v36 = vsel %vm4349_vm1, %v5348_v48, %v4346_v15  ;;  %v4214_v14 = vmul.f32 %v5350_v10, %v4213_v32  ;;  %v4061_v48 = vpop.permute.xlu0 %4060 }
0x1281   : > { %v4355_v28 = vsel %vm4352_vm3, %v4354_v11, %v4350_v36 }
0x1282   : > { %v4417_v42 = vmul.f32 1.0614054, %v4355_v28  ;;  %v4215_v6 = vmul.f32 0.5, %v4214_v14 }
0x1284   : > { %v4958_v9 = vadd.f32 -1.4531521, %v4417_v42  ;;  %v4216_v58 = vsub.f32 1.5, %v4215_v6 }
0x1286   : > { %v4427_v7 = vmul.f32 %v4958_v9, %v4355_v28  ;;  %v4217_v25 = vmul.f32 %v5350_v10, %v4216_v58 }
0x1288   : > { %v4432_v38 = vadd.f32 1.4214138, %v4427_v7  ;;  %v4221_v53 = vsel %vm4220_vm10, %v5350_v10, %v4217_v25 }
0x1289   : > { %v4253_v8 = vmul.f32 %v4221_v53, %v7437_v31 }
0x128a   : > { %v4437_v3 = vmul.f32 %v4432_v38, %v4355_v28  ;;  %v4049_v2 = vpop.permute.xlu1 %4048 }
0x128b   : > { %v4070_v26 = vsel %vm1212_vm9, %v4067_v30, %v4049_v2  ;;  %v4259_v63 = vmul.f32 %v7425_v41, %v4253_v8  ;;  %vm4492_vm9 = vcmp.ge.f32.partialorder %v7466_v45, 0.0 }
0x128c   : > { %v4963_v1 = vadd.f32 -0.28449672, %v4437_v3  ;;  %v4073_v54 = vsel %vm1216_vm11, %v4070_v26, %v4061_v48  ;;  %vm7684_vm11 = vmmov %vm7682_vm0 }
0x128d   : > { %v4080_v31 = vrot.slane %v4073_v54, 7  ;;  %v4265_v57 = vadd.f32 %v7430_v27, %v4259_v63 }
0x128e   : > { %v4447_v35 = vmul.f32 %v4963_v1, %v4355_v28 }
0x128f   : > { %4954 = vmatmul.msk.f32.gmra.mxu1 %vm7682_vm0, %v4265_v57  ;;  %v4081_v34 = vsel %vm286_vm2, %v4078_v56, %v4080_v31 }
0x1290   : > { %v4452_v29 = vadd.f32 0.2548296, %v4447_v35  ;;  %4952 = vmatmul.msk.f32.gmra.mxu0 %vm7683_vm13, %v4081_v34  ;;  %vm7688_vm13 = vmmov %vm7684_vm11 }
0x1292   : > { %v4457_v43 = vmul.f32 %v4452_v29, %v4355_v28 }
0x1294   : > { %v4482_v51 = vmul.f32 %v5352_v4, %v4457_v43 }
0x1296   : > { %v4487_v19 = vsub.f32 1.0, %v4482_v51 }
0x1297   : > { %4955 = vmatmul.msk.f32.gmra.mxu1 %vm7684_vm11, %v4266_v17 }
0x1298   : > { %v4497_v62 = vsub.f32 0.0, %v4487_v19 }
0x129a   : > { %v4502_v49 = vsel %vm4492_vm9, %v4487_v19, %v4497_v62  ;;  %vm7689_vm9 = vmmov %vm7687_vm6 }
0x129b   : > { %v4512_v15 = vadd.f32 1.0, %v4502_v49 }
0x129d   : > { %v4517_v56 = vmul.f32 %v4512_v15, %v4507_v33 }
0x129f   : > { %4556 = vmatmul.f32.vlgmr.msra.gmra.mxu2 %v4517_v56 }
0x12ca   : > { %v4127_v59 = vpop.f32.mrf.mxu0 }
0x12cb   : > { %v4136_v10 = vadd.f32 %v4127_v59, %v6529_v44 }
0x12cd   : > { %v7550_v11 = vadd.f32 %v7356_v0, %v4136_v10 }
0x12cf   : > { %v4156_v60 = vsel %vm7685_vm14, %v7550_v11, 0.0 }
0x12d0   : > { %4157 = vadd.xlane.f32.xlu2 %v4156_v60 }
0x130c   : > { %v4310_v36 = vpop.f32.mrf.mxu1 }
0x130d   : > { %v7555_v45 = vadd.f32 %v7459_v37, %v4310_v36  ;;  %v4130_v32 = vpop.f32.mrf.mxu0 }
0x130e   : > { %v4137_v52 = vadd.f32 %v4130_v32, %v7686_v47 }
0x130f   : > { %v7559_v28 = vmul.f32 0.70710677, %v7555_v45 }
0x1310   : > { %v7562_v46 = vadd.f32 %v7356_v0, %v4137_v52 }
0x1311   : > { %v4328_v44 = vand.u32 2147483647, %v7559_v28  ;;  %vm4493_vm15 = vcmp.ge.f32.partialorder %v7559_v28, 0.0 }
0x1312   : > { %v4159_v42 = vsel %vm7687_vm6, %v7562_v46, 0.0 }
0x1313   : > { %v4333_v14 = vmul.f32 0.3275911, %v4328_v44  ;;  %4160 = vadd.xlane.f32.xlu1 %v4159_v42  ;;  %v4463_v53 = vsub.f32 0.0, %v4328_v44 }
0x1314   : > { %v4313_v39 = vpop.f32.mrf.mxu1 }
0x1315   : > { %v4338_v5 = vadd.f32 1.0, %v4333_v14  ;;  %v7568_v9 = vadd.f32 %v7459_v37, %v4313_v39  ;;  %v4468_v26 = vmul.f32 %v4463_v53, %v4328_v44 }
0x1317   : > { %5353 = vrcp.f32 %v4338_v5  ;;  %v7571_v6 = vmul.f32 0.70710677, %v7568_v9  ;;  %v4368_v20 = vand.u32 2147483648, %v4338_v5  ;;  %v4366_v25 = vand.u32 2147483647, %v4338_v5 }
0x1318   : > { %vm4362_vm1 = vweird.f32 %v4338_v5  ;;  %v4474_v29 = vmul.f32 1.442695, %v4468_v26 }
0x1319   : > { %v4329_v22 = vand.u32 2147483647, %v7571_v6  ;;  %v4369_v61 = vor.u32 1.1754944e-38, %v4368_v20  ;;  %vm4367_vm5 = vcmp.eq.f32.partialorder %v4366_v25, 8.507059e+37  ;;  %vm4494_vm0 = vcmp.ge.f32.partialorder %v7571_v6, 0.0 }
0x131b   : > { %v4334_v0 = vmul.f32 0.3275911, %v4329_v22  ;;  %v4464_v43 = vsub.f32 0.0, %v4329_v22 }
0x131d   : > { %v5354_v12 = vpop.eup %5353  ;;  %v4339_v58 = vadd.f32 1.0, %v4334_v0  ;;  %v4469_v62 = vmul.f32 %v4464_v43, %v4329_v22 }
0x131e   : > { %v4358_v7 = vmul.f32 %v5354_v12, %v4338_v5  ;;  %vm4363_vm7 = vweird.f32 %v5354_v12  ;;  %v4508_v5 = vmul.f32 0.5, %v7555_v45 }
0x131f   : > { %5355 = vrcp.f32 %v4339_v58  ;;  %vm4364_vm3 = vmor %vm4362_vm1, %vm4363_vm7  ;;  %v4383_v2 = vand.u32 2147483648, %v4339_v58  ;;  %v4381_v35 = vand.u32 2147483647, %v4339_v58  ;;  %vm4377_vm4 = vweird.f32 %v4339_v58 }
0x1320   : > { %v4359_v24 = vsub.f32 1.0, %v4358_v7  ;;  %5357 = vpow2.f32 %v4474_v29  ;;  %v4476_v59 = vmul.f32 1.442695, %v4469_v62  ;;  %vm7690_vm7 = vmmov %vm7689_vm9 }
0x1321   : > { %v4384_v31 = vor.u32 1.1754944e-38, %v4383_v2  ;;  %vm4382_vm8 = vcmp.eq.f32.partialorder %v4381_v35, 8.507059e+37  ;;  %vm7691_vm1 = vmmov %vm7688_vm13 }
0x1322   : > { %v4360_v38 = vmul.f32 %v5354_v12, %v4359_v24  ;;  %5359 = vpow2.f32 %v4476_v59 }
0x1324   : > { %v4361_v16 = vadd.f32 %v5354_v12, %v4360_v38 }
0x1325   : > { %v5356_v40 = vpop.eup %5355 }
0x1326   : > { %v4365_v3 = vsel %vm4364_vm3, %v5354_v12, %v4361_v16  ;;  %v4373_v8 = vmul.f32 %v5356_v40, %v4339_v58  ;;  %vm4378_vm12 = vweird.f32 %v5356_v40  ;;  %v5358_v60 = vpop.eup %5357 }
0x1327   : > { %v4370_v30 = vsel %vm4367_vm5, %v4369_v61, %v4365_v3  ;;  %vm4379_vm10 = vmor %vm4377_vm4, %vm4378_vm12 }
0x1328   : > { %v4418_v21 = vmul.f32 1.0614054, %v4370_v30  ;;  %v4374_v1 = vsub.f32 1.0, %v4373_v8  ;;  %v5360_v12 = vpop.eup %5359  ;;  %vm7692_vm12 = vmmov %vm7691_vm1 }
0x1329   : > { %vm7693_vm4 = vmmov %vm7690_vm7 }
0x132a   : > { %v4959_v48 = vadd.f32 -1.4531521, %v4418_v21  ;;  %v4375_v63 = vmul.f32 %v5356_v40, %v4374_v1 }
0x132c   : > { %v4428_v54 = vmul.f32 %v4959_v48, %v4370_v30  ;;  %v4376_v23 = vadd.f32 %v5356_v40, %v4375_v63  ;;  %v4557_v48 = vpop.f32.mrf.mxu2 }
0x132e   : > { %v4433_v57 = vadd.f32 1.4214138, %v4428_v54  ;;  %v4380_v34 = vsel %vm4379_vm10, %v5356_v40, %v4376_v23  ;;  %v4509_v40 = vmul.f32 0.5, %v7568_v9  ;;  %v5095_v54 = vld [vmem:[%s7640_s2 + $0x10] ss:$0 sm:$0xff] }
0x132f   : > { %v4385_v13 = vsel %vm4382_vm8, %v4384_v31, %v4380_v34 }
0x1330   : > { %v4438_v4 = vmul.f32 %v4433_v57, %v4370_v30  ;;  %v4419_v51 = vmul.f32 1.0614054, %v4385_v13 }
0x1332   : > { %v4964_v19 = vadd.f32 -0.28449672, %v4438_v4  ;;  %v4960_v17 = vadd.f32 -1.4531521, %v4419_v51 }
0x1334   : > { %v4448_v49 = vmul.f32 %v4964_v19, %v4370_v30  ;;  %v4429_v33 = vmul.f32 %v4960_v17, %v4385_v13 }
0x1336   : > { %v4453_v15 = vadd.f32 0.2548296, %v4448_v49  ;;  %v4434_v56 = vadd.f32 1.4214138, %v4429_v33 }
0x1338   : > { %v4458_v10 = vmul.f32 %v4453_v15, %v4370_v30  ;;  %v4439_v36 = vmul.f32 %v4434_v56, %v4385_v13 }
0x133a   : > { %v4483_v32 = vmul.f32 %v5358_v60, %v4458_v10  ;;  %v4965_v47 = vadd.f32 -0.28449672, %v4439_v36 }
0x133c   : > { %v4488_v52 = vsub.f32 1.0, %v4483_v32  ;;  %v4449_v44 = vmul.f32 %v4965_v47, %v4385_v13 }
0x133e   : > { %v4498_v42 = vsub.f32 0.0, %v4488_v52  ;;  %v4454_v14 = vadd.f32 0.2548296, %v4449_v44 }
0x1340   : > { %v4503_v39 = vsel %vm4493_vm15, %v4488_v52, %v4498_v42  ;;  %v4459_v0 = vmul.f32 %v4454_v14, %v4385_v13 }
0x1341   : > { %v4513_v22 = vadd.f32 1.0, %v4503_v39 }
0x1342   : > { %v4484_v24 = vmul.f32 %v5360_v12, %v4459_v0 }
0x1343   : > { %v4158_v7 = vpop.xlane.xlu2 %4157  ;;  %v4518_v58 = vmul.f32 %v4513_v22, %v4508_v5 }
0x1344   : > { %v4165_v20 = vmul.f32 %v4158_v7, %v5493_v50  ;;  %v4489_v38 = vsub.f32 1.0, %v4484_v24 }
0x1345   : > { %4559 = vmatmul.f32.gmra.mxu2 %v4518_v58 }
0x1346   : > { %v4170_v25 = vsub.f32 %v7550_v11, %v4165_v20  ;;  %v4499_v16 = vsub.f32 0.0, %v4489_v38 }
0x1348   : > { %v4175_v28 = vmul.f32 %v4170_v25, %v4170_v25  ;;  %v4504_v61 = vsel %vm4494_vm0, %v4489_v38, %v4499_v16 }
0x1349   : > { %v4514_v3 = vadd.f32 1.0, %v4504_v61 }
0x134a   : > { %v4186_v45 = vsel %vm7688_vm13, %v4175_v28, 0.0 }
0x134b   : > { %4187 = vadd.xlane.f32.xlu0 %v4186_v45  ;;  %v4519_v53 = vmul.f32 %v4514_v3, %v4509_v40 }
0x134d   : > { %4561 = vmatmul.f32.gmra.mxu2 %v4519_v53 }
0x1386   : > { %v4161_v8 = vpop.xlane.xlu1 %4160 }
0x1387   : > { %v4166_v30 = vmul.f32 %v4161_v8, %v5493_v50 }
0x1389   : > { %v4171_v21 = vsub.f32 %v7562_v46, %v4166_v30  ;;  %v4558_v46 = vadd.f32 %v5095_v54, %v4557_v48 }
0x138b   : > { %v4176_v1 = vmul.f32 %v4171_v21, %v4171_v21  ;;  %v4569_v4 = vadd.f32 %v4558_v46, %v7360_v55 }
0x138d   : > { %v4189_v11 = vsel %vm7689_vm9, %v4176_v1, 0.0 }
0x138e   : > { %4190 = vadd.xlane.f32.xlu2 %v4189_v11 }
0x13be   : > { %v4188_v6 = vpop.xlane.xlu0 %4187 }
0x13bf   : > { %v4195_v2 = vmul.f32 %v4188_v6, %v5493_v50 }
0x13c1   : > { %v4200_v9 = vadd.f32 1e-06, %v4195_v2 }
0x13c3   : > { %5361 = vrsqrt.f32 %v4200_v9  ;;  %vm4238_vm14 = vweird.f32 %v4200_v9 }
0x13c8   : > { %v4560_v26 = vpop.f32.mrf.mxu2 }
0x13c9   : > { %v5362_v63 = vpop.eup %5361 }
0x13ca   : > { %v4233_v35 = vmul.f32 %v5362_v63, %v4200_v9  ;;  %vm4239_vm11 = vweird.f32 %v5362_v63 }
0x13cb   : > { %vm4240_vm6 = vmor %vm4238_vm14, %vm4239_vm11 }
0x13cc   : > { %v4234_v23 = vmul.f32 %v5362_v63, %v4233_v35 }
0x13ce   : > { %v4235_v31 = vmul.f32 0.5, %v4234_v23 }
0x13d0   : > { %v4236_v57 = vsub.f32 1.5, %v4235_v31  ;;  %v4562_v29 = vpop.f32.mrf.mxu2 }
0x13d1   : > { %v4563_v43 = vadd.f32 %v5095_v54, %v4562_v29 }
0x13d2   : > { %v4237_v34 = vmul.f32 %v5362_v63, %v4236_v57 }
0x13d3   : > { %v4570_v51 = vadd.f32 %v4563_v43, %v7380_v18 }
0x13d4   : > { %v4241_v13 = vsel %vm4240_vm6, %v5362_v63, %v4237_v34 }
0x13d5   : > { %v4255_v19 = vmul.f32 %v4241_v13, %v4170_v25  ;;  %v4595_v17 = vsel %vm286_vm2, %v4569_v4, %v4570_v51 }
0x13d6   : > { %v4598_v62 = vsel %vm7690_vm7, %v4595_v17, 0.0 }
0x13d7   : > { %v4261_v49 = vmul.f32 %v7425_v41, %v4255_v19  ;;  %4599 = vadd.xlane.f32.xlu1 %v4598_v62 }
0x13d9   : > { %v4267_v33 = vadd.f32 %v7430_v27, %v4261_v49 }
0x13db   : > { %4956 = vmatmul.msk.f32.gmra.mxu1 %vm7691_vm1, %v4267_v33 }
0x1401   : > { %v4191_v15 = vpop.xlane.xlu2 %4190 }
0x1402   : > { %v4196_v56 = vmul.f32 %v4191_v15, %v5493_v50 }
0x1404   : > { %v4201_v59 = vadd.f32 1e-06, %v4196_v56 }
0x1406   : > { %5363 = vrsqrt.f32 %v4201_v59  ;;  %vm4248_vm3 = vweird.f32 %v4201_v59 }
0x140c   : > { %v5364_v55 = vpop.eup %5363 }
0x140d   : > { %v4243_v10 = vmul.f32 %v5364_v55, %v4201_v59  ;;  %vm4249_vm2 = vweird.f32 %v5364_v55 }
0x140e   : > { %vm4250_vm5 = vmor %vm4248_vm3, %vm4249_vm2 }
0x140f   : > { %v4244_v18 = vmul.f32 %v5364_v55, %v4243_v10 }
0x1411   : > { %v4245_v60 = vmul.f32 0.5, %v4244_v18 }
0x1413   : > { %v4246_v36 = vsub.f32 1.5, %v4245_v60 }
0x1415   : > { %v4247_v32 = vmul.f32 %v5364_v55, %v4246_v36 }
0x1417   : > { %v4251_v47 = vsel %vm4250_vm5, %v5364_v55, %v4247_v32  ;;  %vm7694_vm5 = vmmov %vm7692_vm12 }
0x1418   : > { %v4256_v52 = vmul.f32 %v4251_v47, %v4171_v21 }
0x141a   : > { %v4262_v44 = vmul.f32 %v7425_v41, %v4256_v52 }
0x141c   : > { %v4268_v42 = vadd.f32 %v7430_v27, %v4262_v44 }
0x141e   : > { %4957 = vmatmul.msk.f32.gmra.mxu1 %vm7692_vm12, %v4268_v42  ;;  %vm4653_vm12 = vcmask 58368  }
0x144a   : > { %v4600_v14 = vpop.xlane.xlu1 %4599 }
0x144b   : > { %v4601_v39 = vmul.f32 %v4600_v14, %v5493_v50 }
0x144d   : > { %v7600_v5 = vsub.f32 %v4595_v17, %v4601_v39 }
0x144f   : > { %v4603_v22 = vmul.f32 %v7600_v5, %v7600_v5 }
0x1451   : > { %v4604_v0 = vsel %vm7693_vm4, %v4603_v22, 0.0  ;;  %v4627_v22 = vld [vmem:[%s7639_s1 + $0x220] sm:$0xff] }
0x1452   : > { %4605 = vadd.xlane.f32.xlu0 %v4604_v0  ;;  %4645 = vmatpush.msrb.mxu3 %v4627_v22 }
0x1458   : > { %v4316_v12 = vpop.f32.mrf.mxu1 }
0x1459   : > { %v4317_v7 = vadd.f32 %v7459_v37, %v4316_v12  ;;  %v4626_v12 = vld [vmem:[%s7639_s1 + $0x218] sm:$0xff] }
0x145a   : > { %4646 = vmatpush.msrb.mxu3 %v4626_v12 }
0x145b   : > { %v4325_v58 = vmul.f32 0.70710677, %v4317_v7  ;;  %v4510_v29 = vmul.f32 0.5, %v4317_v7 }
0x145d   : > { %v4330_v41 = vand.u32 2147483647, %v4325_v58  ;;  %vm4495_vm13 = vcmp.ge.f32.partialorder %v4325_v58, 0.0  ;;  %v4625_v58 = vld [vmem:[%s7639_s1 + $0x210] sm:$0xff] }
0x145e   : > { %4647 = vmatpush.msrb.mxu3 %v4625_v58 }
0x145f   : > { %v4335_v24 = vmul.f32 0.3275911, %v4330_v41  ;;  %v4465_v53 = vsub.f32 0.0, %v4330_v41 }
0x1461   : > { %v4340_v27 = vadd.f32 1.0, %v4335_v24  ;;  %v4470_v1 = vmul.f32 %v4465_v53, %v4330_v41  ;;  %v4624_v24 = vld [vmem:[%s7639_s1 + $0x208] sm:$0xff] }
0x1462   : > { %4648 = vmatpush.msrb.mxu3 %v4624_v24 }
0x1463   : > { %5365 = vrcp.f32 %v4340_v27  ;;  %v4398_v16 = vand.u32 2147483648, %v4340_v27  ;;  %v4396_v61 = vand.u32 2147483647, %v4340_v27  ;;  %vm4392_vm8 = vweird.f32 %v4340_v27 }
0x1464   : > { %v4478_v2 = vmul.f32 1.442695, %v4470_v1 }
0x1465   : > { %v4399_v45 = vor.u32 1.1754944e-38, %v4398_v16  ;;  %vm4397_vm0 = vcmp.eq.f32.partialorder %v4396_v61, 8.507059e+37 }
0x1466   : > { %5367 = vpow2.f32 %v4478_v2  ;;  %v5096_v2 = vld [vmem:[%s7640_s2 + $0x11] ss:$0 sm:$0xff] }
0x1469   : > { %v5366_v20 = vpop.eup %5365 }
0x146a   : > { %v4388_v38 = vmul.f32 %v5366_v20, %v4340_v27  ;;  %vm4393_vm10 = vweird.f32 %v5366_v20 }
0x146b   : > { %vm4394_vm15 = vmor %vm4392_vm8, %vm4393_vm10 }
0x146c   : > { %v4389_v25 = vsub.f32 1.0, %v4388_v38  ;;  %v5368_v54 = vpop.eup %5367 }
0x146e   : > { %v4390_v28 = vmul.f32 %v5366_v20, %v4389_v25 }
0x1470   : > { %v4391_v40 = vadd.f32 %v5366_v20, %v4390_v28 }
0x1472   : > { %v4395_v3 = vsel %vm4394_vm15, %v5366_v20, %v4391_v40 }
0x1473   : > { %v4400_v8 = vsel %vm4397_vm0, %v4399_v45, %v4395_v3 }
0x1474   : > { %v4420_v30 = vmul.f32 1.0614054, %v4400_v8 }
0x1476   : > { %v4961_v21 = vadd.f32 -1.4531521, %v4420_v30 }
0x1478   : > { %v4430_v11 = vmul.f32 %v4961_v21, %v4400_v8 }
0x147a   : > { %v4435_v6 = vadd.f32 1.4214138, %v4430_v11 }
0x147c   : > { %v4440_v48 = vmul.f32 %v4435_v6, %v4400_v8 }
0x147e   : > { %v4966_v9 = vadd.f32 -0.28449672, %v4440_v48 }
0x1480   : > { %v4450_v26 = vmul.f32 %v4966_v9, %v4400_v8  ;;  %v5097_v9 = vld [vmem:[%s7640_s2 + $0x12] ss:$0 sm:$0xff] }
0x1482   : > { %v4455_v63 = vadd.f32 0.2548296, %v4450_v26 }
0x1484   : > { %v4460_v35 = vmul.f32 %v4455_v63, %v4400_v8 }
0x1486   : > { %v4485_v23 = vmul.f32 %v5368_v54, %v4460_v35 }
0x1488   : > { %v4490_v31 = vsub.f32 1.0, %v4485_v23 }
0x148a   : > { %v4500_v46 = vsub.f32 0.0, %v4490_v31 }
0x148c   : > { %v4505_v57 = vsel %vm4495_vm13, %v4490_v31, %v4500_v46  ;;  %v5098_v31 = vld [vmem:[%s7640_s2 + $0x13] ss:$0 sm:$0xff] }
0x148d   : > { %v4515_v34 = vadd.f32 1.0, %v4505_v57 }
0x148f   : > { %v4520_v43 = vmul.f32 %v4515_v34, %v4510_v29 }
0x1491   : > { %4564 = vmatmul.f32.gmra.mxu2 %v4520_v43 }
0x149b   : > { %v4319_v4 = vpop.f32.mrf.mxu1 }
0x149c   : > { %v4320_v13 = vadd.f32 %v7459_v37, %v4319_v4 }
0x149e   : > { %v4326_v51 = vmul.f32 0.70710677, %v4320_v13  ;;  %v4511_v3 = vmul.f32 0.5, %v4320_v13 }
0x14a0   : > { %v4331_v19 = vand.u32 2147483647, %v4326_v51  ;;  %vm4496_vm7 = vcmp.ge.f32.partialorder %v4326_v51, 0.0 }
0x14a2   : > { %v4336_v17 = vmul.f32 0.3275911, %v4331_v19  ;;  %v4466_v36 = vsub.f32 0.0, %v4331_v19 }
0x14a4   : > { %v4341_v62 = vadd.f32 1.0, %v4336_v17  ;;  %v4471_v52 = vmul.f32 %v4466_v36, %v4331_v19 }
0x14a6   : > { %5369 = vrcp.f32 %v4341_v62  ;;  %v4413_v56 = vand.u32 2147483648, %v4341_v62  ;;  %v4411_v55 = vand.u32 2147483647, %v4341_v62  ;;  %vm4407_vm11 = vweird.f32 %v4341_v62 }
0x14a7   : > { %v4480_v14 = vmul.f32 1.442695, %v4471_v52 }
0x14a8   : > { %v4414_v18 = vor.u32 1.1754944e-38, %v4413_v56  ;;  %vm4412_vm6 = vcmp.eq.f32.partialorder %v4411_v55, 8.507059e+37 }
0x14a9   : > { %5371 = vpow2.f32 %v4480_v14 }
0x14ac   : > { %v5370_v49 = vpop.eup %5369 }
0x14ad   : > { %v4403_v33 = vmul.f32 %v5370_v49, %v4341_v62  ;;  %vm4408_vm9 = vweird.f32 %v5370_v49 }
0x14ae   : > { %vm4409_vm14 = vmor %vm4407_vm11, %vm4408_vm9 }
0x14af   : > { %v4404_v15 = vsub.f32 1.0, %v4403_v33  ;;  %v5372_v25 = vpop.eup %5371 }
0x14b1   : > { %v4405_v59 = vmul.f32 %v5370_v49, %v4404_v15 }
0x14b3   : > { %v4406_v10 = vadd.f32 %v5370_v49, %v4405_v59 }
0x14b5   : > { %v4410_v60 = vsel %vm4409_vm14, %v5370_v49, %v4406_v10 }
0x14b6   : > { %v4415_v37 = vsel %vm4412_vm6, %v4414_v18, %v4410_v60 }
0x14b7   : > { %v4421_v32 = vmul.f32 1.0614054, %v4415_v37 }
0x14b9   : > { %v4962_v47 = vadd.f32 -1.4531521, %v4421_v32 }
0x14bb   : > { %v4431_v44 = vmul.f32 %v4962_v47, %v4415_v37 }
0x14bd   : > { %v4436_v42 = vadd.f32 1.4214138, %v4431_v44 }
0x14bf   : > { %v4441_v39 = vmul.f32 %v4436_v42, %v4415_v37 }
0x14c1   : > { %v4967_v0 = vadd.f32 -0.28449672, %v4441_v39 }
0x14c3   : > { %v4451_v7 = vmul.f32 %v4967_v0, %v4415_v37 }
0x14c5   : > { %v4456_v41 = vadd.f32 0.2548296, %v4451_v7  ;;  %v4606_v27 = vpop.xlane.xlu0 %4605 }
0x14c6   : > { %v4607_v20 = vmul.f32 %v4606_v27, %v5493_v50 }
0x14c7   : > { %v4461_v38 = vmul.f32 %v4456_v41, %v4415_v37 }
0x14c8   : > { %v4608_v16 = vadd.f32 1e-06, %v4607_v20 }
0x14c9   : > { %v4486_v28 = vmul.f32 %v5372_v25, %v4461_v38 }
0x14ca   : > { %5373 = vrsqrt.f32 %v4608_v16  ;;  %vm4615_vm2 = vweird.f32 %v4608_v16 }
0x14cb   : > { %v4491_v61 = vsub.f32 1.0, %v4486_v28 }
0x14cd   : > { %v4501_v40 = vsub.f32 0.0, %v4491_v61 }
0x14cf   : > { %v4506_v45 = vsel %vm4496_vm7, %v4491_v61, %v4501_v40 }
0x14d0   : > { %v4516_v53 = vadd.f32 1.0, %v4506_v45  ;;  %v5374_v8 = vpop.eup %5373 }
0x14d1   : > { %v4610_v30 = vmul.f32 %v5374_v8, %v4608_v16  ;;  %vm4616_vm1 = vweird.f32 %v5374_v8 }
0x14d2   : > { %v4521_v21 = vmul.f32 %v4516_v53, %v4511_v3  ;;  %vm4617_vm3 = vmor %vm4615_vm2, %vm4616_vm1 }
0x14d3   : > { %v4611_v1 = vmul.f32 %v5374_v8, %v4610_v30 }
0x14d4   : > { %4566 = vmatmul.f32.gmra.mxu2 %v4521_v21 }
0x14d5   : > { %v4612_v11 = vmul.f32 0.5, %v4611_v1 }
0x14d7   : > { %v4613_v50 = vsub.f32 1.5, %v4612_v11 }
0x14d9   : > { %v4614_v6 = vmul.f32 %v5374_v8, %v4613_v50 }
0x14db   : > { %v4618_v48 = vsel %vm4617_vm3, %v5374_v8, %v4614_v6 }
0x14dc   : > { %v4619_v26 = vmul.f32 %v4618_v48, %v7600_v5 }
0x14de   : > { %v4621_v63 = vmul.f32 %v5096_v2, %v4619_v26 }
0x14e0   : > { %v4623_v35 = vadd.f32 %v5097_v9, %v4621_v63 }
0x14e2   : > { %4968 = vmatmul.msk.f32.vlgmr.msrb.gmra.mxu3 %vm7694_vm5, %v4623_v35 }
0x1514   : > { %v4565_v54 = vpop.f32.mrf.mxu2 }
0x1557   : > { %v4567_v23 = vpop.f32.mrf.mxu2 }
0x1565   : > { %v4650_v46 = vpop.f32.mrf.mxu3 }
0x1566   : > { %v4651_v57 = vadd.f32 %v5098_v31, %v4650_v46 }
0x1568   : > { %4654 = vst.msk [vmem:[%s211_s14] sm:$0x3] %vm4653_vm12, %v4651_v57 }
0x1569 PF: > { %s15_s15 = sadd.s32 1, %s5381_s15  }
0x156a   : > { %p12_p5 = scmp.ge.s32.totalorder %s15_s15, 4  }
0x156c   :  { %14 = sbr.rel (!%p12_p5) target bundleno = 1 (0x1), region = 74 }

</bundles_post_ra>
